<compile_context>
chip_gen: v7x
topology: tpu7x:2x2x1
jax: 0.10.0
libtpu: 0.0.40
codegen_flags: <defaults>
</compile_context>

<pallas_src>
import jax
import jax.numpy as jnp
from jax import lax
from jax.experimental import pallas as pl
from jax.experimental.pallas import tpu as pltpu

# ----------------------------- configuration -------------------------------
FEATURE_WIDTH = 32            # C
NUM_HEADS = 4                 # H  (hidden_width = H*C = 128 -> full lane width)
NUM_PHYS = 32                 # M  (== C so the orthogonal init is square)
NODES_PER_GRAPH = 8           # N  (equal-size graphs)
BATCH = 64                    # B  (number of graphs)
GRAPHS_PER_BLOCK = 32         # graphs per grid step -> 256 node rows / step, grid=(2,)

C, H, M, N, B = FEATURE_WIDTH, NUM_HEADS, NUM_PHYS, NODES_PER_GRAPH, BATCH
GB = GRAPHS_PER_BLOCK
HM, HC = H * M, H * C         # 128, 128
LN_EPS = 1e-5
SCALE = FEATURE_WIDTH ** (-0.5)

assert M == C, "block-diagonal head packing below assumes num_phys == feature_width"
assert B % GB == 0


# ------------------------------ kernel --------------------------------------
def physics_graph_kernel(x_ref, w_node_ref, b_node_ref, w_qkv_ref, w_out_ref,
                         w_ffn_ref, vec_ref, mask_ref, o_ref,
                         w_ref, tok_ref, pt_ref, qkv_ref, hout_ref):
    f32, bf16 = jnp.float32, jnp.bfloat16

    x = x_ref[...]                                     # (GB*N, C) node features (f32)
    mask_bf = mask_ref[...]                            # (HM, HM) 0/1 per-head block mask
    mask32 = mask_bf.astype(f32)

    # --- fused node projections: ONE 256-lane-wide matmul, sliced at lane 128 ----------
    # logits = x @ (w_in[h] @ w_phy / temp[h]) + bias   (l_in + temperature folded in)
    proj = (jnp.dot(x.astype(bf16), w_node_ref[...], preferred_element_type=f32)
            + b_node_ref[...])                         # (GB*N, HM+HC)
    logits = proj[:, :HM]                              # (GB*N, H*M)
    toks = proj[:, HM:]                                # (GB*N, H*C)

    # --- segmented softmax over each head's M-wide lane block (heads packed on lanes) --
    # global row max >= every per-head max, so exp args <= 0; epsilon guards underflow.
    ex = jnp.exp(logits - jnp.max(logits, axis=-1, keepdims=True))
    seg = jnp.dot(ex.astype(bf16), mask_bf, preferred_element_type=f32)
    w_all = ex * pl.reciprocal(seg + 1e-30, approx=True)   # phy_weights, all heads (f32)

    w_ref[...] = w_all                                 # raw softmax weights (scatter reuse)
    tok_ref[...] = toks

    # --- per-graph physics tokens (tiny K=8 matmuls, norm folded into the weight tile) --
    def pt_body(g, carry):
        r = pl.multiple_of(g * N, N)
        m0 = pl.multiple_of(g * HM, HM)
        w_g = w_ref[pl.ds(r, N), :]                    # (N, HM) softmax weights, one graph
        t_g = tok_ref[pl.ds(r, N), :]                  # (N, HC) token features
        colsum = jnp.sum(w_g, axis=0, keepdims=True) + 1e-5       # (1, HM) weight sums
        w_gs = w_g * pl.reciprocal(colsum, approx=True)           # norm folded into weights
        ptg = jnp.dot(w_gs.T, t_g, preferred_element_type=f32) * mask32   # (HM, HC) block-diag
        pt_ref[pl.ds(m0, HM), :] = ptg.astype(bf16)
        return carry

    lax.fori_loop(0, GB, pt_body, 0)

    # --- ONE batched q|k|v projection for every graph / head (lane-packed (128,384)) ----
    qkv_ref[...] = jnp.dot(pt_ref[...], w_qkv_ref[...],
                           preferred_element_type=f32).astype(bf16)   # (GB*HM, 3*HC)

    # --- per-graph attention over physics tokens + scatter back to node rows ------------
    def attn_body(g, carry):
        r = pl.multiple_of(g * N, N)
        m0 = pl.multiple_of(g * HM, HM)
        blk = qkv_ref[pl.ds(m0, HM), :]                # (HM, 3*HC) bf16
        q_g = blk[:, :HC]
        k_g = blk[:, HC:2 * HC]
        v_g = blk[:, 2 * HC:]
        dots = lax.dot_general(q_g, k_g, (((1,), (1,)), ((), ())),
                               preferred_element_type=f32) * SCALE      # block-diag (HM,HM)
        e2 = jnp.exp(dots - jnp.max(dots, axis=-1, keepdims=True)) * mask32
        attn = e2 * pl.reciprocal(jnp.sum(e2, axis=-1, keepdims=True) + 1e-30,
                                  approx=True)         # dropout(p=0) = identity
        phy = jnp.dot(attn.astype(bf16), v_g, preferred_element_type=f32)   # (HM, HC)
        w_g = w_ref[pl.ds(r, N), :]                    # raw phy_weights for the scatter
        hout_ref[pl.ds(r, N), :] = jnp.dot(w_g.astype(bf16), phy.astype(bf16),
                                           preferred_element_type=f32)      # (N, HC)
        return carry

    lax.fori_loop(0, GB, attn_body, 0)

    # --- ONE l_out matmul over the whole chunk ------------------------------------------
    attn_out = (jnp.dot(hout_ref[...].astype(bf16), w_out_ref[...],
                        preferred_element_type=f32) + vec_ref[0:1, :])       # (GB*N, C)

    # --- residual + LayerNorm 1 ----------------------------------------------------------
    y = attn_out + x
    mu = jnp.mean(y, axis=-1, keepdims=True)
    var = jnp.mean((y - mu) ** 2, axis=-1, keepdims=True)
    y1 = (y - mu) * lax.rsqrt(var + LN_EPS) * vec_ref[1:2, :] + vec_ref[2:3, :]

    # --- FFN  (TODO(synk): MLP(C, C, C, num_layers=1, act='relu') assumed to be
    # Linear -> ReLU -> Linear; switch to a single Linear if the repo's MLP differs.) ----
    f = jnp.dot(y1.astype(bf16), w_ffn_ref[0], preferred_element_type=f32) + vec_ref[3:4, :]
    f = jnp.maximum(f, 0.0)
    f = jnp.dot(f.astype(bf16), w_ffn_ref[1], preferred_element_type=f32) + vec_ref[4:5, :]

    # --- residual + LayerNorm 2 ----------------------------------------------------------
    z2 = f + y1
    mu2 = jnp.mean(z2, axis=-1, keepdims=True)
    var2 = jnp.mean((z2 - mu2) ** 2, axis=-1, keepdims=True)
    o_ref[...] = (z2 - mu2) * lax.rsqrt(var2 + LN_EPS) * vec_ref[5:6, :] + vec_ref[6:7, :]


# --------------------------- parameter packing --------------------------------
def pack_params(p):
    """Offline algebraic fusion + packing of the module parameters (done once)."""
    f32, bf16 = jnp.float32, jnp.bfloat16
    with jax.default_matmul_precision('highest'):
        t = p["temp"]                                                      # (H, 1, 1)
        # fold l_in and the temperature into l_phy:  logits = x @ W_logit + b_logit
        w_logit = jnp.einsum("hck,km->hcm", p["w_in"], p["w_phy"]) / t     # (H, C, M)
        b_logit = (jnp.einsum("hik,km->him", p["b_in"], p["w_phy"])
                   + p["b_phy"][None]) / t                                 # (H, 1, M)
    w_logit_all = jnp.transpose(w_logit, (1, 0, 2)).reshape(C, HM)         # (C, H*M)
    b_logit_all = jnp.transpose(b_logit, (1, 0, 2)).reshape(1, HM)
    w_tok_all = jnp.transpose(p["w_tok"], (1, 0, 2)).reshape(C, HC)
    b_tok_all = jnp.transpose(p["b_tok"], (1, 0, 2)).reshape(1, HC)

    w_node = jnp.concatenate([w_logit_all, w_tok_all], axis=1).astype(bf16)  # (C, HM+HC)
    b_node = jnp.concatenate([b_logit_all, b_tok_all], axis=1).astype(f32)   # (1, HM+HC)

    eye_h = jnp.eye(H, dtype=f32)                                          # block-diag q/k/v
    w_qkv = jnp.concatenate([jnp.kron(eye_h, p["wq"]),
                             jnp.kron(eye_h, p["wk"]),
                             jnp.kron(eye_h, p["wv"])], axis=1).astype(bf16)  # (HC, 3*HC)

    w_out_cat = p["w_out"].reshape(HC, C).astype(bf16)                     # (H*C, C)
    w_ffn = jnp.stack([p["wf1"], p["wf2"]], axis=0).astype(bf16)           # (2, C, C)
    vecs = jnp.concatenate([p["b_out"], p["g1"], p["be1"], p["bf1"],
                            p["bf2"], p["g2"], p["be2"],
                            jnp.zeros((1, C), f32)], axis=0)               # (8, C)

    head_id = jnp.repeat(jnp.arange(H), M)
    mask = (head_id[:, None] == head_id[None, :]).astype(bf16)             # (HM, HM) 0/1
    return dict(w_node=w_node, b_node=b_node, w_qkv=w_qkv, w_out=w_out_cat,
                w_ffn=w_ffn, vecs=vecs, mask=mask)


# ------------------------------ wrapper --------------------------------------
def physics_graph_block(x_flat, batch, p, num_graphs):
    """x_flat: (N_total, C) node features; batch: (N_total,) graph id per node.

    Graphs are assumed equal-sized and contiguous (num_graphs passed explicitly, no
    host sync).  TODO(synk): variable-sized graphs (general `unbatch`) would need
    scalar-prefetched per-graph row offsets.
    """
    n_total, c = x_flat.shape
    assert c == C and n_total % num_graphs == 0 and n_total // num_graphs == N
    assert num_graphs % GB == 0
    assert batch.shape[0] == n_total

    packed = pack_params(p)
    grid = (num_graphs // GB,)

    def const2(shape):
        return pl.BlockSpec(shape, lambda i: (0, 0))

    def const3(shape):
        return pl.BlockSpec(shape, lambda i: (0, 0, 0))

    return pl.pallas_call(
        physics_graph_kernel,
        out_shape=jax.ShapeDtypeStruct((n_total, C), jnp.float32),
        grid=grid,
        in_specs=[
            pl.BlockSpec((GB * N, C), lambda i: (i, 0)),   # node features, 256 rows / step
            const2((C, HM + HC)),                          # fused l_in*l_phy | l_token weights
            const2((1, HM + HC)),                          # their biases
            const2((HC, 3 * HC)),                          # lane-packed block-diag q|k|v
            const2((HC, C)),                               # l_out weight (heads on rows)
            const3((2, C, C)),                             # FFN weights
            const2((8, C)),                                # packed bias / LayerNorm vectors
            const2((HM, HM)),                              # per-head block mask (bf16)
        ],
        out_specs=pl.BlockSpec((GB * N, C), lambda i: (i, 0)),
        scratch_shapes=[
            pltpu.VMEM((GB * N, HM), jnp.float32),         # raw phy_weights
            pltpu.VMEM((GB * N, HC), jnp.float32),         # token features
            pltpu.VMEM((GB * HM, HC), jnp.bfloat16),       # masked physics tokens (block-diag)
            pltpu.VMEM((GB * HM, 3 * HC), jnp.bfloat16),   # q | k | v
            pltpu.VMEM((GB * N, HC), jnp.float32),         # head-concat scatter output
        ],
        compiler_params=pltpu.CompilerParams(
            # "parallel" shards the graph chunks across the two v7x TensorCores
            # (grid=(2,) here); it is a no-op on single-TC v5e/v6e.
            dimension_semantics=("parallel",),
            vmem_limit_bytes=32 * 1024 * 1024),
    )(x_flat, packed["w_node"], packed["b_node"], packed["w_qkv"],
      packed["w_out"], packed["w_ffn"], packed["vecs"], packed["mask"])


# ------------------------- pure-JAX reference --------------------------------
def _layer_norm(x, g, b):
    mu = jnp.mean(x, axis=-1, keepdims=True)
    var = jnp.mean((x - mu) ** 2, axis=-1, keepdims=True)
    return (x - mu) * lax.rsqrt(var + LN_EPS) * g + b


def reference_forward(x_flat, p, num_graphs):
    n_total, c = x_flat.shape
    n = n_total // num_graphs
    xg = x_flat.reshape(num_graphs, n, c)                                # (G, N, C)
    phy_x = jnp.einsum("gnc,hcd->ghnd", xg, p["w_in"]) + p["b_in"]
    tok = jnp.einsum("gnc,hcd->ghnd", xg, p["w_tok"]) + p["b_tok"]
    logits = (jnp.einsum("ghnc,cm->ghnm", phy_x, p["w_phy"]) + p["b_phy"]) / p["temp"]
    w = jax.nn.softmax(logits, axis=-1)                                  # (G, H, N, M)
    phy_tok = jnp.einsum("ghnc,ghnm->ghmc", tok, w)
    norm = jnp.sum(w, axis=2)[..., None] + 1e-5
    phy_tok = phy_tok / norm
    q = phy_tok @ p["wq"]
    k = phy_tok @ p["wk"]
    v = phy_tok @ p["wv"]
    attn = jax.nn.softmax(jnp.einsum("ghmc,ghkc->ghmk", q, k) * SCALE, axis=-1)
    phy_y = jnp.einsum("ghmk,ghkc->ghmc", attn, v)
    head_out = jnp.einsum("ghmc,ghnm->ghnc", phy_y, w)
    lin_out = jnp.einsum("ghnc,hcd->gnd", head_out, p["w_out"]) + p["b_out"]
    y1 = _layer_norm(lin_out + xg, p["g1"], p["be1"])
    f = jnp.maximum(y1 @ p["wf1"] + p["bf1"], 0.0) @ p["wf2"] + p["bf2"]
    out = _layer_norm(f + y1, p["g2"], p["be2"])
    return out.reshape(n_total, c)


# --------------------------- parameter init ----------------------------------
def init_params(key):
    ks = jax.random.split(key, 16)
    s = 0.1

    def nrm(k, shape):
        return s * jax.random.normal(k, shape, jnp.float32)

    # orthogonal init for l_phy (square since NUM_PHYS == FEATURE_WIDTH)
    a = jax.random.normal(ks[4], (C, M), jnp.float32)
    q_mat, r = jnp.linalg.qr(a)
    w_phy = q_mat * jnp.sign(jnp.diag(r))[None, :]

    return dict(
        w_in=nrm(ks[0], (H, C, C)), b_in=nrm(ks[1], (H, 1, C)),
        w_tok=nrm(ks[2], (H, C, C)), b_tok=nrm(ks[3], (H, 1, C)),
        w_phy=w_phy, b_phy=nrm(ks[5], (1, M)),
        temp=jnp.full((H, 1, 1), 0.5, jnp.float32),      # nn.Parameter ones([H,1,1])*0.5
        wq=nrm(ks[6], (C, C)), wk=nrm(ks[7], (C, C)), wv=nrm(ks[8], (C, C)),
        w_out=nrm(ks[9], (H, C, C)), b_out=nrm(ks[10], (1, C)),
        g1=jnp.ones((1, C), jnp.float32), be1=jnp.zeros((1, C), jnp.float32),
        wf1=nrm(ks[11], (C, C)), bf1=jnp.zeros((1, C), jnp.float32),
        wf2=nrm(ks[12], (C, C)), bf2=jnp.zeros((1, C), jnp.float32),
        g2=jnp.ones((1, C), jnp.float32), be2=jnp.zeros((1, C), jnp.float32),
    )


# ------------------------------- main -----------------------------------------
if __name__ == "__main__":
    key = jax.random.PRNGKey(0)
    pkey, xkey = jax.random.split(key)
    params = init_params(pkey)

    x_flat = jax.random.normal(xkey, (B * N, C), jnp.float32)     # (N_total, C)
    batch = jnp.repeat(jnp.arange(B, dtype=jnp.int32), N)         # graph ids

    out = physics_graph_block(x_flat, batch, params, num_graphs=B)
    out = jax.block_until_ready(out)
    assert out.shape == (B * N, C)
    assert bool(jnp.all(jnp.isfinite(out)))

    # High-precision reference, plus a bf16-rounded reference to calibrate the tolerance:
    # the kernel runs its matmuls on bf16 operands with algebraically fused weights, so it
    # legitimately diverges from an f32 reference at the bf16-rounding level.
    with jax.default_matmul_precision('highest'):
        ref_hi = reference_forward(x_flat, params, num_graphs=B)
    params_lo = jax.tree_util.tree_map(
        lambda a: a.astype(jnp.bfloat16).astype(jnp.float32), params)
    x_lo = x_flat.astype(jnp.bfloat16).astype(jnp.float32)
    ref_lo = reference_forward(x_lo, params_lo, num_graphs=B)

    calib = float(jnp.max(jnp.abs(ref_hi - ref_lo)))
    tol = max(4e-2, 4.0 * calib)
    max_err = float(jnp.max(jnp.abs(out - ref_hi)))
    mean_err = float(jnp.mean(jnp.abs(out - ref_hi)))
    assert max_err <= tol, f"max abs err {max_err} (tol {tol}, bf16 calib {calib})"
    assert mean_err <= tol / 2.0, f"mean abs err {mean_err} (tol {tol / 2.0})"

    print("KERNEL_OK")
</pallas_src>

<mosaic_0001>
module attributes {stable_mosaic.version = 11 : i64} {
  func.func @physics_graph_kernel(%arg0: i32, %arg1: memref<256x32xf32, #tpu.memory_space<vmem>>, %arg2: memref<32x256xbf16, #tpu.memory_space<vmem>>, %arg3: memref<1x256xf32, #tpu.memory_space<vmem>>, %arg4: memref<128x384xbf16, #tpu.memory_space<vmem>>, %arg5: memref<128x32xbf16, #tpu.memory_space<vmem>>, %arg6: memref<2x32x32xbf16, #tpu.memory_space<vmem>>, %arg7: memref<8x32xf32, #tpu.memory_space<vmem>>, %arg8: memref<128x128xbf16, #tpu.memory_space<vmem>>, %arg9: memref<256x32xf32, #tpu.memory_space<vmem>>, %arg10: memref<256x128xf32, #tpu.memory_space<vmem>>, %arg11: memref<256x128xf32, #tpu.memory_space<vmem>>, %arg12: memref<4096x128xbf16, #tpu.memory_space<vmem>>, %arg13: memref<4096x384xbf16, #tpu.memory_space<vmem>>, %arg14: memref<256x128xf32, #tpu.memory_space<vmem>>) attributes {dimension_semantics = [#tpu.dimension_semantics<parallel>], iteration_bounds = array<i64: 2>, scalar_prefetch = 0 : i64, scratch_operands = 5 : i64, tpu.core_type = #tpu.core_type<tc>, window_params = [{transform_indices = @transform_0, window_bounds = array<i64: 256, 32>}, {pipeline_mode = #tpu.pipeline_mode<synchronous>, transform_indices = @transform_1, window_bounds = array<i64: 32, 256>}, {pipeline_mode = #tpu.pipeline_mode<synchronous>, transform_indices = @transform_2, window_bounds = array<i64: 1, 256>}, {pipeline_mode = #tpu.pipeline_mode<synchronous>, transform_indices = @transform_3, window_bounds = array<i64: 128, 384>}, {pipeline_mode = #tpu.pipeline_mode<synchronous>, transform_indices = @transform_4, window_bounds = array<i64: 128, 32>}, {pipeline_mode = #tpu.pipeline_mode<synchronous>, transform_indices = @transform_5, window_bounds = array<i64: 2, 32, 32>}, {pipeline_mode = #tpu.pipeline_mode<synchronous>, transform_indices = @transform_6, window_bounds = array<i64: 8, 32>}, {pipeline_mode = #tpu.pipeline_mode<synchronous>, transform_indices = @transform_7, window_bounds = array<i64: 128, 128>}, {transform_indices = @transform_8, window_bounds = array<i64: 256, 32>}]} {
    %c0 = arith.constant 0 : index
    %c0_0 = arith.constant 0 : index
    %0 = vector.load %arg1[%c0, %c0_0] : memref<256x32xf32, #tpu.memory_space<vmem>>, vector<256x32xf32>
    %c0_1 = arith.constant 0 : index
    %c0_2 = arith.constant 0 : index
    %1 = vector.load %arg8[%c0_1, %c0_2] : memref<128x128xbf16, #tpu.memory_space<vmem>>, vector<128x128xbf16>
    %2 = arith.extf %1 : vector<128x128xbf16> to vector<128x128xf32>
    %3 = arith.truncf %0 : vector<256x32xf32> to vector<256x32xbf16>
    %c0_3 = arith.constant 0 : index
    %c0_4 = arith.constant 0 : index
    %4 = vector.load %arg2[%c0_3, %c0_4] : memref<32x256xbf16, #tpu.memory_space<vmem>>, vector<32x256xbf16>
    %cst = arith.constant dense<0.000000e+00> : vector<256x256xf32>
    %5 = tpu.matmul %3, %4, %cst {dimension_numbers = #tpu.dot_dimension_numbers<[1], [0], [0], [1], [0, 0, 1, 1], [], []>} : vector<256x32xbf16>, vector<32x256xbf16>, vector<256x256xf32> -> vector<256x256xf32>
    %c0_5 = arith.constant 0 : index
    %c0_6 = arith.constant 0 : index
    %6 = vector.load %arg3[%c0_5, %c0_6] : memref<1x256xf32, #tpu.memory_space<vmem>>, vector<1x256xf32>
    %7 = vector.broadcast %6 : vector<1x256xf32> to vector<256x256xf32>
    %8 = arith.addf %5, %7 : vector<256x256xf32>
    %9 = vector.extract_strided_slice %8 {offsets = [0, 0], sizes = [256, 128], strides = [1, 1]} : vector<256x256xf32> to vector<256x128xf32>
    %10 = vector.extract_strided_slice %8 {offsets = [0, 128], sizes = [256, 128], strides = [1, 1]} : vector<256x256xf32> to vector<256x128xf32>
    %cst_7 = arith.constant dense<0xFF800000> : vector<256xf32>
    %11 = vector.multi_reduction <maximumf>, %9, %cst_7 [1] : vector<256x128xf32> to vector<256xf32>
    %12 = vector.shape_cast %11 : vector<256xf32> to vector<256x1xf32>
    %13 = vector.broadcast %12 : vector<256x1xf32> to vector<256x128xf32>
    %14 = arith.subf %9, %13 : vector<256x128xf32>
    %15 = math.exp %14 : vector<256x128xf32>
    %16 = arith.truncf %15 : vector<256x128xf32> to vector<256x128xbf16>
    %cst_8 = arith.constant dense<0.000000e+00> : vector<256x128xf32>
    %17 = tpu.matmul %16, %1, %cst_8 {dimension_numbers = #tpu.dot_dimension_numbers<[1], [0], [0], [1], [0, 0, 1, 1], [], []>} : vector<256x128xbf16>, vector<128x128xbf16>, vector<256x128xf32> -> vector<256x128xf32>
    %cst_9 = arith.constant 1.000000e-30 : f32
    %18 = vector.broadcast %cst_9 : f32 to vector<256x128xf32>
    %19 = arith.addf %17, %18 : vector<256x128xf32>
    %20 = tpu.reciprocal %19 {approx = true} : vector<256x128xf32> -> vector<256x128xf32>
    %21 = arith.mulf %15, %20 : vector<256x128xf32>
    %c0_10 = arith.constant 0 : index
    %c0_11 = arith.constant 0 : index
    %22 = vector.load %arg10[%c0_10, %c0_11] : memref<256x128xf32, #tpu.memory_space<vmem>>, vector<256x128xf32>
    tpu.vector_store %arg10[%c0_10, %c0_11], %21 {strides = array<i32>} : memref<256x128xf32, #tpu.memory_space<vmem>>, vector<256x128xf32>,
    %c0_12 = arith.constant 0 : index
    %c0_13 = arith.constant 0 : index
    %23 = vector.load %arg11[%c0_12, %c0_13] : memref<256x128xf32, #tpu.memory_space<vmem>>, vector<256x128xf32>
    tpu.vector_store %arg11[%c0_12, %c0_13], %10 {strides = array<i32>} : memref<256x128xf32, #tpu.memory_space<vmem>>, vector<256x128xf32>,
    %c0_i32 = arith.constant 0 : i32
    %c32_i32 = arith.constant 32 : i32
    %24 = arith.addi %c0_i32, %c32_i32 : i32
    %c1_i32 = arith.constant 1 : i32
    scf.for %arg15 = %c0_i32 to %24 step %c1_i32  : i32 {
      %c8_i32 = arith.constant 8 : i32
      %105 = arith.muli %arg15, %c8_i32 : i32
      %106 = tpu.assume_multiple %105, 8 : i32
      %c128_i32 = arith.constant 128 : i32
      %107 = arith.muli %arg15, %c128_i32 : i32
      %108 = tpu.assume_multiple %107, 128 : i32
      %109 = arith.index_cast %106 : i32 to index
      %c0_60 = arith.constant 0 : index
      %110 = vector.load %arg10[%109, %c0_60] : memref<256x128xf32, #tpu.memory_space<vmem>>, vector<8x128xf32>
      %111 = arith.index_cast %106 : i32 to index
      %c0_61 = arith.constant 0 : index
      %112 = vector.load %arg11[%111, %c0_61] : memref<256x128xf32, #tpu.memory_space<vmem>>, vector<8x128xf32>
      %cst_62 = arith.constant dense<0.000000e+00> : vector<128xf32>
      %113 = vector.multi_reduction <add>, %110, %cst_62 [0] : vector<8x128xf32> to vector<128xf32>
      %114 = vector.shape_cast %113 : vector<128xf32> to vector<1x128xf32>
      %cst_63 = arith.constant 9.99999974E-6 : f32
      %115 = vector.broadcast %cst_63 : f32 to vector<1x128xf32>
      %116 = arith.addf %114, %115 : vector<1x128xf32>
      %117 = tpu.reciprocal %116 {approx = true} : vector<1x128xf32> -> vector<1x128xf32>
      %118 = vector.broadcast %117 : vector<1x128xf32> to vector<8x128xf32>
      %119 = arith.mulf %110, %118 : vector<8x128xf32>
      %120 = tpu.transpose %119, [1, 0] : vector<8x128xf32> -> vector<128x8xf32>
      %cst_64 = arith.constant dense<0.000000e+00> : vector<128x128xf32>
      %121 = tpu.matmul %120, %112, %cst_64 {dimension_numbers = #tpu.dot_dimension_numbers<[1], [0], [0], [1], [0, 0, 1, 1], [], []>} : vector<128x8xf32>, vector<8x128xf32>, vector<128x128xf32> -> vector<128x128xf32>
      %122 = arith.mulf %121, %2 : vector<128x128xf32>
      %123 = arith.truncf %122 : vector<128x128xf32> to vector<128x128xbf16>
      %124 = arith.index_cast %108 : i32 to index
      %c0_65 = arith.constant 0 : index
      %125 = vector.load %arg12[%124, %c0_65] : memref<4096x128xbf16, #tpu.memory_space<vmem>>, vector<128x128xbf16>
      tpu.vector_store %arg12[%124, %c0_65], %123 {strides = array<i32>} : memref<4096x128xbf16, #tpu.memory_space<vmem>>, vector<128x128xbf16>,
    }
    %c32_i32_14 = arith.constant 32 : i32
    %c0_15 = arith.constant 0 : index
    %c0_16 = arith.constant 0 : index
    %25 = vector.load %arg12[%c0_15, %c0_16] : memref<4096x128xbf16, #tpu.memory_space<vmem>>, vector<4096x128xbf16>
    %c0_17 = arith.constant 0 : index
    %c0_18 = arith.constant 0 : index
    %26 = vector.load %arg4[%c0_17, %c0_18] : memref<128x384xbf16, #tpu.memory_space<vmem>>, vector<128x384xbf16>
    %cst_19 = arith.constant dense<0.000000e+00> : vector<4096x384xf32>
    %27 = tpu.matmul %25, %26, %cst_19 {dimension_numbers = #tpu.dot_dimension_numbers<[1], [0], [0], [1], [0, 0, 1, 1], [], []>} : vector<4096x128xbf16>, vector<128x384xbf16>, vector<4096x384xf32> -> vector<4096x384xf32>
    %28 = arith.truncf %27 : vector<4096x384xf32> to vector<4096x384xbf16>
    %c0_20 = arith.constant 0 : index
    %c0_21 = arith.constant 0 : index
    %29 = vector.load %arg13[%c0_20, %c0_21] : memref<4096x384xbf16, #tpu.memory_space<vmem>>, vector<4096x384xbf16>
    tpu.vector_store %arg13[%c0_20, %c0_21], %28 {strides = array<i32>} : memref<4096x384xbf16, #tpu.memory_space<vmem>>, vector<4096x384xbf16>,
    %c0_i32_22 = arith.constant 0 : i32
    %c32_i32_23 = arith.constant 32 : i32
    %30 = arith.addi %c0_i32_22, %c32_i32_23 : i32
    %c1_i32_24 = arith.constant 1 : i32
    scf.for %arg15 = %c0_i32_22 to %30 step %c1_i32_24  : i32 {
      %c8_i32 = arith.constant 8 : i32
      %105 = arith.muli %arg15, %c8_i32 : i32
      %106 = tpu.assume_multiple %105, 8 : i32
      %c128_i32 = arith.constant 128 : i32
      %107 = arith.muli %arg15, %c128_i32 : i32
      %108 = tpu.assume_multiple %107, 128 : i32
      %109 = arith.index_cast %108 : i32 to index
      %c0_60 = arith.constant 0 : index
      %110 = vector.load %arg13[%109, %c0_60] : memref<4096x384xbf16, #tpu.memory_space<vmem>>, vector<128x384xbf16>
      %111 = vector.extract_strided_slice %110 {offsets = [0, 0], sizes = [128, 128], strides = [1, 1]} : vector<128x384xbf16> to vector<128x128xbf16>
      %112 = vector.extract_strided_slice %110 {offsets = [0, 128], sizes = [128, 128], strides = [1, 1]} : vector<128x384xbf16> to vector<128x128xbf16>
      %113 = vector.extract_strided_slice %110 {offsets = [0, 256], sizes = [128, 128], strides = [1, 1]} : vector<128x384xbf16> to vector<128x128xbf16>
      %cst_61 = arith.constant dense<0.000000e+00> : vector<128x128xf32>
      %114 = tpu.matmul %111, %112, %cst_61 {dimension_numbers = #tpu.dot_dimension_numbers<[1], [1], [0], [0], [0, 0, 1, 0], [], []>} : vector<128x128xbf16>, vector<128x128xbf16>, vector<128x128xf32> -> vector<128x128xf32>
      %cst_62 = arith.constant 0.176776692 : f32
      %115 = vector.broadcast %cst_62 : f32 to vector<128x128xf32>
      %116 = arith.mulf %114, %115 : vector<128x128xf32>
      %cst_63 = arith.constant dense<0xFF800000> : vector<128xf32>
      %117 = vector.multi_reduction <maximumf>, %116, %cst_63 [1] : vector<128x128xf32> to vector<128xf32>
      %118 = vector.shape_cast %117 : vector<128xf32> to vector<128x1xf32>
      %119 = vector.broadcast %118 : vector<128x1xf32> to vector<128x128xf32>
      %120 = arith.subf %116, %119 : vector<128x128xf32>
      %121 = math.exp %120 : vector<128x128xf32>
      %122 = arith.mulf %121, %2 : vector<128x128xf32>
      %cst_64 = arith.constant dense<0.000000e+00> : vector<128xf32>
      %123 = vector.multi_reduction <add>, %122, %cst_64 [1] : vector<128x128xf32> to vector<128xf32>
      %124 = vector.shape_cast %123 : vector<128xf32> to vector<128x1xf32>
      %cst_65 = arith.constant 1.000000e-30 : f32
      %125 = vector.broadcast %cst_65 : f32 to vector<128x1xf32>
      %126 = arith.addf %124, %125 : vector<128x1xf32>
      %127 = tpu.reciprocal %126 {approx = true} : vector<128x1xf32> -> vector<128x1xf32>
      %128 = vector.broadcast %127 : vector<128x1xf32> to vector<128x128xf32>
      %129 = arith.mulf %122, %128 : vector<128x128xf32>
      %130 = arith.truncf %129 : vector<128x128xf32> to vector<128x128xbf16>
      %cst_66 = arith.constant dense<0.000000e+00> : vector<128x128xf32>
      %131 = tpu.matmul %130, %113, %cst_66 {dimension_numbers = #tpu.dot_dimension_numbers<[1], [0], [0], [1], [0, 0, 1, 1], [], []>} : vector<128x128xbf16>, vector<128x128xbf16>, vector<128x128xf32> -> vector<128x128xf32>
      %132 = arith.index_cast %106 : i32 to index
      %c0_67 = arith.constant 0 : index
      %133 = vector.load %arg10[%132, %c0_67] : memref<256x128xf32, #tpu.memory_space<vmem>>, vector<8x128xf32>
      %134 = arith.truncf %133 : vector<8x128xf32> to vector<8x128xbf16>
      %135 = arith.truncf %131 : vector<128x128xf32> to vector<128x128xbf16>
      %cst_68 = arith.constant dense<0.000000e+00> : vector<8x128xf32>
      %136 = tpu.matmul %134, %135, %cst_68 {dimension_numbers = #tpu.dot_dimension_numbers<[1], [0], [0], [1], [0, 0, 1, 1], [], []>} : vector<8x128xbf16>, vector<128x128xbf16>, vector<8x128xf32> -> vector<8x128xf32>
      %137 = arith.index_cast %106 : i32 to index
      %c0_69 = arith.constant 0 : index
      %138 = vector.load %arg14[%137, %c0_69] : memref<256x128xf32, #tpu.memory_space<vmem>>, vector<8x128xf32>
      tpu.vector_store %arg14[%137, %c0_69], %136 {strides = array<i32>} : memref<256x128xf32, #tpu.memory_space<vmem>>, vector<8x128xf32>,
    }
    %c32_i32_25 = arith.constant 32 : i32
    %c0_26 = arith.constant 0 : index
    %c0_27 = arith.constant 0 : index
    %31 = vector.load %arg14[%c0_26, %c0_27] : memref<256x128xf32, #tpu.memory_space<vmem>>, vector<256x128xf32>
    %32 = arith.truncf %31 : vector<256x128xf32> to vector<256x128xbf16>
    %c0_28 = arith.constant 0 : index
    %c0_29 = arith.constant 0 : index
    %33 = vector.load %arg5[%c0_28, %c0_29] : memref<128x32xbf16, #tpu.memory_space<vmem>>, vector<128x32xbf16>
    %cst_30 = arith.constant dense<0.000000e+00> : vector<256x32xf32>
    %34 = tpu.matmul %32, %33, %cst_30 {dimension_numbers = #tpu.dot_dimension_numbers<[1], [0], [0], [1], [0, 0, 1, 1], [], []>} : vector<256x128xbf16>, vector<128x32xbf16>, vector<256x32xf32> -> vector<256x32xf32>
    %c0_31 = arith.constant 0 : index
    %c0_32 = arith.constant 0 : index
    %35 = vector.load %arg7[%c0_31, %c0_32] : memref<8x32xf32, #tpu.memory_space<vmem>>, vector<1x32xf32>
    %36 = vector.broadcast %35 : vector<1x32xf32> to vector<256x32xf32>
    %37 = arith.addf %34, %36 : vector<256x32xf32>
    %38 = arith.addf %37, %0 : vector<256x32xf32>
    %cst_33 = arith.constant dense<0.000000e+00> : vector<256xf32>
    %39 = vector.multi_reduction <add>, %38, %cst_33 [1] : vector<256x32xf32> to vector<256xf32>
    %40 = vector.shape_cast %39 : vector<256xf32> to vector<256x1xf32>
    %cst_34 = arith.constant 3.200000e+01 : f32
    %41 = vector.broadcast %cst_34 : f32 to vector<256x1xf32>
    %42 = arith.divf %40, %41 : vector<256x1xf32>
    %43 = vector.broadcast %42 : vector<256x1xf32> to vector<256x32xf32>
    %44 = arith.subf %38, %43 : vector<256x32xf32>
    %45 = arith.mulf %44, %44 : vector<256x32xf32>
    %cst_35 = arith.constant dense<0.000000e+00> : vector<256xf32>
    %46 = vector.multi_reduction <add>, %45, %cst_35 [1] : vector<256x32xf32> to vector<256xf32>
    %47 = vector.shape_cast %46 : vector<256xf32> to vector<256x1xf32>
    %cst_36 = arith.constant 3.200000e+01 : f32
    %48 = vector.broadcast %cst_36 : f32 to vector<256x1xf32>
    %49 = arith.divf %47, %48 : vector<256x1xf32>
    %50 = vector.broadcast %42 : vector<256x1xf32> to vector<256x32xf32>
    %51 = arith.subf %38, %50 : vector<256x32xf32>
    %cst_37 = arith.constant 9.99999974E-6 : f32
    %52 = vector.broadcast %cst_37 : f32 to vector<256x1xf32>
    %53 = arith.addf %49, %52 : vector<256x1xf32>
    %54 = math.rsqrt %53 : vector<256x1xf32>
    %55 = vector.broadcast %54 : vector<256x1xf32> to vector<256x32xf32>
    %56 = arith.mulf %51, %55 : vector<256x32xf32>
    %c1 = arith.constant 1 : index
    %c0_38 = arith.constant 0 : index
    %57 = vector.load %arg7[%c1, %c0_38] : memref<8x32xf32, #tpu.memory_space<vmem>>, vector<1x32xf32>
    %58 = vector.broadcast %57 : vector<1x32xf32> to vector<256x32xf32>
    %59 = arith.mulf %56, %58 : vector<256x32xf32>
    %c2 = arith.constant 2 : index
    %c0_39 = arith.constant 0 : index
    %60 = vector.load %arg7[%c2, %c0_39] : memref<8x32xf32, #tpu.memory_space<vmem>>, vector<1x32xf32>
    %61 = vector.broadcast %60 : vector<1x32xf32> to vector<256x32xf32>
    %62 = arith.addf %59, %61 : vector<256x32xf32>
    %63 = arith.truncf %62 : vector<256x32xf32> to vector<256x32xbf16>
    %c0_40 = arith.constant 0 : index
    %c0_41 = arith.constant 0 : index
    %c0_42 = arith.constant 0 : index
    %64 = vector.load %arg6[%c0_40, %c0_41, %c0_42] : memref<2x32x32xbf16, #tpu.memory_space<vmem>>, vector<1x32x32xbf16>
    %65 = vector.shape_cast %64 : vector<1x32x32xbf16> to vector<32x32xbf16>
    %cst_43 = arith.constant dense<0.000000e+00> : vector<256x32xf32>
    %66 = tpu.matmul %63, %65, %cst_43 {dimension_numbers = #tpu.dot_dimension_numbers<[1], [0], [0], [1], [0, 0, 1, 1], [], []>} : vector<256x32xbf16>, vector<32x32xbf16>, vector<256x32xf32> -> vector<256x32xf32>
    %c3 = arith.constant 3 : index
    %c0_44 = arith.constant 0 : index
    %67 = vector.load %arg7[%c3, %c0_44] : memref<8x32xf32, #tpu.memory_space<vmem>>, vector<1x32xf32>
    %68 = vector.broadcast %67 : vector<1x32xf32> to vector<256x32xf32>
    %69 = arith.addf %66, %68 : vector<256x32xf32>
    %cst_45 = arith.constant 0.000000e+00 : f32
    %70 = vector.broadcast %cst_45 : f32 to vector<256x32xf32>
    %71 = arith.maximumf %69, %70 : vector<256x32xf32>
    %72 = arith.truncf %71 : vector<256x32xf32> to vector<256x32xbf16>
    %c1_46 = arith.constant 1 : index
    %c0_47 = arith.constant 0 : index
    %c0_48 = arith.constant 0 : index
    %73 = vector.load %arg6[%c1_46, %c0_47, %c0_48] : memref<2x32x32xbf16, #tpu.memory_space<vmem>>, vector<1x32x32xbf16>
    %74 = vector.shape_cast %73 : vector<1x32x32xbf16> to vector<32x32xbf16>
    %cst_49 = arith.constant dense<0.000000e+00> : vector<256x32xf32>
    %75 = tpu.matmul %72, %74, %cst_49 {dimension_numbers = #tpu.dot_dimension_numbers<[1], [0], [0], [1], [0, 0, 1, 1], [], []>} : vector<256x32xbf16>, vector<32x32xbf16>, vector<256x32xf32> -> vector<256x32xf32>
    %c4 = arith.constant 4 : index
    %c0_50 = arith.constant 0 : index
    %76 = vector.load %arg7[%c4, %c0_50] : memref<8x32xf32, #tpu.memory_space<vmem>>, vector<1x32xf32>
    %77 = vector.broadcast %76 : vector<1x32xf32> to vector<256x32xf32>
    %78 = arith.addf %75, %77 : vector<256x32xf32>
    %79 = arith.addf %78, %62 : vector<256x32xf32>
    %cst_51 = arith.constant dense<0.000000e+00> : vector<256xf32>
    %80 = vector.multi_reduction <add>, %79, %cst_51 [1] : vector<256x32xf32> to vector<256xf32>
    %81 = vector.shape_cast %80 : vector<256xf32> to vector<256x1xf32>
    %cst_52 = arith.constant 3.200000e+01 : f32
    %82 = vector.broadcast %cst_52 : f32 to vector<256x1xf32>
    %83 = arith.divf %81, %82 : vector<256x1xf32>
    %84 = vector.broadcast %83 : vector<256x1xf32> to vector<256x32xf32>
    %85 = arith.subf %79, %84 : vector<256x32xf32>
    %86 = arith.mulf %85, %85 : vector<256x32xf32>
    %cst_53 = arith.constant dense<0.000000e+00> : vector<256xf32>
    %87 = vector.multi_reduction <add>, %86, %cst_53 [1] : vector<256x32xf32> to vector<256xf32>
    %88 = vector.shape_cast %87 : vector<256xf32> to vector<256x1xf32>
    %cst_54 = arith.constant 3.200000e+01 : f32
    %89 = vector.broadcast %cst_54 : f32 to vector<256x1xf32>
    %90 = arith.divf %88, %89 : vector<256x1xf32>
    %91 = vector.broadcast %83 : vector<256x1xf32> to vector<256x32xf32>
    %92 = arith.subf %79, %91 : vector<256x32xf32>
    %cst_55 = arith.constant 9.99999974E-6 : f32
    %93 = vector.broadcast %cst_55 : f32 to vector<256x1xf32>
    %94 = arith.addf %90, %93 : vector<256x1xf32>
    %95 = math.rsqrt %94 : vector<256x1xf32>
    %96 = vector.broadcast %95 : vector<256x1xf32> to vector<256x32xf32>
    %97 = arith.mulf %92, %96 : vector<256x32xf32>
    %c5 = arith.constant 5 : index
    %c0_56 = arith.constant 0 : index
    %98 = vector.load %arg7[%c5, %c0_56] : memref<8x32xf32, #tpu.memory_space<vmem>>, vector<1x32xf32>
    %99 = vector.broadcast %98 : vector<1x32xf32> to vector<256x32xf32>
    %100 = arith.mulf %97, %99 : vector<256x32xf32>
    %c6 = arith.constant 6 : index
    %c0_57 = arith.constant 0 : index
    %101 = vector.load %arg7[%c6, %c0_57] : memref<8x32xf32, #tpu.memory_space<vmem>>, vector<1x32xf32>
    %102 = vector.broadcast %101 : vector<1x32xf32> to vector<256x32xf32>
    %103 = arith.addf %100, %102 : vector<256x32xf32>
    %c0_58 = arith.constant 0 : index
    %c0_59 = arith.constant 0 : index
    %104 = vector.load %arg9[%c0_58, %c0_59] : memref<256x32xf32, #tpu.memory_space<vmem>>, vector<256x32xf32>
    tpu.vector_store %arg9[%c0_58, %c0_59], %103 {strides = array<i32>} : memref<256x32xf32, #tpu.memory_space<vmem>>, vector<256x32xf32>,
    return
  }
  func.func @transform_0(%arg0: i32) -> (i32, i32) {
    %c0_i32 = arith.constant 0 : i32
    %c0_i32_0 = arith.constant 0 : i32
    return %arg0, %c0_i32 : i32, i32
  }
  func.func @transform_1(%arg0: i32) -> (i32, i32) {
    %c0_i32 = arith.constant 0 : i32
    %c0_i32_0 = arith.constant 0 : i32
    %c0_i32_1 = arith.constant 0 : i32
    return %c0_i32, %c0_i32_0 : i32, i32
  }
  func.func @transform_2(%arg0: i32) -> (i32, i32) {
    %c0_i32 = arith.constant 0 : i32
    %c0_i32_0 = arith.constant 0 : i32
    %c0_i32_1 = arith.constant 0 : i32
    return %c0_i32, %c0_i32_0 : i32, i32
  }
  func.func @transform_3(%arg0: i32) -> (i32, i32) {
    %c0_i32 = arith.constant 0 : i32
    %c0_i32_0 = arith.constant 0 : i32
    %c0_i32_1 = arith.constant 0 : i32
    return %c0_i32, %c0_i32_0 : i32, i32
  }
  func.func @transform_4(%arg0: i32) -> (i32, i32) {
    %c0_i32 = arith.constant 0 : i32
    %c0_i32_0 = arith.constant 0 : i32
    %c0_i32_1 = arith.constant 0 : i32
    return %c0_i32, %c0_i32_0 : i32, i32
  }
  func.func @transform_5(%arg0: i32) -> (i32, i32, i32) {
    %c0_i32 = arith.constant 0 : i32
    %c0_i32_0 = arith.constant 0 : i32
    %c0_i32_1 = arith.constant 0 : i32
    %c0_i32_2 = arith.constant 0 : i32
    return %c0_i32, %c0_i32_0, %c0_i32_1 : i32, i32, i32
  }
  func.func @transform_6(%arg0: i32) -> (i32, i32) {
    %c0_i32 = arith.constant 0 : i32
    %c0_i32_0 = arith.constant 0 : i32
    %c0_i32_1 = arith.constant 0 : i32
    return %c0_i32, %c0_i32_0 : i32, i32
  }
  func.func @transform_7(%arg0: i32) -> (i32, i32) {
    %c0_i32 = arith.constant 0 : i32
    %c0_i32_0 = arith.constant 0 : i32
    %c0_i32_1 = arith.constant 0 : i32
    return %c0_i32, %c0_i32_0 : i32, i32
  }
  func.func @transform_8(%arg0: i32) -> (i32, i32) {
    %c0_i32 = arith.constant 0 : i32
    %c0_i32_0 = arith.constant 0 : i32
    return %arg0, %c0_i32 : i32, i32
  }
}

</mosaic_0001>

<bundles_post_ra>
// kernel: tpu_custom_call.1
= control target key start
LH: loop header
LB: loop body
LE: loop exit
PB: predicated region body
PF: predicated region fallthrough
CT: control target
= control target key end

     0   :  { %s12559_s27 = smov 0   ;;  %s15346_s0 = inlined_call_operand.vmem [shape: f32[512,32], index: 0, kind: input, shape index: {}]   ;;  %s15347_s1 = inlined_call_operand.vmem [shape: bf16[32,256], index: 1, kind: input, shape index: {}]   ;;  %s15348_s2 = inlined_call_operand.vmem [shape: f32[1,256], index: 2, kind: input, shape index: {}]   ;;  %s15349_s3 = inlined_call_operand.vmem [shape: bf16[128,384], index: 3, kind: input, shape index: {}]   ;;  %s15350_s4 = inlined_call_operand.vmem [shape: bf16[128,32], index: 4, kind: input, shape index: {}]   ;;  %s15351_s5 = inlined_call_operand.vmem [shape: bf16[2,32,32], index: 5, kind: input, shape index: {}]   ;;  %s15352_s6 = inlined_call_operand.vmem [shape: f32[8,32], index: 6, kind: input, shape index: {}]   ;;  %s15353_s7 = inlined_call_operand.vmem [shape: bf16[128,128], index: 7, kind: input, shape index: {}]   ;;  %s15354_s8 = inlined_call_operand.vmem [shape: f32[512,32], index: 8, kind: output, shape index: {}]  }
   0x1 LB: > { %s10532_s28 = sadd.s32 4294967295, %s12501_s27   ;;  %p10536_p0 = scmp.ge.s32.totalorder %s12501_s27, 1  ;;  %s12501_s27 = sphi %s12559_s27, %s18_s27  }
   0x2   : > { %p263_p1 = scmp.lt.s32.totalorder %s12501_s27, 3 }
   0x4   : > { %p264_p2 = pnand %p10536_p0, %p263_p1 }
   0x6   : > { %267 = sbr.rel (%p264_p2) target bundleno = 5366 (0x14f6), region = 52 }
   0xd   : > { %v11939_v0 = vld [vmem:[%s15347_s1 + $0x4] ss:$8 sps:$4 sm:$0xff]   ;;  %s10537_s9 = sshll.u32 %s10532_s28, 5  ;;  %v11941_v1 = vld [vmem:[%s15347_s1] ss:$8 sps:$4 sm:$0xff]   ;;  %v15355_v2 = vmov 0   ;;  %v396_v56 = vlaneseq }
   0xe   : > { %507 = vmatprep.mubr.bf16.mxu0 %v15355_v2  ;;  %p298_p3 = scmp.lt.s32.totalorder %s10537_s9, 63  ;;  %627 = vmatprep.mubr.bf16.mxu1 %v15355_v2  ;;  %v11942_v3 = vld [vmem:[%s15347_s1 + $0x14] ss:$8 sps:$4 sm:$0xff]   ;;  %v11944_v4 = vld [vmem:[%s15347_s1 + $0x10] ss:$8 sps:$4 sm:$0xff]   ;;  %vm426_vm0 = vcmask 261120  }
   0xf   : > { %475 = vmatprep.subr.bf16.mxu0 %v11939_v0  ;;  %11885 = vmatprep.subr.bf16.mxu1 %v11939_v0  ;;  %v12752_v53 = vld [vmem:[%s15353_s7] sm:$0xff]   ;;  %v397_v57 = vshrl.u32 %v396_v56, 7  ;;  %s13172_s20 = smov 0  }
  0x10   : > { %476 = vmatpush1.bf16.msra.mxu0 %v11941_v1  ;;  %s15463_s9 = smov (!%p298_p3, %s10537_s9), 63  ;;  %11887 = vmatpush1.bf16.msra.mxu1 %v11941_v1  ;;  %v394_v59 = vld [vmem:[%s15348_s2] sm:$0x3] }
  0x11   : > { %477 = vmatprep.subr.bf16.mxu0 %v11942_v3  ;;  %11886 = vmatprep.subr.bf16.mxu1 %v11942_v3  ;;  %s10538_s16 = sshll.u32 %s15463_s9, 3  ;;  %v398_v58 = vsub.s32 0, %v397_v57  ;;  %v402_v60 = vsub.s32 1, %v397_v57 }
  0x12   : > { %s12584_s19 = scalar_lea.vmem %s15346_s0, %s10538_s16  ;;  %s12589_s22 = scalar_lea.vmem %s15354_s8, %s10538_s16 }
  0x13   : > { %v12592_v5 = vld [vmem:[%s12584_s19] sm:$0xff]  ;;  %v12595_v6 = vld [vmem:[%s12584_s19 + $0x8] sm:$0xff]  ;;  %v12602_v8 = vld [vmem:[%s12584_s19 + $0x10] sm:$0xff]  ;;  %v12761_v61 = vrot.slane %v394_v59, %v398_v58  ;;  %v12763_v62 = vrot.slane %v394_v59, %v402_v60 }
  0x14   : > { %478 = vmatpush1.bf16.msra.mxu0 %v11944_v4  ;;  %11888 = vmatpush1.bf16.msra.mxu1 %v11944_v4  ;;  %v374_v7 = vpack.c.bf16 %v12595_v6, %v12592_v5  ;;  %v12605_v9 = vld [vmem:[%s12584_s19 + $0x18] sm:$0xff]  ;;  %v12608_v10 = vld [vmem:[%s12584_s19 + $0xc0] sm:$0xff]  ;;  %v12613_v12 = vld [vmem:[%s12584_s19 + $0xc8] sm:$0xff] }
  0x15   : > { %15381 = vst [vmem:[#allocation7_spill] sm:$0xff] %v12608_v10  ;;  %v375_v11 = vpack.c.bf16 %v12605_v9, %v12602_v8  ;;  %15382 = vst [vmem:[#allocation8_spill] sm:$0xff] %v12613_v12  ;;  %v386_v13 = vpack.c.bf16 %v12613_v12, %v12608_v10  ;;  %v12621_v14 = vld [vmem:[%s12584_s19 + $0xd0] sm:$0xff]  ;;  %v12624_v15 = vld [vmem:[%s12584_s19 + $0xd8] sm:$0xff]  ;;  %11079 = vmatprep.subr.bf16.mxu1 %v12752_v53 }
  0x16   : > { %15383 = vst [vmem:[#allocation9_spill] sm:$0xff] %v12621_v14  ;;  %15384 = vst [vmem:[#allocation10_spill] sm:$0xff] %v12624_v15  ;;  %v12628_v16 = vld [vmem:[%s12584_s19 + $0x20] sm:$0xff]  ;;  %v12631_v17 = vld [vmem:[%s12584_s19 + $0x28] sm:$0xff]  ;;  %v387_v18 = vpack.c.bf16 %v12624_v15, %v12621_v14 }
  0x17   : > { %10545 = vmatmul.mubr.msk.bf16.vlgmr.msra.gmra.mrb[0].mxu0 %vm426_vm0, %v374_v7  ;;  %10557 = vmatmul.mubr.msk.bf16.vlgmr.msra.gmra.mrb[0].mxu1 %vm426_vm0, %v386_v13  ;;  %v376_v19 = vpack.c.bf16 %v12631_v17, %v12628_v16  ;;  %v12641_v20 = vld [vmem:[%s12584_s19 + $0xe0] sm:$0xff]  ;;  %v12644_v21 = vld [vmem:[%s12584_s19 + $0xe8] sm:$0xff]  ;;  %v12648_v22 = vld [vmem:[%s12584_s19 + $0x30] sm:$0xff] }
  0x18   : > { %517 = vmatprep.mubr.bf16.mxu0 %v15355_v2  ;;  %637 = vmatprep.mubr.bf16.mxu1 %v15355_v2  ;;  %15385 = vst [vmem:[#allocation11_spill] sm:$0xff] %v12641_v20  ;;  %15386 = vst [vmem:[#allocation12_spill] sm:$0xff] %v12644_v21  ;;  %v12651_v23 = vld [vmem:[%s12584_s19 + $0x38] sm:$0xff]  ;;  %v388_v24 = vpack.c.bf16 %v12644_v21, %v12641_v20  ;;  %v12661_v26 = vld [vmem:[%s12584_s19 + $0xf0] sm:$0xff] }
  0x19   : > { %v377_v25 = vpack.c.bf16 %v12651_v23, %v12648_v22  ;;  %15387 = vst [vmem:[#allocation13_spill] sm:$0xff] %v12661_v26  ;;  %v12664_v27 = vld [vmem:[%s12584_s19 + $0xf8] sm:$0xff]  ;;  %v12668_v28 = vld [vmem:[%s12584_s19 + $0x40] sm:$0xff]  ;;  %v12671_v29 = vld [vmem:[%s12584_s19 + $0x48] sm:$0xff]  ;;  %11080 = vmatpush3.bf16.msra.mxu1 %v12752_v53 }
  0x1a   : > { %15388 = vst [vmem:[#allocation14_spill] sm:$0xff] %v12664_v27  ;;  %15389 = vst [vmem:[#allocation15_spill] sm:$0xff] %v12668_v28  ;;  %v389_v30 = vpack.c.bf16 %v12664_v27, %v12661_v26  ;;  %v378_v31 = vpack.c.bf16 %v12671_v29, %v12668_v28  ;;  %v12681_v32 = vld [vmem:[%s12584_s19 + $0x50] sm:$0xff]  ;;  %v12684_v33 = vld [vmem:[%s12584_s19 + $0x58] sm:$0xff] }
  0x1b   : > { %15390 = vst [vmem:[#allocation16_spill] sm:$0xff] %v12671_v29  ;;  %15391 = vst [vmem:[#allocation17_spill] sm:$0xff] %v12681_v32  ;;  %v379_v34 = vpack.c.bf16 %v12684_v33, %v12681_v32  ;;  %v12691_v35 = vld [vmem:[%s12584_s19 + $0x60] sm:$0xff]  ;;  %v12694_v36 = vld [vmem:[%s12584_s19 + $0x68] sm:$0xff] }
  0x1c   : > { %15392 = vst [vmem:[#allocation18_spill] sm:$0xff] %v12684_v33  ;;  %15393 = vst [vmem:[#allocation19_spill] sm:$0xff] %v12691_v35  ;;  %v380_v37 = vpack.c.bf16 %v12694_v36, %v12691_v35  ;;  %v12701_v38 = vld [vmem:[%s12584_s19 + $0x70] sm:$0xff]  ;;  %v12704_v39 = vld [vmem:[%s12584_s19 + $0x78] sm:$0xff] }
  0x1d   : > { %15394 = vst [vmem:[#allocation20_spill] sm:$0xff] %v12694_v36  ;;  %15395 = vst [vmem:[#allocation21_spill] sm:$0xff] %v12701_v38  ;;  %v381_v40 = vpack.c.bf16 %v12704_v39, %v12701_v38  ;;  %v12711_v41 = vld [vmem:[%s12584_s19 + $0x80] sm:$0xff]  ;;  %v12714_v42 = vld [vmem:[%s12584_s19 + $0x88] sm:$0xff] }
  0x1e   : > { %15396 = vst [vmem:[#allocation22_spill] sm:$0xff] %v12704_v39  ;;  %15397 = vst [vmem:[#allocation23_spill] sm:$0xff] %v12711_v41  ;;  %v382_v43 = vpack.c.bf16 %v12714_v42, %v12711_v41  ;;  %v12721_v44 = vld [vmem:[%s12584_s19 + $0x90] sm:$0xff]  ;;  %v12724_v45 = vld [vmem:[%s12584_s19 + $0x98] sm:$0xff] }
  0x1f   : > { %10546 = vmatmul.mubr.msk.bf16.gmra.mrb[4].mxu0 %vm426_vm0, %v375_v11  ;;  %10558 = vmatmul.mubr.msk.bf16.gmra.mrb[4].mxu1 %vm426_vm0, %v387_v18  ;;  %15398 = vst [vmem:[#allocation24_spill] sm:$0xff] %v12714_v42  ;;  %15399 = vst [vmem:[#allocation25_spill] sm:$0xff] %v12721_v44  ;;  %v383_v46 = vpack.c.bf16 %v12724_v45, %v12721_v44  ;;  %v12731_v47 = vld [vmem:[%s12584_s19 + $0xa0] sm:$0xff]  ;;  %v12734_v48 = vld [vmem:[%s12584_s19 + $0xa8] sm:$0xff] }
  0x20   : > { %527 = vmatprep.mubr.bf16.mxu0 %v15355_v2  ;;  %647 = vmatprep.mubr.bf16.mxu1 %v15355_v2  ;;  %15400 = vst [vmem:[#allocation26_spill] sm:$0xff] %v12724_v45  ;;  %15401 = vst [vmem:[#allocation27_spill] sm:$0xff] %v12731_v47  ;;  %v384_v49 = vpack.c.bf16 %v12734_v48, %v12731_v47  ;;  %v12741_v50 = vld [vmem:[%s12584_s19 + $0xb0] sm:$0xff]  ;;  %v12744_v51 = vld [vmem:[%s12584_s19 + $0xb8] sm:$0xff] }
  0x21   : > { %15402 = vst [vmem:[#allocation28_spill] sm:$0xff] %v12734_v48  ;;  %15403 = vst [vmem:[#allocation29_spill] sm:$0xff] %v12741_v50  ;;  %v385_v52 = vpack.c.bf16 %v12744_v51, %v12741_v50  ;;  %v12796_v58 = vld [vmem:[%s15353_s7 + $0x8] sm:$0xff]  }
  0x22   : > { %15404 = vst [vmem:[#allocation30_spill] sm:$0xff] %v12744_v51  ;;  %11081 = vmatprep.subr.bf16.mxu1 %v12796_v58 }
  0x23   : > { %11082 = vmatpush3.bf16.msra.mxu1 %v12796_v58 }
  0x27   : > { %10547 = vmatmul.mubr.msk.bf16.gmra.mrb[8].mxu0 %vm426_vm0, %v376_v19  ;;  %10559 = vmatmul.mubr.msk.bf16.gmra.mrb[8].mxu1 %vm426_vm0, %v388_v24 }
  0x28   : > { %537 = vmatprep.mubr.bf16.mxu0 %v15355_v2  ;;  %657 = vmatprep.mubr.bf16.mxu1 %v15355_v2 }
  0x2f   : > { %10548 = vmatmul.mubr.msk.bf16.gmra.mrb[12].mxu0 %vm426_vm0, %v377_v25  ;;  %10560 = vmatmul.mubr.msk.bf16.gmra.mrb[12].mxu1 %vm426_vm0, %v389_v30 }
  0x30   : > { %547 = vmatprep.mubr.bf16.mxu0 %v15355_v2 }
  0x37   : > { %10549 = vmatmul.mubr.msk.bf16.gmra.mrb[16].mxu0 %vm426_vm0, %v378_v31 }
  0x38   : > { %557 = vmatprep.mubr.bf16.mxu0 %v15355_v2 }
  0x3f   : > { %10550 = vmatmul.mubr.msk.bf16.gmra.mrb[20].mxu0 %vm426_vm0, %v379_v34 }
  0x40   : > { %567 = vmatprep.mubr.bf16.mxu0 %v15355_v2 }
  0x47   : > { %10551 = vmatmul.mubr.msk.bf16.gmra.mrb[24].mxu0 %vm426_vm0, %v380_v37 }
  0x48   : > { %577 = vmatprep.mubr.bf16.mxu0 %v15355_v2 }
  0x4f   : > { %10552 = vmatmul.mubr.msk.bf16.gmra.mrb[28].mxu0 %vm426_vm0, %v381_v40 }
  0x50   : > { %587 = vmatprep.mubr.bf16.mxu0 %v15355_v2 }
  0x57   : > { %10553 = vmatmul.mubr.msk.bf16.gmra.mrb[32].mxu0 %vm426_vm0, %v382_v43 }
  0x58   : > { %597 = vmatprep.mubr.bf16.mxu0 %v15355_v2 }
  0x5f   : > { %10554 = vmatmul.mubr.msk.bf16.gmra.mrb[36].mxu0 %vm426_vm0, %v383_v46 }
  0x60   : > { %607 = vmatprep.mubr.bf16.mxu0 %v15355_v2 }
  0x67   : > { %10555 = vmatmul.mubr.msk.bf16.gmra.mrb[40].mxu0 %vm426_vm0, %v384_v49 }
  0x68   : > { %617 = vmatprep.mubr.bf16.mxu0 %v15355_v2 }
  0x6f   : > { %10556 = vmatmul.mubr.msk.bf16.gmra.mrb[44].mxu0 %vm426_vm0, %v385_v52 }
  0xea   : > { %v509_v63 = vpop.f32.mrb[0].mxu0  ;;  %v12775_v18 = vpop.f32.mrb[0].mxu1 }
  0xeb   : > { %v12766_v0 = vadd.f32 %v509_v63, %v12761_v61  ;;  %v511_v1 = vpop.f32.mrb[1].mxu0  ;;  %v631_v24 = vpop.f32.mrb[1].mxu1 }
  0xec   : > { %v512_v3 = vadd.f32 %v511_v1, %v12763_v62  ;;  %v513_v4 = vpop.f32.mrb[2].mxu0  ;;  %v632_v31 = vadd.f32 %v631_v24, %v12763_v62  ;;  %v12781_v34 = vpop.f32.mrb[2].mxu1 }
  0xed   : > { %v515_v7 = vpop.f32.mrb[3].mxu0  ;;  %668 = vmax.xlane.f32.xlu0 %v12766_v0  ;;  %v12772_v13 = vadd.f32 %v513_v4, %v12761_v61  ;;  %v635_v43 = vpop.f32.mrb[3].mxu1 }
  0xee   : > { %1149 = vst [vmem:[#allocation3] sm:$0xff] %v512_v3  ;;  %v516_v11 = vadd.f32 %v515_v7, %v12763_v62  ;;  %1173 = vst [vmem:[#allocation3 + $0xc0] sm:$0xff] %v632_v31  ;;  %v636_v49 = vadd.f32 %v635_v43, %v12763_v62 }
  0xf0   : > { %1150 = vst [vmem:[#allocation3 + $0x8] sm:$0xff] %v516_v11  ;;  %1174 = vst [vmem:[#allocation3 + $0xc8] sm:$0xff] %v636_v49 }
  0xf1   : > { %670 = vmax.xlane.f32.xlu0 %v12772_v13 }
  0xf2   : > { %v519_v19 = vpop.f32.mrb[4].mxu0  ;;  %v12791_v57 = vpop.f32.mrb[4].mxu1 }
  0xf3   : > { %v12778_v25 = vadd.f32 %v519_v19, %v12761_v61  ;;  %v521_v30 = vpop.f32.mrb[5].mxu0  ;;  %v641_v60 = vpop.f32.mrb[5].mxu1 }
  0xf4   : > { %v522_v37 = vadd.f32 %v521_v30, %v12763_v62  ;;  %v523_v40 = vpop.f32.mrb[6].mxu0  ;;  %v642_v3 = vadd.f32 %v641_v60, %v12763_v62  ;;  %v12802_v4 = vpop.f32.mrb[6].mxu1 }
  0xf5   : > { %v525_v46 = vpop.f32.mrb[7].mxu0  ;;  %672 = vmax.xlane.f32.xlu1 %v12778_v25  ;;  %v12788_v56 = vadd.f32 %v523_v40, %v12761_v61  ;;  %v645_v19 = vpop.f32.mrb[7].mxu1 }
  0xf6   : > { %1151 = vst [vmem:[#allocation3 + $0x10] sm:$0xff] %v522_v37  ;;  %v526_v52 = vadd.f32 %v525_v46, %v12763_v62  ;;  %1175 = vst [vmem:[#allocation3 + $0xd0] sm:$0xff] %v642_v3  ;;  %v646_v31 = vadd.f32 %v645_v19, %v12763_v62  ;;  %v12815_v37 = vld [vmem:[%s15353_s7 + $0x10] sm:$0xff]   ;;  %v12849_v19 = vld [vmem:[%s15353_s7 + $0x20] sm:$0xff]  }
  0xf7   : > { %11083 = vmatprep.subr.bf16.mxu1 %v12815_v37  ;;  %v12883_v46 = vld [vmem:[%s15353_s7 + $0x30] sm:$0xff]  }
  0xf8   : > { %1152 = vst [vmem:[#allocation3 + $0x18] sm:$0xff] %v526_v52  ;;  %1176 = vst [vmem:[#allocation3 + $0xd8] sm:$0xff] %v646_v31  ;;  %11084 = vmatpush3.bf16.msra.mxu1 %v12815_v37  ;;  %v12828_v52 = vld [vmem:[%s15353_s7 + $0x18] sm:$0xff]  }
  0xf9   : > { %674 = vmax.xlane.f32.xlu1 %v12788_v56  ;;  %11085 = vmatprep.subr.bf16.mxu1 %v12828_v52 }
  0xfa   : > { %v529_v59 = vpop.f32.mrb[8].mxu0  ;;  %v12822_v49 = vpop.f32.mrb[8].mxu1 }
  0xfb   : > { %v12799_v63 = vadd.f32 %v529_v59, %v12761_v61  ;;  %v531_v1 = vpop.f32.mrb[9].mxu0  ;;  %v651_v60 = vpop.f32.mrb[9].mxu1 }
  0xfc   : > { %v532_v7 = vadd.f32 %v531_v1, %v12763_v62  ;;  %v533_v11 = vpop.f32.mrb[10].mxu0  ;;  %11086 = vmatpush3.bf16.msra.mxu1 %v12828_v52 }
  0xfd   : > { %v12807_v24 = vadd.f32 %v533_v11, %v12761_v61  ;;  %v535_v30 = vpop.f32.mrb[11].mxu0  ;;  %676 = vmax.xlane.f32.xlu0 %v12799_v63  ;;  %v12834_v11 = vpop.f32.mrb[10].mxu1  ;;  %11087 = vmatprep.subr.bf16.mxu1 %v12849_v19 }
  0xfe   : > { %1153 = vst [vmem:[#allocation3 + $0x20] sm:$0xff] %v532_v7  ;;  %v536_v40 = vadd.f32 %v535_v30, %v12763_v62  ;;  %v652_v7 = vadd.f32 %v651_v60, %v12763_v62  ;;  %v655_v2 = vpop.f32.mrb[11].mxu1 }
  0xff   : > { %678 = vmax.xlane.f32.xlu1 %v12807_v24  ;;  %v656_v60 = vadd.f32 %v655_v2, %v12763_v62 }
 0x100   : > { %1154 = vst [vmem:[#allocation3 + $0x28] sm:$0xff] %v536_v40  ;;  %1177 = vst [vmem:[#allocation3 + $0xe0] sm:$0xff] %v652_v7  ;;  %11088 = vmatpush3.bf16.msra.mxu1 %v12849_v19  ;;  %v12862_v7 = vld [vmem:[%s15353_s7 + $0x28] sm:$0xff]  }
 0x101   : > { %1178 = vst [vmem:[#allocation3 + $0xe8] sm:$0xff] %v656_v60  ;;  %11089 = vmatprep.subr.bf16.mxu1 %v12862_v7 }
 0x102   : > { %v539_v59 = vpop.f32.mrb[12].mxu0  ;;  %v12856_v2 = vpop.f32.mrb[12].mxu1 }
 0x103   : > { %v12831_v1 = vadd.f32 %v539_v59, %v12761_v61  ;;  %v541_v3 = vpop.f32.mrb[13].mxu0 }
 0x104   : > { %v542_v31 = vadd.f32 %v541_v3, %v12763_v62  ;;  %v543_v40 = vpop.f32.mrb[14].mxu0  ;;  %11090 = vmatpush3.bf16.msra.mxu1 %v12862_v7 }
 0x105   : > { %v12841_v43 = vadd.f32 %v543_v40, %v12761_v61  ;;  %v545_v59 = vpop.f32.mrb[15].mxu0  ;;  %680 = vmax.xlane.f32.xlu0 %v12831_v1  ;;  %11091 = vmatprep.subr.bf16.mxu1 %v12883_v46 }
 0x106   : > { %1155 = vst [vmem:[#allocation3 + $0x30] sm:$0xff] %v542_v31  ;;  %v546_v3 = vadd.f32 %v545_v59, %v12763_v62  ;;  %v661_v59 = vpop.f32.mrb[13].mxu1 }
 0x107   : > { %682 = vmax.xlane.f32.xlu1 %v12841_v43  ;;  %v662_v30 = vadd.f32 %v661_v59, %v12763_v62 }
 0x108   : > { %1156 = vst [vmem:[#allocation3 + $0x38] sm:$0xff] %v546_v3  ;;  %v12868_v3 = vpop.f32.mrb[14].mxu1  ;;  %11092 = vmatpush3.bf16.msra.mxu1 %v12883_v46 }
 0x109   : > { %v665_v21 = vpop.f32.mrb[15].mxu1  ;;  %1179 = vst [vmem:[#allocation3 + $0xf0] sm:$0xff] %v662_v30 }
 0x10a   : > { %v549_v31 = vpop.f32.mrb[16].mxu0  ;;  %v666_v59 = vadd.f32 %v665_v21, %v12763_v62 }
 0x10b   : > { %v12865_v60 = vadd.f32 %v549_v31, %v12761_v61  ;;  %v551_v40 = vpop.f32.mrb[17].mxu0 }
 0x10c   : > { %v552_v55 = vadd.f32 %v551_v40, %v12763_v62  ;;  %v553_v27 = vpop.f32.mrb[18].mxu0  ;;  %1180 = vst [vmem:[#allocation3 + $0xf8] sm:$0xff] %v666_v59 }
 0x10d   : > { %v12875_v26 = vadd.f32 %v553_v27, %v12761_v61  ;;  %v555_v31 = vpop.f32.mrb[19].mxu0  ;;  %684 = vmax.xlane.f32.xlu0 %v12865_v60 }
 0x10e   : > { %1157 = vst [vmem:[#allocation3 + $0x40] sm:$0xff] %v552_v55  ;;  %v556_v40 = vadd.f32 %v555_v31, %v12763_v62  ;;  %v12896_v55 = vld [vmem:[%s15353_s7 + $0x38] sm:$0xff]  }
 0x10f   : > { %686 = vmax.xlane.f32.xlu1 %v12875_v26  ;;  %11093 = vmatprep.subr.bf16.mxu1 %v12896_v55 }
 0x110   : > { %1158 = vst [vmem:[#allocation3 + $0x48] sm:$0xff] %v556_v40  ;;  %11094 = vmatpush3.bf16.msra.mxu1 %v12896_v55 }
 0x112   : > { %v559_v31 = vpop.f32.mrb[20].mxu0 }
 0x113   : > { %v12899_v59 = vadd.f32 %v559_v31, %v12761_v61  ;;  %v561_v27 = vpop.f32.mrb[21].mxu0 }
 0x114   : > { %v562_v40 = vadd.f32 %v561_v27, %v12763_v62  ;;  %v563_v54 = vpop.f32.mrb[22].mxu0 }
 0x115   : > { %v12904_v21 = vadd.f32 %v563_v54, %v12761_v61  ;;  %v565_v30 = vpop.f32.mrb[23].mxu0  ;;  %688 = vmax.xlane.f32.xlu0 %v12899_v59 }
 0x116   : > { %1159 = vst [vmem:[#allocation3 + $0x50] sm:$0xff] %v562_v40  ;;  %v566_v20 = vadd.f32 %v565_v30, %v12763_v62 }
 0x117   : > { %690 = vmax.xlane.f32.xlu1 %v12904_v21 }
 0x118   : > { %1160 = vst [vmem:[#allocation3 + $0x58] sm:$0xff] %v566_v20 }
 0x11a   : > { %v569_v15 = vpop.f32.mrb[24].mxu0 }
 0x11b   : > { %v12913_v12 = vadd.f32 %v569_v15, %v12761_v61  ;;  %v571_v54 = vpop.f32.mrb[25].mxu0 }
 0x11c   : > { %v572_v14 = vadd.f32 %v571_v54, %v12763_v62  ;;  %v573_v10 = vpop.f32.mrb[26].mxu0 }
 0x11d   : > { %v12917_v51 = vadd.f32 %v573_v10, %v12761_v61  ;;  %v575_v40 = vpop.f32.mrb[27].mxu0  ;;  %692 = vmax.xlane.f32.xlu0 %v12913_v12 }
 0x11e   : > { %1161 = vst [vmem:[#allocation3 + $0x60] sm:$0xff] %v572_v14  ;;  %v576_v30 = vadd.f32 %v575_v40, %v12763_v62 }
 0x11f   : > { %694 = vmax.xlane.f32.xlu1 %v12917_v51 }
 0x120   : > { %1162 = vst [vmem:[#allocation3 + $0x68] sm:$0xff] %v576_v30 }
 0x122   : > { %v579_v20 = vpop.f32.mrb[28].mxu0 }
 0x123   : > { %v12923_v15 = vadd.f32 %v579_v20, %v12761_v61  ;;  %v581_v31 = vpop.f32.mrb[29].mxu0 }
 0x124   : > { %v582_v54 = vadd.f32 %v581_v31, %v12763_v62  ;;  %v583_v27 = vpop.f32.mrb[30].mxu0 }
 0x125   : > { %v12927_v10 = vadd.f32 %v583_v27, %v12761_v61  ;;  %v585_v48 = vpop.f32.mrb[31].mxu0  ;;  %696 = vmax.xlane.f32.xlu0 %v12923_v15 }
 0x126   : > { %1163 = vst [vmem:[#allocation3 + $0x70] sm:$0xff] %v582_v54  ;;  %v586_v14 = vadd.f32 %v585_v48, %v12763_v62 }
 0x127   : > { %698 = vmax.xlane.f32.xlu1 %v12927_v10 }
 0x128   : > { %1164 = vst [vmem:[#allocation3 + $0x78] sm:$0xff] %v586_v14 }
 0x12a   : > { %v589_v40 = vpop.f32.mrb[32].mxu0 }
 0x12b   : > { %v12933_v30 = vadd.f32 %v589_v40, %v12761_v61  ;;  %v591_v20 = vpop.f32.mrb[33].mxu0 }
 0x12c   : > { %v592_v31 = vadd.f32 %v591_v20, %v12763_v62  ;;  %v593_v50 = vpop.f32.mrb[34].mxu0 }
 0x12d   : > { %v12937_v27 = vadd.f32 %v593_v50, %v12761_v61  ;;  %v595_v47 = vpop.f32.mrb[35].mxu0  ;;  %700 = vmax.xlane.f32.xlu0 %v12933_v30 }
 0x12e   : > { %1165 = vst [vmem:[#allocation3 + $0x80] sm:$0xff] %v592_v31  ;;  %v596_v48 = vadd.f32 %v595_v47, %v12763_v62 }
 0x12f   : > { %702 = vmax.xlane.f32.xlu1 %v12937_v27 }
 0x130   : > { %1166 = vst [vmem:[#allocation3 + $0x88] sm:$0xff] %v596_v48 }
 0x132   : > { %v599_v54 = vpop.f32.mrb[36].mxu0 }
 0x133   : > { %v12943_v14 = vadd.f32 %v599_v54, %v12761_v61  ;;  %v601_v40 = vpop.f32.mrb[37].mxu0 }
 0x134   : > { %v602_v20 = vadd.f32 %v601_v40, %v12763_v62  ;;  %v603_v45 = vpop.f32.mrb[38].mxu0 }
 0x135   : > { %v12947_v50 = vadd.f32 %v603_v45, %v12761_v61  ;;  %v605_v42 = vpop.f32.mrb[39].mxu0  ;;  %704 = vmax.xlane.f32.xlu0 %v12943_v14 }
 0x136   : > { %1167 = vst [vmem:[#allocation3 + $0x90] sm:$0xff] %v602_v20  ;;  %v606_v47 = vadd.f32 %v605_v42, %v12763_v62 }
 0x137   : > { %706 = vmax.xlane.f32.xlu1 %v12947_v50 }
 0x138   : > { %1168 = vst [vmem:[#allocation3 + $0x98] sm:$0xff] %v606_v47 }
 0x13a   : > { %v609_v31 = vpop.f32.mrb[40].mxu0 }
 0x13b   : > { %v12953_v48 = vadd.f32 %v609_v31, %v12761_v61  ;;  %v611_v54 = vpop.f32.mrb[41].mxu0 }
 0x13c   : > { %v612_v40 = vadd.f32 %v611_v54, %v12763_v62  ;;  %v613_v44 = vpop.f32.mrb[42].mxu0 }
 0x13d   : > { %v12957_v45 = vadd.f32 %v613_v44, %v12761_v61  ;;  %v615_v41 = vpop.f32.mrb[43].mxu0  ;;  %708 = vmax.xlane.f32.xlu0 %v12953_v48 }
 0x13e   : > { %1169 = vst [vmem:[#allocation3 + $0xa0] sm:$0xff] %v612_v40  ;;  %v616_v42 = vadd.f32 %v615_v41, %v12763_v62  ;;  %v12973_v40 = vadd.f32 %v12775_v18, %v12761_v61  ;;  %v12998_v18 = vadd.f32 %v12834_v11, %v12761_v61 }
 0x13f   : > { %710 = vmax.xlane.f32.xlu1 %v12957_v45 }
 0x140   : > { %1170 = vst [vmem:[#allocation3 + $0xa8] sm:$0xff] %v616_v42  ;;  %v12978_v42 = vadd.f32 %v12781_v34, %v12761_v61  ;;  %v13002_v34 = vadd.f32 %v12856_v2, %v12761_v61 }
 0x142   : > { %v619_v20 = vpop.f32.mrb[44].mxu0 }
 0x143   : > { %v12963_v47 = vadd.f32 %v619_v20, %v12761_v61  ;;  %v621_v31 = vpop.f32.mrb[45].mxu0 }
 0x144   : > { %v622_v54 = vadd.f32 %v621_v31, %v12763_v62  ;;  %v623_v39 = vpop.f32.mrb[46].mxu0 }
 0x145   : > { %v12967_v44 = vadd.f32 %v623_v39, %v12761_v61  ;;  %v625_v36 = vpop.f32.mrb[47].mxu0  ;;  %712 = vmax.xlane.f32.xlu0 %v12963_v47  ;;  %v12983_v39 = vadd.f32 %v12791_v57, %v12761_v61  ;;  %v13008_v57 = vadd.f32 %v12868_v3, %v12761_v61 }
 0x146   : > { %1171 = vst [vmem:[#allocation3 + $0xb0] sm:$0xff] %v622_v54  ;;  %v626_v41 = vadd.f32 %v625_v36, %v12763_v62  ;;  %v12988_v36 = vadd.f32 %v12802_v4, %v12761_v61  ;;  %v12993_v62 = vadd.f32 %v12822_v49, %v12761_v61 }
 0x147   : > { %714 = vmax.xlane.f32.xlu1 %v12967_v44 }
 0x148   : > { %1172 = vst [vmem:[#allocation3 + $0xb8] sm:$0xff] %v626_v41 }
 0x149   : > { %716 = vmax.xlane.f32.xlu0 %v12973_v40 }
 0x14b   : > { %718 = vmax.xlane.f32.xlu1 %v12978_v42 }
 0x14d   : > { %720 = vmax.xlane.f32.xlu0 %v12983_v39 }
 0x14f   : > { %722 = vmax.xlane.f32.xlu1 %v12988_v36 }
 0x151   : > { %724 = vmax.xlane.f32.xlu0 %v12993_v62 }
 0x153   : > { %726 = vmax.xlane.f32.xlu1 %v12998_v18 }
 0x155   : > { %728 = vmax.xlane.f32.xlu0 %v13002_v34 }
 0x157   : > { %730 = vmax.xlane.f32.xlu1 %v13008_v57 }
 0x17a   : > { %v669_v4 = vpop.xlane.xlu0 %668 }
 0x17b   : > { %v732_v49 = vsub.f32 %v12766_v0, %v669_v4 }
 0x17d   : > { %v764_v11 = vmul.f32 1.442695, %v732_v49 }
 0x17e   : > { %v671_v20 = vpop.xlane.xlu0 %670 }
 0x17f   : > { %v733_v2 = vsub.f32 %v12772_v13, %v671_v20  ;;  %11961 = vpow2.f32 %v764_v11 }
 0x181   : > { %v766_v31 = vmul.f32 1.442695, %v733_v2 }
 0x182   : > { %v673_v54 = vpop.xlane.xlu1 %672 }
 0x183   : > { %11963 = vpow2.f32 %v766_v31  ;;  %v734_v41 = vsub.f32 %v12778_v25, %v673_v54 }
 0x185   : > { %v768_v38 = vmul.f32 1.442695, %v734_v41 }
 0x186   : > { %v675_v61 = vpop.xlane.xlu1 %674 }
 0x187   : > { %v735_v3 = vsub.f32 %v12788_v56, %v675_v61  ;;  %11965 = vpow2.f32 %v768_v38 }
 0x189   : > { %v770_v35 = vmul.f32 1.442695, %v735_v3  ;;  %v13017_v4 = vpop.eup %11961 }
 0x18a   : > { %v677_v33 = vpop.xlane.xlu0 %676 }
 0x18b   : > { %11967 = vpow2.f32 %v770_v35  ;;  %v736_v0 = vsub.f32 %v12799_v63, %v677_v33 }
 0x18c   : > { %v679_v49 = vpop.xlane.xlu1 %678 }
 0x18d   : > { %v13019_v13 = vpop.eup %11963  ;;  %v772_v11 = vmul.f32 1.442695, %v736_v0  ;;  %v737_v20 = vsub.f32 %v12807_v24, %v679_v49 }
 0x18e   : > { %v828_v25 = vpack.c.bf16 %v13019_v13, %v13017_v4 }
 0x18f   : > { %v774_v2 = vmul.f32 1.442695, %v737_v20  ;;  %11969 = vpow2.f32 %v772_v11 }
 0x190   : > { %11095 = vmatprep.mubr.bf16.mxu1 %v828_v25 }
 0x191   : > { %11971 = vpow2.f32 %v774_v2  ;;  %v13025_v56 = vpop.eup %11965 }
 0x192   : > { %v681_v38 = vpop.xlane.xlu0 %680 }
 0x193   : > { %v738_v35 = vsub.f32 %v12831_v1, %v681_v38 }
 0x194   : > { %v683_v33 = vpop.xlane.xlu1 %682 }
 0x195   : > { %v13027_v63 = vpop.eup %11967  ;;  %v776_v31 = vmul.f32 1.442695, %v738_v35  ;;  %v739_v54 = vsub.f32 %v12841_v43, %v683_v33 }
 0x196   : > { %v829_v24 = vpack.c.bf16 %v13027_v63, %v13025_v56 }
 0x197   : > { %v778_v41 = vmul.f32 1.442695, %v739_v54  ;;  %11973 = vpow2.f32 %v776_v31 }
 0x198   : > { %11096 = vmatmul.mubr.bf16.vlgmr.msra.gmra.mrb[16].mxu1 %v829_v24 }
 0x199   : > { %11975 = vpow2.f32 %v778_v41  ;;  %v13032_v61 = vpop.eup %11969 }
 0x19a   : > { %v685_v3 = vpop.xlane.xlu0 %684 }
 0x19b   : > { %v13034_v0 = vpop.eup %11971  ;;  %v740_v1 = vsub.f32 %v12865_v60, %v685_v3 }
 0x19c   : > { %v687_v49 = vpop.xlane.xlu1 %686  ;;  %v830_v11 = vpack.c.bf16 %v13034_v0, %v13032_v61 }
 0x19d   : > { %v780_v20 = vmul.f32 1.442695, %v740_v1  ;;  %v741_v43 = vsub.f32 %v12875_v26, %v687_v49 }
 0x19e   : > { %11099 = vmatprep.mubr.bf16.mxu1 %v830_v11 }
 0x19f   : > { %v782_v25 = vmul.f32 1.442695, %v741_v43  ;;  %11977 = vpow2.f32 %v780_v20 }
 0x1a1   : > { %11979 = vpow2.f32 %v782_v25  ;;  %v13040_v2 = vpop.eup %11973 }
 0x1a2   : > { %v689_v38 = vpop.xlane.xlu0 %688 }
 0x1a3   : > { %v13042_v35 = vpop.eup %11975  ;;  %v742_v33 = vsub.f32 %v12899_v59, %v689_v38 }
 0x1a4   : > { %v691_v31 = vpop.xlane.xlu1 %690  ;;  %v831_v60 = vpack.c.bf16 %v13042_v35, %v13040_v2 }
 0x1a5   : > { %v784_v54 = vmul.f32 1.442695, %v742_v33  ;;  %v743_v24 = vsub.f32 %v12904_v21, %v691_v31 }
 0x1a6   : > { %11100 = vmatmul.mubr.bf16.gmra.mrb[20].mxu1 %v831_v60 }
 0x1a7   : > { %v786_v26 = vmul.f32 1.442695, %v743_v24  ;;  %11981 = vpow2.f32 %v784_v54 }
 0x1a9   : > { %11983 = vpow2.f32 %v786_v26  ;;  %v13048_v41 = vpop.eup %11977 }
 0x1aa   : > { %v693_v3 = vpop.xlane.xlu0 %692 }
 0x1ab   : > { %v13050_v1 = vpop.eup %11979  ;;  %v744_v49 = vsub.f32 %v12913_v12, %v693_v3 }
 0x1ac   : > { %v695_v11 = vpop.xlane.xlu1 %694  ;;  %v832_v59 = vpack.c.bf16 %v13050_v1, %v13048_v41 }
 0x1ad   : > { %v788_v20 = vmul.f32 1.442695, %v744_v49  ;;  %v745_v43 = vsub.f32 %v12917_v51, %v695_v11 }
 0x1ae   : > { %11103 = vmatprep.mubr.bf16.mxu1 %v832_v59 }
 0x1af   : > { %v790_v21 = vmul.f32 1.442695, %v745_v43  ;;  %11985 = vpow2.f32 %v788_v20 }
 0x1b1   : > { %11987 = vpow2.f32 %v790_v21  ;;  %v13056_v25 = vpop.eup %11981 }
 0x1b2   : > { %v697_v38 = vpop.xlane.xlu0 %696 }
 0x1b3   : > { %v13058_v33 = vpop.eup %11983  ;;  %v746_v31 = vsub.f32 %v12923_v15, %v697_v38 }
 0x1b4   : > { %v699_v60 = vpop.xlane.xlu1 %698  ;;  %v833_v12 = vpack.c.bf16 %v13058_v33, %v13056_v25 }
 0x1b5   : > { %v792_v54 = vmul.f32 1.442695, %v746_v31  ;;  %v747_v24 = vsub.f32 %v12927_v10, %v699_v60 }
 0x1b6   : > { %11104 = vmatmul.mubr.bf16.gmra.mrb[24].mxu1 %v833_v12 }
 0x1b7   : > { %v794_v51 = vmul.f32 1.442695, %v747_v24  ;;  %11989 = vpow2.f32 %v792_v54 }
 0x1b9   : > { %11991 = vpow2.f32 %v794_v51  ;;  %v13064_v26 = vpop.eup %11985 }
 0x1ba   : > { %v701_v3 = vpop.xlane.xlu0 %700 }
 0x1bb   : > { %v13066_v49 = vpop.eup %11987  ;;  %v748_v11 = vsub.f32 %v12933_v30, %v701_v3 }
 0x1bc   : > { %v703_v59 = vpop.xlane.xlu1 %702  ;;  %v834_v15 = vpack.c.bf16 %v13066_v49, %v13064_v26 }
 0x1bd   : > { %v796_v20 = vmul.f32 1.442695, %v748_v11  ;;  %v749_v43 = vsub.f32 %v12937_v27, %v703_v59 }
 0x1be   : > { %11107 = vmatprep.mubr.bf16.mxu1 %v834_v15 }
 0x1bf   : > { %v798_v10 = vmul.f32 1.442695, %v749_v43  ;;  %11993 = vpow2.f32 %v796_v20 }
 0x1c1   : > { %11995 = vpow2.f32 %v798_v10  ;;  %v13072_v21 = vpop.eup %11989 }
 0x1c2   : > { %v705_v38 = vpop.xlane.xlu0 %704 }
 0x1c3   : > { %v13074_v31 = vpop.eup %11991  ;;  %v750_v60 = vsub.f32 %v12943_v14, %v705_v38 }
 0x1c4   : > { %v707_v12 = vpop.xlane.xlu1 %706  ;;  %v835_v30 = vpack.c.bf16 %v13074_v31, %v13072_v21 }
 0x1c5   : > { %v800_v54 = vmul.f32 1.442695, %v750_v60  ;;  %v751_v24 = vsub.f32 %v12947_v50, %v707_v12 }
 0x1c6   : > { %11108 = vmatmul.mubr.bf16.gmra.mrb[28].mxu1 %v835_v30 }
 0x1c7   : > { %v802_v27 = vmul.f32 1.442695, %v751_v24  ;;  %11997 = vpow2.f32 %v800_v54 }
 0x1c9   : > { %11999 = vpow2.f32 %v802_v27  ;;  %v13080_v51 = vpop.eup %11993 }
 0x1ca   : > { %v709_v3 = vpop.xlane.xlu0 %708 }
 0x1cb   : > { %v13082_v11 = vpop.eup %11995  ;;  %v752_v59 = vsub.f32 %v12953_v48, %v709_v3 }
 0x1cc   : > { %v711_v15 = vpop.xlane.xlu1 %710  ;;  %v836_v14 = vpack.c.bf16 %v13082_v11, %v13080_v51 }
 0x1cd   : > { %v804_v20 = vmul.f32 1.442695, %v752_v59  ;;  %v753_v43 = vsub.f32 %v12957_v45, %v711_v15 }
 0x1ce   : > { %11111 = vmatprep.mubr.bf16.mxu1 %v836_v14 }
 0x1cf   : > { %v806_v50 = vmul.f32 1.442695, %v753_v43  ;;  %12001 = vpow2.f32 %v804_v20 }
 0x1d1   : > { %12003 = vpow2.f32 %v806_v50  ;;  %v13088_v10 = vpop.eup %11997 }
 0x1d2   : > { %v713_v38 = vpop.xlane.xlu0 %712 }
 0x1d3   : > { %v13090_v60 = vpop.eup %11999  ;;  %v754_v12 = vsub.f32 %v12963_v47, %v713_v38 }
 0x1d4   : > { %v715_v30 = vpop.xlane.xlu1 %714  ;;  %v837_v48 = vpack.c.bf16 %v13090_v60, %v13088_v10 }
 0x1d5   : > { %v808_v54 = vmul.f32 1.442695, %v754_v12  ;;  %v755_v24 = vsub.f32 %v12967_v44, %v715_v30 }
 0x1d6   : > { %11112 = vmatmul.mubr.bf16.gmra.mrb[32].mxu1 %v837_v48  ;;  %v717_v45 = vpop.xlane.xlu0 %716 }
 0x1d7   : > { %v810_v27 = vmul.f32 1.442695, %v755_v24  ;;  %v756_v3 = vsub.f32 %v12973_v40, %v717_v45  ;;  %12005 = vpow2.f32 %v808_v54 }
 0x1d8   : > { %v719_v59 = vpop.xlane.xlu1 %718 }
 0x1d9   : > { %12007 = vpow2.f32 %v810_v27  ;;  %v812_v15 = vmul.f32 1.442695, %v756_v3  ;;  %v757_v14 = vsub.f32 %v12978_v42, %v719_v59  ;;  %v13098_v20 = vpop.eup %12001 }
 0x1da   : > { %v721_v47 = vpop.xlane.xlu0 %720 }
 0x1db   : > { %v13100_v43 = vpop.eup %12003  ;;  %v814_v50 = vmul.f32 1.442695, %v757_v14  ;;  %v758_v38 = vsub.f32 %v12983_v39, %v721_v47  ;;  %12009 = vpow2.f32 %v812_v15 }
 0x1dc   : > { %v723_v44 = vpop.xlane.xlu1 %722  ;;  %v838_v12 = vpack.c.bf16 %v13100_v43, %v13098_v20 }
 0x1dd   : > { %12011 = vpow2.f32 %v814_v50  ;;  %v816_v40 = vmul.f32 1.442695, %v758_v38  ;;  %v759_v30 = vsub.f32 %v12988_v36, %v723_v44 }
 0x1de   : > { %11115 = vmatprep.mubr.bf16.mxu1 %v838_v12  ;;  %v725_v48 = vpop.xlane.xlu0 %724 }
 0x1df   : > { %v818_v42 = vmul.f32 1.442695, %v759_v30  ;;  %v760_v54 = vsub.f32 %v12993_v62, %v725_v48  ;;  %12013 = vpow2.f32 %v816_v40 }
 0x1e0   : > { %v727_v24 = vpop.xlane.xlu1 %726 }
 0x1e1   : > { %12015 = vpow2.f32 %v818_v42  ;;  %v820_v45 = vmul.f32 1.442695, %v760_v54  ;;  %v761_v39 = vsub.f32 %v12998_v18, %v727_v24  ;;  %v13108_v27 = vpop.eup %12005 }
 0x1e2   : > { %v729_v3 = vpop.xlane.xlu0 %728 }
 0x1e3   : > { %v13110_v59 = vpop.eup %12007  ;;  %v822_v15 = vmul.f32 1.442695, %v761_v39  ;;  %v762_v14 = vsub.f32 %v13002_v34, %v729_v3  ;;  %12017 = vpow2.f32 %v820_v45 }
 0x1e4   : > { %v731_v36 = vpop.xlane.xlu1 %730  ;;  %v839_v47 = vpack.c.bf16 %v13110_v59, %v13108_v27 }
 0x1e5   : > { %12019 = vpow2.f32 %v822_v15  ;;  %v824_v62 = vmul.f32 1.442695, %v762_v14  ;;  %v763_v50 = vsub.f32 %v13008_v57, %v731_v36  ;;  %v13116_v38 = vpop.eup %12009 }
 0x1e6   : > { %11116 = vmatmul.mubr.bf16.gmra.mrb[36].mxu1 %v839_v47 }
 0x1e7   : > { %v13118_v18 = vpop.eup %12011  ;;  %v826_v44 = vmul.f32 1.442695, %v763_v50  ;;  %12021 = vpow2.f32 %v824_v62 }
 0x1e8   : > { %v840_v12 = vpack.c.bf16 %v13118_v18, %v13116_v38 }
 0x1e9   : > { %12023 = vpow2.f32 %v826_v44  ;;  %v13122_v34 = vpop.eup %12013 }
 0x1ea   : > { %11119 = vmatprep.mubr.bf16.mxu1 %v840_v12 }
 0x1eb   : > { %v13124_v40 = vpop.eup %12015 }
 0x1ec   : > { %v841_v30 = vpack.c.bf16 %v13124_v40, %v13122_v34 }
 0x1ed   : > { %v13128_v57 = vpop.eup %12017 }
 0x1ee   : > { %11120 = vmatmul.mubr.bf16.gmra.mrb[40].mxu1 %v841_v30 }
 0x1ef   : > { %v13130_v48 = vpop.eup %12019 }
 0x1f0   : > { %v842_v42 = vpack.c.bf16 %v13130_v48, %v13128_v57 }
 0x1f1   : > { %v13134_v54 = vpop.eup %12021 }
 0x1f2   : > { %11123 = vmatprep.mubr.bf16.mxu1 %v842_v42 }
 0x1f3   : > { %v13136_v24 = vpop.eup %12023 }
 0x1f4   : > { %v843_v45 = vpack.c.bf16 %v13136_v24, %v13134_v54 }
 0x1f6   : > { %11124 = vmatmul.mubr.bf16.gmra.mrb[44].mxu1 %v843_v45 }
 0x26b   : > { %v11097_v39 = vpop.f32.mrb[16].mxu1 }
 0x26c   : > { %v935_v3 = vadd.f32 1e-30, %v11097_v39  ;;  %v926_v15 = vpop.f32.mrb[17].mxu1 }
 0x26d   : > { %v927_v14 = vadd.f32 1e-30, %v926_v15  ;;  %v11098_v36 = vpop.f32.mrb[18].mxu1 }
 0x26e   : > { %12025 = vrcp.f32 %v935_v3  ;;  %v938_v47 = vadd.f32 1e-30, %v11098_v36  ;;  %v929_v62 = vpop.f32.mrb[19].mxu1 }
 0x26f   : > { %12027 = vrcp.f32 %v927_v14  ;;  %v930_v50 = vadd.f32 1e-30, %v929_v62 }
 0x270   : > { %12029 = vrcp.f32 %v938_v47 }
 0x271   : > { %12031 = vrcp.f32 %v930_v50 }
 0x278   : > { %v12026_v44 = vpop.eup %12025 }
 0x279   : > { %v12028_v12 = vpop.eup %12027  ;;  %v1087_v30 = vmul.f32 %v12026_v44, %v13025_v56  ;;  %v11101_v42 = vpop.f32.mrb[20].mxu1 }
 0x27a   : > { %v12030_v29 = vpop.eup %12029  ;;  %v1085_v45 = vmul.f32 %v12028_v12, %v13017_v4  ;;  %v951_v32 = vadd.f32 1e-30, %v11101_v42  ;;  %v942_v39 = vpop.f32.mrb[21].mxu1 }
 0x27b   : > { %v12032_v28 = vpop.eup %12031  ;;  %1119 = vst [vmem:[#allocation2 + $0x10] sm:$0xff] %v1087_v30  ;;  %v1088_v3 = vmul.f32 %v12030_v29, %v13027_v63  ;;  %v943_v15 = vadd.f32 1e-30, %v942_v39  ;;  %v11102_v36 = vpop.f32.mrb[22].mxu1 }
 0x27c   : > { %1117 = vst [vmem:[#allocation2] sm:$0xff] %v1085_v45  ;;  %v1086_v14 = vmul.f32 %v12032_v28, %v13019_v13  ;;  %12033 = vrcp.f32 %v951_v32  ;;  %v954_v47 = vadd.f32 1e-30, %v11102_v36  ;;  %v945_v62 = vpop.f32.mrb[23].mxu1 }
 0x27d   : > { %1120 = vst [vmem:[#allocation2 + $0x18] sm:$0xff] %v1088_v3  ;;  %12035 = vrcp.f32 %v943_v15  ;;  %v946_v56 = vadd.f32 1e-30, %v945_v62 }
 0x27e   : > { %1118 = vst [vmem:[#allocation2 + $0x8] sm:$0xff] %v1086_v14  ;;  %12037 = vrcp.f32 %v954_v47 }
 0x27f   : > { %12039 = vrcp.f32 %v946_v56 }
 0x286   : > { %v12034_v4 = vpop.eup %12033 }
 0x287   : > { %v12036_v50 = vpop.eup %12035  ;;  %v1091_v44 = vmul.f32 %v12034_v4, %v13040_v2 }
 0x288   : > { %v12038_v12 = vpop.eup %12037  ;;  %v1089_v29 = vmul.f32 %v12036_v50, %v13032_v61 }
 0x289   : > { %v12040_v63 = vpop.eup %12039  ;;  %1123 = vst [vmem:[#allocation2 + $0x30] sm:$0xff] %v1091_v44  ;;  %v1092_v28 = vmul.f32 %v12038_v12, %v13042_v35  ;;  %v11105_v32 = vpop.f32.mrb[24].mxu1 }
 0x28a   : > { %1121 = vst [vmem:[#allocation2 + $0x20] sm:$0xff] %v1089_v29  ;;  %v1090_v13 = vmul.f32 %v12040_v63, %v13034_v0  ;;  %v967_v30 = vadd.f32 1e-30, %v11105_v32  ;;  %v958_v42 = vpop.f32.mrb[25].mxu1 }
 0x28b   : > { %1124 = vst [vmem:[#allocation2 + $0x38] sm:$0xff] %v1092_v28  ;;  %v959_v45 = vadd.f32 1e-30, %v958_v42  ;;  %v11106_v39 = vpop.f32.mrb[26].mxu1 }
 0x28c   : > { %1122 = vst [vmem:[#allocation2 + $0x28] sm:$0xff] %v1090_v13  ;;  %12041 = vrcp.f32 %v967_v30  ;;  %v970_v3 = vadd.f32 1e-30, %v11106_v39  ;;  %v961_v2 = vpop.f32.mrb[27].mxu1 }
 0x28d   : > { %12043 = vrcp.f32 %v959_v45  ;;  %v962_v15 = vadd.f32 1e-30, %v961_v2 }
 0x28e   : > { %12045 = vrcp.f32 %v970_v3 }
 0x28f   : > { %12047 = vrcp.f32 %v962_v15 }
 0x296   : > { %v12042_v61 = vpop.eup %12041 }
 0x297   : > { %v12044_v36 = vpop.eup %12043  ;;  %v1095_v35 = vmul.f32 %v12042_v61, %v13056_v25 }
 0x298   : > { %v12046_v14 = vpop.eup %12045  ;;  %v1093_v0 = vmul.f32 %v12044_v36, %v13048_v41 }
 0x299   : > { %v12048_v47 = vpop.eup %12047  ;;  %1127 = vst [vmem:[#allocation2 + $0x50] sm:$0xff] %v1095_v35  ;;  %v1096_v62 = vmul.f32 %v12046_v14, %v13058_v33  ;;  %v11109_v56 = vpop.f32.mrb[28].mxu1 }
 0x29a   : > { %1125 = vst [vmem:[#allocation2 + $0x40] sm:$0xff] %v1093_v0  ;;  %v1094_v4 = vmul.f32 %v12048_v47, %v13050_v1  ;;  %v983_v50 = vadd.f32 1e-30, %v11109_v56  ;;  %v974_v44 = vpop.f32.mrb[29].mxu1 }
 0x29b   : > { %1128 = vst [vmem:[#allocation2 + $0x58] sm:$0xff] %v1096_v62  ;;  %v975_v12 = vadd.f32 1e-30, %v974_v44  ;;  %v11110_v29 = vpop.f32.mrb[30].mxu1 }
 0x29c   : > { %1126 = vst [vmem:[#allocation2 + $0x48] sm:$0xff] %v1094_v4  ;;  %12049 = vrcp.f32 %v983_v50  ;;  %v986_v63 = vadd.f32 1e-30, %v11110_v29  ;;  %v977_v25 = vpop.f32.mrb[31].mxu1 }
 0x29d   : > { %12051 = vrcp.f32 %v975_v12  ;;  %v978_v28 = vadd.f32 1e-30, %v977_v25 }
 0x29e   : > { %12053 = vrcp.f32 %v986_v63 }
 0x29f   : > { %12055 = vrcp.f32 %v978_v28 }
 0x2a6   : > { %v12050_v41 = vpop.eup %12049 }
 0x2a7   : > { %v12052_v32 = vpop.eup %12051  ;;  %v1099_v33 = vmul.f32 %v12050_v41, %v13072_v21 }
 0x2a8   : > { %v12054_v13 = vpop.eup %12053  ;;  %v1097_v1 = vmul.f32 %v12052_v32, %v13064_v26 }
 0x2a9   : > { %v12056_v30 = vpop.eup %12055  ;;  %1131 = vst [vmem:[#allocation2 + $0x70] sm:$0xff] %v1099_v33  ;;  %v1100_v42 = vmul.f32 %v12054_v13, %v13074_v31  ;;  %v11113_v45 = vpop.f32.mrb[32].mxu1 }
 0x2aa   : > { %1129 = vst [vmem:[#allocation2 + $0x60] sm:$0xff] %v1097_v1  ;;  %v1098_v39 = vmul.f32 %v12056_v30, %v13066_v49  ;;  %v999_v3 = vadd.f32 1e-30, %v11113_v45  ;;  %v990_v2 = vpop.f32.mrb[33].mxu1 }
 0x2ab   : > { %1132 = vst [vmem:[#allocation2 + $0x78] sm:$0xff] %v1100_v42  ;;  %v991_v15 = vadd.f32 1e-30, %v990_v2  ;;  %v11114_v61 = vpop.f32.mrb[34].mxu1 }
 0x2ac   : > { %1130 = vst [vmem:[#allocation2 + $0x68] sm:$0xff] %v1098_v39  ;;  %12057 = vrcp.f32 %v999_v3  ;;  %v1002_v36 = vadd.f32 1e-30, %v11114_v61  ;;  %v993_v21 = vpop.f32.mrb[35].mxu1 }
 0x2ad   : > { %12059 = vrcp.f32 %v991_v15  ;;  %v994_v35 = vadd.f32 1e-30, %v993_v21 }
 0x2ae   : > { %12061 = vrcp.f32 %v1002_v36 }
 0x2af   : > { %12063 = vrcp.f32 %v994_v35 }
 0x2b6   : > { %v12058_v26 = vpop.eup %12057 }
 0x2b7   : > { %v12060_v14 = vpop.eup %12059  ;;  %v1103_v31 = vmul.f32 %v12058_v26, %v13088_v10 }
 0x2b8   : > { %v12062_v0 = vpop.eup %12061  ;;  %v1101_v49 = vmul.f32 %v12060_v14, %v13080_v51 }
 0x2b9   : > { %v12064_v47 = vpop.eup %12063  ;;  %1135 = vst [vmem:[#allocation2 + $0x90] sm:$0xff] %v1103_v31  ;;  %v1104_v62 = vmul.f32 %v12062_v0, %v13090_v60  ;;  %v11117_v56 = vpop.f32.mrb[36].mxu1 }
 0x2ba   : > { %1133 = vst [vmem:[#allocation2 + $0x80] sm:$0xff] %v1101_v49  ;;  %v1102_v4 = vmul.f32 %v12064_v47, %v13082_v11  ;;  %v1015_v50 = vadd.f32 1e-30, %v11117_v56  ;;  %v1006_v44 = vpop.f32.mrb[37].mxu1 }
 0x2bb   : > { %1136 = vst [vmem:[#allocation2 + $0x98] sm:$0xff] %v1104_v62  ;;  %v1007_v12 = vadd.f32 1e-30, %v1006_v44  ;;  %v11118_v29 = vpop.f32.mrb[38].mxu1 }
 0x2bc   : > { %1134 = vst [vmem:[#allocation2 + $0x88] sm:$0xff] %v1102_v4  ;;  %12065 = vrcp.f32 %v1015_v50  ;;  %v1018_v63 = vadd.f32 1e-30, %v11118_v29  ;;  %v1009_v10 = vpop.f32.mrb[39].mxu1 }
 0x2bd   : > { %12067 = vrcp.f32 %v1007_v12  ;;  %v1010_v25 = vadd.f32 1e-30, %v1009_v10 }
 0x2be   : > { %12069 = vrcp.f32 %v1018_v63 }
 0x2bf   : > { %12071 = vrcp.f32 %v1010_v25 }
 0x2c1   : > { %v11121_v51 = vpop.f32.mrb[40].mxu1 }
 0x2c2   : > { %v1031_v28 = vadd.f32 1e-30, %v11121_v51  ;;  %v1022_v60 = vpop.f32.mrb[41].mxu1 }
 0x2c3   : > { %v1023_v41 = vadd.f32 1e-30, %v1022_v60  ;;  %v11122_v32 = vpop.f32.mrb[42].mxu1 }
 0x2c4   : > { %12073 = vrcp.f32 %v1031_v28  ;;  %v1034_v11 = vadd.f32 1e-30, %v11122_v32  ;;  %v1025_v33 = vpop.f32.mrb[43].mxu1 }
 0x2c5   : > { %12075 = vrcp.f32 %v1023_v41  ;;  %v1026_v13 = vadd.f32 1e-30, %v1025_v33 }
 0x2c6   : > { %v12066_v1 = vpop.eup %12065  ;;  %12077 = vrcp.f32 %v1034_v11 }
 0x2c7   : > { %v12068_v30 = vpop.eup %12067  ;;  %v1107_v42 = vmul.f32 %v12066_v1, %v13108_v27  ;;  %12079 = vrcp.f32 %v1026_v13 }
 0x2c8   : > { %v12070_v45 = vpop.eup %12069  ;;  %v1105_v39 = vmul.f32 %v12068_v30, %v13098_v20 }
 0x2c9   : > { %v12072_v3 = vpop.eup %12071  ;;  %1139 = vst [vmem:[#allocation2 + $0xb0] sm:$0xff] %v1107_v42  ;;  %v1108_v2 = vmul.f32 %v12070_v45, %v13110_v59  ;;  %v11125_v15 = vpop.f32.mrb[44].mxu1 }
 0x2ca   : > { %1137 = vst [vmem:[#allocation2 + $0xa0] sm:$0xff] %v1105_v39  ;;  %v1106_v61 = vmul.f32 %v12072_v3, %v13100_v43  ;;  %v1047_v36 = vadd.f32 1e-30, %v11125_v15  ;;  %v1038_v21 = vpop.f32.mrb[45].mxu1 }
 0x2cb   : > { %1140 = vst [vmem:[#allocation2 + $0xb8] sm:$0xff] %v1108_v2  ;;  %v1039_v35 = vadd.f32 1e-30, %v1038_v21  ;;  %v11126_v26 = vpop.f32.mrb[46].mxu1 }
 0x2cc   : > { %1138 = vst [vmem:[#allocation2 + $0xa8] sm:$0xff] %v1106_v61  ;;  %12081 = vrcp.f32 %v1047_v36  ;;  %v1050_v27 = vadd.f32 1e-30, %v11126_v26  ;;  %v1041_v14 = vpop.f32.mrb[47].mxu1 }
 0x2cd   : > { %12083 = vrcp.f32 %v1039_v35  ;;  %v1042_v31 = vadd.f32 1e-30, %v1041_v14 }
 0x2ce   : > { %v12074_v20 = vpop.eup %12073  ;;  %12085 = vrcp.f32 %v1050_v27 }
 0x2cf   : > { %v12076_v0 = vpop.eup %12075  ;;  %v1111_v59 = vmul.f32 %v12074_v20, %v13122_v34  ;;  %12087 = vrcp.f32 %v1042_v31 }
 0x2d0   : > { %v12078_v49 = vpop.eup %12077  ;;  %v1109_v43 = vmul.f32 %v12076_v0, %v13116_v38 }
 0x2d1   : > { %v12080_v47 = vpop.eup %12079  ;;  %1143 = vst [vmem:[#allocation2 + $0xd0] sm:$0xff] %v1111_v59  ;;  %v1112_v62 = vmul.f32 %v12078_v49, %v13124_v40 }
 0x2d2   : > { %1141 = vst [vmem:[#allocation2 + $0xc0] sm:$0xff] %v1109_v43  ;;  %v1110_v56 = vmul.f32 %v12080_v47, %v13118_v18 }
 0x2d3   : > { %1144 = vst [vmem:[#allocation2 + $0xd8] sm:$0xff] %v1112_v62 }
 0x2d4   : > { %1142 = vst [vmem:[#allocation2 + $0xc8] sm:$0xff] %v1110_v56 }
 0x2d6   : > { %v12082_v4 = vpop.eup %12081 }
 0x2d7   : > { %v12084_v50 = vpop.eup %12083  ;;  %v1115_v44 = vmul.f32 %v12082_v4, %v13134_v54 }
 0x2d8   : > { %v12086_v12 = vpop.eup %12085  ;;  %v1113_v34 = vmul.f32 %v12084_v50, %v13128_v57 }
 0x2d9   : > { %v12088_v29 = vpop.eup %12087  ;;  %1147 = vst [vmem:[#allocation2 + $0xf0] sm:$0xff] %v1115_v44  ;;  %v1116_v38 = vmul.f32 %v12086_v12, %v13136_v24 }
 0x2da   : > { %1145 = vst [vmem:[#allocation2 + $0xe0] sm:$0xff] %v1113_v34  ;;  %v1114_v63 = vmul.f32 %v12088_v29, %v13130_v48 }
 0x2db   : > { %1148 = vst [vmem:[#allocation2 + $0xf8] sm:$0xff] %v1116_v38 }
 0x2dc   : > { %1146 = vst [vmem:[#allocation2 + $0xe8] sm:$0xff] %v1114_v63 }
 0x2dd LB: >> { %s10569_s21 = sshll.u32 %s12505_s20, 3  ;;  %vm1234_vm1 = vcmask 64512   ;;  %s10570_s25 = sshll.u32 %s12505_s20, 7  ;;  %v15405_v26 = vunpack.c.h.bf16 %v12752_v53  ;;  %v15406_v31 = vunpack.c.l.bf16 %v12752_v53  ;;  %v15407_v49 = vunpack.c.h.bf16 %v12796_v58  ;;  %s12505_s20 = sphi %s13172_s20, %s1186_s20  }
 0x2de   : >> { %s1189_s23 = scalar_lea.vmem [#allocation2], %s10569_s21  ;;  %s1191_s24 = scalar_lea.vmem [#allocation3], %s10569_s21  ;;  %v15408_v62 = vunpack.c.l.bf16 %v12796_v58  ;;  %v15409_v44 = vunpack.c.h.bf16 %v12815_v37  ;;  %v15410_v29 = vunpack.c.l.bf16 %v12815_v37 }
 0x2df   : >> { %v1192_v60 = vld [vmem:[%s1191_s24] sm:$0xff]  ;;  %s1452_s26 = sshra.s32 %s10570_s25, 4  ;;  %s1186_s20 = sadd.s32 1, %s12505_s20  }
 0x2e0   : >> { %11127 = vmatprep.subr.mxu0 %v1192_v60  ;;  %11889 = vmatprep.subr.mxu1 %v1192_v60  ;;  %s10587_s28 = sshll.u32 %s1452_s26, 3  ;;  %p1183_p4 = scmp.ge.s32.totalorder %s1186_s20, 32  }
 0x2e1   : >> { %11128 = vmatpush3.msra.mxu0 %v1192_v60  ;;  %11890 = vmatpush3.msra.mxu1 %v1192_v60  ;;  %s13199_s29 = scalar_lea.vmem [#allocation4], %s10587_s28  ;;  %s13912_s16 = smov (%p1183_p4), 0  }
 0x2e3   : >> { %v1190_v18 = vld [vmem:[%s1189_s23] sm:$0xff] }
 0x2e4   : >> { %v1193_v40 = vrot.slane %v1190_v18, 4 }
 0x2e6   : >> { %v1194_v57 = vadd.f32 %v1193_v40, %v1190_v18  ;;  %v15411_v40 = vunpack.c.h.bf16 %v12828_v52 }
 0x2e8   : >> { %v1195_v54 = vrot.slane %v1194_v57, 2 }
 0x2ea   : >> { %v1196_v24 = vadd.f32 %v1195_v54, %v1194_v57 }
 0x2ec   : >> { %v1197_v10 = vrot.slane %v1196_v24, 1 }
 0x2ee   : >> { %v1198_v25 = vadd.f32 %v1197_v10, %v1196_v24  ;;  %v15412_v24 = vunpack.c.l.bf16 %v12828_v52 }
 0x2f0   : >> { %v1199_v48 = vadd.f32 1e-05, %v1198_v25 }
 0x2f2   : >> { %12089 = vrcp.f32 %v1199_v48 }
 0x2fc   : >> { %v12090_v51 = vpop.eup %12089 }
 0x2fd   : >> { %v1201_v28 = vmul.f32 %v12090_v51, %v1190_v18  ;;  %v15413_v51 = vunpack.c.h.bf16 %v12849_v19 }
 0x2ff   : >> { %1202 = vxpose.xlu0.b32.start.end [1/1] (short) %v1201_v28, 128 }
 0x37f   : >> { %v1218_v41 = vpop.trf.xlu0 }
 0x380   : >> { %11129 = vmatprep.mubr.msk.f32.mxu0 %vm1234_vm1, %v1218_v41  ;;  %v15414_v41 = vunpack.c.l.bf16 %v12849_v19 }
 0x383   : >> { %v1219_v32 = vpop.trf.xlu0 }
 0x384   : >> { %11130 = vmatmul.mubr.msk.f32.vlgmr.msra.gmra.mrb[0].mxu0 %vm1234_vm1, %v1219_v32 }
 0x387   : >> { %v1220_v11 = vpop.trf.xlu0 }
 0x388   : >> { %11132 = vmatprep.mubr.msk.f32.mxu0 %vm1234_vm1, %v1220_v11 }
 0x38b   : >> { %v1221_v33 = vpop.trf.xlu0 }
 0x38c   : >> { %11133 = vmatmul.mubr.msk.f32.gmra.mrb[2].mxu0 %vm1234_vm1, %v1221_v33 }
 0x38f   : >> { %v1222_v13 = vpop.trf.xlu0 }
 0x390   : >> { %11135 = vmatprep.mubr.msk.f32.mxu0 %vm1234_vm1, %v1222_v13  ;;  %v15415_v13 = vunpack.c.h.bf16 %v12862_v7 }
 0x393   : >> { %v1223_v1 = vpop.trf.xlu0 }
 0x394   : >> { %11136 = vmatmul.mubr.msk.f32.gmra.mrb[4].mxu0 %vm1234_vm1, %v1223_v1 }
 0x397   : >> { %v1224_v30 = vpop.trf.xlu0 }
 0x398   : >> { %11138 = vmatprep.mubr.msk.f32.mxu0 %vm1234_vm1, %v1224_v30 }
 0x39b   : >> { %v1225_v42 = vpop.trf.xlu0 }
 0x39c   : >> { %11139 = vmatmul.mubr.msk.f32.gmra.mrb[6].mxu0 %vm1234_vm1, %v1225_v42  ;;  %v15416_v42 = vunpack.c.l.bf16 %v12862_v7 }
 0x39f   : >> { %v1226_v45 = vpop.trf.xlu0 }
 0x3a0   : >> { %11141 = vmatprep.mubr.msk.f32.mxu1 %vm1234_vm1, %v1226_v45 }
 0x3a3   : >> { %v1227_v39 = vpop.trf.xlu0 }
 0x3a4   : >> { %11142 = vmatmul.mubr.msk.f32.vlgmr.msra.gmra.mrb[0].mxu1 %vm1234_vm1, %v1227_v39 }
 0x3a7   : >> { %v1228_v3 = vpop.trf.xlu0 }
 0x3a8   : >> { %11144 = vmatprep.mubr.msk.f32.mxu1 %vm1234_vm1, %v1228_v3 }
 0x3ab   : >> { %v1229_v2 = vpop.trf.xlu0 }
 0x3ac   : >> { %11145 = vmatmul.mubr.msk.f32.gmra.mrb[2].mxu1 %vm1234_vm1, %v1229_v2  ;;  %v15417_v2 = vunpack.c.h.bf16 %v12883_v46 }
 0x3af   : >> { %v1230_v15 = vpop.trf.xlu0 }
 0x3b0   : >> { %11147 = vmatprep.mubr.msk.f32.mxu1 %vm1234_vm1, %v1230_v15 }
 0x3b3   : >> { %v1231_v61 = vpop.trf.xlu0 }
 0x3b4   : >> { %11148 = vmatmul.mubr.msk.f32.gmra.mrb[4].mxu1 %vm1234_vm1, %v1231_v61 }
 0x3b7   : >> { %v1232_v36 = vpop.trf.xlu0 }
 0x3b8   : >> { %11150 = vmatprep.mubr.msk.f32.mxu1 %vm1234_vm1, %v1232_v36  ;;  %v15418_v36 = vunpack.c.l.bf16 %v12883_v46 }
 0x3bb   : >> { %v1233_v21 = vpop.trf.xlu0 }
 0x3bc   : >> { %11151 = vmatmul.mubr.msk.f32.gmra.mrb[6].mxu1 %vm1234_vm1, %v1233_v21 }
 0x457   : >> { %v11131_v35 = vpop.f32.mrb[0].mxu0 }
 0x458   : >> { %v1429_v27 = vmul.f32 %v11131_v35, %v15405_v26  ;;  %v1349_v14 = vpop.f32.mrb[1].mxu0 }
 0x459   : >> { %v1428_v20 = vmul.f32 %v1349_v14, %v15406_v31 }
 0x45b   : >> { %v1444_v0 = vpack.c.bf16 %v1429_v27, %v1428_v20  ;;  %v15419_v27 = vunpack.c.h.bf16 %v12896_v55  ;;  %v15420_v20 = vunpack.c.l.bf16 %v12896_v55 }
 0x45d   : >> { %1456 = vst [vmem:[%s13199_s29] sm:$0xff] %v1444_v0 }
 0x45f   : >> { %v11134_v59 = vpop.f32.mrb[2].mxu0 }
 0x460   : >> { %v1431_v43 = vmul.f32 %v11134_v59, %v15407_v49  ;;  %v1359_v47 = vpop.f32.mrb[3].mxu0  ;;  %v12091_v49 = vld [vmem:[%s15349_s3 + $0x4] ss:$12 sps:$4 sm:$0xff] (%p1183_p4)  }
 0x461   : >> { %v1430_v56 = vmul.f32 %v1359_v47, %v15408_v62  ;;  %v12093_v47 = vld [vmem:[%s15349_s3] ss:$12 sps:$4 sm:$0xff] (%p1183_p4)   ;;  %1880 = vmatprep.subr.bf16.mxu0 (%p1183_p4), %v12091_v49  ;;  %11891 = vmatprep.subr.bf16.mxu1 (%p1183_p4), %v12091_v49  ;;  %v12094_v62 = vld [vmem:[%s15349_s3 + $0x1c] ss:$12 sps:$4 sm:$0xff] (%p1183_p4)  }
 0x462   : > { %1881 = vmatpush1.bf16.msra.mxu0 (%p1183_p4), %v12093_v47  ;;  %11899 = vmatpush1.bf16.msra.mxu1 (%p1183_p4), %v12093_v47 }
 0x463   : >> { %v1445_v4 = vpack.c.bf16 %v1431_v43, %v1430_v56  ;;  %v15421_v43 = vmov (%p1183_p4), 0   ;;  %v12096_v56 = vld [vmem:[%s15349_s3 + $0x18] ss:$12 sps:$4 sm:$0xff] (%p1183_p4)   ;;  %1882 = vmatprep.subr.bf16.mxu0 (%p1183_p4), %v12094_v62  ;;  %11892 = vmatprep.subr.bf16.mxu1 (%p1183_p4), %v12094_v62 }
 0x464   : > { %1912 = vmatprep.mubr.bf16.mxu0 (%p1183_p4), %v15421_v43  ;;  %3832 = vmatprep.mubr.bf16.mxu1 (%p1183_p4), %v15421_v43 }
 0x465   : >> { %1457 = vst [vmem:[%s13199_s29 + $0x8] sm:$0xff] %v1445_v4  ;;  %v12097_v4 = vld [vmem:[%s15349_s3 + $0x34] ss:$12 sps:$4 sm:$0xff] (%p1183_p4)  }
 0x466   : > { %1883 = vmatpush1.bf16.msra.mxu0 (%p1183_p4), %v12096_v56  ;;  %11900 = vmatpush1.bf16.msra.mxu1 (%p1183_p4), %v12096_v56 }
 0x467   : >> { %v11137_v50 = vpop.f32.mrb[4].mxu0  ;;  %1884 = vmatprep.subr.bf16.mxu0 (%p1183_p4), %v12097_v4  ;;  %11893 = vmatprep.subr.bf16.mxu1 (%p1183_p4), %v12097_v4 }
 0x468   : >> { %v1433_v12 = vmul.f32 %v11137_v50, %v15409_v44  ;;  %v1369_v34 = vpop.f32.mrb[5].mxu0  ;;  %v12099_v50 = vld [vmem:[%s15349_s3 + $0x30] ss:$12 sps:$4 sm:$0xff] (%p1183_p4)   ;;  %v12100_v44 = vld [vmem:[%s15349_s3 + $0x4c] ss:$12 sps:$4 sm:$0xff] (%p1183_p4)  }
 0x469   : >> { %v1432_v38 = vmul.f32 %v1369_v34, %v15410_v29  ;;  %v12103_v34 = vld [vmem:[%s15349_s3 + $0x64] ss:$12 sps:$4 sm:$0xff] (%p1183_p4)   ;;  %v12105_v29 = vld [vmem:[%s15349_s3 + $0x60] ss:$12 sps:$4 sm:$0xff] (%p1183_p4)  }
 0x46a   : > { %1885 = vmatpush1.bf16.msra.mxu0 (%p1183_p4), %v12099_v50  ;;  %11901 = vmatpush1.bf16.msra.mxu1 (%p1183_p4), %v12099_v50 }
 0x46b   : >> { %v1446_v63 = vpack.c.bf16 %v1433_v12, %v1432_v38  ;;  %v12102_v12 = vld [vmem:[%s15349_s3 + $0x48] ss:$12 sps:$4 sm:$0xff] (%p1183_p4)   ;;  %1886 = vmatprep.subr.bf16.mxu0 (%p1183_p4), %v12100_v44  ;;  %11894 = vmatprep.subr.bf16.mxu1 (%p1183_p4), %v12100_v44 }
 0x46c   : > { %v12106_v38 = vld [vmem:[%s15349_s3 + $0x7c] ss:$12 sps:$4 sm:$0xff] (%p1183_p4)  }
 0x46d   : >> { %1458 = vst [vmem:[%s13199_s29 + $0x10] sm:$0xff] %v1446_v63  ;;  %v12108_v63 = vld [vmem:[%s15349_s3 + $0x78] ss:$12 sps:$4 sm:$0xff] (%p1183_p4)  }
 0x46e   : > { %1887 = vmatpush1.bf16.msra.mxu0 (%p1183_p4), %v12102_v12  ;;  %11902 = vmatpush1.bf16.msra.mxu1 (%p1183_p4), %v12102_v12  ;;  %v12119_v12 = vld [vmem:[%s15349_s3 + $0x68] ss:$12 sps:$4 sm:$0xff] (%p1183_p4)  }
 0x46f   : >> { %v11140_v18 = vpop.f32.mrb[6].mxu0  ;;  %1888 = vmatprep.subr.bf16.mxu0 (%p1183_p4), %v12103_v34  ;;  %11895 = vmatprep.subr.bf16.mxu1 (%p1183_p4), %v12103_v34 }
 0x470   : >> { %v1435_v57 = vmul.f32 %v11140_v18, %v15411_v40  ;;  %v1379_v54 = vpop.f32.mrb[7].mxu0  ;;  %v12109_v18 = vld [vmem:[%s15349_s3 + $0x94] ss:$12 sps:$4 sm:$0xff] (%p1183_p4)   ;;  %v12111_v40 = vld [vmem:[%s15349_s3 + $0x90] ss:$12 sps:$4 sm:$0xff] (%p1183_p4)  }
 0x471   : >> { %v1434_v10 = vmul.f32 %v1379_v54, %v15412_v24  ;;  %v12114_v54 = vld [vmem:[%s15349_s3 + $0xa8] ss:$12 sps:$4 sm:$0xff] (%p1183_p4)  }
 0x472   : > { %1889 = vmatpush1.bf16.msra.mxu0 (%p1183_p4), %v12105_v29  ;;  %11903 = vmatpush1.bf16.msra.mxu1 (%p1183_p4), %v12105_v29  ;;  %v12115_v24 = vld [vmem:[%s15349_s3 + $0x8] ss:$12 sps:$4 sm:$0xff] (%p1183_p4)  }
 0x473   : >> { %v1447_v25 = vpack.c.bf16 %v1435_v57, %v1434_v10  ;;  %1890 = vmatprep.subr.bf16.mxu0 (%p1183_p4), %v12106_v38  ;;  %11896 = vmatprep.subr.bf16.mxu1 (%p1183_p4), %v12106_v38  ;;  %v12112_v57 = vld [vmem:[%s15349_s3 + $0xac] ss:$12 sps:$4 sm:$0xff] (%p1183_p4)  }
 0x475   : >> { %1459 = vst [vmem:[%s13199_s29 + $0x18] sm:$0xff] %v1447_v25 }
 0x476   : > { %1891 = vmatpush1.bf16.msra.mxu0 (%p1183_p4), %v12108_v63  ;;  %11904 = vmatpush1.bf16.msra.mxu1 (%p1183_p4), %v12108_v63 }
 0x477   : >> { %v11143_v48 = vpop.f32.mrb[0].mxu1  ;;  %1892 = vmatprep.subr.bf16.mxu0 (%p1183_p4), %v12109_v18  ;;  %11897 = vmatprep.subr.bf16.mxu1 (%p1183_p4), %v12109_v18 }
 0x478   : >> { %v1437_v28 = vmul.f32 %v11143_v48, %v15413_v51  ;;  %v1389_v60 = vpop.f32.mrb[1].mxu1  ;;  %v12116_v48 = vld [vmem:[%s15349_s3 + $0x20] ss:$12 sps:$4 sm:$0xff] (%p1183_p4)   ;;  %v12117_v51 = vld [vmem:[%s15349_s3 + $0x38] ss:$12 sps:$4 sm:$0xff] (%p1183_p4)  }
 0x479   : >> { %v1436_v32 = vmul.f32 %v1389_v60, %v15414_v41 }
 0x47a   : > { %1893 = vmatpush1.bf16.msra.mxu0 (%p1183_p4), %v12111_v40  ;;  %11905 = vmatpush1.bf16.msra.mxu1 (%p1183_p4), %v12111_v40 }
 0x47b   : >> { %v1448_v11 = vpack.c.bf16 %v1437_v28, %v1436_v32  ;;  %1894 = vmatprep.subr.bf16.mxu0 (%p1183_p4), %v12112_v57  ;;  %11898 = vmatprep.subr.bf16.mxu1 (%p1183_p4), %v12112_v57 }
 0x47d   : >> { %1460 = vst [vmem:[%s13199_s29 + $0x20] sm:$0xff] %v1448_v11 }
 0x47e   : > { %1895 = vmatpush1.bf16.msra.mxu0 (%p1183_p4), %v12114_v54  ;;  %11906 = vmatpush1.bf16.msra.mxu1 (%p1183_p4), %v12114_v54 }
 0x47f   : >> { %v11146_v33 = vpop.f32.mrb[2].mxu1  ;;  %11153 = vmatprep.subr.bf16.mxu1 (%p1183_p4), %v12115_v24 }
 0x480   : >> { %v1439_v1 = vmul.f32 %v11146_v33, %v15415_v13  ;;  %v1399_v30 = vpop.f32.mrb[3].mxu1 }
 0x481   : >> { %v1438_v45 = vmul.f32 %v1399_v30, %v15416_v42 }
 0x483   : >> { %v1449_v39 = vpack.c.bf16 %v1439_v1, %v1438_v45 }
 0x485   : >> { %1461 = vst [vmem:[%s13199_s29 + $0x28] sm:$0xff] %v1449_v39 }
 0x487   : >> { %v11149_v3 = vpop.f32.mrb[4].mxu1 }
 0x488   : >> { %v1441_v15 = vmul.f32 %v11149_v3, %v15417_v2  ;;  %v1409_v61 = vpop.f32.mrb[5].mxu1 }
 0x489   : >> { %v1440_v21 = vmul.f32 %v1409_v61, %v15418_v36  ;;  %v12118_v36 = vld [vmem:[%s15349_s3 + $0x50] ss:$12 sps:$4 sm:$0xff] (%p1183_p4)  }
 0x48b   : >> { %v1450_v35 = vpack.c.bf16 %v1441_v15, %v1440_v21 }
 0x48d   : >> { %1462 = vst [vmem:[%s13199_s29 + $0x30] sm:$0xff] %v1450_v35 }
 0x48f   : >> { %v11152_v26 = vpop.f32.mrb[6].mxu1  ;;  %1185 = sbr.rel (!%p1183_p4) target bundleno = 733 (0x2dd), region = 103 }
 0x490   : >> { %v1443_v14 = vmul.f32 %v11152_v26, %v15419_v27  ;;  %v1419_v31 = vpop.f32.mrb[7].mxu1 }
 0x491   : >> { %v1442_v0 = vmul.f32 %v1419_v31, %v15420_v20 }
 0x493   : >> { %v1451_v59 = vpack.c.bf16 %v1443_v14, %v1442_v0 }
 0x495   : >> { %1463 = vst [vmem:[%s13199_s29 + $0x38] sm:$0xff] %v1451_v59 }
 0x49c   : > { %v1464_v10 = vld [vmem:[#allocation4] sm:$0xff]  ;;  %v1465_v28 = vld [vmem:[#allocation4 + $0x8] sm:$0xff]  ;;  %v1466_v41 = vld [vmem:[#allocation4 + $0x10] sm:$0xff] }
 0x49d   : > { %v1656_v25 = vld [vmem:[#allocation4 + $0x600] sm:$0xff]  ;;  %1913 = vmatmul.mubr.bf16.vlgmr.msra.gmra.mrb[0].mxu0 %v1464_v10  ;;  %v1657_v60 = vld [vmem:[#allocation4 + $0x608] sm:$0xff]  ;;  %v1658_v32 = vld [vmem:[#allocation4 + $0x610] sm:$0xff] }
 0x49e   : > { %3833 = vmatmul.mubr.bf16.vlgmr.msra.gmra.mrb[0].mxu1 %v1656_v25  ;;  %1922 = vmatprep.mubr.bf16.mxu0 %v15421_v43  ;;  %v1467_v11 = vld [vmem:[#allocation4 + $0x18] sm:$0xff]  ;;  %v1468_v13 = vld [vmem:[#allocation4 + $0x20] sm:$0xff]  ;;  %v1469_v30 = vld [vmem:[#allocation4 + $0x28] sm:$0xff] }
 0x49f   : > { %11154 = vmatpush3.bf16.msra.mxu1 %v12115_v24  ;;  %3842 = vmatprep.mubr.bf16.mxu1 %v15421_v43  ;;  %v1659_v33 = vld [vmem:[#allocation4 + $0x618] sm:$0xff]  ;;  %v1660_v1 = vld [vmem:[#allocation4 + $0x620] sm:$0xff]  ;;  %v1661_v42 = vld [vmem:[#allocation4 + $0x628] sm:$0xff] }
 0x4a0   : > { %11155 = vmatprep.subr.bf16.mxu1 %v12116_v48  ;;  %v1470_v45 = vld [vmem:[#allocation4 + $0x30] sm:$0xff]  ;;  %v1471_v3 = vld [vmem:[#allocation4 + $0x38] sm:$0xff]  ;;  %v1472_v15 = vld [vmem:[#allocation4 + $0x40] sm:$0xff] }
 0x4a1   : > { %v1662_v39 = vld [vmem:[#allocation4 + $0x630] sm:$0xff]  ;;  %v1663_v2 = vld [vmem:[#allocation4 + $0x638] sm:$0xff]  ;;  %v1664_v61 = vld [vmem:[#allocation4 + $0x640] sm:$0xff] }
 0x4a2   : > { %v1473_v21 = vld [vmem:[#allocation4 + $0x48] sm:$0xff]  ;;  %v1474_v26 = vld [vmem:[#allocation4 + $0x50] sm:$0xff]  ;;  %v1475_v14 = vld [vmem:[#allocation4 + $0x58] sm:$0xff] }
 0x4a3   : > { %11156 = vmatpush3.bf16.msra.mxu1 %v12116_v48  ;;  %v1665_v35 = vld [vmem:[#allocation4 + $0x648] sm:$0xff]  ;;  %v1666_v27 = vld [vmem:[#allocation4 + $0x650] sm:$0xff]  ;;  %v1667_v31 = vld [vmem:[#allocation4 + $0x658] sm:$0xff] }
 0x4a4   : > { %11157 = vmatprep.subr.bf16.mxu1 %v12117_v51  ;;  %v1476_v20 = vld [vmem:[#allocation4 + $0x60] sm:$0xff]  ;;  %v1477_v59 = vld [vmem:[#allocation4 + $0x68] sm:$0xff]  ;;  %v1478_v47 = vld [vmem:[#allocation4 + $0x70] sm:$0xff] }
 0x4a5   : > { %1923 = vmatmul.mubr.bf16.gmra.mrb[4].mxu0 %v1465_v28  ;;  %v1668_v0 = vld [vmem:[#allocation4 + $0x660] sm:$0xff]  ;;  %v1669_v49 = vld [vmem:[#allocation4 + $0x668] sm:$0xff]  ;;  %v1670_v62 = vld [vmem:[#allocation4 + $0x670] sm:$0xff] }
 0x4a6   : > { %3843 = vmatmul.mubr.bf16.gmra.mrb[4].mxu1 %v1657_v60  ;;  %1932 = vmatprep.mubr.bf16.mxu0 %v15421_v43  ;;  %v1479_v56 = vld [vmem:[#allocation4 + $0x78] sm:$0xff]  ;;  %v1480_v50 = vld [vmem:[#allocation4 + $0x80] sm:$0xff]  ;;  %v1481_v34 = vld [vmem:[#allocation4 + $0x88] sm:$0xff] }
 0x4a7   : > { %3852 = vmatprep.mubr.bf16.mxu1 %v15421_v43  ;;  %11158 = vmatpush3.bf16.msra.mxu1 %v12117_v51  ;;  %v1671_v4 = vld [vmem:[#allocation4 + $0x678] sm:$0xff]  ;;  %v1672_v44 = vld [vmem:[#allocation4 + $0x680] sm:$0xff]  ;;  %v1673_v29 = vld [vmem:[#allocation4 + $0x688] sm:$0xff] }
 0x4a8   : > { %11159 = vmatprep.subr.bf16.mxu1 %v12118_v36  ;;  %v1482_v38 = vld [vmem:[#allocation4 + $0x90] sm:$0xff]  ;;  %v1483_v18 = vld [vmem:[#allocation4 + $0x98] sm:$0xff]  ;;  %v1484_v57 = vld [vmem:[#allocation4 + $0xa0] sm:$0xff] }
 0x4a9   : > { %v1674_v63 = vld [vmem:[#allocation4 + $0x690] sm:$0xff]  ;;  %v1675_v40 = vld [vmem:[#allocation4 + $0x698] sm:$0xff]  ;;  %v1676_v54 = vld [vmem:[#allocation4 + $0x6a0] sm:$0xff] }
 0x4aa   : > { %v1485_v24 = vld [vmem:[#allocation4 + $0xa8] sm:$0xff]  ;;  %v1486_v25 = vld [vmem:[#allocation4 + $0xb0] sm:$0xff]  ;;  %v1487_v51 = vld [vmem:[#allocation4 + $0xb8] sm:$0xff] }
 0x4ab   : > { %11160 = vmatpush3.bf16.msra.mxu1 %v12118_v36  ;;  %v1677_v10 = vld [vmem:[#allocation4 + $0x6a8] sm:$0xff]  ;;  %v1678_v48 = vld [vmem:[#allocation4 + $0x6b0] sm:$0xff]  ;;  %v1679_v28 = vld [vmem:[#allocation4 + $0x6b8] sm:$0xff] }
 0x4ac   : > { %11161 = vmatprep.subr.bf16.mxu1 %v12119_v12  ;;  %v1488_v60 = vld [vmem:[#allocation4 + $0xc0] sm:$0xff] }
 0x4ad   : > { %1933 = vmatmul.mubr.bf16.gmra.mrb[8].mxu0 %v1466_v41  ;;  %v1680_v41 = vld [vmem:[#allocation4 + $0x6c0] sm:$0xff] }
 0x4ae   : > { %3853 = vmatmul.mubr.bf16.gmra.mrb[8].mxu1 %v1658_v32  ;;  %1942 = vmatprep.mubr.bf16.mxu0 %v15421_v43  ;;  %v12120_v32 = vld [vmem:[%s15349_s3 + $0x80] ss:$12 sps:$4 sm:$0xff]  }
 0x4af   : > { %3862 = vmatprep.mubr.bf16.mxu1 %v15421_v43  ;;  %11162 = vmatpush3.bf16.msra.mxu1 %v12119_v12 }
 0x4b0   : > { %11163 = vmatprep.subr.bf16.mxu1 %v12120_v32 }
 0x4b3   : > { %11164 = vmatpush3.bf16.msra.mxu1 %v12120_v32 }
 0x4b5   : > { %1943 = vmatmul.mubr.bf16.gmra.mrb[12].mxu0 %v1467_v11  ;;  %v1489_v11 = vld [vmem:[#allocation4 + $0xc8] sm:$0xff] }
 0x4b6   : > { %3863 = vmatmul.mubr.bf16.gmra.mrb[12].mxu1 %v1659_v33  ;;  %1952 = vmatprep.mubr.bf16.mxu0 %v15421_v43  ;;  %v1681_v33 = vld [vmem:[#allocation4 + $0x6c8] sm:$0xff] }
 0x4b7   : > { %3872 = vmatprep.mubr.bf16.mxu1 %v15421_v43 }
 0x4bd   : > { %1953 = vmatmul.mubr.bf16.gmra.mrb[16].mxu0 %v1468_v13  ;;  %v1490_v13 = vld [vmem:[#allocation4 + $0xd0] sm:$0xff] }
 0x4be   : > { %3873 = vmatmul.mubr.bf16.gmra.mrb[16].mxu1 %v1660_v1  ;;  %1962 = vmatprep.mubr.bf16.mxu0 %v15421_v43  ;;  %v1682_v1 = vld [vmem:[#allocation4 + $0x6d0] sm:$0xff] }
 0x4bf   : > { %3882 = vmatprep.mubr.bf16.mxu1 %v15421_v43 }
 0x4c5   : > { %1963 = vmatmul.mubr.bf16.gmra.mrb[20].mxu0 %v1469_v30 }
 0x4c6   : > { %3883 = vmatmul.mubr.bf16.gmra.mrb[20].mxu1 %v1661_v42  ;;  %1972 = vmatprep.mubr.bf16.mxu0 %v15421_v43 }
 0x4c7   : > { %3892 = vmatprep.mubr.bf16.mxu1 %v15421_v43 }
 0x4cd   : > { %1973 = vmatmul.mubr.bf16.gmra.mrb[24].mxu0 %v1470_v45 }
 0x4ce   : > { %3893 = vmatmul.mubr.bf16.gmra.mrb[24].mxu1 %v1662_v39  ;;  %1982 = vmatprep.mubr.bf16.mxu0 %v15421_v43 }
 0x4cf   : > { %3902 = vmatprep.mubr.bf16.mxu1 %v15421_v43 }
 0x4d5   : > { %1983 = vmatmul.mubr.bf16.gmra.mrb[28].mxu0 %v1471_v3 }
 0x4d6   : > { %3903 = vmatmul.mubr.bf16.gmra.mrb[28].mxu1 %v1663_v2  ;;  %1992 = vmatprep.mubr.bf16.mxu0 %v15421_v43 }
 0x4d7   : > { %3912 = vmatprep.mubr.bf16.mxu1 %v15421_v43 }
 0x4dd   : > { %1993 = vmatmul.mubr.bf16.gmra.mrb[32].mxu0 %v1472_v15  ;;  %v1491_v15 = vld [vmem:[#allocation4 + $0xd8] sm:$0xff] }
 0x4de   : > { %3913 = vmatmul.mubr.bf16.gmra.mrb[32].mxu1 %v1664_v61  ;;  %2002 = vmatprep.mubr.bf16.mxu0 %v15421_v43  ;;  %v1683_v61 = vld [vmem:[#allocation4 + $0x6d8] sm:$0xff] }
 0x4df   : > { %3922 = vmatprep.mubr.bf16.mxu1 %v15421_v43 }
 0x4e5   : > { %2003 = vmatmul.mubr.bf16.gmra.mrb[36].mxu0 %v1473_v21 }
 0x4e6   : > { %3923 = vmatmul.mubr.bf16.gmra.mrb[36].mxu1 %v1665_v35  ;;  %2012 = vmatprep.mubr.bf16.mxu0 %v15421_v43 }
 0x4e7   : > { %3932 = vmatprep.mubr.bf16.mxu1 %v15421_v43 }
 0x4ed   : > { %2013 = vmatmul.mubr.bf16.gmra.mrb[40].mxu0 %v1474_v26 }
 0x4ee   : > { %3933 = vmatmul.mubr.bf16.gmra.mrb[40].mxu1 %v1666_v27  ;;  %2022 = vmatprep.mubr.bf16.mxu0 %v15421_v43 }
 0x4ef   : > { %3942 = vmatprep.mubr.bf16.mxu1 %v15421_v43 }
 0x4f5   : > { %2023 = vmatmul.mubr.bf16.gmra.mrb[44].mxu0 %v1475_v14 }
 0x4f6   : > { %3943 = vmatmul.mubr.bf16.gmra.mrb[44].mxu1 %v1667_v31  ;;  %2032 = vmatprep.mubr.bf16.mxu0 %v15421_v43 }
 0x4f7   : > { %3952 = vmatprep.mubr.bf16.mxu1 %v15421_v43 }
 0x4fd   : > { %2033 = vmatmul.mubr.bf16.gmra.mrb[48].mxu0 %v1476_v20 }
 0x4fe   : > { %3953 = vmatmul.mubr.bf16.gmra.mrb[48].mxu1 %v1668_v0  ;;  %2042 = vmatprep.mubr.bf16.mxu0 %v15421_v43 }
 0x4ff   : > { %3962 = vmatprep.mubr.bf16.mxu1 %v15421_v43 }
 0x505   : > { %2043 = vmatmul.mubr.bf16.gmra.mrb[52].mxu0 %v1477_v59 }
 0x506   : > { %3963 = vmatmul.mubr.bf16.gmra.mrb[52].mxu1 %v1669_v49  ;;  %2052 = vmatprep.mubr.bf16.mxu0 %v15421_v43 }
 0x507   : > { %3972 = vmatprep.mubr.bf16.mxu1 %v15421_v43 }
 0x50d   : > { %2053 = vmatmul.mubr.bf16.gmra.mrb[56].mxu0 %v1478_v47 }
 0x50e   : > { %3973 = vmatmul.mubr.bf16.gmra.mrb[56].mxu1 %v1670_v62  ;;  %2062 = vmatprep.mubr.bf16.mxu0 %v15421_v43  ;;  %v1492_v62 = vld [vmem:[#allocation4 + $0xe0] sm:$0xff] }
 0x50f   : > { %3982 = vmatprep.mubr.bf16.mxu1 %v15421_v43 }
 0x515   : > { %2063 = vmatmul.mubr.bf16.gmra.mrb[60].mxu0 %v1479_v56  ;;  %v1684_v56 = vld [vmem:[#allocation4 + $0x6e0] sm:$0xff] }
 0x516   : > { %3983 = vmatmul.mubr.bf16.gmra.mrb[60].mxu1 %v1671_v4  ;;  %2072 = vmatprep.mubr.bf16.mxu0 %v15421_v43 }
 0x517   : > { %3992 = vmatprep.mubr.bf16.mxu1 %v15421_v43 }
 0x51d   : > { %2073 = vmatmul.mubr.bf16.gmra.mrb[64].mxu0 %v1480_v50 }
 0x51e   : > { %3993 = vmatmul.mubr.bf16.gmra.mrb[64].mxu1 %v1672_v44  ;;  %2082 = vmatprep.mubr.bf16.mxu0 %v15421_v43 }
 0x51f   : > { %4002 = vmatprep.mubr.bf16.mxu1 %v15421_v43 }
 0x525   : > { %2083 = vmatmul.mubr.bf16.gmra.mrb[68].mxu0 %v1481_v34 }
 0x526   : > { %4003 = vmatmul.mubr.bf16.gmra.mrb[68].mxu1 %v1673_v29  ;;  %2092 = vmatprep.mubr.bf16.mxu0 %v15421_v43 }
 0x527   : > { %4012 = vmatprep.mubr.bf16.mxu1 %v15421_v43 }
 0x52d   : > { %2093 = vmatmul.mubr.bf16.gmra.mrb[72].mxu0 %v1482_v38 }
 0x52e   : > { %4013 = vmatmul.mubr.bf16.gmra.mrb[72].mxu1 %v1674_v63  ;;  %2102 = vmatprep.mubr.bf16.mxu0 %v15421_v43 }
 0x52f   : > { %4022 = vmatprep.mubr.bf16.mxu1 %v15421_v43 }
 0x535   : > { %2103 = vmatmul.mubr.bf16.gmra.mrb[76].mxu0 %v1483_v18 }
 0x536   : > { %4023 = vmatmul.mubr.bf16.gmra.mrb[76].mxu1 %v1675_v40  ;;  %2112 = vmatprep.mubr.bf16.mxu0 %v15421_v43 }
 0x537   : > { %4032 = vmatprep.mubr.bf16.mxu1 %v15421_v43 }
 0x53d   : > { %2113 = vmatmul.mubr.bf16.gmra.mrb[80].mxu0 %v1484_v57 }
 0x53e   : > { %4033 = vmatmul.mubr.bf16.gmra.mrb[80].mxu1 %v1676_v54  ;;  %2122 = vmatprep.mubr.bf16.mxu0 %v15421_v43 }
 0x53f   : > { %4042 = vmatprep.mubr.bf16.mxu1 %v15421_v43 }
 0x545   : > { %2123 = vmatmul.mubr.bf16.gmra.mrb[84].mxu0 %v1485_v24  ;;  %v1493_v24 = vld [vmem:[#allocation4 + $0xe8] sm:$0xff] }
 0x546   : > { %4043 = vmatmul.mubr.bf16.gmra.mrb[84].mxu1 %v1677_v10  ;;  %2132 = vmatprep.mubr.bf16.mxu0 %v15421_v43  ;;  %v1685_v10 = vld [vmem:[#allocation4 + $0x6e8] sm:$0xff] }
 0x547   : > { %4052 = vmatprep.mubr.bf16.mxu1 %v15421_v43 }
 0x54d   : > { %2133 = vmatmul.mubr.bf16.gmra.mrb[88].mxu0 %v1486_v25 }
 0x54e   : > { %4053 = vmatmul.mubr.bf16.gmra.mrb[88].mxu1 %v1678_v48  ;;  %2142 = vmatprep.mubr.bf16.mxu0 %v15421_v43 }
 0x54f   : > { %4062 = vmatprep.mubr.bf16.mxu1 %v15421_v43 }
 0x555   : > { %2143 = vmatmul.mubr.bf16.gmra.mrb[92].mxu0 %v1487_v51 }
 0x556   : > { %4063 = vmatmul.mubr.bf16.gmra.mrb[92].mxu1 %v1679_v28  ;;  %2152 = vmatprep.mubr.bf16.mxu0 %v15421_v43 }
 0x557   : > { %4072 = vmatprep.mubr.bf16.mxu1 %v15421_v43 }
 0x55d   : > { %2153 = vmatmul.mubr.bf16.gmra.mrb[96].mxu0 %v1488_v60 }
 0x55e   : > { %4073 = vmatmul.mubr.bf16.gmra.mrb[96].mxu1 %v1680_v41  ;;  %2162 = vmatprep.mubr.bf16.mxu0 %v15421_v43 }
 0x55f   : > { %4082 = vmatprep.mubr.bf16.mxu1 %v15421_v43 }
 0x565   : > { %2163 = vmatmul.mubr.bf16.gmra.mrb[100].mxu0 %v1489_v11 }
 0x566   : > { %4083 = vmatmul.mubr.bf16.gmra.mrb[100].mxu1 %v1681_v33  ;;  %2172 = vmatprep.mubr.bf16.mxu0 %v15421_v43 }
 0x567   : > { %4092 = vmatprep.mubr.bf16.mxu1 %v15421_v43 }
 0x56d   : > { %2173 = vmatmul.mubr.bf16.gmra.mrb[104].mxu0 %v1490_v13 }
 0x56e   : > { %4093 = vmatmul.mubr.bf16.gmra.mrb[104].mxu1 %v1682_v1  ;;  %2182 = vmatprep.mubr.bf16.mxu0 %v15421_v43 }
 0x56f   : > { %4102 = vmatprep.mubr.bf16.mxu1 %v15421_v43 }
 0x570   : > { %v1914_v30 = vpop.f32.mrb[0].mxu0 }
 0x571   : > { %v3834_v42 = vpop.f32.mrb[0].mxu1  ;;  %v1916_v45 = vpop.f32.mrb[1].mxu0 }
 0x572   : > { %v3836_v39 = vpop.f32.mrb[1].mxu1  ;;  %v1918_v3 = vpop.f32.mrb[2].mxu0 }
 0x573   : > { %v3838_v2 = vpop.f32.mrb[2].mxu1  ;;  %v6554_v36 = vpack.c.bf16 %v1918_v3, %v1914_v30  ;;  %v1920_v35 = vpop.f32.mrb[3].mxu0 }
 0x574   : > { %v7130_v21 = vpack.c.bf16 %v3838_v2, %v3834_v42  ;;  %v3840_v26 = vpop.f32.mrb[3].mxu1  ;;  %v6555_v27 = vpack.c.bf16 %v1920_v35, %v1916_v45  ;;  %v1494_v42 = vld [vmem:[#allocation4 + $0xf0] sm:$0xff] }
 0x575   : > { %v7131_v14 = vpack.c.bf16 %v3840_v26, %v3836_v39  ;;  %7322 = vst [vmem:[#allocation5] sm:$0xff] %v6554_v36  ;;  %2183 = vmatmul.mubr.bf16.gmra.mrb[108].mxu0 %v1491_v15  ;;  %v1686_v45 = vld [vmem:[#allocation4 + $0x6f0] sm:$0xff] }
 0x576   : > { %7898 = vst [vmem:[#allocation5 + $0x1200] sm:$0xff] %v7130_v21  ;;  %4103 = vmatmul.mubr.bf16.gmra.mrb[108].mxu1 %v1683_v61  ;;  %7323 = vst [vmem:[#allocation5 + $0x8] sm:$0xff] %v6555_v27  ;;  %2192 = vmatprep.mubr.bf16.mxu0 %v15421_v43 }
 0x577   : > { %7899 = vst [vmem:[#allocation5 + $0x1208] sm:$0xff] %v7131_v14  ;;  %4112 = vmatprep.mubr.bf16.mxu1 %v15421_v43 }
 0x578   : > { %v1924_v31 = vpop.f32.mrb[4].mxu0 }
 0x579   : > { %v3844_v20 = vpop.f32.mrb[4].mxu1  ;;  %v1926_v0 = vpop.f32.mrb[5].mxu0 }
 0x57a   : > { %v3846_v59 = vpop.f32.mrb[5].mxu1  ;;  %v1928_v49 = vpop.f32.mrb[6].mxu0 }
 0x57b   : > { %v3848_v47 = vpop.f32.mrb[6].mxu1  ;;  %v6557_v4 = vpack.c.bf16 %v1928_v49, %v1924_v31  ;;  %v1930_v44 = vpop.f32.mrb[7].mxu0 }
 0x57c   : > { %v7133_v50 = vpack.c.bf16 %v3848_v47, %v3844_v20  ;;  %v3850_v12 = vpop.f32.mrb[7].mxu1  ;;  %v6558_v34 = vpack.c.bf16 %v1930_v44, %v1926_v0  ;;  %v1495_v20 = vld [vmem:[#allocation4 + $0xf8] sm:$0xff] }
 0x57d   : > { %v7134_v29 = vpack.c.bf16 %v3850_v12, %v3846_v59  ;;  %7325 = vst [vmem:[#allocation5 + $0x18] sm:$0xff] %v6557_v4  ;;  %2193 = vmatmul.mubr.bf16.gmra.mrb[112].mxu0 %v1492_v62  ;;  %v1687_v0 = vld [vmem:[#allocation4 + $0x6f8] sm:$0xff] }
 0x57e   : > { %7901 = vst [vmem:[#allocation5 + $0x1218] sm:$0xff] %v7133_v50  ;;  %4113 = vmatmul.mubr.bf16.gmra.mrb[112].mxu1 %v1684_v56  ;;  %7326 = vst [vmem:[#allocation5 + $0x20] sm:$0xff] %v6558_v34  ;;  %2202 = vmatprep.mubr.bf16.mxu0 %v15421_v43 }
 0x57f   : > { %7902 = vst [vmem:[#allocation5 + $0x1220] sm:$0xff] %v7134_v29  ;;  %4122 = vmatprep.mubr.bf16.mxu1 %v15421_v43 }
 0x580   : > { %v1934_v38 = vpop.f32.mrb[8].mxu0 }
 0x581   : > { %v3854_v63 = vpop.f32.mrb[8].mxu1  ;;  %v1936_v18 = vpop.f32.mrb[9].mxu0 }
 0x582   : > { %v3856_v40 = vpop.f32.mrb[9].mxu1  ;;  %v1938_v57 = vpop.f32.mrb[10].mxu0 }
 0x583   : > { %v3858_v54 = vpop.f32.mrb[10].mxu1  ;;  %v6560_v25 = vpack.c.bf16 %v1938_v57, %v1934_v38  ;;  %v1940_v51 = vpop.f32.mrb[11].mxu0 }
 0x584   : > { %v7136_v48 = vpack.c.bf16 %v3858_v54, %v3854_v63  ;;  %v3860_v28 = vpop.f32.mrb[11].mxu1  ;;  %v6561_v60 = vpack.c.bf16 %v1940_v51, %v1936_v18  ;;  %v1496_v63 = vld [vmem:[#allocation4 + $0x100] sm:$0xff] }
 0x585   : > { %v7137_v41 = vpack.c.bf16 %v3860_v28, %v3856_v40  ;;  %7328 = vst [vmem:[#allocation5 + $0x30] sm:$0xff] %v6560_v25  ;;  %2203 = vmatmul.mubr.bf16.gmra.mrb[116].mxu0 %v1493_v24  ;;  %v1688_v18 = vld [vmem:[#allocation4 + $0x700] sm:$0xff] }
 0x586   : > { %7904 = vst [vmem:[#allocation5 + $0x1230] sm:$0xff] %v7136_v48  ;;  %4123 = vmatmul.mubr.bf16.gmra.mrb[116].mxu1 %v1685_v10  ;;  %7329 = vst [vmem:[#allocation5 + $0x38] sm:$0xff] %v6561_v60  ;;  %2212 = vmatprep.mubr.bf16.mxu0 %v15421_v43  ;;  %v12121_v48 = vld [vmem:[%s15349_s3 + $0x98] ss:$12 sps:$4 sm:$0xff]  }
 0x587   : > { %7905 = vst [vmem:[#allocation5 + $0x1238] sm:$0xff] %v7137_v41  ;;  %4132 = vmatprep.mubr.bf16.mxu1 %v15421_v43  ;;  %11165 = vmatprep.subr.bf16.mxu1 %v12121_v48 }
 0x588   : > { %v1944_v32 = vpop.f32.mrb[12].mxu0  ;;  %11166 = vmatpush3.bf16.msra.mxu1 %v12121_v48 }
 0x589   : > { %v3864_v11 = vpop.f32.mrb[12].mxu1  ;;  %v1946_v33 = vpop.f32.mrb[13].mxu0 }
 0x58a   : > { %v3866_v13 = vpop.f32.mrb[13].mxu1  ;;  %v1948_v1 = vpop.f32.mrb[14].mxu0 }
 0x58b   : > { %v3868_v30 = vpop.f32.mrb[14].mxu1  ;;  %v6563_v39 = vpack.c.bf16 %v1948_v1, %v1944_v32  ;;  %v1950_v2 = vpop.f32.mrb[15].mxu0 }
 0x58c   : > { %v7139_v3 = vpack.c.bf16 %v3868_v30, %v3864_v11  ;;  %v3870_v15 = vpop.f32.mrb[15].mxu1  ;;  %v6564_v61 = vpack.c.bf16 %v1950_v2, %v1946_v33  ;;  %v1497_v33 = vld [vmem:[#allocation4 + $0x108] sm:$0xff] }
 0x58d   : > { %v7140_v36 = vpack.c.bf16 %v3870_v15, %v3866_v13  ;;  %7331 = vst [vmem:[#allocation5 + $0x48] sm:$0xff] %v6563_v39  ;;  %2213 = vmatmul.mubr.bf16.gmra.mrb[120].mxu0 %v1494_v42  ;;  %v1689_v13 = vld [vmem:[#allocation4 + $0x708] sm:$0xff] }
 0x58e   : > { %7907 = vst [vmem:[#allocation5 + $0x1248] sm:$0xff] %v7139_v3  ;;  %4133 = vmatmul.mubr.bf16.gmra.mrb[120].mxu1 %v1686_v45  ;;  %7332 = vst [vmem:[#allocation5 + $0x50] sm:$0xff] %v6564_v61  ;;  %2222 = vmatprep.mubr.bf16.mxu0 %v15421_v43 }
 0x58f   : > { %7908 = vst [vmem:[#allocation5 + $0x1250] sm:$0xff] %v7140_v36  ;;  %4142 = vmatprep.mubr.bf16.mxu1 %v15421_v43 }
 0x590   : > { %v1954_v21 = vpop.f32.mrb[16].mxu0 }
 0x591   : > { %v3874_v35 = vpop.f32.mrb[16].mxu1  ;;  %v1956_v26 = vpop.f32.mrb[17].mxu0 }
 0x592   : > { %v3876_v27 = vpop.f32.mrb[17].mxu1  ;;  %v1958_v14 = vpop.f32.mrb[18].mxu0 }
 0x593   : > { %v3878_v31 = vpop.f32.mrb[18].mxu1  ;;  %v6566_v59 = vpack.c.bf16 %v1958_v14, %v1954_v21  ;;  %v1960_v47 = vpop.f32.mrb[19].mxu0 }
 0x594   : > { %v7142_v49 = vpack.c.bf16 %v3878_v31, %v3874_v35  ;;  %v3880_v62 = vpop.f32.mrb[19].mxu1  ;;  %v6567_v56 = vpack.c.bf16 %v1960_v47, %v1956_v26  ;;  %v1498_v26 = vld [vmem:[#allocation4 + $0x110] sm:$0xff] }
 0x595   : > { %v7143_v4 = vpack.c.bf16 %v3880_v62, %v3876_v27  ;;  %7334 = vst [vmem:[#allocation5 + $0x60] sm:$0xff] %v6566_v59  ;;  %2223 = vmatmul.mubr.bf16.gmra.mrb[124].mxu0 %v1495_v20  ;;  %v1690_v27 = vld [vmem:[#allocation4 + $0x710] sm:$0xff] }
 0x596   : > { %7910 = vst [vmem:[#allocation5 + $0x1260] sm:$0xff] %v7142_v49  ;;  %4143 = vmatmul.mubr.bf16.gmra.mrb[124].mxu1 %v1687_v0  ;;  %7335 = vst [vmem:[#allocation5 + $0x68] sm:$0xff] %v6567_v56  ;;  %2232 = vmatprep.mubr.bf16.mxu0 %v15421_v43 }
 0x597   : > { %7911 = vst [vmem:[#allocation5 + $0x1268] sm:$0xff] %v7143_v4  ;;  %4152 = vmatprep.mubr.bf16.mxu1 %v15421_v43 }
 0x598   : > { %v1964_v50 = vpop.f32.mrb[20].mxu0 }
 0x599   : > { %v3884_v44 = vpop.f32.mrb[20].mxu1  ;;  %v1966_v12 = vpop.f32.mrb[21].mxu0 }
 0x59a   : > { %v3886_v34 = vpop.f32.mrb[21].mxu1  ;;  %v1968_v29 = vpop.f32.mrb[22].mxu0 }
 0x59b   : > { %v3888_v38 = vpop.f32.mrb[22].mxu1  ;;  %v6569_v40 = vpack.c.bf16 %v1968_v29, %v1964_v50  ;;  %v1970_v54 = vpop.f32.mrb[23].mxu0 }
 0x59c   : > { %v7145_v57 = vpack.c.bf16 %v3888_v38, %v3884_v44  ;;  %v3890_v24 = vpop.f32.mrb[23].mxu1  ;;  %v6570_v10 = vpack.c.bf16 %v1970_v54, %v1966_v12  ;;  %v1499_v12 = vld [vmem:[#allocation4 + $0x118] sm:$0xff] }
 0x59d   : > { %v7146_v25 = vpack.c.bf16 %v3890_v24, %v3886_v34  ;;  %7337 = vst [vmem:[#allocation5 + $0x78] sm:$0xff] %v6569_v40  ;;  %2233 = vmatmul.mubr.bf16.gmra.mrb[128].mxu0 %v1496_v63  ;;  %v1691_v34 = vld [vmem:[#allocation4 + $0x718] sm:$0xff] }
 0x59e   : > { %7913 = vst [vmem:[#allocation5 + $0x1278] sm:$0xff] %v7145_v57  ;;  %4153 = vmatmul.mubr.bf16.gmra.mrb[128].mxu1 %v1688_v18  ;;  %7338 = vst [vmem:[#allocation5 + $0x80] sm:$0xff] %v6570_v10  ;;  %2242 = vmatprep.mubr.bf16.mxu0 %v15421_v43 }
 0x59f   : > { %7914 = vst [vmem:[#allocation5 + $0x1280] sm:$0xff] %v7146_v25  ;;  %4162 = vmatprep.mubr.bf16.mxu1 %v15421_v43 }
 0x5a0   : > { %v1974_v51 = vpop.f32.mrb[24].mxu0 }
 0x5a1   : > { %v3894_v28 = vpop.f32.mrb[24].mxu1  ;;  %v1976_v60 = vpop.f32.mrb[25].mxu0 }
 0x5a2   : > { %v3896_v41 = vpop.f32.mrb[25].mxu1  ;;  %v1978_v32 = vpop.f32.mrb[26].mxu0 }
 0x5a3   : > { %v3898_v11 = vpop.f32.mrb[26].mxu1  ;;  %v6572_v1 = vpack.c.bf16 %v1978_v32, %v1974_v51  ;;  %v1980_v42 = vpop.f32.mrb[27].mxu0 }
 0x5a4   : > { %v7148_v30 = vpack.c.bf16 %v3898_v11, %v3894_v28  ;;  %v3900_v45 = vpop.f32.mrb[27].mxu1  ;;  %v6573_v39 = vpack.c.bf16 %v1980_v42, %v1976_v60  ;;  %v1500_v28 = vld [vmem:[#allocation4 + $0x120] sm:$0xff] }
 0x5a5   : > { %v7149_v3 = vpack.c.bf16 %v3900_v45, %v3896_v41  ;;  %7340 = vst [vmem:[#allocation5 + $0x90] sm:$0xff] %v6572_v1  ;;  %2243 = vmatmul.mubr.bf16.gmra.mrb[132].mxu0 %v1497_v33  ;;  %v1692_v60 = vld [vmem:[#allocation4 + $0x720] sm:$0xff] }
 0x5a6   : > { %7916 = vst [vmem:[#allocation5 + $0x1290] sm:$0xff] %v7148_v30  ;;  %4163 = vmatmul.mubr.bf16.gmra.mrb[132].mxu1 %v1689_v13  ;;  %7341 = vst [vmem:[#allocation5 + $0x98] sm:$0xff] %v6573_v39  ;;  %2252 = vmatprep.mubr.bf16.mxu0 %v15421_v43 }
 0x5a7   : > { %7917 = vst [vmem:[#allocation5 + $0x1298] sm:$0xff] %v7149_v3  ;;  %4172 = vmatprep.mubr.bf16.mxu1 %v15421_v43 }
 0x5a8   : > { %v1984_v2 = vpop.f32.mrb[28].mxu0 }
 0x5a9   : > { %v3904_v15 = vpop.f32.mrb[28].mxu1  ;;  %v1986_v61 = vpop.f32.mrb[29].mxu0 }
 0x5aa   : > { %v3906_v36 = vpop.f32.mrb[29].mxu1  ;;  %v1988_v21 = vpop.f32.mrb[30].mxu0 }
 0x5ab   : > { %v3908_v35 = vpop.f32.mrb[30].mxu1  ;;  %v6575_v14 = vpack.c.bf16 %v1988_v21, %v1984_v2  ;;  %v1990_v20 = vpop.f32.mrb[31].mxu0 }
 0x5ac   : > { %v7151_v31 = vpack.c.bf16 %v3908_v35, %v3904_v15  ;;  %v3910_v0 = vpop.f32.mrb[31].mxu1  ;;  %v6576_v59 = vpack.c.bf16 %v1990_v20, %v1986_v61  ;;  %v1501_v15 = vld [vmem:[#allocation4 + $0x128] sm:$0xff] }
 0x5ad   : > { %v7152_v49 = vpack.c.bf16 %v3910_v0, %v3906_v36  ;;  %7343 = vst [vmem:[#allocation5 + $0xa8] sm:$0xff] %v6575_v14  ;;  %2253 = vmatmul.mubr.bf16.gmra.mrb[136].mxu0 %v1498_v26  ;;  %v1693_v61 = vld [vmem:[#allocation4 + $0x728] sm:$0xff] }
 0x5ae   : > { %7919 = vst [vmem:[#allocation5 + $0x12a8] sm:$0xff] %v7151_v31  ;;  %4173 = vmatmul.mubr.bf16.gmra.mrb[136].mxu1 %v1690_v27  ;;  %7344 = vst [vmem:[#allocation5 + $0xb0] sm:$0xff] %v6576_v59  ;;  %2262 = vmatprep.mubr.bf16.mxu0 %v15421_v43 }
 0x5af   : > { %7920 = vst [vmem:[#allocation5 + $0x12b0] sm:$0xff] %v7152_v49  ;;  %4182 = vmatprep.mubr.bf16.mxu1 %v15421_v43 }
 0x5b0   : > { %v1994_v47 = vpop.f32.mrb[32].mxu0 }
 0x5b1   : > { %v3914_v62 = vpop.f32.mrb[32].mxu1  ;;  %v1996_v56 = vpop.f32.mrb[33].mxu0 }
 0x5b2   : > { %v3916_v4 = vpop.f32.mrb[33].mxu1  ;;  %v1998_v50 = vpop.f32.mrb[34].mxu0 }
 0x5b3   : > { %v3918_v44 = vpop.f32.mrb[34].mxu1  ;;  %v6578_v29 = vpack.c.bf16 %v1998_v50, %v1994_v47  ;;  %v2000_v63 = vpop.f32.mrb[35].mxu0 }
 0x5b4   : > { %v7154_v38 = vpack.c.bf16 %v3918_v44, %v3914_v62  ;;  %v3920_v18 = vpop.f32.mrb[35].mxu1  ;;  %v6579_v40 = vpack.c.bf16 %v2000_v63, %v1996_v56  ;;  %v1502_v62 = vld [vmem:[#allocation4 + $0x130] sm:$0xff] }
 0x5b5   : > { %v7155_v57 = vpack.c.bf16 %v3920_v18, %v3916_v4  ;;  %7346 = vst [vmem:[#allocation5 + $0xc0] sm:$0xff] %v6578_v29  ;;  %2263 = vmatmul.mubr.bf16.gmra.mrb[140].mxu0 %v1499_v12  ;;  %v1694_v56 = vld [vmem:[#allocation4 + $0x730] sm:$0xff] }
 0x5b6   : > { %7922 = vst [vmem:[#allocation5 + $0x12c0] sm:$0xff] %v7154_v38  ;;  %4183 = vmatmul.mubr.bf16.gmra.mrb[140].mxu1 %v1691_v34  ;;  %7347 = vst [vmem:[#allocation5 + $0xc8] sm:$0xff] %v6579_v40  ;;  %2272 = vmatprep.mubr.bf16.mxu0 %v15421_v43 }
 0x5b7   : > { %7923 = vst [vmem:[#allocation5 + $0x12c8] sm:$0xff] %v7155_v57  ;;  %4192 = vmatprep.mubr.bf16.mxu1 %v15421_v43 }
 0x5b8   : > { %v2004_v54 = vpop.f32.mrb[36].mxu0 }
 0x5b9   : > { %v3924_v24 = vpop.f32.mrb[36].mxu1  ;;  %v2006_v10 = vpop.f32.mrb[37].mxu0 }
 0x5ba   : > { %v3926_v25 = vpop.f32.mrb[37].mxu1  ;;  %v2008_v48 = vpop.f32.mrb[38].mxu0 }
 0x5bb   : > { %v3928_v51 = vpop.f32.mrb[38].mxu1  ;;  %v6581_v41 = vpack.c.bf16 %v2008_v48, %v2004_v54  ;;  %v2010_v11 = vpop.f32.mrb[39].mxu0 }
 0x5bc   : > { %v7157_v32 = vpack.c.bf16 %v3928_v51, %v3924_v24  ;;  %v3930_v33 = vpop.f32.mrb[39].mxu1  ;;  %v6582_v13 = vpack.c.bf16 %v2010_v11, %v2006_v10  ;;  %v1503_v24 = vld [vmem:[#allocation4 + $0x138] sm:$0xff] }
 0x5bd   : > { %v7158_v1 = vpack.c.bf16 %v3930_v33, %v3926_v25  ;;  %7349 = vst [vmem:[#allocation5 + $0xd8] sm:$0xff] %v6581_v41  ;;  %2273 = vmatmul.mubr.bf16.gmra.mrb[144].mxu0 %v1500_v28  ;;  %v1695_v10 = vld [vmem:[#allocation4 + $0x738] sm:$0xff] }
 0x5be   : > { %7925 = vst [vmem:[#allocation5 + $0x12d8] sm:$0xff] %v7157_v32  ;;  %4193 = vmatmul.mubr.bf16.gmra.mrb[144].mxu1 %v1692_v60  ;;  %7350 = vst [vmem:[#allocation5 + $0xe0] sm:$0xff] %v6582_v13  ;;  %2282 = vmatprep.mubr.bf16.mxu0 %v15421_v43 }
 0x5bf   : > { %7926 = vst [vmem:[#allocation5 + $0x12e0] sm:$0xff] %v7158_v1  ;;  %4202 = vmatprep.mubr.bf16.mxu1 %v15421_v43 }
 0x5c0   : > { %v2014_v30 = vpop.f32.mrb[40].mxu0 }
 0x5c1   : > { %v3934_v42 = vpop.f32.mrb[40].mxu1  ;;  %v2016_v45 = vpop.f32.mrb[41].mxu0 }
 0x5c2   : > { %v3936_v39 = vpop.f32.mrb[41].mxu1  ;;  %v2018_v3 = vpop.f32.mrb[42].mxu0 }
 0x5c3   : > { %v3938_v2 = vpop.f32.mrb[42].mxu1  ;;  %v6584_v36 = vpack.c.bf16 %v2018_v3, %v2014_v30  ;;  %v2020_v35 = vpop.f32.mrb[43].mxu0 }
 0x5c4   : > { %v7160_v21 = vpack.c.bf16 %v3938_v2, %v3934_v42  ;;  %v3940_v26 = vpop.f32.mrb[43].mxu1  ;;  %v6585_v27 = vpack.c.bf16 %v2020_v35, %v2016_v45  ;;  %v1504_v42 = vld [vmem:[#allocation4 + $0x140] sm:$0xff] }
 0x5c5   : > { %v7161_v14 = vpack.c.bf16 %v3940_v26, %v3936_v39  ;;  %7352 = vst [vmem:[#allocation5 + $0xf0] sm:$0xff] %v6584_v36  ;;  %2283 = vmatmul.mubr.bf16.gmra.mrb[148].mxu0 %v1501_v15  ;;  %v1696_v45 = vld [vmem:[#allocation4 + $0x740] sm:$0xff] }
 0x5c6   : > { %7928 = vst [vmem:[#allocation5 + $0x12f0] sm:$0xff] %v7160_v21  ;;  %4203 = vmatmul.mubr.bf16.gmra.mrb[148].mxu1 %v1693_v61  ;;  %7353 = vst [vmem:[#allocation5 + $0xf8] sm:$0xff] %v6585_v27  ;;  %2292 = vmatprep.mubr.bf16.mxu0 %v15421_v43  ;;  %v12122_v21 = vld [vmem:[%s15349_s3 + $0xb0] ss:$12 sps:$4 sm:$0xff]  }
 0x5c7   : > { %7929 = vst [vmem:[#allocation5 + $0x12f8] sm:$0xff] %v7161_v14  ;;  %4212 = vmatprep.mubr.bf16.mxu1 %v15421_v43  ;;  %11167 = vmatprep.subr.bf16.mxu1 %v12122_v21 }
 0x5c8   : > { %v2024_v31 = vpop.f32.mrb[44].mxu0  ;;  %11168 = vmatpush3.bf16.msra.mxu1 %v12122_v21 }
 0x5c9   : > { %v3944_v20 = vpop.f32.mrb[44].mxu1  ;;  %v2026_v0 = vpop.f32.mrb[45].mxu0 }
 0x5ca   : > { %v3946_v59 = vpop.f32.mrb[45].mxu1  ;;  %v2028_v49 = vpop.f32.mrb[46].mxu0 }
 0x5cb   : > { %v3948_v47 = vpop.f32.mrb[46].mxu1  ;;  %v6587_v4 = vpack.c.bf16 %v2028_v49, %v2024_v31  ;;  %v2030_v44 = vpop.f32.mrb[47].mxu0 }
 0x5cc   : > { %v7163_v50 = vpack.c.bf16 %v3948_v47, %v3944_v20  ;;  %v3950_v12 = vpop.f32.mrb[47].mxu1  ;;  %v6588_v34 = vpack.c.bf16 %v2030_v44, %v2026_v0  ;;  %v1505_v0 = vld [vmem:[#allocation4 + $0x148] sm:$0xff] }
 0x5cd   : > { %v7164_v29 = vpack.c.bf16 %v3950_v12, %v3946_v59  ;;  %7355 = vst [vmem:[#allocation5 + $0x108] sm:$0xff] %v6587_v4  ;;  %2293 = vmatmul.mubr.bf16.gmra.mrb[152].mxu0 %v1502_v62  ;;  %v1697_v59 = vld [vmem:[#allocation4 + $0x748] sm:$0xff] }
 0x5ce   : > { %7931 = vst [vmem:[#allocation5 + $0x1308] sm:$0xff] %v7163_v50  ;;  %4213 = vmatmul.mubr.bf16.gmra.mrb[152].mxu1 %v1694_v56  ;;  %7356 = vst [vmem:[#allocation5 + $0x110] sm:$0xff] %v6588_v34  ;;  %2302 = vmatprep.mubr.bf16.mxu0 %v15421_v43 }
 0x5cf   : > { %7932 = vst [vmem:[#allocation5 + $0x1310] sm:$0xff] %v7164_v29  ;;  %4222 = vmatprep.mubr.bf16.mxu1 %v15421_v43 }
 0x5d0   : > { %v2034_v38 = vpop.f32.mrb[48].mxu0 }
 0x5d1   : > { %v3954_v63 = vpop.f32.mrb[48].mxu1  ;;  %v2036_v18 = vpop.f32.mrb[49].mxu0 }
 0x5d2   : > { %v3956_v40 = vpop.f32.mrb[49].mxu1  ;;  %v2038_v57 = vpop.f32.mrb[50].mxu0 }
 0x5d3   : > { %v3958_v54 = vpop.f32.mrb[50].mxu1  ;;  %v6590_v25 = vpack.c.bf16 %v2038_v57, %v2034_v38  ;;  %v2040_v51 = vpop.f32.mrb[51].mxu0 }
 0x5d4   : > { %v7166_v48 = vpack.c.bf16 %v3958_v54, %v3954_v63  ;;  %v3960_v28 = vpop.f32.mrb[51].mxu1  ;;  %v6591_v60 = vpack.c.bf16 %v2040_v51, %v2036_v18  ;;  %v1506_v18 = vld [vmem:[#allocation4 + $0x150] sm:$0xff] }
 0x5d5   : > { %v7167_v41 = vpack.c.bf16 %v3960_v28, %v3956_v40  ;;  %7358 = vst [vmem:[#allocation5 + $0x120] sm:$0xff] %v6590_v25  ;;  %2303 = vmatmul.mubr.bf16.gmra.mrb[156].mxu0 %v1503_v24  ;;  %v1698_v40 = vld [vmem:[#allocation4 + $0x750] sm:$0xff] }
 0x5d6   : > { %7934 = vst [vmem:[#allocation5 + $0x1320] sm:$0xff] %v7166_v48  ;;  %4223 = vmatmul.mubr.bf16.gmra.mrb[156].mxu1 %v1695_v10  ;;  %7359 = vst [vmem:[#allocation5 + $0x128] sm:$0xff] %v6591_v60  ;;  %2312 = vmatprep.mubr.bf16.mxu0 %v15421_v43 }
 0x5d7   : > { %7935 = vst [vmem:[#allocation5 + $0x1328] sm:$0xff] %v7167_v41  ;;  %4232 = vmatprep.mubr.bf16.mxu1 %v15421_v43 }
 0x5d8   : > { %v2044_v32 = vpop.f32.mrb[52].mxu0 }
 0x5d9   : > { %v3964_v11 = vpop.f32.mrb[52].mxu1  ;;  %v2046_v33 = vpop.f32.mrb[53].mxu0 }
 0x5da   : > { %v3966_v13 = vpop.f32.mrb[53].mxu1  ;;  %v2048_v1 = vpop.f32.mrb[54].mxu0 }
 0x5db   : > { %v3968_v30 = vpop.f32.mrb[54].mxu1  ;;  %v6593_v39 = vpack.c.bf16 %v2048_v1, %v2044_v32  ;;  %v2050_v2 = vpop.f32.mrb[55].mxu0 }
 0x5dc   : > { %v7169_v3 = vpack.c.bf16 %v3968_v30, %v3964_v11  ;;  %v3970_v15 = vpop.f32.mrb[55].mxu1  ;;  %v6594_v61 = vpack.c.bf16 %v2050_v2, %v2046_v33  ;;  %v1507_v33 = vld [vmem:[#allocation4 + $0x158] sm:$0xff] }
 0x5dd   : > { %v7170_v36 = vpack.c.bf16 %v3970_v15, %v3966_v13  ;;  %7361 = vst [vmem:[#allocation5 + $0x138] sm:$0xff] %v6593_v39  ;;  %2313 = vmatmul.mubr.bf16.gmra.mrb[160].mxu0 %v1504_v42  ;;  %v1699_v13 = vld [vmem:[#allocation4 + $0x758] sm:$0xff] }
 0x5de   : > { %7937 = vst [vmem:[#allocation5 + $0x1338] sm:$0xff] %v7169_v3  ;;  %4233 = vmatmul.mubr.bf16.gmra.mrb[160].mxu1 %v1696_v45  ;;  %7362 = vst [vmem:[#allocation5 + $0x140] sm:$0xff] %v6594_v61  ;;  %2322 = vmatprep.mubr.bf16.mxu0 %v15421_v43 }
 0x5df   : > { %7938 = vst [vmem:[#allocation5 + $0x1340] sm:$0xff] %v7170_v36  ;;  %4242 = vmatprep.mubr.bf16.mxu1 %v15421_v43 }
 0x5e0   : > { %v2054_v35 = vpop.f32.mrb[56].mxu0 }
 0x5e1   : > { %v3974_v26 = vpop.f32.mrb[56].mxu1  ;;  %v2056_v27 = vpop.f32.mrb[57].mxu0 }
 0x5e2   : > { %v3976_v14 = vpop.f32.mrb[57].mxu1  ;;  %v2058_v31 = vpop.f32.mrb[58].mxu0 }
 0x5e3   : > { %v3978_v20 = vpop.f32.mrb[58].mxu1  ;;  %v6596_v49 = vpack.c.bf16 %v2058_v31, %v2054_v35  ;;  %v2060_v62 = vpop.f32.mrb[59].mxu0 }
 0x5e4   : > { %v7172_v47 = vpack.c.bf16 %v3978_v20, %v3974_v26  ;;  %v3980_v56 = vpop.f32.mrb[59].mxu1  ;;  %v6597_v4 = vpack.c.bf16 %v2060_v62, %v2056_v27  ;;  %v1508_v26 = vld [vmem:[#allocation4 + $0x160] sm:$0xff] }
 0x5e5   : > { %v7173_v50 = vpack.c.bf16 %v3980_v56, %v3976_v14  ;;  %7364 = vst [vmem:[#allocation5 + $0x150] sm:$0xff] %v6596_v49  ;;  %2323 = vmatmul.mubr.bf16.gmra.mrb[164].mxu0 %v1505_v0  ;;  %v1700_v27 = vld [vmem:[#allocation4 + $0x760] sm:$0xff] }
 0x5e6   : > { %7940 = vst [vmem:[#allocation5 + $0x1350] sm:$0xff] %v7172_v47  ;;  %4243 = vmatmul.mubr.bf16.gmra.mrb[164].mxu1 %v1697_v59  ;;  %7365 = vst [vmem:[#allocation5 + $0x158] sm:$0xff] %v6597_v4  ;;  %2332 = vmatprep.mubr.bf16.mxu0 %v15421_v43 }
 0x5e7   : > { %7941 = vst [vmem:[#allocation5 + $0x1358] sm:$0xff] %v7173_v50  ;;  %4252 = vmatprep.mubr.bf16.mxu1 %v15421_v43 }
 0x5e8   : > { %v2064_v44 = vpop.f32.mrb[60].mxu0 }
 0x5e9   : > { %v3984_v12 = vpop.f32.mrb[60].mxu1  ;;  %v2066_v34 = vpop.f32.mrb[61].mxu0 }
 0x5ea   : > { %v3986_v29 = vpop.f32.mrb[61].mxu1  ;;  %v2068_v38 = vpop.f32.mrb[62].mxu0 }
 0x5eb   : > { %v3988_v63 = vpop.f32.mrb[62].mxu1  ;;  %v6599_v57 = vpack.c.bf16 %v2068_v38, %v2064_v44  ;;  %v2070_v24 = vpop.f32.mrb[63].mxu0 }
 0x5ec   : > { %v7175_v54 = vpack.c.bf16 %v3988_v63, %v3984_v12  ;;  %v3990_v10 = vpop.f32.mrb[63].mxu1  ;;  %v6600_v25 = vpack.c.bf16 %v2070_v24, %v2066_v34  ;;  %v1509_v12 = vld [vmem:[#allocation4 + $0x168] sm:$0xff] }
 0x5ed   : > { %v7176_v48 = vpack.c.bf16 %v3990_v10, %v3986_v29  ;;  %7367 = vst [vmem:[#allocation5 + $0x168] sm:$0xff] %v6599_v57  ;;  %2333 = vmatmul.mubr.bf16.gmra.mrb[168].mxu0 %v1506_v18  ;;  %v1701_v34 = vld [vmem:[#allocation4 + $0x768] sm:$0xff] }
 0x5ee   : > { %7943 = vst [vmem:[#allocation5 + $0x1368] sm:$0xff] %v7175_v54  ;;  %4253 = vmatmul.mubr.bf16.gmra.mrb[168].mxu1 %v1698_v40  ;;  %7368 = vst [vmem:[#allocation5 + $0x170] sm:$0xff] %v6600_v25  ;;  %2342 = vmatprep.mubr.bf16.mxu0 %v15421_v43 }
 0x5ef   : > { %7944 = vst [vmem:[#allocation5 + $0x1370] sm:$0xff] %v7176_v48  ;;  %4262 = vmatprep.mubr.bf16.mxu1 %v15421_v43 }
 0x5f0   : > { %v2074_v51 = vpop.f32.mrb[64].mxu0 }
 0x5f1   : > { %v3994_v28 = vpop.f32.mrb[64].mxu1  ;;  %v2076_v60 = vpop.f32.mrb[65].mxu0 }
 0x5f2   : > { %v3996_v41 = vpop.f32.mrb[65].mxu1  ;;  %v2078_v32 = vpop.f32.mrb[66].mxu0 }
 0x5f3   : > { %v3998_v11 = vpop.f32.mrb[66].mxu1  ;;  %v6602_v1 = vpack.c.bf16 %v2078_v32, %v2074_v51  ;;  %v2080_v42 = vpop.f32.mrb[67].mxu0 }
 0x5f4   : > { %v7178_v30 = vpack.c.bf16 %v3998_v11, %v3994_v28  ;;  %v4000_v45 = vpop.f32.mrb[67].mxu1  ;;  %v6603_v39 = vpack.c.bf16 %v2080_v42, %v2076_v60  ;;  %v1510_v28 = vld [vmem:[#allocation4 + $0x170] sm:$0xff] }
 0x5f5   : > { %v7179_v3 = vpack.c.bf16 %v4000_v45, %v3996_v41  ;;  %7370 = vst [vmem:[#allocation5 + $0x180] sm:$0xff] %v6602_v1  ;;  %2343 = vmatmul.mubr.bf16.gmra.mrb[172].mxu0 %v1507_v33  ;;  %v1702_v60 = vld [vmem:[#allocation4 + $0x770] sm:$0xff] }
 0x5f6   : > { %7946 = vst [vmem:[#allocation5 + $0x1380] sm:$0xff] %v7178_v30  ;;  %4263 = vmatmul.mubr.bf16.gmra.mrb[172].mxu1 %v1699_v13  ;;  %7371 = vst [vmem:[#allocation5 + $0x188] sm:$0xff] %v6603_v39  ;;  %2352 = vmatprep.mubr.bf16.mxu0 %v15421_v43 }
 0x5f7   : > { %7947 = vst [vmem:[#allocation5 + $0x1388] sm:$0xff] %v7179_v3  ;;  %4272 = vmatprep.mubr.bf16.mxu1 %v15421_v43 }
 0x5f8   : > { %v2084_v2 = vpop.f32.mrb[68].mxu0 }
 0x5f9   : > { %v4004_v15 = vpop.f32.mrb[68].mxu1  ;;  %v2086_v61 = vpop.f32.mrb[69].mxu0 }
 0x5fa   : > { %v4006_v36 = vpop.f32.mrb[69].mxu1  ;;  %v2088_v21 = vpop.f32.mrb[70].mxu0 }
 0x5fb   : > { %v4008_v35 = vpop.f32.mrb[70].mxu1  ;;  %v6605_v14 = vpack.c.bf16 %v2088_v21, %v2084_v2  ;;  %v2090_v20 = vpop.f32.mrb[71].mxu0 }
 0x5fc   : > { %v7181_v31 = vpack.c.bf16 %v4008_v35, %v4004_v15  ;;  %v4010_v0 = vpop.f32.mrb[71].mxu1  ;;  %v6606_v59 = vpack.c.bf16 %v2090_v20, %v2086_v61  ;;  %v1511_v15 = vld [vmem:[#allocation4 + $0x178] sm:$0xff] }
 0x5fd   : > { %v7182_v49 = vpack.c.bf16 %v4010_v0, %v4006_v36  ;;  %7373 = vst [vmem:[#allocation5 + $0x198] sm:$0xff] %v6605_v14  ;;  %2353 = vmatmul.mubr.bf16.gmra.mrb[176].mxu0 %v1508_v26  ;;  %v1703_v61 = vld [vmem:[#allocation4 + $0x778] sm:$0xff] }
 0x5fe   : > { %7949 = vst [vmem:[#allocation5 + $0x1398] sm:$0xff] %v7181_v31  ;;  %4273 = vmatmul.mubr.bf16.gmra.mrb[176].mxu1 %v1700_v27  ;;  %7374 = vst [vmem:[#allocation5 + $0x1a0] sm:$0xff] %v6606_v59  ;;  %2362 = vmatprep.mubr.bf16.mxu0 %v15421_v43 }
 0x5ff   : > { %7950 = vst [vmem:[#allocation5 + $0x13a0] sm:$0xff] %v7182_v49  ;;  %4282 = vmatprep.mubr.bf16.mxu1 %v15421_v43 }
 0x600   : > { %v2094_v47 = vpop.f32.mrb[72].mxu0 }
 0x601   : > { %v4014_v62 = vpop.f32.mrb[72].mxu1  ;;  %v2096_v56 = vpop.f32.mrb[73].mxu0 }
 0x602   : > { %v4016_v4 = vpop.f32.mrb[73].mxu1  ;;  %v2098_v50 = vpop.f32.mrb[74].mxu0 }
 0x603   : > { %v4018_v44 = vpop.f32.mrb[74].mxu1  ;;  %v6608_v29 = vpack.c.bf16 %v2098_v50, %v2094_v47  ;;  %v2100_v63 = vpop.f32.mrb[75].mxu0 }
 0x604   : > { %v7184_v38 = vpack.c.bf16 %v4018_v44, %v4014_v62  ;;  %v4020_v18 = vpop.f32.mrb[75].mxu1  ;;  %v6609_v40 = vpack.c.bf16 %v2100_v63, %v2096_v56  ;;  %v1512_v62 = vld [vmem:[#allocation4 + $0x180] sm:$0xff] }
 0x605   : > { %v7185_v57 = vpack.c.bf16 %v4020_v18, %v4016_v4  ;;  %7376 = vst [vmem:[#allocation5 + $0x1b0] sm:$0xff] %v6608_v29  ;;  %2363 = vmatmul.mubr.bf16.gmra.mrb[180].mxu0 %v1509_v12  ;;  %v1704_v56 = vld [vmem:[#allocation4 + $0x780] sm:$0xff] }
 0x606   : > { %7952 = vst [vmem:[#allocation5 + $0x13b0] sm:$0xff] %v7184_v38  ;;  %4283 = vmatmul.mubr.bf16.gmra.mrb[180].mxu1 %v1701_v34  ;;  %7377 = vst [vmem:[#allocation5 + $0x1b8] sm:$0xff] %v6609_v40  ;;  %2372 = vmatprep.mubr.bf16.mxu0 %v15421_v43 }
 0x607   : > { %7953 = vst [vmem:[#allocation5 + $0x13b8] sm:$0xff] %v7185_v57  ;;  %4292 = vmatprep.mubr.bf16.mxu1 %v15421_v43 }
 0x608   : > { %v2104_v54 = vpop.f32.mrb[76].mxu0 }
 0x609   : > { %v4024_v24 = vpop.f32.mrb[76].mxu1  ;;  %v2106_v10 = vpop.f32.mrb[77].mxu0 }
 0x60a   : > { %v4026_v25 = vpop.f32.mrb[77].mxu1  ;;  %v2108_v48 = vpop.f32.mrb[78].mxu0 }
 0x60b   : > { %v4028_v51 = vpop.f32.mrb[78].mxu1  ;;  %v6611_v41 = vpack.c.bf16 %v2108_v48, %v2104_v54  ;;  %v2110_v11 = vpop.f32.mrb[79].mxu0 }
 0x60c   : > { %v7187_v32 = vpack.c.bf16 %v4028_v51, %v4024_v24  ;;  %v4030_v33 = vpop.f32.mrb[79].mxu1  ;;  %v6612_v13 = vpack.c.bf16 %v2110_v11, %v2106_v10  ;;  %v1513_v24 = vld [vmem:[#allocation4 + $0x188] sm:$0xff] }
 0x60d   : > { %v7188_v1 = vpack.c.bf16 %v4030_v33, %v4026_v25  ;;  %7379 = vst [vmem:[#allocation5 + $0x1c8] sm:$0xff] %v6611_v41  ;;  %2373 = vmatmul.mubr.bf16.gmra.mrb[184].mxu0 %v1510_v28  ;;  %v1705_v10 = vld [vmem:[#allocation4 + $0x788] sm:$0xff] }
 0x60e   : > { %7955 = vst [vmem:[#allocation5 + $0x13c8] sm:$0xff] %v7187_v32  ;;  %4293 = vmatmul.mubr.bf16.gmra.mrb[184].mxu1 %v1702_v60  ;;  %7380 = vst [vmem:[#allocation5 + $0x1d0] sm:$0xff] %v6612_v13  ;;  %2382 = vmatprep.mubr.bf16.mxu0 %v15421_v43 }
 0x60f   : > { %7956 = vst [vmem:[#allocation5 + $0x13d0] sm:$0xff] %v7188_v1  ;;  %4302 = vmatprep.mubr.bf16.mxu1 %v15421_v43 }
 0x610   : > { %v2114_v30 = vpop.f32.mrb[80].mxu0 }
 0x611   : > { %v4034_v42 = vpop.f32.mrb[80].mxu1  ;;  %v2116_v45 = vpop.f32.mrb[81].mxu0 }
 0x612   : > { %v4036_v39 = vpop.f32.mrb[81].mxu1  ;;  %v2118_v3 = vpop.f32.mrb[82].mxu0 }
 0x613   : > { %v4038_v2 = vpop.f32.mrb[82].mxu1  ;;  %v6614_v36 = vpack.c.bf16 %v2118_v3, %v2114_v30  ;;  %v2120_v35 = vpop.f32.mrb[83].mxu0 }
 0x614   : > { %v7190_v21 = vpack.c.bf16 %v4038_v2, %v4034_v42  ;;  %v4040_v26 = vpop.f32.mrb[83].mxu1  ;;  %v6615_v27 = vpack.c.bf16 %v2120_v35, %v2116_v45  ;;  %v1514_v42 = vld [vmem:[#allocation4 + $0x190] sm:$0xff] }
 0x615   : > { %v7191_v14 = vpack.c.bf16 %v4040_v26, %v4036_v39  ;;  %7382 = vst [vmem:[#allocation5 + $0x1e0] sm:$0xff] %v6614_v36  ;;  %2383 = vmatmul.mubr.bf16.gmra.mrb[188].mxu0 %v1511_v15  ;;  %v1706_v45 = vld [vmem:[#allocation4 + $0x790] sm:$0xff] }
 0x616   : > { %7958 = vst [vmem:[#allocation5 + $0x13e0] sm:$0xff] %v7190_v21  ;;  %4303 = vmatmul.mubr.bf16.gmra.mrb[188].mxu1 %v1703_v61  ;;  %7383 = vst [vmem:[#allocation5 + $0x1e8] sm:$0xff] %v6615_v27  ;;  %2392 = vmatprep.mubr.bf16.mxu0 %v15421_v43 }
 0x617   : > { %7959 = vst [vmem:[#allocation5 + $0x13e8] sm:$0xff] %v7191_v14  ;;  %4312 = vmatprep.mubr.bf16.mxu1 %v15421_v43 }
 0x618   : > { %v2124_v31 = vpop.f32.mrb[84].mxu0 }
 0x619   : > { %v4044_v20 = vpop.f32.mrb[84].mxu1  ;;  %v2126_v0 = vpop.f32.mrb[85].mxu0 }
 0x61a   : > { %v4046_v59 = vpop.f32.mrb[85].mxu1  ;;  %v2128_v49 = vpop.f32.mrb[86].mxu0 }
 0x61b   : > { %v4048_v47 = vpop.f32.mrb[86].mxu1  ;;  %v6617_v4 = vpack.c.bf16 %v2128_v49, %v2124_v31  ;;  %v2130_v44 = vpop.f32.mrb[87].mxu0 }
 0x61c   : > { %v7193_v50 = vpack.c.bf16 %v4048_v47, %v4044_v20  ;;  %v4050_v12 = vpop.f32.mrb[87].mxu1  ;;  %v6618_v34 = vpack.c.bf16 %v2130_v44, %v2126_v0  ;;  %v1515_v20 = vld [vmem:[#allocation4 + $0x198] sm:$0xff] }
 0x61d   : > { %v7194_v29 = vpack.c.bf16 %v4050_v12, %v4046_v59  ;;  %7385 = vst [vmem:[#allocation5 + $0x1f8] sm:$0xff] %v6617_v4  ;;  %2393 = vmatmul.mubr.bf16.gmra.mrb[192].mxu0 %v1512_v62  ;;  %v1707_v0 = vld [vmem:[#allocation4 + $0x798] sm:$0xff] }
 0x61e   : > { %7961 = vst [vmem:[#allocation5 + $0x13f8] sm:$0xff] %v7193_v50  ;;  %4313 = vmatmul.mubr.bf16.gmra.mrb[192].mxu1 %v1704_v56  ;;  %7386 = vst [vmem:[#allocation5 + $0x200] sm:$0xff] %v6618_v34  ;;  %2402 = vmatprep.mubr.bf16.mxu0 %v15421_v43 }
 0x61f   : > { %7962 = vst [vmem:[#allocation5 + $0x1400] sm:$0xff] %v7194_v29  ;;  %4322 = vmatprep.mubr.bf16.mxu1 %v15421_v43 }
 0x620   : > { %v2134_v38 = vpop.f32.mrb[88].mxu0 }
 0x621   : > { %v4054_v63 = vpop.f32.mrb[88].mxu1  ;;  %v2136_v18 = vpop.f32.mrb[89].mxu0 }
 0x622   : > { %v4056_v40 = vpop.f32.mrb[89].mxu1  ;;  %v2138_v57 = vpop.f32.mrb[90].mxu0 }
 0x623   : > { %v4058_v54 = vpop.f32.mrb[90].mxu1  ;;  %v6620_v25 = vpack.c.bf16 %v2138_v57, %v2134_v38  ;;  %v2140_v51 = vpop.f32.mrb[91].mxu0 }
 0x624   : > { %v7196_v48 = vpack.c.bf16 %v4058_v54, %v4054_v63  ;;  %v4060_v28 = vpop.f32.mrb[91].mxu1  ;;  %v6621_v60 = vpack.c.bf16 %v2140_v51, %v2136_v18  ;;  %v1516_v63 = vld [vmem:[#allocation4 + $0x1a0] sm:$0xff] }
 0x625   : > { %v7197_v41 = vpack.c.bf16 %v4060_v28, %v4056_v40  ;;  %7388 = vst [vmem:[#allocation5 + $0x210] sm:$0xff] %v6620_v25  ;;  %2403 = vmatmul.mubr.bf16.gmra.mrb[196].mxu0 %v1513_v24  ;;  %v1708_v18 = vld [vmem:[#allocation4 + $0x7a0] sm:$0xff] }
 0x626   : > { %7964 = vst [vmem:[#allocation5 + $0x1410] sm:$0xff] %v7196_v48  ;;  %4323 = vmatmul.mubr.bf16.gmra.mrb[196].mxu1 %v1705_v10  ;;  %7389 = vst [vmem:[#allocation5 + $0x218] sm:$0xff] %v6621_v60  ;;  %2412 = vmatprep.mubr.bf16.mxu0 %v15421_v43 }
 0x627   : > { %7965 = vst [vmem:[#allocation5 + $0x1418] sm:$0xff] %v7197_v41  ;;  %4332 = vmatprep.mubr.bf16.mxu1 %v15421_v43 }
 0x628   : > { %v2144_v32 = vpop.f32.mrb[92].mxu0 }
 0x629   : > { %v4064_v11 = vpop.f32.mrb[92].mxu1  ;;  %v2146_v33 = vpop.f32.mrb[93].mxu0 }
 0x62a   : > { %v4066_v13 = vpop.f32.mrb[93].mxu1  ;;  %v2148_v1 = vpop.f32.mrb[94].mxu0 }
 0x62b   : > { %v4068_v30 = vpop.f32.mrb[94].mxu1  ;;  %v6623_v39 = vpack.c.bf16 %v2148_v1, %v2144_v32  ;;  %v2150_v2 = vpop.f32.mrb[95].mxu0 }
 0x62c   : > { %v7199_v3 = vpack.c.bf16 %v4068_v30, %v4064_v11  ;;  %v4070_v15 = vpop.f32.mrb[95].mxu1  ;;  %v6624_v61 = vpack.c.bf16 %v2150_v2, %v2146_v33  ;;  %v1517_v11 = vld [vmem:[#allocation4 + $0x1a8] sm:$0xff] }
 0x62d   : > { %v7200_v36 = vpack.c.bf16 %v4070_v15, %v4066_v13  ;;  %7391 = vst [vmem:[#allocation5 + $0x228] sm:$0xff] %v6623_v39  ;;  %2413 = vmatmul.mubr.bf16.gmra.mrb[200].mxu0 %v1514_v42  ;;  %v1709_v33 = vld [vmem:[#allocation4 + $0x7a8] sm:$0xff] }
 0x62e   : > { %7967 = vst [vmem:[#allocation5 + $0x1428] sm:$0xff] %v7199_v3  ;;  %4333 = vmatmul.mubr.bf16.gmra.mrb[200].mxu1 %v1706_v45  ;;  %7392 = vst [vmem:[#allocation5 + $0x230] sm:$0xff] %v6624_v61  ;;  %2422 = vmatprep.mubr.bf16.mxu0 %v15421_v43 }
 0x62f   : > { %7968 = vst [vmem:[#allocation5 + $0x1430] sm:$0xff] %v7200_v36  ;;  %4342 = vmatprep.mubr.bf16.mxu1 %v15421_v43 }
 0x630   : > { %v2154_v21 = vpop.f32.mrb[96].mxu0 }
 0x631   : > { %v4074_v35 = vpop.f32.mrb[96].mxu1  ;;  %v2156_v26 = vpop.f32.mrb[97].mxu0 }
 0x632   : > { %v4076_v27 = vpop.f32.mrb[97].mxu1  ;;  %v2158_v14 = vpop.f32.mrb[98].mxu0 }
 0x633   : > { %v4078_v31 = vpop.f32.mrb[98].mxu1  ;;  %v6626_v59 = vpack.c.bf16 %v2158_v14, %v2154_v21  ;;  %v2160_v47 = vpop.f32.mrb[99].mxu0 }
 0x634   : > { %v7202_v49 = vpack.c.bf16 %v4078_v31, %v4074_v35  ;;  %v4080_v62 = vpop.f32.mrb[99].mxu1  ;;  %v6627_v56 = vpack.c.bf16 %v2160_v47, %v2156_v26  ;;  %v1518_v35 = vld [vmem:[#allocation4 + $0x1b0] sm:$0xff] }
 0x635   : > { %v7203_v4 = vpack.c.bf16 %v4080_v62, %v4076_v27  ;;  %7394 = vst [vmem:[#allocation5 + $0x240] sm:$0xff] %v6626_v59  ;;  %2423 = vmatmul.mubr.bf16.gmra.mrb[204].mxu0 %v1515_v20  ;;  %v1710_v26 = vld [vmem:[#allocation4 + $0x7b0] sm:$0xff] }
 0x636   : > { %7970 = vst [vmem:[#allocation5 + $0x1440] sm:$0xff] %v7202_v49  ;;  %4343 = vmatmul.mubr.bf16.gmra.mrb[204].mxu1 %v1707_v0  ;;  %7395 = vst [vmem:[#allocation5 + $0x248] sm:$0xff] %v6627_v56  ;;  %2432 = vmatprep.mubr.bf16.mxu0 %v15421_v43 }
 0x637   : > { %7971 = vst [vmem:[#allocation5 + $0x1448] sm:$0xff] %v7203_v4  ;;  %4352 = vmatprep.mubr.bf16.mxu1 %v15421_v43 }
 0x638   : > { %v2164_v50 = vpop.f32.mrb[100].mxu0 }
 0x639   : > { %v4084_v44 = vpop.f32.mrb[100].mxu1  ;;  %v2166_v12 = vpop.f32.mrb[101].mxu0 }
 0x63a   : > { %v4086_v34 = vpop.f32.mrb[101].mxu1  ;;  %v2168_v29 = vpop.f32.mrb[102].mxu0 }
 0x63b   : > { %v4088_v38 = vpop.f32.mrb[102].mxu1  ;;  %v6629_v40 = vpack.c.bf16 %v2168_v29, %v2164_v50  ;;  %v2170_v54 = vpop.f32.mrb[103].mxu0 }
 0x63c   : > { %v7205_v57 = vpack.c.bf16 %v4088_v38, %v4084_v44  ;;  %v4090_v24 = vpop.f32.mrb[103].mxu1  ;;  %v6630_v10 = vpack.c.bf16 %v2170_v54, %v2166_v12  ;;  %v1519_v44 = vld [vmem:[#allocation4 + $0x1b8] sm:$0xff] }
 0x63d   : > { %v7206_v25 = vpack.c.bf16 %v4090_v24, %v4086_v34  ;;  %7397 = vst [vmem:[#allocation5 + $0x258] sm:$0xff] %v6629_v40  ;;  %2433 = vmatmul.mubr.bf16.gmra.mrb[208].mxu0 %v1516_v63  ;;  %v1711_v12 = vld [vmem:[#allocation4 + $0x7b8] sm:$0xff] }
 0x63e   : > { %7973 = vst [vmem:[#allocation5 + $0x1458] sm:$0xff] %v7205_v57  ;;  %4353 = vmatmul.mubr.bf16.gmra.mrb[208].mxu1 %v1708_v18  ;;  %7398 = vst [vmem:[#allocation5 + $0x260] sm:$0xff] %v6630_v10  ;;  %2442 = vmatprep.mubr.bf16.mxu0 %v15421_v43 }
 0x63f   : > { %7974 = vst [vmem:[#allocation5 + $0x1460] sm:$0xff] %v7206_v25  ;;  %4362 = vmatprep.mubr.bf16.mxu1 %v15421_v43 }
 0x640   : > { %v2174_v48 = vpop.f32.mrb[104].mxu0 }
 0x641   : > { %v4094_v51 = vpop.f32.mrb[104].mxu1  ;;  %v2176_v28 = vpop.f32.mrb[105].mxu0 }
 0x642   : > { %v4096_v60 = vpop.f32.mrb[105].mxu1  ;;  %v2178_v41 = vpop.f32.mrb[106].mxu0 }
 0x643   : > { %v4098_v32 = vpop.f32.mrb[106].mxu1  ;;  %v6632_v13 = vpack.c.bf16 %v2178_v41, %v2174_v48  ;;  %v2180_v30 = vpop.f32.mrb[107].mxu0 }
 0x644   : > { %v7208_v1 = vpack.c.bf16 %v4098_v32, %v4094_v51  ;;  %v4100_v42 = vpop.f32.mrb[107].mxu1  ;;  %v6633_v45 = vpack.c.bf16 %v2180_v30, %v2176_v28  ;;  %v1520_v51 = vld [vmem:[#allocation4 + $0x1c0] sm:$0xff] }
 0x645   : > { %v7209_v39 = vpack.c.bf16 %v4100_v42, %v4096_v60  ;;  %7400 = vst [vmem:[#allocation5 + $0x270] sm:$0xff] %v6632_v13  ;;  %2443 = vmatmul.mubr.bf16.gmra.mrb[212].mxu0 %v1517_v11  ;;  %v1712_v28 = vld [vmem:[#allocation4 + $0x7c0] sm:$0xff] }
 0x646   : > { %7976 = vst [vmem:[#allocation5 + $0x1470] sm:$0xff] %v7208_v1  ;;  %4363 = vmatmul.mubr.bf16.gmra.mrb[212].mxu1 %v1709_v33  ;;  %7401 = vst [vmem:[#allocation5 + $0x278] sm:$0xff] %v6633_v45  ;;  %2452 = vmatprep.mubr.bf16.mxu0 %v15421_v43 }
 0x647   : > { %7977 = vst [vmem:[#allocation5 + $0x1478] sm:$0xff] %v7209_v39  ;;  %4372 = vmatprep.mubr.bf16.mxu1 %v15421_v43 }
 0x648   : > { %v2184_v3 = vpop.f32.mrb[108].mxu0 }
 0x649   : > { %v4104_v2 = vpop.f32.mrb[108].mxu1  ;;  %v2186_v15 = vpop.f32.mrb[109].mxu0 }
 0x64a   : > { %v4106_v61 = vpop.f32.mrb[109].mxu1  ;;  %v2188_v36 = vpop.f32.mrb[110].mxu0 }
 0x64b   : > { %v4108_v21 = vpop.f32.mrb[110].mxu1  ;;  %v6635_v27 = vpack.c.bf16 %v2188_v36, %v2184_v3  ;;  %v2190_v31 = vpop.f32.mrb[111].mxu0 }
 0x64c   : > { %v7211_v14 = vpack.c.bf16 %v4108_v21, %v4104_v2  ;;  %v4110_v20 = vpop.f32.mrb[111].mxu1  ;;  %v6636_v0 = vpack.c.bf16 %v2190_v31, %v2186_v15  ;;  %v1521_v2 = vld [vmem:[#allocation4 + $0x1c8] sm:$0xff] }
 0x64d   : > { %v7212_v59 = vpack.c.bf16 %v4110_v20, %v4106_v61  ;;  %7403 = vst [vmem:[#allocation5 + $0x288] sm:$0xff] %v6635_v27  ;;  %2453 = vmatmul.mubr.bf16.gmra.mrb[216].mxu0 %v1518_v35  ;;  %v1713_v15 = vld [vmem:[#allocation4 + $0x7c8] sm:$0xff] }
 0x64e   : > { %7979 = vst [vmem:[#allocation5 + $0x1488] sm:$0xff] %v7211_v14  ;;  %4373 = vmatmul.mubr.bf16.gmra.mrb[216].mxu1 %v1710_v26  ;;  %7404 = vst [vmem:[#allocation5 + $0x290] sm:$0xff] %v6636_v0  ;;  %2462 = vmatprep.mubr.bf16.mxu0 %v15421_v43 }
 0x64f   : > { %7980 = vst [vmem:[#allocation5 + $0x1490] sm:$0xff] %v7212_v59  ;;  %4382 = vmatprep.mubr.bf16.mxu1 %v15421_v43 }
 0x650   : > { %v2194_v49 = vpop.f32.mrb[112].mxu0 }
 0x651   : > { %v4114_v47 = vpop.f32.mrb[112].mxu1  ;;  %v2196_v62 = vpop.f32.mrb[113].mxu0 }
 0x652   : > { %v4116_v56 = vpop.f32.mrb[113].mxu1  ;;  %v2198_v4 = vpop.f32.mrb[114].mxu0 }
 0x653   : > { %v4118_v50 = vpop.f32.mrb[114].mxu1  ;;  %v6638_v34 = vpack.c.bf16 %v2198_v4, %v2194_v49  ;;  %v2200_v38 = vpop.f32.mrb[115].mxu0 }
 0x654   : > { %v7214_v29 = vpack.c.bf16 %v4118_v50, %v4114_v47  ;;  %v4120_v63 = vpop.f32.mrb[115].mxu1  ;;  %v6639_v18 = vpack.c.bf16 %v2200_v38, %v2196_v62  ;;  %v1522_v47 = vld [vmem:[#allocation4 + $0x1d0] sm:$0xff] }
 0x655   : > { %v7215_v40 = vpack.c.bf16 %v4120_v63, %v4116_v56  ;;  %7406 = vst [vmem:[#allocation5 + $0x2a0] sm:$0xff] %v6638_v34  ;;  %2463 = vmatmul.mubr.bf16.gmra.mrb[220].mxu0 %v1519_v44  ;;  %v1714_v62 = vld [vmem:[#allocation4 + $0x7d0] sm:$0xff] }
 0x656   : > { %7982 = vst [vmem:[#allocation5 + $0x14a0] sm:$0xff] %v7214_v29  ;;  %4383 = vmatmul.mubr.bf16.gmra.mrb[220].mxu1 %v1711_v12  ;;  %7407 = vst [vmem:[#allocation5 + $0x2a8] sm:$0xff] %v6639_v18  ;;  %2472 = vmatprep.mubr.bf16.mxu0 %v15421_v43 }
 0x657   : > { %7983 = vst [vmem:[#allocation5 + $0x14a8] sm:$0xff] %v7215_v40  ;;  %4392 = vmatprep.mubr.bf16.mxu1 %v15421_v43 }
 0x658   : > { %v2204_v57 = vpop.f32.mrb[116].mxu0 }
 0x659   : > { %v4124_v54 = vpop.f32.mrb[116].mxu1  ;;  %v2206_v24 = vpop.f32.mrb[117].mxu0 }
 0x65a   : > { %v4126_v10 = vpop.f32.mrb[117].mxu1  ;;  %v2208_v25 = vpop.f32.mrb[118].mxu0 }
 0x65b   : > { %v4128_v48 = vpop.f32.mrb[118].mxu1  ;;  %v6641_v60 = vpack.c.bf16 %v2208_v25, %v2204_v57  ;;  %v2210_v32 = vpop.f32.mrb[119].mxu0 }
 0x65c   : > { %v7217_v41 = vpack.c.bf16 %v4128_v48, %v4124_v54  ;;  %v4130_v11 = vpop.f32.mrb[119].mxu1  ;;  %v6642_v33 = vpack.c.bf16 %v2210_v32, %v2206_v24  ;;  %v1523_v54 = vld [vmem:[#allocation4 + $0x1d8] sm:$0xff] }
 0x65d   : > { %v7218_v13 = vpack.c.bf16 %v4130_v11, %v4126_v10  ;;  %7409 = vst [vmem:[#allocation5 + $0x2b8] sm:$0xff] %v6641_v60  ;;  %2473 = vmatmul.mubr.bf16.gmra.mrb[224].mxu0 %v1520_v51  ;;  %v1715_v24 = vld [vmem:[#allocation4 + $0x7d8] sm:$0xff] }
 0x65e   : > { %7985 = vst [vmem:[#allocation5 + $0x14b8] sm:$0xff] %v7217_v41  ;;  %4393 = vmatmul.mubr.bf16.gmra.mrb[224].mxu1 %v1712_v28  ;;  %7410 = vst [vmem:[#allocation5 + $0x2c0] sm:$0xff] %v6642_v33  ;;  %2482 = vmatprep.mubr.bf16.mxu0 %v15421_v43 }
 0x65f   : > { %7986 = vst [vmem:[#allocation5 + $0x14c0] sm:$0xff] %v7218_v13  ;;  %4402 = vmatprep.mubr.bf16.mxu1 %v15421_v43 }
 0x660   : > { %v2214_v1 = vpop.f32.mrb[120].mxu0 }
 0x661   : > { %v4134_v30 = vpop.f32.mrb[120].mxu1  ;;  %v2216_v42 = vpop.f32.mrb[121].mxu0 }
 0x662   : > { %v4136_v45 = vpop.f32.mrb[121].mxu1  ;;  %v2218_v39 = vpop.f32.mrb[122].mxu0 }
 0x663   : > { %v4138_v3 = vpop.f32.mrb[122].mxu1  ;;  %v6644_v61 = vpack.c.bf16 %v2218_v39, %v2214_v1  ;;  %v2220_v21 = vpop.f32.mrb[123].mxu0 }
 0x664   : > { %v7220_v36 = vpack.c.bf16 %v4138_v3, %v4134_v30  ;;  %v4140_v35 = vpop.f32.mrb[123].mxu1  ;;  %v6645_v26 = vpack.c.bf16 %v2220_v21, %v2216_v42  ;;  %v1524_v30 = vld [vmem:[#allocation4 + $0x1e0] sm:$0xff] }
 0x665   : > { %v7221_v27 = vpack.c.bf16 %v4140_v35, %v4136_v45  ;;  %7412 = vst [vmem:[#allocation5 + $0x2d0] sm:$0xff] %v6644_v61  ;;  %2483 = vmatmul.mubr.bf16.gmra.mrb[228].mxu0 %v1521_v2  ;;  %v1716_v42 = vld [vmem:[#allocation4 + $0x7e0] sm:$0xff] }
 0x666   : > { %7988 = vst [vmem:[#allocation5 + $0x14d0] sm:$0xff] %v7220_v36  ;;  %4403 = vmatmul.mubr.bf16.gmra.mrb[228].mxu1 %v1713_v15  ;;  %7413 = vst [vmem:[#allocation5 + $0x2d8] sm:$0xff] %v6645_v26  ;;  %2492 = vmatprep.mubr.bf16.mxu0 %v15421_v43 }
 0x667   : > { %7989 = vst [vmem:[#allocation5 + $0x14d8] sm:$0xff] %v7221_v27  ;;  %4412 = vmatprep.mubr.bf16.mxu1 %v15421_v43 }
 0x668   : > { %v2224_v14 = vpop.f32.mrb[124].mxu0 }
 0x669   : > { %v4144_v31 = vpop.f32.mrb[124].mxu1  ;;  %v2226_v20 = vpop.f32.mrb[125].mxu0 }
 0x66a   : > { %v4146_v0 = vpop.f32.mrb[125].mxu1  ;;  %v2228_v59 = vpop.f32.mrb[126].mxu0 }
 0x66b   : > { %v4148_v49 = vpop.f32.mrb[126].mxu1  ;;  %v6647_v56 = vpack.c.bf16 %v2228_v59, %v2224_v14  ;;  %v2230_v50 = vpop.f32.mrb[127].mxu0 }
 0x66c   : > { %v7223_v4 = vpack.c.bf16 %v4148_v49, %v4144_v31  ;;  %v4150_v44 = vpop.f32.mrb[127].mxu1  ;;  %v6648_v12 = vpack.c.bf16 %v2230_v50, %v2226_v20  ;;  %v1525_v31 = vld [vmem:[#allocation4 + $0x1e8] sm:$0xff] }
 0x66d   : > { %v7224_v34 = vpack.c.bf16 %v4150_v44, %v4146_v0  ;;  %7415 = vst [vmem:[#allocation5 + $0x2e8] sm:$0xff] %v6647_v56  ;;  %2493 = vmatmul.mubr.bf16.gmra.mrb[232].mxu0 %v1522_v47  ;;  %v1717_v20 = vld [vmem:[#allocation4 + $0x7e8] sm:$0xff] }
 0x66e   : > { %7991 = vst [vmem:[#allocation5 + $0x14e8] sm:$0xff] %v7223_v4  ;;  %4413 = vmatmul.mubr.bf16.gmra.mrb[232].mxu1 %v1714_v62  ;;  %7416 = vst [vmem:[#allocation5 + $0x2f0] sm:$0xff] %v6648_v12  ;;  %2502 = vmatprep.mubr.bf16.mxu0 %v15421_v43 }
 0x66f   : > { %7992 = vst [vmem:[#allocation5 + $0x14f0] sm:$0xff] %v7224_v34  ;;  %4422 = vmatprep.mubr.bf16.mxu1 %v15421_v43 }
 0x670   : > { %v2234_v29 = vpop.f32.mrb[128].mxu0 }
 0x671   : > { %v4154_v38 = vpop.f32.mrb[128].mxu1  ;;  %v2236_v63 = vpop.f32.mrb[129].mxu0 }
 0x672   : > { %v4156_v18 = vpop.f32.mrb[129].mxu1  ;;  %v2238_v40 = vpop.f32.mrb[130].mxu0 }
 0x673   : > { %v4158_v57 = vpop.f32.mrb[130].mxu1  ;;  %v6650_v10 = vpack.c.bf16 %v2238_v40, %v2234_v29  ;;  %v2240_v48 = vpop.f32.mrb[131].mxu0 }
 0x674   : > { %v7226_v25 = vpack.c.bf16 %v4158_v57, %v4154_v38  ;;  %v4160_v51 = vpop.f32.mrb[131].mxu1  ;;  %v6651_v28 = vpack.c.bf16 %v2240_v48, %v2236_v63  ;;  %v1526_v38 = vld [vmem:[#allocation4 + $0x1f0] sm:$0xff] }
 0x675   : > { %v7227_v60 = vpack.c.bf16 %v4160_v51, %v4156_v18  ;;  %7418 = vst [vmem:[#allocation5 + $0x300] sm:$0xff] %v6650_v10  ;;  %2503 = vmatmul.mubr.bf16.gmra.mrb[236].mxu0 %v1523_v54  ;;  %v1718_v63 = vld [vmem:[#allocation4 + $0x7f0] sm:$0xff] }
 0x676   : > { %7994 = vst [vmem:[#allocation5 + $0x1500] sm:$0xff] %v7226_v25  ;;  %4423 = vmatmul.mubr.bf16.gmra.mrb[236].mxu1 %v1715_v24  ;;  %7419 = vst [vmem:[#allocation5 + $0x308] sm:$0xff] %v6651_v28  ;;  %2512 = vmatprep.mubr.bf16.mxu0 %v15421_v43 }
 0x677   : > { %7995 = vst [vmem:[#allocation5 + $0x1508] sm:$0xff] %v7227_v60  ;;  %4432 = vmatprep.mubr.bf16.mxu1 %v15421_v43 }
 0x678   : > { %v2244_v41 = vpop.f32.mrb[132].mxu0 }
 0x679   : > { %v4164_v32 = vpop.f32.mrb[132].mxu1  ;;  %v2246_v11 = vpop.f32.mrb[133].mxu0 }
 0x67a   : > { %v4166_v33 = vpop.f32.mrb[133].mxu1  ;;  %v2248_v13 = vpop.f32.mrb[134].mxu0 }
 0x67b   : > { %v4168_v1 = vpop.f32.mrb[134].mxu1  ;;  %v6653_v45 = vpack.c.bf16 %v2248_v13, %v2244_v41  ;;  %v2250_v3 = vpop.f32.mrb[135].mxu0 }
 0x67c   : > { %v7229_v39 = vpack.c.bf16 %v4168_v1, %v4164_v32  ;;  %v4170_v2 = vpop.f32.mrb[135].mxu1  ;;  %v6654_v15 = vpack.c.bf16 %v2250_v3, %v2246_v11  ;;  %v1527_v32 = vld [vmem:[#allocation4 + $0x1f8] sm:$0xff] }
 0x67d   : > { %v7230_v61 = vpack.c.bf16 %v4170_v2, %v4166_v33  ;;  %7421 = vst [vmem:[#allocation5 + $0x318] sm:$0xff] %v6653_v45  ;;  %2513 = vmatmul.mubr.bf16.gmra.mrb[240].mxu0 %v1524_v30  ;;  %v1719_v11 = vld [vmem:[#allocation4 + $0x7f8] sm:$0xff] }
 0x67e   : > { %7997 = vst [vmem:[#allocation5 + $0x1518] sm:$0xff] %v7229_v39  ;;  %4433 = vmatmul.mubr.bf16.gmra.mrb[240].mxu1 %v1716_v42  ;;  %7422 = vst [vmem:[#allocation5 + $0x320] sm:$0xff] %v6654_v15  ;;  %2522 = vmatprep.mubr.bf16.mxu0 %v15421_v43  ;;  %v12123_v39 = vld [vmem:[#allocation4] sm:$0xff] }
 0x67f   : > { %7998 = vst [vmem:[#allocation5 + $0x1520] sm:$0xff] %v7230_v61  ;;  %4442 = vmatprep.mubr.bf16.mxu1 %v15421_v43 }
 0x680   : > { %v2254_v36 = vpop.f32.mrb[136].mxu0 }
 0x681   : > { %v4174_v21 = vpop.f32.mrb[136].mxu1  ;;  %v2256_v35 = vpop.f32.mrb[137].mxu0 }
 0x682   : > { %v4176_v26 = vpop.f32.mrb[137].mxu1  ;;  %v2258_v27 = vpop.f32.mrb[138].mxu0 }
 0x683   : > { %v4178_v14 = vpop.f32.mrb[138].mxu1  ;;  %v6656_v0 = vpack.c.bf16 %v2258_v27, %v2254_v36  ;;  %v2260_v49 = vpop.f32.mrb[139].mxu0 }
 0x684   : > { %v7232_v59 = vpack.c.bf16 %v4178_v14, %v4174_v21  ;;  %v4180_v47 = vpop.f32.mrb[139].mxu1  ;;  %v6657_v62 = vpack.c.bf16 %v2260_v49, %v2256_v35  ;;  %v1528_v35 = vld [vmem:[#allocation4 + $0x200] sm:$0xff]  ;;  %v12125_v49 = vld [vmem:[#allocation4 + $0x10] sm:$0xff] }
 0x685   : > { %v7233_v56 = vpack.c.bf16 %v4180_v47, %v4176_v26  ;;  %7424 = vst [vmem:[#allocation5 + $0x330] sm:$0xff] %v6656_v0  ;;  %2523 = vmatmul.mubr.bf16.gmra.mrb[244].mxu0 %v1525_v31 }
 0x686   : > { %8000 = vst [vmem:[#allocation5 + $0x1530] sm:$0xff] %v7232_v59  ;;  %4443 = vmatmul.mubr.bf16.gmra.mrb[244].mxu1 %v1717_v20  ;;  %7425 = vst [vmem:[#allocation5 + $0x338] sm:$0xff] %v6657_v62  ;;  %2532 = vmatprep.mubr.bf16.mxu0 %v15421_v43  ;;  %v12124_v59 = vld [vmem:[#allocation4 + $0x8] sm:$0xff] }
 0x687   : > { %8001 = vst [vmem:[#allocation5 + $0x1538] sm:$0xff] %v7233_v56  ;;  %4452 = vmatprep.mubr.bf16.mxu1 %v15421_v43 }
 0x688   : > { %v2264_v4 = vpop.f32.mrb[140].mxu0 }
 0x689   : > { %v4184_v50 = vpop.f32.mrb[140].mxu1  ;;  %v2266_v44 = vpop.f32.mrb[141].mxu0 }
 0x68a   : > { %v4186_v12 = vpop.f32.mrb[141].mxu1  ;;  %v2268_v34 = vpop.f32.mrb[142].mxu0 }
 0x68b   : > { %v4188_v29 = vpop.f32.mrb[142].mxu1  ;;  %v6659_v18 = vpack.c.bf16 %v2268_v34, %v2264_v4  ;;  %v2270_v57 = vpop.f32.mrb[143].mxu0 }
 0x68c   : > { %v7235_v40 = vpack.c.bf16 %v4188_v29, %v4184_v50  ;;  %v4190_v54 = vpop.f32.mrb[143].mxu1  ;;  %v6660_v24 = vpack.c.bf16 %v2270_v57, %v2266_v44  ;;  %v12126_v57 = vld [vmem:[#allocation4 + $0x18] sm:$0xff] }
 0x68d   : > { %v7236_v10 = vpack.c.bf16 %v4190_v54, %v4186_v12  ;;  %7427 = vst [vmem:[#allocation5 + $0x348] sm:$0xff] %v6659_v18  ;;  %2533 = vmatmul.mubr.bf16.gmra.mrb[248].mxu0 %v1526_v38  ;;  %v1529_v12 = vld [vmem:[#allocation4 + $0x208] sm:$0xff]  ;;  %v12127_v54 = vld [vmem:[#allocation4 + $0x20] sm:$0xff] }
 0x68e   : > { %8003 = vst [vmem:[#allocation5 + $0x1548] sm:$0xff] %v7235_v40  ;;  %4453 = vmatmul.mubr.bf16.gmra.mrb[248].mxu1 %v1718_v63  ;;  %7428 = vst [vmem:[#allocation5 + $0x350] sm:$0xff] %v6660_v24  ;;  %2542 = vmatprep.mubr.bf16.mxu0 %v15421_v43 }
 0x68f   : > { %8004 = vst [vmem:[#allocation5 + $0x1550] sm:$0xff] %v7236_v10  ;;  %4462 = vmatprep.mubr.bf16.mxu1 %v15421_v43 }
 0x690   : > { %v2274_v25 = vpop.f32.mrb[144].mxu0 }
 0x691   : > { %v4194_v48 = vpop.f32.mrb[144].mxu1  ;;  %v2276_v51 = vpop.f32.mrb[145].mxu0 }
 0x692   : > { %v4196_v28 = vpop.f32.mrb[145].mxu1  ;;  %v2278_v60 = vpop.f32.mrb[146].mxu0 }
 0x693   : > { %v4198_v41 = vpop.f32.mrb[146].mxu1  ;;  %v6662_v33 = vpack.c.bf16 %v2278_v60, %v2274_v25  ;;  %v2280_v1 = vpop.f32.mrb[147].mxu0  ;;  %v1530_v60 = vld [vmem:[#allocation4 + $0x210] sm:$0xff] }
 0x694   : > { %v7238_v13 = vpack.c.bf16 %v4198_v41, %v4194_v48  ;;  %v4200_v30 = vpop.f32.mrb[147].mxu1  ;;  %v6663_v42 = vpack.c.bf16 %v2280_v1, %v2276_v51 }
 0x695   : > { %v7239_v45 = vpack.c.bf16 %v4200_v30, %v4196_v28  ;;  %7430 = vst [vmem:[#allocation5 + $0x360] sm:$0xff] %v6662_v33  ;;  %2543 = vmatmul.mubr.bf16.gmra.mrb[252].mxu0 %v1527_v32  ;;  %v12128_v30 = vld [vmem:[#allocation4 + $0x28] sm:$0xff] }
 0x696   : > { %8006 = vst [vmem:[#allocation5 + $0x1560] sm:$0xff] %v7238_v13  ;;  %4463 = vmatmul.mubr.bf16.gmra.mrb[252].mxu1 %v1719_v11  ;;  %7431 = vst [vmem:[#allocation5 + $0x368] sm:$0xff] %v6663_v42  ;;  %2552 = vmatprep.mubr.bf16.mxu0 %v15421_v43  ;;  %v12129_v42 = vld [vmem:[#allocation4 + $0x30] sm:$0xff] }
 0x697   : > { %8007 = vst [vmem:[#allocation5 + $0x1568] sm:$0xff] %v7239_v45  ;;  %11169 = vmatprep.mubr.bf16.mxu1 %v12123_v39 }
 0x698   : > { %v2284_v3 = vpop.f32.mrb[148].mxu0 }
 0x699   : > { %v4204_v2 = vpop.f32.mrb[148].mxu1  ;;  %v2286_v15 = vpop.f32.mrb[149].mxu0 }
 0x69a   : > { %v4206_v61 = vpop.f32.mrb[149].mxu1  ;;  %v2288_v36 = vpop.f32.mrb[150].mxu0 }
 0x69b   : > { %v4208_v21 = vpop.f32.mrb[150].mxu1  ;;  %v6665_v26 = vpack.c.bf16 %v2288_v36, %v2284_v3  ;;  %v2290_v14 = vpop.f32.mrb[151].mxu0  ;;  %v1531_v36 = vld [vmem:[#allocation4 + $0x218] sm:$0xff] }
 0x69c   : > { %v7241_v27 = vpack.c.bf16 %v4208_v21, %v4204_v2  ;;  %v4210_v31 = vpop.f32.mrb[151].mxu1  ;;  %v6666_v20 = vpack.c.bf16 %v2290_v14, %v2286_v15 }
 0x69d   : > { %v7242_v0 = vpack.c.bf16 %v4210_v31, %v4206_v61  ;;  %7433 = vst [vmem:[#allocation5 + $0x378] sm:$0xff] %v6665_v26  ;;  %2553 = vmatmul.mubr.bf16.gmra.mrb[0].mxu0 %v1528_v35 }
 0x69e   : > { %8009 = vst [vmem:[#allocation5 + $0x1578] sm:$0xff] %v7241_v27  ;;  %11170 = vmatmul.mubr.bf16.vlgmr.msra.gmra.mrb[0].mxu1 %v12124_v59  ;;  %7434 = vst [vmem:[#allocation5 + $0x380] sm:$0xff] %v6666_v20  ;;  %2562 = vmatprep.mubr.bf16.mxu0 %v15421_v43  ;;  %v12130_v20 = vld [vmem:[#allocation4 + $0x38] sm:$0xff] }
 0x69f   : > { %8010 = vst [vmem:[#allocation5 + $0x1580] sm:$0xff] %v7242_v0  ;;  %11173 = vmatprep.mubr.bf16.mxu1 %v12125_v49  ;;  %v12131_v0 = vld [vmem:[#allocation4 + $0x40] sm:$0xff] }
 0x6a0   : > { %v2294_v47 = vpop.f32.mrb[152].mxu0 }
 0x6a1   : > { %v4214_v62 = vpop.f32.mrb[152].mxu1  ;;  %v2296_v56 = vpop.f32.mrb[153].mxu0 }
 0x6a2   : > { %v4216_v4 = vpop.f32.mrb[153].mxu1  ;;  %v2298_v50 = vpop.f32.mrb[154].mxu0 }
 0x6a3   : > { %v4218_v44 = vpop.f32.mrb[154].mxu1  ;;  %v6668_v34 = vpack.c.bf16 %v2298_v50, %v2294_v47  ;;  %v2300_v38 = vpop.f32.mrb[155].mxu0  ;;  %v1532_v50 = vld [vmem:[#allocation4 + $0x220] sm:$0xff] }
 0x6a4   : > { %v7244_v29 = vpack.c.bf16 %v4218_v44, %v4214_v62  ;;  %v4220_v63 = vpop.f32.mrb[155].mxu1  ;;  %v6669_v18 = vpack.c.bf16 %v2300_v38, %v2296_v56 }
 0x6a5   : > { %v7245_v40 = vpack.c.bf16 %v4220_v63, %v4216_v4  ;;  %7436 = vst [vmem:[#allocation5 + $0x390] sm:$0xff] %v6668_v34  ;;  %2563 = vmatmul.mubr.bf16.gmra.mrb[4].mxu0 %v1529_v12 }
 0x6a6   : > { %8012 = vst [vmem:[#allocation5 + $0x1590] sm:$0xff] %v7244_v29  ;;  %11174 = vmatmul.mubr.bf16.gmra.mrb[4].mxu1 %v12126_v57  ;;  %7437 = vst [vmem:[#allocation5 + $0x398] sm:$0xff] %v6669_v18  ;;  %2572 = vmatprep.mubr.bf16.mxu0 %v15421_v43  ;;  %v12132_v18 = vld [vmem:[#allocation4 + $0x48] sm:$0xff] }
 0x6a7   : > { %8013 = vst [vmem:[#allocation5 + $0x1598] sm:$0xff] %v7245_v40  ;;  %11177 = vmatprep.mubr.bf16.mxu1 %v12127_v54  ;;  %v12133_v40 = vld [vmem:[#allocation4 + $0x50] sm:$0xff] }
 0x6a8   : > { %v2304_v24 = vpop.f32.mrb[156].mxu0 }
 0x6a9   : > { %v4224_v10 = vpop.f32.mrb[156].mxu1  ;;  %v2306_v25 = vpop.f32.mrb[157].mxu0 }
 0x6aa   : > { %v4226_v48 = vpop.f32.mrb[157].mxu1  ;;  %v2308_v51 = vpop.f32.mrb[158].mxu0 }
 0x6ab   : > { %v4228_v28 = vpop.f32.mrb[158].mxu1  ;;  %v6671_v41 = vpack.c.bf16 %v2308_v51, %v2304_v24  ;;  %v2310_v11 = vpop.f32.mrb[159].mxu0  ;;  %v1533_v51 = vld [vmem:[#allocation4 + $0x228] sm:$0xff] }
 0x6ac   : > { %v7247_v32 = vpack.c.bf16 %v4228_v28, %v4224_v10  ;;  %v4230_v33 = vpop.f32.mrb[159].mxu1  ;;  %v6672_v13 = vpack.c.bf16 %v2310_v11, %v2306_v25 }
 0x6ad   : > { %v7248_v1 = vpack.c.bf16 %v4230_v33, %v4226_v48  ;;  %7439 = vst [vmem:[#allocation5 + $0x3a8] sm:$0xff] %v6671_v41  ;;  %2573 = vmatmul.mubr.bf16.gmra.mrb[8].mxu0 %v1530_v60 }
 0x6ae   : > { %8015 = vst [vmem:[#allocation5 + $0x15a8] sm:$0xff] %v7247_v32  ;;  %11178 = vmatmul.mubr.bf16.gmra.mrb[8].mxu1 %v12128_v30  ;;  %7440 = vst [vmem:[#allocation5 + $0x3b0] sm:$0xff] %v6672_v13  ;;  %2582 = vmatprep.mubr.bf16.mxu0 %v15421_v43  ;;  %v12134_v13 = vld [vmem:[#allocation4 + $0x58] sm:$0xff] }
 0x6af   : > { %8016 = vst [vmem:[#allocation5 + $0x15b0] sm:$0xff] %v7248_v1  ;;  %11181 = vmatprep.mubr.bf16.mxu1 %v12129_v42  ;;  %v12135_v1 = vld [vmem:[#allocation4 + $0x60] sm:$0xff] }
 0x6b0   : > { %v2314_v45 = vpop.f32.mrb[160].mxu0 }
 0x6b1   : > { %v4234_v39 = vpop.f32.mrb[160].mxu1  ;;  %v2316_v3 = vpop.f32.mrb[161].mxu0 }
 0x6b2   : > { %v4236_v2 = vpop.f32.mrb[161].mxu1  ;;  %v2318_v15 = vpop.f32.mrb[162].mxu0 }
 0x6b3   : > { %v4238_v61 = vpop.f32.mrb[162].mxu1  ;;  %v6674_v21 = vpack.c.bf16 %v2318_v15, %v2314_v45  ;;  %v2320_v26 = vpop.f32.mrb[163].mxu0  ;;  %v1534_v15 = vld [vmem:[#allocation4 + $0x230] sm:$0xff] }
 0x6b4   : > { %v7250_v35 = vpack.c.bf16 %v4238_v61, %v4234_v39  ;;  %v4240_v27 = vpop.f32.mrb[163].mxu1  ;;  %v6675_v14 = vpack.c.bf16 %v2320_v26, %v2316_v3 }
 0x6b5   : > { %v7251_v31 = vpack.c.bf16 %v4240_v27, %v4236_v2  ;;  %7442 = vst [vmem:[#allocation5 + $0x3c0] sm:$0xff] %v6674_v21  ;;  %2583 = vmatmul.mubr.bf16.gmra.mrb[12].mxu0 %v1531_v36 }
 0x6b6   : > { %8018 = vst [vmem:[#allocation5 + $0x15c0] sm:$0xff] %v7250_v35  ;;  %11182 = vmatmul.mubr.bf16.gmra.mrb[12].mxu1 %v12130_v20  ;;  %7443 = vst [vmem:[#allocation5 + $0x3c8] sm:$0xff] %v6675_v14  ;;  %2592 = vmatprep.mubr.bf16.mxu0 %v15421_v43  ;;  %v12136_v14 = vld [vmem:[#allocation4 + $0x68] sm:$0xff] }
 0x6b7   : > { %8019 = vst [vmem:[#allocation5 + $0x15c8] sm:$0xff] %v7251_v31  ;;  %11185 = vmatprep.mubr.bf16.mxu1 %v12131_v0  ;;  %v12137_v31 = vld [vmem:[#allocation4 + $0x70] sm:$0xff] }
 0x6b8   : > { %v2324_v59 = vpop.f32.mrb[164].mxu0 }
 0x6b9   : > { %v4244_v49 = vpop.f32.mrb[164].mxu1  ;;  %v2326_v47 = vpop.f32.mrb[165].mxu0 }
 0x6ba   : > { %v4246_v62 = vpop.f32.mrb[165].mxu1  ;;  %v2328_v56 = vpop.f32.mrb[166].mxu0 }
 0x6bb   : > { %v4248_v4 = vpop.f32.mrb[166].mxu1  ;;  %v6677_v44 = vpack.c.bf16 %v2328_v56, %v2324_v59  ;;  %v2330_v34 = vpop.f32.mrb[167].mxu0  ;;  %v1535_v56 = vld [vmem:[#allocation4 + $0x238] sm:$0xff] }
 0x6bc   : > { %v7253_v12 = vpack.c.bf16 %v4248_v4, %v4244_v49  ;;  %v4250_v29 = vpop.f32.mrb[167].mxu1  ;;  %v6678_v38 = vpack.c.bf16 %v2330_v34, %v2326_v47 }
 0x6bd   : > { %v7254_v63 = vpack.c.bf16 %v4250_v29, %v4246_v62  ;;  %7445 = vst [vmem:[#allocation5 + $0x3d8] sm:$0xff] %v6677_v44  ;;  %2593 = vmatmul.mubr.bf16.gmra.mrb[16].mxu0 %v1532_v50 }
 0x6be   : > { %8021 = vst [vmem:[#allocation5 + $0x15d8] sm:$0xff] %v7253_v12  ;;  %11186 = vmatmul.mubr.bf16.gmra.mrb[16].mxu1 %v12132_v18  ;;  %7446 = vst [vmem:[#allocation5 + $0x3e0] sm:$0xff] %v6678_v38  ;;  %2602 = vmatprep.mubr.bf16.mxu0 %v15421_v43  ;;  %v12138_v38 = vld [vmem:[#allocation4 + $0x78] sm:$0xff] }
 0x6bf   : > { %8022 = vst [vmem:[#allocation5 + $0x15e0] sm:$0xff] %v7254_v63  ;;  %11189 = vmatprep.mubr.bf16.mxu1 %v12133_v40  ;;  %v12139_v63 = vld [vmem:[#allocation4 + $0x80] sm:$0xff] }
 0x6c0   : > { %v2334_v57 = vpop.f32.mrb[168].mxu0 }
 0x6c1   : > { %v4254_v54 = vpop.f32.mrb[168].mxu1  ;;  %v2336_v24 = vpop.f32.mrb[169].mxu0 }
 0x6c2   : > { %v4256_v10 = vpop.f32.mrb[169].mxu1  ;;  %v2338_v25 = vpop.f32.mrb[170].mxu0 }
 0x6c3   : > { %v4258_v48 = vpop.f32.mrb[170].mxu1  ;;  %v6680_v28 = vpack.c.bf16 %v2338_v25, %v2334_v57  ;;  %v2340_v41 = vpop.f32.mrb[171].mxu0  ;;  %v1536_v25 = vld [vmem:[#allocation4 + $0x240] sm:$0xff] }
 0x6c4   : > { %v7256_v60 = vpack.c.bf16 %v4258_v48, %v4254_v54  ;;  %v4260_v32 = vpop.f32.mrb[171].mxu1  ;;  %v6681_v11 = vpack.c.bf16 %v2340_v41, %v2336_v24 }
 0x6c5   : > { %v7257_v33 = vpack.c.bf16 %v4260_v32, %v4256_v10  ;;  %7448 = vst [vmem:[#allocation5 + $0x3f0] sm:$0xff] %v6680_v28  ;;  %2603 = vmatmul.mubr.bf16.gmra.mrb[20].mxu0 %v1533_v51 }
 0x6c6   : > { %8024 = vst [vmem:[#allocation5 + $0x15f0] sm:$0xff] %v7256_v60  ;;  %11190 = vmatmul.mubr.bf16.gmra.mrb[20].mxu1 %v12134_v13  ;;  %7449 = vst [vmem:[#allocation5 + $0x3f8] sm:$0xff] %v6681_v11  ;;  %2612 = vmatprep.mubr.bf16.mxu0 %v15421_v43  ;;  %v12140_v11 = vld [vmem:[#allocation4 + $0x88] sm:$0xff] }
 0x6c7   : > { %8025 = vst [vmem:[#allocation5 + $0x15f8] sm:$0xff] %v7257_v33  ;;  %11193 = vmatprep.mubr.bf16.mxu1 %v12135_v1  ;;  %v12141_v33 = vld [vmem:[#allocation4 + $0x90] sm:$0xff] }
 0x6c8   : > { %v2344_v30 = vpop.f32.mrb[172].mxu0 }
 0x6c9   : > { %v4264_v42 = vpop.f32.mrb[172].mxu1  ;;  %v2346_v45 = vpop.f32.mrb[173].mxu0 }
 0x6ca   : > { %v4266_v39 = vpop.f32.mrb[173].mxu1  ;;  %v2348_v3 = vpop.f32.mrb[174].mxu0 }
 0x6cb   : > { %v4268_v2 = vpop.f32.mrb[174].mxu1  ;;  %v6683_v61 = vpack.c.bf16 %v2348_v3, %v2344_v30  ;;  %v2350_v21 = vpop.f32.mrb[175].mxu0  ;;  %v1537_v3 = vld [vmem:[#allocation4 + $0x248] sm:$0xff] }
 0x6cc   : > { %v7259_v36 = vpack.c.bf16 %v4268_v2, %v4264_v42  ;;  %v4270_v35 = vpop.f32.mrb[175].mxu1  ;;  %v6684_v26 = vpack.c.bf16 %v2350_v21, %v2346_v45 }
 0x6cd   : > { %v7260_v27 = vpack.c.bf16 %v4270_v35, %v4266_v39  ;;  %7451 = vst [vmem:[#allocation5 + $0x408] sm:$0xff] %v6683_v61  ;;  %2613 = vmatmul.mubr.bf16.gmra.mrb[24].mxu0 %v1534_v15 }
 0x6ce   : > { %8027 = vst [vmem:[#allocation5 + $0x1608] sm:$0xff] %v7259_v36  ;;  %11194 = vmatmul.mubr.bf16.gmra.mrb[24].mxu1 %v12136_v14  ;;  %7452 = vst [vmem:[#allocation5 + $0x410] sm:$0xff] %v6684_v26  ;;  %2622 = vmatprep.mubr.bf16.mxu0 %v15421_v43  ;;  %v12142_v26 = vld [vmem:[#allocation4 + $0x98] sm:$0xff] }
 0x6cf   : > { %8028 = vst [vmem:[#allocation5 + $0x1610] sm:$0xff] %v7260_v27  ;;  %11197 = vmatprep.mubr.bf16.mxu1 %v12137_v31  ;;  %v12143_v27 = vld [vmem:[#allocation4 + $0xa0] sm:$0xff] }
 0x6d0   : > { %v2354_v20 = vpop.f32.mrb[176].mxu0 }
 0x6d1   : > { %v4274_v0 = vpop.f32.mrb[176].mxu1  ;;  %v2356_v59 = vpop.f32.mrb[177].mxu0 }
 0x6d2   : > { %v4276_v49 = vpop.f32.mrb[177].mxu1  ;;  %v2358_v47 = vpop.f32.mrb[178].mxu0 }
 0x6d3   : > { %v4278_v62 = vpop.f32.mrb[178].mxu1  ;;  %v6686_v4 = vpack.c.bf16 %v2358_v47, %v2354_v20  ;;  %v2360_v44 = vpop.f32.mrb[179].mxu0  ;;  %v1538_v47 = vld [vmem:[#allocation4 + $0x250] sm:$0xff] }
 0x6d4   : > { %v7262_v50 = vpack.c.bf16 %v4278_v62, %v4274_v0  ;;  %v4280_v12 = vpop.f32.mrb[179].mxu1  ;;  %v6687_v34 = vpack.c.bf16 %v2360_v44, %v2356_v59 }
 0x6d5   : > { %v7263_v29 = vpack.c.bf16 %v4280_v12, %v4276_v49  ;;  %7454 = vst [vmem:[#allocation5 + $0x420] sm:$0xff] %v6686_v4  ;;  %2623 = vmatmul.mubr.bf16.gmra.mrb[28].mxu0 %v1535_v56 }
 0x6d6   : > { %8030 = vst [vmem:[#allocation5 + $0x1620] sm:$0xff] %v7262_v50  ;;  %11198 = vmatmul.mubr.bf16.gmra.mrb[28].mxu1 %v12138_v38  ;;  %7455 = vst [vmem:[#allocation5 + $0x428] sm:$0xff] %v6687_v34  ;;  %2632 = vmatprep.mubr.bf16.mxu0 %v15421_v43  ;;  %v12144_v34 = vld [vmem:[#allocation4 + $0xa8] sm:$0xff] }
 0x6d7   : > { %8031 = vst [vmem:[#allocation5 + $0x1628] sm:$0xff] %v7263_v29  ;;  %11201 = vmatprep.mubr.bf16.mxu1 %v12139_v63  ;;  %v12145_v29 = vld [vmem:[#allocation4 + $0xb0] sm:$0xff] }
 0x6d8   : > { %v2364_v18 = vpop.f32.mrb[180].mxu0 }
 0x6d9   : > { %v4284_v40 = vpop.f32.mrb[180].mxu1  ;;  %v2366_v57 = vpop.f32.mrb[181].mxu0 }
 0x6da   : > { %v4286_v54 = vpop.f32.mrb[181].mxu1  ;;  %v2368_v24 = vpop.f32.mrb[182].mxu0 }
 0x6db   : > { %v4288_v10 = vpop.f32.mrb[182].mxu1  ;;  %v6689_v48 = vpack.c.bf16 %v2368_v24, %v2364_v18  ;;  %v2370_v28 = vpop.f32.mrb[183].mxu0  ;;  %v1539_v24 = vld [vmem:[#allocation4 + $0x258] sm:$0xff] }
 0x6dc   : > { %v7265_v51 = vpack.c.bf16 %v4288_v10, %v4284_v40  ;;  %v4290_v60 = vpop.f32.mrb[183].mxu1  ;;  %v6690_v41 = vpack.c.bf16 %v2370_v28, %v2366_v57 }
 0x6dd   : > { %v7266_v32 = vpack.c.bf16 %v4290_v60, %v4286_v54  ;;  %7457 = vst [vmem:[#allocation5 + $0x438] sm:$0xff] %v6689_v48  ;;  %2633 = vmatmul.mubr.bf16.gmra.mrb[32].mxu0 %v1536_v25 }
 0x6de   : > { %8033 = vst [vmem:[#allocation5 + $0x1638] sm:$0xff] %v7265_v51  ;;  %11202 = vmatmul.mubr.bf16.gmra.mrb[32].mxu1 %v12140_v11  ;;  %7458 = vst [vmem:[#allocation5 + $0x440] sm:$0xff] %v6690_v41  ;;  %2642 = vmatprep.mubr.bf16.mxu0 %v15421_v43  ;;  %v12146_v41 = vld [vmem:[#allocation4 + $0xb8] sm:$0xff] }
 0x6df   : > { %8034 = vst [vmem:[#allocation5 + $0x1640] sm:$0xff] %v7266_v32  ;;  %11205 = vmatprep.mubr.bf16.mxu1 %v12141_v33  ;;  %v12147_v32 = vld [vmem:[#allocation4 + $0xc0] sm:$0xff] }
 0x6e0   : > { %v2374_v13 = vpop.f32.mrb[184].mxu0 }
 0x6e1   : > { %v4294_v1 = vpop.f32.mrb[184].mxu1  ;;  %v2376_v30 = vpop.f32.mrb[185].mxu0 }
 0x6e2   : > { %v4296_v42 = vpop.f32.mrb[185].mxu1  ;;  %v2378_v45 = vpop.f32.mrb[186].mxu0 }
 0x6e3   : > { %v4298_v39 = vpop.f32.mrb[186].mxu1  ;;  %v6692_v2 = vpack.c.bf16 %v2378_v45, %v2374_v13  ;;  %v2380_v61 = vpop.f32.mrb[187].mxu0  ;;  %v1540_v45 = vld [vmem:[#allocation4 + $0x260] sm:$0xff] }
 0x6e4   : > { %v7268_v15 = vpack.c.bf16 %v4298_v39, %v4294_v1  ;;  %v4300_v36 = vpop.f32.mrb[187].mxu1  ;;  %v6693_v21 = vpack.c.bf16 %v2380_v61, %v2376_v30 }
 0x6e5   : > { %v7269_v35 = vpack.c.bf16 %v4300_v36, %v4296_v42  ;;  %7460 = vst [vmem:[#allocation5 + $0x450] sm:$0xff] %v6692_v2  ;;  %2643 = vmatmul.mubr.bf16.gmra.mrb[36].mxu0 %v1537_v3 }
 0x6e6   : > { %8036 = vst [vmem:[#allocation5 + $0x1650] sm:$0xff] %v7268_v15  ;;  %11206 = vmatmul.mubr.bf16.gmra.mrb[36].mxu1 %v12142_v26  ;;  %7461 = vst [vmem:[#allocation5 + $0x458] sm:$0xff] %v6693_v21  ;;  %2652 = vmatprep.mubr.bf16.mxu0 %v15421_v43  ;;  %v12148_v21 = vld [vmem:[#allocation4 + $0xc8] sm:$0xff] }
 0x6e7   : > { %8037 = vst [vmem:[#allocation5 + $0x1658] sm:$0xff] %v7269_v35  ;;  %11209 = vmatprep.mubr.bf16.mxu1 %v12143_v27  ;;  %v12149_v35 = vld [vmem:[#allocation4 + $0xd0] sm:$0xff] }
 0x6e8   : > { %v2384_v14 = vpop.f32.mrb[188].mxu0 }
 0x6e9   : > { %v4304_v31 = vpop.f32.mrb[188].mxu1  ;;  %v2386_v20 = vpop.f32.mrb[189].mxu0 }
 0x6ea   : > { %v4306_v0 = vpop.f32.mrb[189].mxu1  ;;  %v2388_v59 = vpop.f32.mrb[190].mxu0 }
 0x6eb   : > { %v4308_v49 = vpop.f32.mrb[190].mxu1  ;;  %v6695_v62 = vpack.c.bf16 %v2388_v59, %v2384_v14  ;;  %v2390_v4 = vpop.f32.mrb[191].mxu0  ;;  %v1541_v59 = vld [vmem:[#allocation4 + $0x268] sm:$0xff] }
 0x6ec   : > { %v7271_v56 = vpack.c.bf16 %v4308_v49, %v4304_v31  ;;  %v4310_v50 = vpop.f32.mrb[191].mxu1  ;;  %v6696_v44 = vpack.c.bf16 %v2390_v4, %v2386_v20 }
 0x6ed   : > { %v7272_v12 = vpack.c.bf16 %v4310_v50, %v4306_v0  ;;  %7463 = vst [vmem:[#allocation5 + $0x468] sm:$0xff] %v6695_v62  ;;  %2653 = vmatmul.mubr.bf16.gmra.mrb[40].mxu0 %v1538_v47 }
 0x6ee   : > { %8039 = vst [vmem:[#allocation5 + $0x1668] sm:$0xff] %v7271_v56  ;;  %11210 = vmatmul.mubr.bf16.gmra.mrb[40].mxu1 %v12144_v34  ;;  %7464 = vst [vmem:[#allocation5 + $0x470] sm:$0xff] %v6696_v44  ;;  %2662 = vmatprep.mubr.bf16.mxu0 %v15421_v43  ;;  %v12150_v44 = vld [vmem:[#allocation4 + $0xd8] sm:$0xff] }
 0x6ef   : > { %8040 = vst [vmem:[#allocation5 + $0x1670] sm:$0xff] %v7272_v12  ;;  %11213 = vmatprep.mubr.bf16.mxu1 %v12145_v29  ;;  %v12151_v12 = vld [vmem:[#allocation4 + $0xe0] sm:$0xff] }
 0x6f0   : > { %v2394_v38 = vpop.f32.mrb[192].mxu0 }
 0x6f1   : > { %v4314_v63 = vpop.f32.mrb[192].mxu1  ;;  %v2396_v18 = vpop.f32.mrb[193].mxu0 }
 0x6f2   : > { %v4316_v40 = vpop.f32.mrb[193].mxu1  ;;  %v2398_v57 = vpop.f32.mrb[194].mxu0 }
 0x6f3   : > { %v4318_v54 = vpop.f32.mrb[194].mxu1  ;;  %v6698_v10 = vpack.c.bf16 %v2398_v57, %v2394_v38  ;;  %v2400_v48 = vpop.f32.mrb[195].mxu0  ;;  %v1542_v57 = vld [vmem:[#allocation4 + $0x270] sm:$0xff] }
 0x6f4   : > { %v7274_v25 = vpack.c.bf16 %v4318_v54, %v4314_v63  ;;  %v4320_v51 = vpop.f32.mrb[195].mxu1  ;;  %v6699_v28 = vpack.c.bf16 %v2400_v48, %v2396_v18 }
 0x6f5   : > { %v7275_v60 = vpack.c.bf16 %v4320_v51, %v4316_v40  ;;  %7466 = vst [vmem:[#allocation5 + $0x480] sm:$0xff] %v6698_v10  ;;  %2663 = vmatmul.mubr.bf16.gmra.mrb[44].mxu0 %v1539_v24 }
 0x6f6   : > { %8042 = vst [vmem:[#allocation5 + $0x1680] sm:$0xff] %v7274_v25  ;;  %11214 = vmatmul.mubr.bf16.gmra.mrb[44].mxu1 %v12146_v41  ;;  %7467 = vst [vmem:[#allocation5 + $0x488] sm:$0xff] %v6699_v28  ;;  %2672 = vmatprep.mubr.bf16.mxu0 %v15421_v43  ;;  %v12152_v28 = vld [vmem:[#allocation4 + $0xe8] sm:$0xff] }
 0x6f7   : > { %8043 = vst [vmem:[#allocation5 + $0x1688] sm:$0xff] %v7275_v60  ;;  %11217 = vmatprep.mubr.bf16.mxu1 %v12147_v32  ;;  %v12153_v60 = vld [vmem:[#allocation4 + $0xf0] sm:$0xff] }
 0x6f8   : > { %v2404_v11 = vpop.f32.mrb[196].mxu0 }
 0x6f9   : > { %v4324_v33 = vpop.f32.mrb[196].mxu1  ;;  %v2406_v13 = vpop.f32.mrb[197].mxu0 }
 0x6fa   : > { %v4326_v1 = vpop.f32.mrb[197].mxu1  ;;  %v2408_v30 = vpop.f32.mrb[198].mxu0 }
 0x6fb   : > { %v4328_v42 = vpop.f32.mrb[198].mxu1  ;;  %v6701_v39 = vpack.c.bf16 %v2408_v30, %v2404_v11  ;;  %v2410_v2 = vpop.f32.mrb[199].mxu0  ;;  %v1543_v30 = vld [vmem:[#allocation4 + $0x278] sm:$0xff] }
 0x6fc   : > { %v7277_v3 = vpack.c.bf16 %v4328_v42, %v4324_v33  ;;  %v4330_v15 = vpop.f32.mrb[199].mxu1  ;;  %v6702_v61 = vpack.c.bf16 %v2410_v2, %v2406_v13 }
 0x6fd   : > { %v7278_v36 = vpack.c.bf16 %v4330_v15, %v4326_v1  ;;  %7469 = vst [vmem:[#allocation5 + $0x498] sm:$0xff] %v6701_v39  ;;  %2673 = vmatmul.mubr.bf16.gmra.mrb[48].mxu0 %v1540_v45 }
 0x6fe   : > { %8045 = vst [vmem:[#allocation5 + $0x1698] sm:$0xff] %v7277_v3  ;;  %11218 = vmatmul.mubr.bf16.gmra.mrb[48].mxu1 %v12148_v21  ;;  %7470 = vst [vmem:[#allocation5 + $0x4a0] sm:$0xff] %v6702_v61  ;;  %2682 = vmatprep.mubr.bf16.mxu0 %v15421_v43  ;;  %v12154_v61 = vld [vmem:[#allocation4 + $0xf8] sm:$0xff] }
 0x6ff   : > { %8046 = vst [vmem:[#allocation5 + $0x16a0] sm:$0xff] %v7278_v36  ;;  %11221 = vmatprep.mubr.bf16.mxu1 %v12149_v35  ;;  %v12155_v36 = vld [vmem:[#allocation4 + $0x100] sm:$0xff] }
 0x700   : > { %v2414_v26 = vpop.f32.mrb[200].mxu0 }
 0x701   : > { %v4334_v27 = vpop.f32.mrb[200].mxu1  ;;  %v2416_v14 = vpop.f32.mrb[201].mxu0 }
 0x702   : > { %v4336_v31 = vpop.f32.mrb[201].mxu1  ;;  %v2418_v20 = vpop.f32.mrb[202].mxu0 }
 0x703   : > { %v4338_v0 = vpop.f32.mrb[202].mxu1  ;;  %v6704_v49 = vpack.c.bf16 %v2418_v20, %v2414_v26  ;;  %v2420_v62 = vpop.f32.mrb[203].mxu0  ;;  %v13457_v20 = vld [vmem:[#allocation4 + $0x280] sm:$0xff] }
 0x704   : > { %v7280_v47 = vpack.c.bf16 %v4338_v0, %v4334_v27  ;;  %v4340_v56 = vpop.f32.mrb[203].mxu1  ;;  %v6705_v4 = vpack.c.bf16 %v2420_v62, %v2416_v14 }
 0x705   : > { %v7281_v50 = vpack.c.bf16 %v4340_v56, %v4336_v31  ;;  %7472 = vst [vmem:[#allocation5 + $0x4b0] sm:$0xff] %v6704_v49  ;;  %2683 = vmatmul.mubr.bf16.gmra.mrb[52].mxu0 %v1541_v59 }
 0x706   : > { %8048 = vst [vmem:[#allocation5 + $0x16b0] sm:$0xff] %v7280_v47  ;;  %11222 = vmatmul.mubr.bf16.gmra.mrb[52].mxu1 %v12150_v44  ;;  %7473 = vst [vmem:[#allocation5 + $0x4b8] sm:$0xff] %v6705_v4  ;;  %2692 = vmatprep.mubr.bf16.mxu0 %v15421_v43  ;;  %v12156_v4 = vld [vmem:[#allocation4 + $0x108] sm:$0xff] }
 0x707   : > { %8049 = vst [vmem:[#allocation5 + $0x16b8] sm:$0xff] %v7281_v50  ;;  %11225 = vmatprep.mubr.bf16.mxu1 %v12151_v12  ;;  %v12157_v50 = vld [vmem:[#allocation4 + $0x110] sm:$0xff] }
 0x708   : > { %v2424_v34 = vpop.f32.mrb[204].mxu0 }
 0x709   : > { %v4344_v29 = vpop.f32.mrb[204].mxu1  ;;  %v2426_v38 = vpop.f32.mrb[205].mxu0 }
 0x70a   : > { %v4346_v63 = vpop.f32.mrb[205].mxu1  ;;  %v2428_v18 = vpop.f32.mrb[206].mxu0 }
 0x70b   : > { %v4348_v40 = vpop.f32.mrb[206].mxu1  ;;  %v6707_v54 = vpack.c.bf16 %v2428_v18, %v2424_v34  ;;  %v2430_v10 = vpop.f32.mrb[207].mxu0  ;;  %v13461_v18 = vld [vmem:[#allocation4 + $0x288] sm:$0xff] }
 0x70c   : > { %v7283_v24 = vpack.c.bf16 %v4348_v40, %v4344_v29  ;;  %v4350_v25 = vpop.f32.mrb[207].mxu1  ;;  %v6708_v48 = vpack.c.bf16 %v2430_v10, %v2426_v38 }
 0x70d   : > { %v7284_v51 = vpack.c.bf16 %v4350_v25, %v4346_v63  ;;  %7475 = vst [vmem:[#allocation5 + $0x4c8] sm:$0xff] %v6707_v54  ;;  %2693 = vmatmul.mubr.bf16.gmra.mrb[56].mxu0 %v1542_v57 }
 0x70e   : > { %8051 = vst [vmem:[#allocation5 + $0x16c8] sm:$0xff] %v7283_v24  ;;  %11226 = vmatmul.mubr.bf16.gmra.mrb[56].mxu1 %v12152_v28  ;;  %7476 = vst [vmem:[#allocation5 + $0x4d0] sm:$0xff] %v6708_v48  ;;  %2702 = vmatprep.mubr.bf16.mxu0 %v15421_v43  ;;  %v12158_v48 = vld [vmem:[#allocation4 + $0x118] sm:$0xff] }
 0x70f   : > { %8052 = vst [vmem:[#allocation5 + $0x16d0] sm:$0xff] %v7284_v51  ;;  %11229 = vmatprep.mubr.bf16.mxu1 %v12153_v60  ;;  %v12159_v51 = vld [vmem:[#allocation4 + $0x120] sm:$0xff] }
 0x710   : > { %v2434_v41 = vpop.f32.mrb[208].mxu0 }
 0x711   : > { %v4354_v32 = vpop.f32.mrb[208].mxu1  ;;  %v2436_v11 = vpop.f32.mrb[209].mxu0 }
 0x712   : > { %v4356_v33 = vpop.f32.mrb[209].mxu1  ;;  %v2438_v13 = vpop.f32.mrb[210].mxu0 }
 0x713   : > { %v4358_v1 = vpop.f32.mrb[210].mxu1  ;;  %v6710_v42 = vpack.c.bf16 %v2438_v13, %v2434_v41  ;;  %v2440_v39 = vpop.f32.mrb[211].mxu0  ;;  %v13465_v13 = vld [vmem:[#allocation4 + $0x290] sm:$0xff] }
 0x714   : > { %v7286_v45 = vpack.c.bf16 %v4358_v1, %v4354_v32  ;;  %v4360_v3 = vpop.f32.mrb[211].mxu1  ;;  %v6711_v2 = vpack.c.bf16 %v2440_v39, %v2436_v11 }
 0x715   : > { %v7287_v15 = vpack.c.bf16 %v4360_v3, %v4356_v33  ;;  %7478 = vst [vmem:[#allocation5 + $0x4e0] sm:$0xff] %v6710_v42  ;;  %2703 = vmatmul.mubr.bf16.gmra.mrb[60].mxu0 %v1543_v30 }
 0x716   : > { %8054 = vst [vmem:[#allocation5 + $0x16e0] sm:$0xff] %v7286_v45  ;;  %11230 = vmatmul.mubr.bf16.gmra.mrb[60].mxu1 %v12154_v61  ;;  %7479 = vst [vmem:[#allocation5 + $0x4e8] sm:$0xff] %v6711_v2  ;;  %2712 = vmatprep.mubr.bf16.mxu0 %v15421_v43  ;;  %v12160_v2 = vld [vmem:[#allocation4 + $0x128] sm:$0xff] }
 0x717   : > { %8055 = vst [vmem:[#allocation5 + $0x16e8] sm:$0xff] %v7287_v15  ;;  %11233 = vmatprep.mubr.bf16.mxu1 %v12155_v36  ;;  %v12161_v15 = vld [vmem:[#allocation4 + $0x130] sm:$0xff] }
 0x718   : > { %v2444_v21 = vpop.f32.mrb[212].mxu0 }
 0x719   : > { %v4364_v35 = vpop.f32.mrb[212].mxu1  ;;  %v2446_v26 = vpop.f32.mrb[213].mxu0 }
 0x71a   : > { %v4366_v27 = vpop.f32.mrb[213].mxu1  ;;  %v2448_v14 = vpop.f32.mrb[214].mxu0 }
 0x71b   : > { %v4368_v31 = vpop.f32.mrb[214].mxu1  ;;  %v6713_v0 = vpack.c.bf16 %v2448_v14, %v2444_v21  ;;  %v2450_v49 = vpop.f32.mrb[215].mxu0  ;;  %v13469_v14 = vld [vmem:[#allocation4 + $0x298] sm:$0xff] }
 0x71c   : > { %v7289_v59 = vpack.c.bf16 %v4368_v31, %v4364_v35  ;;  %v4370_v47 = vpop.f32.mrb[215].mxu1  ;;  %v6714_v62 = vpack.c.bf16 %v2450_v49, %v2446_v26 }
 0x71d   : > { %v7290_v56 = vpack.c.bf16 %v4370_v47, %v4366_v27  ;;  %7481 = vst [vmem:[#allocation5 + $0x4f8] sm:$0xff] %v6713_v0  ;;  %2713 = vmatmul.mubr.bf16.gmra.mrb[64].mxu0 %v13457_v20 }
 0x71e   : > { %8057 = vst [vmem:[#allocation5 + $0x16f8] sm:$0xff] %v7289_v59  ;;  %11234 = vmatmul.mubr.bf16.gmra.mrb[64].mxu1 %v12156_v4  ;;  %7482 = vst [vmem:[#allocation5 + $0x500] sm:$0xff] %v6714_v62  ;;  %2722 = vmatprep.mubr.bf16.mxu0 %v15421_v43  ;;  %v12163_v4 = vld [vmem:[#allocation4 + $0x140] sm:$0xff] }
 0x71f   : > { %8058 = vst [vmem:[#allocation5 + $0x1700] sm:$0xff] %v7290_v56  ;;  %11237 = vmatprep.mubr.bf16.mxu1 %v12157_v50  ;;  %v12162_v56 = vld [vmem:[#allocation4 + $0x138] sm:$0xff] }
 0x720   : > { %v2454_v44 = vpop.f32.mrb[216].mxu0 }
 0x721   : > { %v4374_v12 = vpop.f32.mrb[216].mxu1  ;;  %v2456_v34 = vpop.f32.mrb[217].mxu0 }
 0x722   : > { %v4376_v29 = vpop.f32.mrb[217].mxu1  ;;  %v2458_v38 = vpop.f32.mrb[218].mxu0 }
 0x723   : > { %v4378_v63 = vpop.f32.mrb[218].mxu1  ;;  %v6716_v40 = vpack.c.bf16 %v2458_v38, %v2454_v44  ;;  %v2460_v54 = vpop.f32.mrb[219].mxu0 }
 0x724   : > { %v7292_v57 = vpack.c.bf16 %v4378_v63, %v4374_v12  ;;  %v4380_v24 = vpop.f32.mrb[219].mxu1  ;;  %v6717_v10 = vpack.c.bf16 %v2460_v54, %v2456_v34  ;;  %v13473_v63 = vld [vmem:[#allocation4 + $0x2a0] sm:$0xff] }
 0x725   : > { %v7293_v25 = vpack.c.bf16 %v4380_v24, %v4376_v29  ;;  %7484 = vst [vmem:[#allocation5 + $0x510] sm:$0xff] %v6716_v40  ;;  %2723 = vmatmul.mubr.bf16.gmra.mrb[68].mxu0 %v13461_v18 }
 0x726   : > { %8060 = vst [vmem:[#allocation5 + $0x1710] sm:$0xff] %v7292_v57  ;;  %11238 = vmatmul.mubr.bf16.gmra.mrb[68].mxu1 %v12158_v48  ;;  %7485 = vst [vmem:[#allocation5 + $0x518] sm:$0xff] %v6717_v10  ;;  %2732 = vmatprep.mubr.bf16.mxu0 %v15421_v43  ;;  %v12164_v48 = vld [vmem:[#allocation4 + $0x148] sm:$0xff] }
 0x727   : > { %8061 = vst [vmem:[#allocation5 + $0x1718] sm:$0xff] %v7293_v25  ;;  %11241 = vmatprep.mubr.bf16.mxu1 %v12159_v51  ;;  %v12165_v51 = vld [vmem:[#allocation4 + $0x150] sm:$0xff] }
 0x728   : > { %v2464_v28 = vpop.f32.mrb[220].mxu0 }
 0x729   : > { %v4384_v60 = vpop.f32.mrb[220].mxu1  ;;  %v2466_v41 = vpop.f32.mrb[221].mxu0 }
 0x72a   : > { %v4386_v32 = vpop.f32.mrb[221].mxu1  ;;  %v2468_v11 = vpop.f32.mrb[222].mxu0 }
 0x72b   : > { %v4388_v33 = vpop.f32.mrb[222].mxu1  ;;  %v6719_v1 = vpack.c.bf16 %v2468_v11, %v2464_v28  ;;  %v2470_v42 = vpop.f32.mrb[223].mxu0 }
 0x72c   : > { %v7295_v30 = vpack.c.bf16 %v4388_v33, %v4384_v60  ;;  %v4390_v45 = vpop.f32.mrb[223].mxu1  ;;  %v6720_v39 = vpack.c.bf16 %v2470_v42, %v2466_v41 }
 0x72d   : > { %v7296_v3 = vpack.c.bf16 %v4390_v45, %v4386_v32  ;;  %7487 = vst [vmem:[#allocation5 + $0x528] sm:$0xff] %v6719_v1  ;;  %2733 = vmatmul.mubr.bf16.gmra.mrb[72].mxu0 %v13465_v13  ;;  %v13477_v1 = vld [vmem:[#allocation4 + $0x2a8] sm:$0xff] }
 0x72e   : > { %8063 = vst [vmem:[#allocation5 + $0x1728] sm:$0xff] %v7295_v30  ;;  %11242 = vmatmul.mubr.bf16.gmra.mrb[72].mxu1 %v12160_v2  ;;  %7488 = vst [vmem:[#allocation5 + $0x530] sm:$0xff] %v6720_v39  ;;  %2742 = vmatprep.mubr.bf16.mxu0 %v15421_v43 }
 0x72f   : > { %8064 = vst [vmem:[#allocation5 + $0x1730] sm:$0xff] %v7296_v3  ;;  %11245 = vmatprep.mubr.bf16.mxu1 %v12161_v15  ;;  %v12166_v15 = vld [vmem:[#allocation4 + $0x158] sm:$0xff] }
 0x730   : > { %v2474_v61 = vpop.f32.mrb[224].mxu0 }
 0x731   : > { %v4394_v36 = vpop.f32.mrb[224].mxu1  ;;  %v2476_v21 = vpop.f32.mrb[225].mxu0 }
 0x732   : > { %v4396_v35 = vpop.f32.mrb[225].mxu1  ;;  %v2478_v26 = vpop.f32.mrb[226].mxu0 }
 0x733   : > { %v4398_v27 = vpop.f32.mrb[226].mxu1  ;;  %v6722_v31 = vpack.c.bf16 %v2478_v26, %v2474_v61  ;;  %v2480_v59 = vpop.f32.mrb[227].mxu0  ;;  %v12167_v61 = vld [vmem:[#allocation4 + $0x160] sm:$0xff] }
 0x734   : > { %v7298_v0 = vpack.c.bf16 %v4398_v27, %v4394_v36  ;;  %v4400_v49 = vpop.f32.mrb[227].mxu1  ;;  %v6723_v47 = vpack.c.bf16 %v2480_v59, %v2476_v21 }
 0x735   : > { %v7299_v62 = vpack.c.bf16 %v4400_v49, %v4396_v35  ;;  %7490 = vst [vmem:[#allocation5 + $0x540] sm:$0xff] %v6722_v31  ;;  %2743 = vmatmul.mubr.bf16.gmra.mrb[76].mxu0 %v13469_v14 }
 0x736   : > { %8066 = vst [vmem:[#allocation5 + $0x1740] sm:$0xff] %v7298_v0  ;;  %11246 = vmatmul.mubr.bf16.gmra.mrb[76].mxu1 %v12162_v56  ;;  %7491 = vst [vmem:[#allocation5 + $0x548] sm:$0xff] %v6723_v47  ;;  %2752 = vmatprep.mubr.bf16.mxu0 %v15421_v43  ;;  %v13481_v0 = vld [vmem:[#allocation4 + $0x2b0] sm:$0xff] }
 0x737   : > { %8067 = vst [vmem:[#allocation5 + $0x1748] sm:$0xff] %v7299_v62  ;;  %11249 = vmatprep.mubr.bf16.mxu1 %v12163_v4 }
 0x738   : > { %v2484_v50 = vpop.f32.mrb[228].mxu0 }
 0x739   : > { %v4404_v44 = vpop.f32.mrb[228].mxu1  ;;  %v2486_v12 = vpop.f32.mrb[229].mxu0 }
 0x73a   : > { %v4406_v34 = vpop.f32.mrb[229].mxu1  ;;  %v2488_v29 = vpop.f32.mrb[230].mxu0 }
 0x73b   : > { %v4408_v38 = vpop.f32.mrb[230].mxu1  ;;  %v6725_v40 = vpack.c.bf16 %v2488_v29, %v2484_v50  ;;  %v2490_v54 = vpop.f32.mrb[231].mxu0  ;;  %v12168_v50 = vld [vmem:[#allocation4 + $0x168] sm:$0xff] }
 0x73c   : > { %v7301_v57 = vpack.c.bf16 %v4408_v38, %v4404_v44  ;;  %v4410_v24 = vpop.f32.mrb[231].mxu1  ;;  %v6726_v10 = vpack.c.bf16 %v2490_v54, %v2486_v12  ;;  %v12169_v44 = vld [vmem:[#allocation4 + $0x170] sm:$0xff]  ;;  %v13485_v54 = vld [vmem:[#allocation4 + $0x2b8] sm:$0xff] }
 0x73d   : > { %v7302_v25 = vpack.c.bf16 %v4410_v24, %v4406_v34  ;;  %7493 = vst [vmem:[#allocation5 + $0x558] sm:$0xff] %v6725_v40  ;;  %2753 = vmatmul.mubr.bf16.gmra.mrb[80].mxu0 %v13473_v63 }
 0x73e   : > { %8069 = vst [vmem:[#allocation5 + $0x1758] sm:$0xff] %v7301_v57  ;;  %11250 = vmatmul.mubr.bf16.gmra.mrb[80].mxu1 %v12164_v48  ;;  %7494 = vst [vmem:[#allocation5 + $0x560] sm:$0xff] %v6726_v10  ;;  %2762 = vmatprep.mubr.bf16.mxu0 %v15421_v43 }
 0x73f   : > { %8070 = vst [vmem:[#allocation5 + $0x1760] sm:$0xff] %v7302_v25  ;;  %11253 = vmatprep.mubr.bf16.mxu1 %v12165_v51 }
 0x740   : > { %v2494_v28 = vpop.f32.mrb[232].mxu0 }
 0x741   : > { %v4414_v60 = vpop.f32.mrb[232].mxu1  ;;  %v2496_v41 = vpop.f32.mrb[233].mxu0 }
 0x742   : > { %v4416_v32 = vpop.f32.mrb[233].mxu1  ;;  %v2498_v11 = vpop.f32.mrb[234].mxu0 }
 0x743   : > { %v4418_v33 = vpop.f32.mrb[234].mxu1  ;;  %v6728_v30 = vpack.c.bf16 %v2498_v11, %v2494_v28  ;;  %v2500_v45 = vpop.f32.mrb[235].mxu0 }
 0x744   : > { %v7304_v42 = vpack.c.bf16 %v4418_v33, %v4414_v60  ;;  %v4420_v39 = vpop.f32.mrb[235].mxu1  ;;  %v6729_v3 = vpack.c.bf16 %v2500_v45, %v2496_v41  ;;  %v12170_v60 = vld [vmem:[#allocation4 + $0x178] sm:$0xff]  ;;  %v12171_v41 = vld [vmem:[#allocation4 + $0x180] sm:$0xff] }
 0x745   : > { %v7305_v2 = vpack.c.bf16 %v4420_v39, %v4416_v32  ;;  %7496 = vst [vmem:[#allocation5 + $0x570] sm:$0xff] %v6728_v30  ;;  %2763 = vmatmul.mubr.bf16.gmra.mrb[84].mxu0 %v13477_v1  ;;  %v13489_v39 = vld [vmem:[#allocation4 + $0x2c0] sm:$0xff] }
 0x746   : > { %8072 = vst [vmem:[#allocation5 + $0x1770] sm:$0xff] %v7304_v42  ;;  %11254 = vmatmul.mubr.bf16.gmra.mrb[84].mxu1 %v12166_v15  ;;  %7497 = vst [vmem:[#allocation5 + $0x578] sm:$0xff] %v6729_v3  ;;  %2772 = vmatprep.mubr.bf16.mxu0 %v15421_v43 }
 0x747   : > { %8073 = vst [vmem:[#allocation5 + $0x1778] sm:$0xff] %v7305_v2  ;;  %11257 = vmatprep.mubr.bf16.mxu1 %v12167_v61 }
 0x748   : > { %v2504_v36 = vpop.f32.mrb[236].mxu0 }
 0x749   : > { %v4424_v21 = vpop.f32.mrb[236].mxu1  ;;  %v2506_v35 = vpop.f32.mrb[237].mxu0 }
 0x74a   : > { %v4426_v26 = vpop.f32.mrb[237].mxu1  ;;  %v2508_v27 = vpop.f32.mrb[238].mxu0 }
 0x74b   : > { %v4428_v31 = vpop.f32.mrb[238].mxu1  ;;  %v6731_v59 = vpack.c.bf16 %v2508_v27, %v2504_v36  ;;  %v2510_v47 = vpop.f32.mrb[239].mxu0 }
 0x74c   : > { %v7307_v49 = vpack.c.bf16 %v4428_v31, %v4424_v21  ;;  %v4430_v62 = vpop.f32.mrb[239].mxu1  ;;  %v6732_v56 = vpack.c.bf16 %v2510_v47, %v2506_v35  ;;  %v12172_v35 = vld [vmem:[#allocation4 + $0x188] sm:$0xff] }
 0x74d   : > { %v7308_v4 = vpack.c.bf16 %v4430_v62, %v4426_v26  ;;  %7499 = vst [vmem:[#allocation5 + $0x588] sm:$0xff] %v6731_v59  ;;  %2773 = vmatmul.mubr.bf16.gmra.mrb[88].mxu0 %v13481_v0  ;;  %v12173_v26 = vld [vmem:[#allocation4 + $0x190] sm:$0xff] }
 0x74e   : > { %8075 = vst [vmem:[#allocation5 + $0x1788] sm:$0xff] %v7307_v49  ;;  %11258 = vmatmul.mubr.bf16.gmra.mrb[88].mxu1 %v12168_v50  ;;  %7500 = vst [vmem:[#allocation5 + $0x590] sm:$0xff] %v6732_v56  ;;  %2782 = vmatprep.mubr.bf16.mxu0 %v15421_v43  ;;  %v13493_v56 = vld [vmem:[#allocation4 + $0x2c8] sm:$0xff] }
 0x74f   : > { %8076 = vst [vmem:[#allocation5 + $0x1790] sm:$0xff] %v7308_v4  ;;  %11261 = vmatprep.mubr.bf16.mxu1 %v12169_v44 }
 0x750   : > { %v2514_v12 = vpop.f32.mrb[240].mxu0 }
 0x751   : > { %v4434_v34 = vpop.f32.mrb[240].mxu1  ;;  %v2516_v29 = vpop.f32.mrb[241].mxu0 }
 0x752   : > { %v4436_v38 = vpop.f32.mrb[241].mxu1  ;;  %v2518_v40 = vpop.f32.mrb[242].mxu0 }
 0x753   : > { %v4438_v57 = vpop.f32.mrb[242].mxu1  ;;  %v6734_v24 = vpack.c.bf16 %v2518_v40, %v2514_v12  ;;  %v2520_v25 = vpop.f32.mrb[243].mxu0  ;;  %v12175_v40 = vld [vmem:[#allocation4 + $0x1a0] sm:$0xff] }
 0x754   : > { %v7310_v10 = vpack.c.bf16 %v4438_v57, %v4434_v34  ;;  %v4440_v48 = vpop.f32.mrb[243].mxu1  ;;  %v6735_v51 = vpack.c.bf16 %v2520_v25, %v2516_v29 }
 0x755   : > { %v7311_v28 = vpack.c.bf16 %v4440_v48, %v4436_v38  ;;  %7502 = vst [vmem:[#allocation5 + $0x5a0] sm:$0xff] %v6734_v24  ;;  %2783 = vmatmul.mubr.bf16.gmra.mrb[92].mxu0 %v13485_v54  ;;  %v12174_v38 = vld [vmem:[#allocation4 + $0x198] sm:$0xff] }
 0x756   : > { %8078 = vst [vmem:[#allocation5 + $0x17a0] sm:$0xff] %v7310_v10  ;;  %11262 = vmatmul.mubr.bf16.gmra.mrb[92].mxu1 %v12170_v60  ;;  %7503 = vst [vmem:[#allocation5 + $0x5a8] sm:$0xff] %v6735_v51  ;;  %2792 = vmatprep.mubr.bf16.mxu0 %v15421_v43 }
 0x757   : > { %8079 = vst [vmem:[#allocation5 + $0x17a8] sm:$0xff] %v7311_v28  ;;  %11265 = vmatprep.mubr.bf16.mxu1 %v12171_v41  ;;  %v13497_v28 = vld [vmem:[#allocation4 + $0x2d0] sm:$0xff] }
 0x758   : > { %v2524_v32 = vpop.f32.mrb[244].mxu0 }
 0x759   : > { %v4444_v11 = vpop.f32.mrb[244].mxu1  ;;  %v2526_v33 = vpop.f32.mrb[245].mxu0 }
 0x75a   : > { %v4446_v30 = vpop.f32.mrb[245].mxu1  ;;  %v2528_v42 = vpop.f32.mrb[246].mxu0 }
 0x75b   : > { %v4448_v45 = vpop.f32.mrb[246].mxu1  ;;  %v6737_v3 = vpack.c.bf16 %v2528_v42, %v2524_v32  ;;  %v2530_v15 = vpop.f32.mrb[247].mxu0  ;;  %v12176_v42 = vld [vmem:[#allocation4 + $0x1a8] sm:$0xff] }
 0x75c   : > { %v7313_v2 = vpack.c.bf16 %v4448_v45, %v4444_v11  ;;  %v4450_v61 = vpop.f32.mrb[247].mxu1  ;;  %v6738_v36 = vpack.c.bf16 %v2530_v15, %v2526_v33  ;;  %v12177_v45 = vld [vmem:[#allocation4 + $0x1b0] sm:$0xff] }
 0x75d   : > { %v7314_v21 = vpack.c.bf16 %v4450_v61, %v4446_v30  ;;  %7505 = vst [vmem:[#allocation5 + $0x5b8] sm:$0xff] %v6737_v3  ;;  %2793 = vmatmul.mubr.bf16.gmra.mrb[96].mxu0 %v13489_v39 }
 0x75e   : > { %8081 = vst [vmem:[#allocation5 + $0x17b8] sm:$0xff] %v7313_v2  ;;  %11266 = vmatmul.mubr.bf16.gmra.mrb[96].mxu1 %v12172_v35  ;;  %7506 = vst [vmem:[#allocation5 + $0x5c0] sm:$0xff] %v6738_v36  ;;  %2802 = vmatprep.mubr.bf16.mxu0 %v15421_v43  ;;  %v13501_v35 = vld [vmem:[#allocation4 + $0x2d8] sm:$0xff] }
 0x75f   : > { %8082 = vst [vmem:[#allocation5 + $0x17c0] sm:$0xff] %v7314_v21  ;;  %11269 = vmatprep.mubr.bf16.mxu1 %v12173_v26 }
 0x760   : > { %v2534_v27 = vpop.f32.mrb[248].mxu0 }
 0x761   : > { %v4454_v31 = vpop.f32.mrb[248].mxu1  ;;  %v2536_v59 = vpop.f32.mrb[249].mxu0 }
 0x762   : > { %v4456_v49 = vpop.f32.mrb[249].mxu1  ;;  %v2538_v47 = vpop.f32.mrb[250].mxu0 }
 0x763   : > { %v4458_v62 = vpop.f32.mrb[250].mxu1  ;;  %v6740_v4 = vpack.c.bf16 %v2538_v47, %v2534_v27  ;;  %v2540_v44 = vpop.f32.mrb[251].mxu0 }
 0x764   : > { %v7316_v50 = vpack.c.bf16 %v4458_v62, %v4454_v31  ;;  %v4460_v12 = vpop.f32.mrb[251].mxu1  ;;  %v6741_v34 = vpack.c.bf16 %v2540_v44, %v2536_v59  ;;  %v12178_v62 = vld [vmem:[#allocation4 + $0x1b8] sm:$0xff] }
 0x765   : > { %v7317_v29 = vpack.c.bf16 %v4460_v12, %v4456_v49  ;;  %7508 = vst [vmem:[#allocation5 + $0x5d0] sm:$0xff] %v6740_v4  ;;  %2803 = vmatmul.mubr.bf16.gmra.mrb[100].mxu0 %v13493_v56  ;;  %v12179_v4 = vld [vmem:[#allocation4 + $0x1c0] sm:$0xff] }
 0x766   : > { %8084 = vst [vmem:[#allocation5 + $0x17d0] sm:$0xff] %v7316_v50  ;;  %11270 = vmatmul.mubr.bf16.gmra.mrb[100].mxu1 %v12174_v38  ;;  %7509 = vst [vmem:[#allocation5 + $0x5d8] sm:$0xff] %v6741_v34  ;;  %2812 = vmatprep.mubr.bf16.mxu0 %v15421_v43 }
 0x767   : > { %8085 = vst [vmem:[#allocation5 + $0x17d8] sm:$0xff] %v7317_v29  ;;  %11273 = vmatprep.mubr.bf16.mxu1 %v12175_v40  ;;  %v13505_v40 = vld [vmem:[#allocation4 + $0x2e0] sm:$0xff] }
 0x768   : > { %v2544_v57 = vpop.f32.mrb[252].mxu0 }
 0x769   : > { %v4464_v24 = vpop.f32.mrb[252].mxu1  ;;  %v2546_v10 = vpop.f32.mrb[253].mxu0 }
 0x76a   : > { %v4466_v25 = vpop.f32.mrb[253].mxu1  ;;  %v2548_v48 = vpop.f32.mrb[254].mxu0 }
 0x76b   : > { %v4468_v51 = vpop.f32.mrb[254].mxu1  ;;  %v6743_v60 = vpack.c.bf16 %v2548_v48, %v2544_v57  ;;  %v2550_v32 = vpop.f32.mrb[255].mxu0 }
 0x76c   : > { %v7319_v41 = vpack.c.bf16 %v4468_v51, %v4464_v24  ;;  %v4470_v11 = vpop.f32.mrb[255].mxu1  ;;  %v6744_v33 = vpack.c.bf16 %v2550_v32, %v2546_v10 }
 0x76d   : > { %v7320_v30 = vpack.c.bf16 %v4470_v11, %v4466_v25  ;;  %7511 = vst [vmem:[#allocation5 + $0x5e8] sm:$0xff] %v6743_v60  ;;  %2813 = vmatmul.mubr.bf16.gmra.mrb[104].mxu0 %v13497_v28  ;;  %v12180_v60 = vld [vmem:[#allocation4 + $0x1c8] sm:$0xff] }
 0x76e   : > { %8087 = vst [vmem:[#allocation5 + $0x17e8] sm:$0xff] %v7319_v41  ;;  %11274 = vmatmul.mubr.bf16.gmra.mrb[104].mxu1 %v12176_v42  ;;  %7512 = vst [vmem:[#allocation5 + $0x5f0] sm:$0xff] %v6744_v33  ;;  %2822 = vmatprep.mubr.bf16.mxu0 %v15421_v43  ;;  %v12181_v41 = vld [vmem:[#allocation4 + $0x1d0] sm:$0xff] }
 0x76f   : > { %8088 = vst [vmem:[#allocation5 + $0x17f0] sm:$0xff] %v7320_v30  ;;  %11277 = vmatprep.mubr.bf16.mxu1 %v12177_v45 }
 0x770   : > { %v2554_v3 = vpop.f32.mrb[0].mxu0 }
 0x771   : > { %v11171_v2 = vpop.f32.mrb[0].mxu1  ;;  %v2556_v15 = vpop.f32.mrb[1].mxu0 }
 0x772   : > { %v4507_v61 = vpop.f32.mrb[1].mxu1  ;;  %v2558_v36 = vpop.f32.mrb[2].mxu0 }
 0x773   : > { %v11172_v21 = vpop.f32.mrb[2].mxu1  ;;  %v6746_v26 = vpack.c.bf16 %v2558_v36, %v2554_v3  ;;  %v2560_v31 = vpop.f32.mrb[3].mxu0  ;;  %v13509_v3 = vld [vmem:[#allocation4 + $0x2e8] sm:$0xff] }
 0x774   : > { %v6559_v27 = vpack.c.bf16 %v11172_v21, %v11171_v2  ;;  %v4510_v59 = vpop.f32.mrb[3].mxu1  ;;  %v6747_v49 = vpack.c.bf16 %v2560_v31, %v2556_v15  ;;  %v12183_v31 = vld [vmem:[#allocation4 + $0x1e0] sm:$0xff] }
 0x775   : > { %v6556_v47 = vpack.c.bf16 %v4510_v59, %v4507_v61  ;;  %7514 = vst [vmem:[#allocation5 + $0x600] sm:$0xff] %v6746_v26  ;;  %2823 = vmatmul.mubr.bf16.gmra.mrb[108].mxu0 %v13501_v35 }
 0x776   : > { %7327 = vst [vmem:[#allocation5 + $0x28] sm:$0xff] %v6559_v27  ;;  %11278 = vmatmul.mubr.bf16.gmra.mrb[108].mxu1 %v12178_v62  ;;  %7515 = vst [vmem:[#allocation5 + $0x608] sm:$0xff] %v6747_v49  ;;  %2832 = vmatprep.mubr.bf16.mxu0 %v15421_v43  ;;  %v12182_v27 = vld [vmem:[#allocation4 + $0x1d8] sm:$0xff] }
 0x777   : > { %7324 = vst [vmem:[#allocation5 + $0x10] sm:$0xff] %v6556_v47  ;;  %11281 = vmatprep.mubr.bf16.mxu1 %v12179_v4 }
 0x778   : > { %v2564_v50 = vpop.f32.mrb[4].mxu0 }
 0x779   : > { %v11175_v44 = vpop.f32.mrb[4].mxu1  ;;  %v2566_v12 = vpop.f32.mrb[5].mxu0 }
 0x77a   : > { %v4523_v34 = vpop.f32.mrb[5].mxu1  ;;  %v2568_v29 = vpop.f32.mrb[6].mxu0 }
 0x77b   : > { %v11176_v38 = vpop.f32.mrb[6].mxu1  ;;  %v6749_v57 = vpack.c.bf16 %v2568_v29, %v2564_v50  ;;  %v2570_v10 = vpop.f32.mrb[7].mxu0 }
 0x77c   : > { %v6565_v24 = vpack.c.bf16 %v11176_v38, %v11175_v44  ;;  %v4526_v25 = vpop.f32.mrb[7].mxu1  ;;  %v6750_v48 = vpack.c.bf16 %v2570_v10, %v2566_v12  ;;  %v13513_v44 = vld [vmem:[#allocation4 + $0x2f0] sm:$0xff]  ;;  %v12184_v10 = vld [vmem:[#allocation4 + $0x1e8] sm:$0xff] }
 0x77d   : > { %v6562_v51 = vpack.c.bf16 %v4526_v25, %v4523_v34  ;;  %7517 = vst [vmem:[#allocation5 + $0x618] sm:$0xff] %v6749_v57  ;;  %2833 = vmatmul.mubr.bf16.gmra.mrb[112].mxu0 %v13505_v40  ;;  %v12185_v25 = vld [vmem:[#allocation4 + $0x1f0] sm:$0xff] }
 0x77e   : > { %7333 = vst [vmem:[#allocation5 + $0x58] sm:$0xff] %v6565_v24  ;;  %11282 = vmatmul.mubr.bf16.gmra.mrb[112].mxu1 %v12180_v60  ;;  %7518 = vst [vmem:[#allocation5 + $0x620] sm:$0xff] %v6750_v48  ;;  %2842 = vmatprep.mubr.bf16.mxu0 %v15421_v43 }
 0x77f   : > { %7330 = vst [vmem:[#allocation5 + $0x40] sm:$0xff] %v6562_v51  ;;  %11285 = vmatprep.mubr.bf16.mxu1 %v12181_v41 }
 0x780   : > { %v2574_v32 = vpop.f32.mrb[8].mxu0 }
 0x781   : > { %v11179_v11 = vpop.f32.mrb[8].mxu1  ;;  %v2576_v33 = vpop.f32.mrb[9].mxu0 }
 0x782   : > { %v4539_v30 = vpop.f32.mrb[9].mxu1  ;;  %v2578_v42 = vpop.f32.mrb[10].mxu0 }
 0x783   : > { %v11180_v45 = vpop.f32.mrb[10].mxu1  ;;  %v6752_v2 = vpack.c.bf16 %v2578_v42, %v2574_v32  ;;  %v2580_v61 = vpop.f32.mrb[11].mxu0 }
 0x784   : > { %v6571_v15 = vpack.c.bf16 %v11180_v45, %v11179_v11  ;;  %v4542_v36 = vpop.f32.mrb[11].mxu1  ;;  %v6753_v21 = vpack.c.bf16 %v2580_v61, %v2576_v33  ;;  %v13517_v33 = vld [vmem:[#allocation4 + $0x2f8] sm:$0xff] }
 0x785   : > { %v6568_v26 = vpack.c.bf16 %v4542_v36, %v4539_v30  ;;  %7520 = vst [vmem:[#allocation5 + $0x630] sm:$0xff] %v6752_v2  ;;  %2843 = vmatmul.mubr.bf16.gmra.mrb[116].mxu0 %v13509_v3  ;;  %v12186_v36 = vld [vmem:[#allocation4 + $0x1f8] sm:$0xff] }
 0x786   : > { %7339 = vst [vmem:[#allocation5 + $0x88] sm:$0xff] %v6571_v15  ;;  %11286 = vmatmul.mubr.bf16.gmra.mrb[116].mxu1 %v12182_v27  ;;  %7521 = vst [vmem:[#allocation5 + $0x638] sm:$0xff] %v6753_v21  ;;  %2852 = vmatprep.mubr.bf16.mxu0 %v15421_v43  ;;  %v12187_v21 = vld [vmem:[#allocation4 + $0x200] sm:$0xff] }
 0x787   : > { %7336 = vst [vmem:[#allocation5 + $0x70] sm:$0xff] %v6568_v26  ;;  %11289 = vmatprep.mubr.bf16.mxu1 %v12183_v31 }
 0x788   : > { %v2584_v59 = vpop.f32.mrb[12].mxu0 }
 0x789   : > { %v11183_v49 = vpop.f32.mrb[12].mxu1  ;;  %v2586_v47 = vpop.f32.mrb[13].mxu0 }
 0x78a   : > { %v4555_v62 = vpop.f32.mrb[13].mxu1  ;;  %v2588_v4 = vpop.f32.mrb[14].mxu0 }
 0x78b   : > { %v11184_v50 = vpop.f32.mrb[14].mxu1  ;;  %v6755_v12 = vpack.c.bf16 %v2588_v4, %v2584_v59  ;;  %v2590_v29 = vpop.f32.mrb[15].mxu0 }
 0x78c   : > { %v6577_v34 = vpack.c.bf16 %v11184_v50, %v11183_v49  ;;  %v4558_v38 = vpop.f32.mrb[15].mxu1  ;;  %v6756_v57 = vpack.c.bf16 %v2590_v29, %v2586_v47 }
 0x78d   : > { %v6574_v24 = vpack.c.bf16 %v4558_v38, %v4555_v62  ;;  %7523 = vst [vmem:[#allocation5 + $0x648] sm:$0xff] %v6755_v12  ;;  %2853 = vmatmul.mubr.bf16.gmra.mrb[120].mxu0 %v13513_v44  ;;  %v13521_v62 = vld [vmem:[#allocation4 + $0x300] sm:$0xff] }
 0x78e   : > { %7345 = vst [vmem:[#allocation5 + $0xb8] sm:$0xff] %v6577_v34  ;;  %11290 = vmatmul.mubr.bf16.gmra.mrb[120].mxu1 %v12184_v10  ;;  %7524 = vst [vmem:[#allocation5 + $0x650] sm:$0xff] %v6756_v57  ;;  %2862 = vmatprep.mubr.bf16.mxu0 %v15421_v43  ;;  %v12188_v57 = vld [vmem:[#allocation4 + $0x208] sm:$0xff] }
 0x78f   : > { %7342 = vst [vmem:[#allocation5 + $0xa0] sm:$0xff] %v6574_v24  ;;  %11293 = vmatprep.mubr.bf16.mxu1 %v12185_v25  ;;  %v12189_v24 = vld [vmem:[#allocation4 + $0x210] sm:$0xff] }
 0x790   : > { %v2594_v48 = vpop.f32.mrb[16].mxu0 }
 0x791   : > { %v11187_v51 = vpop.f32.mrb[16].mxu1  ;;  %v2596_v60 = vpop.f32.mrb[17].mxu0 }
 0x792   : > { %v4571_v41 = vpop.f32.mrb[17].mxu1  ;;  %v2598_v32 = vpop.f32.mrb[18].mxu0 }
 0x793   : > { %v11188_v11 = vpop.f32.mrb[18].mxu1  ;;  %v6758_v30 = vpack.c.bf16 %v2598_v32, %v2594_v48  ;;  %v2600_v45 = vpop.f32.mrb[19].mxu0  ;;  %v13525_v32 = vld [vmem:[#allocation4 + $0x308] sm:$0xff] }
 0x794   : > { %v6583_v42 = vpack.c.bf16 %v11188_v11, %v11187_v51  ;;  %v4574_v2 = vpop.f32.mrb[19].mxu1  ;;  %v6759_v15 = vpack.c.bf16 %v2600_v45, %v2596_v60 }
 0x795   : > { %v6580_v61 = vpack.c.bf16 %v4574_v2, %v4571_v41  ;;  %7526 = vst [vmem:[#allocation5 + $0x660] sm:$0xff] %v6758_v30  ;;  %2863 = vmatmul.mubr.bf16.gmra.mrb[124].mxu0 %v13517_v33 }
 0x796   : > { %7351 = vst [vmem:[#allocation5 + $0xe8] sm:$0xff] %v6583_v42  ;;  %11294 = vmatmul.mubr.bf16.gmra.mrb[124].mxu1 %v12186_v36  ;;  %7527 = vst [vmem:[#allocation5 + $0x668] sm:$0xff] %v6759_v15  ;;  %2872 = vmatprep.mubr.bf16.mxu0 %v15421_v43  ;;  %v12191_v36 = vld [vmem:[#allocation4 + $0x220] sm:$0xff] }
 0x797   : > { %7348 = vst [vmem:[#allocation5 + $0xd0] sm:$0xff] %v6580_v61  ;;  %11297 = vmatprep.mubr.bf16.mxu1 %v12187_v21  ;;  %v12190_v61 = vld [vmem:[#allocation4 + $0x218] sm:$0xff] }
 0x798   : > { %v2604_v26 = vpop.f32.mrb[20].mxu0 }
 0x799   : > { %v11191_v27 = vpop.f32.mrb[20].mxu1  ;;  %v2606_v31 = vpop.f32.mrb[21].mxu0 }
 0x79a   : > { %v4587_v59 = vpop.f32.mrb[21].mxu1  ;;  %v2608_v49 = vpop.f32.mrb[22].mxu0 }
 0x79b   : > { %v11192_v47 = vpop.f32.mrb[22].mxu1  ;;  %v6761_v4 = vpack.c.bf16 %v2608_v49, %v2604_v26  ;;  %v2610_v12 = vpop.f32.mrb[23].mxu0 }
 0x79c   : > { %v6589_v50 = vpack.c.bf16 %v11192_v47, %v11191_v27  ;;  %v4590_v34 = vpop.f32.mrb[23].mxu1  ;;  %v6762_v29 = vpack.c.bf16 %v2610_v12, %v2606_v31  ;;  %v13529_v47 = vld [vmem:[#allocation4 + $0x310] sm:$0xff] }
 0x79d   : > { %v6586_v38 = vpack.c.bf16 %v4590_v34, %v4587_v59  ;;  %7529 = vst [vmem:[#allocation5 + $0x678] sm:$0xff] %v6761_v4  ;;  %2873 = vmatmul.mubr.bf16.gmra.mrb[128].mxu0 %v13521_v62 }
 0x79e   : > { %7357 = vst [vmem:[#allocation5 + $0x118] sm:$0xff] %v6589_v50  ;;  %11298 = vmatmul.mubr.bf16.gmra.mrb[128].mxu1 %v12188_v57  ;;  %7530 = vst [vmem:[#allocation5 + $0x680] sm:$0xff] %v6762_v29  ;;  %2882 = vmatprep.mubr.bf16.mxu0 %v15421_v43  ;;  %v12192_v57 = vld [vmem:[#allocation4 + $0x228] sm:$0xff] }
 0x79f   : > { %7354 = vst [vmem:[#allocation5 + $0x100] sm:$0xff] %v6586_v38  ;;  %11301 = vmatprep.mubr.bf16.mxu1 %v12189_v24  ;;  %v12193_v24 = vld [vmem:[#allocation4 + $0x230] sm:$0xff] }
 0x7a0   : > { %v2614_v10 = vpop.f32.mrb[24].mxu0 }
 0x7a1   : > { %v11195_v25 = vpop.f32.mrb[24].mxu1  ;;  %v2616_v48 = vpop.f32.mrb[25].mxu0 }
 0x7a2   : > { %v4603_v51 = vpop.f32.mrb[25].mxu1  ;;  %v2618_v60 = vpop.f32.mrb[26].mxu0 }
 0x7a3   : > { %v11196_v41 = vpop.f32.mrb[26].mxu1  ;;  %v6764_v11 = vpack.c.bf16 %v2618_v60, %v2614_v10  ;;  %v2620_v42 = vpop.f32.mrb[27].mxu0 }
 0x7a4   : > { %v6595_v30 = vpack.c.bf16 %v11196_v41, %v11195_v25  ;;  %v4606_v45 = vpop.f32.mrb[27].mxu1  ;;  %v6765_v2 = vpack.c.bf16 %v2620_v42, %v2616_v48 }
 0x7a5   : > { %v6592_v15 = vpack.c.bf16 %v4606_v45, %v4603_v51  ;;  %7532 = vst [vmem:[#allocation5 + $0x690] sm:$0xff] %v6764_v11  ;;  %2883 = vmatmul.mubr.bf16.gmra.mrb[132].mxu0 %v13525_v32  ;;  %v13533_v11 = vld [vmem:[#allocation4 + $0x318] sm:$0xff] }
 0x7a6   : > { %7363 = vst [vmem:[#allocation5 + $0x148] sm:$0xff] %v6595_v30  ;;  %11302 = vmatmul.mubr.bf16.gmra.mrb[132].mxu1 %v12190_v61  ;;  %7533 = vst [vmem:[#allocation5 + $0x698] sm:$0xff] %v6765_v2  ;;  %2892 = vmatprep.mubr.bf16.mxu0 %v15421_v43 }
 0x7a7   : > { %7360 = vst [vmem:[#allocation5 + $0x130] sm:$0xff] %v6592_v15  ;;  %11305 = vmatprep.mubr.bf16.mxu1 %v12191_v36  ;;  %v12194_v36 = vld [vmem:[#allocation4 + $0x238] sm:$0xff] }
 0x7a8   : > { %v2624_v21 = vpop.f32.mrb[28].mxu0 }
 0x7a9   : > { %v11199_v26 = vpop.f32.mrb[28].mxu1  ;;  %v2626_v27 = vpop.f32.mrb[29].mxu0 }
 0x7aa   : > { %v4619_v31 = vpop.f32.mrb[29].mxu1  ;;  %v2628_v59 = vpop.f32.mrb[30].mxu0 }
 0x7ab   : > { %v11200_v49 = vpop.f32.mrb[30].mxu1  ;;  %v6767_v4 = vpack.c.bf16 %v2628_v59, %v2624_v21  ;;  %v2630_v12 = vpop.f32.mrb[31].mxu0  ;;  %v12195_v21 = vld [vmem:[#allocation4 + $0x240] sm:$0xff] }
 0x7ac   : > { %v6601_v50 = vpack.c.bf16 %v11200_v49, %v11199_v26  ;;  %v4622_v34 = vpop.f32.mrb[31].mxu1  ;;  %v6768_v29 = vpack.c.bf16 %v2630_v12, %v2626_v27 }
 0x7ad   : > { %v6598_v38 = vpack.c.bf16 %v4622_v34, %v4619_v31  ;;  %7535 = vst [vmem:[#allocation5 + $0x6a8] sm:$0xff] %v6767_v4  ;;  %2893 = vmatmul.mubr.bf16.gmra.mrb[136].mxu0 %v13529_v47 }
 0x7ae   : > { %7369 = vst [vmem:[#allocation5 + $0x178] sm:$0xff] %v6601_v50  ;;  %11306 = vmatmul.mubr.bf16.gmra.mrb[136].mxu1 %v12192_v57  ;;  %7536 = vst [vmem:[#allocation5 + $0x6b0] sm:$0xff] %v6768_v29  ;;  %2902 = vmatprep.mubr.bf16.mxu0 %v15421_v43  ;;  %v13537_v50 = vld [vmem:[#allocation4 + $0x320] sm:$0xff] }
 0x7af   : > { %7366 = vst [vmem:[#allocation5 + $0x160] sm:$0xff] %v6598_v38  ;;  %11309 = vmatprep.mubr.bf16.mxu1 %v12193_v24 }
 0x7b0   : > { %v2634_v10 = vpop.f32.mrb[32].mxu0 }
 0x7b1   : > { %v11203_v25 = vpop.f32.mrb[32].mxu1  ;;  %v2636_v48 = vpop.f32.mrb[33].mxu0 }
 0x7b2   : > { %v4635_v51 = vpop.f32.mrb[33].mxu1  ;;  %v2638_v60 = vpop.f32.mrb[34].mxu0 }
 0x7b3   : > { %v11204_v41 = vpop.f32.mrb[34].mxu1  ;;  %v6770_v30 = vpack.c.bf16 %v2638_v60, %v2634_v10  ;;  %v2640_v45 = vpop.f32.mrb[35].mxu0  ;;  %v12196_v10 = vld [vmem:[#allocation4 + $0x248] sm:$0xff] }
 0x7b4   : > { %v6607_v42 = vpack.c.bf16 %v11204_v41, %v11203_v25  ;;  %v4638_v2 = vpop.f32.mrb[35].mxu1  ;;  %v6771_v15 = vpack.c.bf16 %v2640_v45, %v2636_v48  ;;  %v12197_v25 = vld [vmem:[#allocation4 + $0x250] sm:$0xff]  ;;  %v13541_v45 = vld [vmem:[#allocation4 + $0x328] sm:$0xff] }
 0x7b5   : > { %v6604_v61 = vpack.c.bf16 %v4638_v2, %v4635_v51  ;;  %7538 = vst [vmem:[#allocation5 + $0x6c0] sm:$0xff] %v6770_v30  ;;  %2903 = vmatmul.mubr.bf16.gmra.mrb[140].mxu0 %v13533_v11 }
 0x7b6   : > { %7375 = vst [vmem:[#allocation5 + $0x1a8] sm:$0xff] %v6607_v42  ;;  %11310 = vmatmul.mubr.bf16.gmra.mrb[140].mxu1 %v12194_v36  ;;  %7539 = vst [vmem:[#allocation5 + $0x6c8] sm:$0xff] %v6771_v15  ;;  %2912 = vmatprep.mubr.bf16.mxu0 %v15421_v43 }
 0x7b7   : > { %7372 = vst [vmem:[#allocation5 + $0x190] sm:$0xff] %v6604_v61  ;;  %11313 = vmatprep.mubr.bf16.mxu1 %v12195_v21 }
 0x7b8   : > { %v2644_v26 = vpop.f32.mrb[36].mxu0 }
 0x7b9   : > { %v11207_v27 = vpop.f32.mrb[36].mxu1  ;;  %v2646_v31 = vpop.f32.mrb[37].mxu0 }
 0x7ba   : > { %v4651_v59 = vpop.f32.mrb[37].mxu1  ;;  %v2648_v49 = vpop.f32.mrb[38].mxu0 }
 0x7bb   : > { %v11208_v4 = vpop.f32.mrb[38].mxu1  ;;  %v6773_v12 = vpack.c.bf16 %v2648_v49, %v2644_v26  ;;  %v2650_v29 = vpop.f32.mrb[39].mxu0 }
 0x7bc   : > { %v6613_v34 = vpack.c.bf16 %v11208_v4, %v11207_v27  ;;  %v4654_v38 = vpop.f32.mrb[39].mxu1  ;;  %v6774_v57 = vpack.c.bf16 %v2650_v29, %v2646_v31  ;;  %v12198_v27 = vld [vmem:[#allocation4 + $0x258] sm:$0xff]  ;;  %v12199_v31 = vld [vmem:[#allocation4 + $0x260] sm:$0xff] }
 0x7bd   : > { %v6610_v24 = vpack.c.bf16 %v4654_v38, %v4651_v59  ;;  %7541 = vst [vmem:[#allocation5 + $0x6d8] sm:$0xff] %v6773_v12  ;;  %2913 = vmatmul.mubr.bf16.gmra.mrb[144].mxu0 %v13537_v50  ;;  %v13545_v38 = vld [vmem:[#allocation4 + $0x330] sm:$0xff] }
 0x7be   : > { %7381 = vst [vmem:[#allocation5 + $0x1d8] sm:$0xff] %v6613_v34  ;;  %11314 = vmatmul.mubr.bf16.gmra.mrb[144].mxu1 %v12196_v10  ;;  %7542 = vst [vmem:[#allocation5 + $0x6e0] sm:$0xff] %v6774_v57  ;;  %2922 = vmatprep.mubr.bf16.mxu0 %v15421_v43 }
 0x7bf   : > { %7378 = vst [vmem:[#allocation5 + $0x1c0] sm:$0xff] %v6610_v24  ;;  %11317 = vmatprep.mubr.bf16.mxu1 %v12197_v25 }
 0x7c0   : > { %v2654_v48 = vpop.f32.mrb[40].mxu0 }
 0x7c1   : > { %v11211_v51 = vpop.f32.mrb[40].mxu1  ;;  %v2656_v60 = vpop.f32.mrb[41].mxu0 }
 0x7c2   : > { %v4667_v41 = vpop.f32.mrb[41].mxu1  ;;  %v2658_v30 = vpop.f32.mrb[42].mxu0 }
 0x7c3   : > { %v11212_v42 = vpop.f32.mrb[42].mxu1  ;;  %v6776_v2 = vpack.c.bf16 %v2658_v30, %v2654_v48  ;;  %v2660_v61 = vpop.f32.mrb[43].mxu0 }
 0x7c4   : > { %v6619_v15 = vpack.c.bf16 %v11212_v42, %v11211_v51  ;;  %v4670_v36 = vpop.f32.mrb[43].mxu1  ;;  %v6777_v21 = vpack.c.bf16 %v2660_v61, %v2656_v60  ;;  %v12200_v60 = vld [vmem:[#allocation4 + $0x268] sm:$0xff] }
 0x7c5   : > { %v6616_v26 = vpack.c.bf16 %v4670_v36, %v4667_v41  ;;  %7544 = vst [vmem:[#allocation5 + $0x6f0] sm:$0xff] %v6776_v2  ;;  %2923 = vmatmul.mubr.bf16.gmra.mrb[148].mxu0 %v13541_v45  ;;  %v12201_v41 = vld [vmem:[#allocation4 + $0x270] sm:$0xff] }
 0x7c6   : > { %7387 = vst [vmem:[#allocation5 + $0x208] sm:$0xff] %v6619_v15  ;;  %11318 = vmatmul.mubr.bf16.gmra.mrb[148].mxu1 %v12198_v27  ;;  %7545 = vst [vmem:[#allocation5 + $0x6f8] sm:$0xff] %v6777_v21  ;;  %2932 = vmatprep.mubr.bf16.mxu0 %v15421_v43  ;;  %v13549_v21 = vld [vmem:[#allocation4 + $0x338] sm:$0xff] }
 0x7c7   : > { %7384 = vst [vmem:[#allocation5 + $0x1f0] sm:$0xff] %v6616_v26  ;;  %11321 = vmatprep.mubr.bf16.mxu1 %v12199_v31 }
 0x7c8   : > { %v2664_v59 = vpop.f32.mrb[44].mxu0 }
 0x7c9   : > { %v11215_v49 = vpop.f32.mrb[44].mxu1  ;;  %v2666_v4 = vpop.f32.mrb[45].mxu0 }
 0x7ca   : > { %v4683_v12 = vpop.f32.mrb[45].mxu1  ;;  %v2668_v34 = vpop.f32.mrb[46].mxu0 }
 0x7cb   : > { %v11216_v29 = vpop.f32.mrb[46].mxu1  ;;  %v6779_v57 = vpack.c.bf16 %v2668_v34, %v2664_v59  ;;  %v2670_v10 = vpop.f32.mrb[47].mxu0 }
 0x7cc   : > { %v6625_v24 = vpack.c.bf16 %v11216_v29, %v11215_v49  ;;  %v4686_v25 = vpop.f32.mrb[47].mxu1  ;;  %v6780_v48 = vpack.c.bf16 %v2670_v10, %v2666_v4 }
 0x7cd   : > { %v6622_v51 = vpack.c.bf16 %v4686_v25, %v4683_v12  ;;  %7547 = vst [vmem:[#allocation5 + $0x708] sm:$0xff] %v6779_v57  ;;  %2933 = vmatmul.mubr.bf16.gmra.mrb[152].mxu0 %v13545_v38  ;;  %v12202_v12 = vld [vmem:[#allocation4 + $0x278] sm:$0xff] }
 0x7ce   : > { %7393 = vst [vmem:[#allocation5 + $0x238] sm:$0xff] %v6625_v24  ;;  %11322 = vmatmul.mubr.bf16.gmra.mrb[152].mxu1 %v12200_v60  ;;  %7548 = vst [vmem:[#allocation5 + $0x710] sm:$0xff] %v6780_v48  ;;  %2942 = vmatprep.mubr.bf16.mxu0 %v15421_v43  ;;  %v13554_v48 = vld [vmem:[#allocation4 + $0x340] sm:$0xff] }
 0x7cf   : > { %7390 = vst [vmem:[#allocation5 + $0x220] sm:$0xff] %v6622_v51  ;;  %11325 = vmatprep.mubr.bf16.mxu1 %v12201_v41 }
 0x7d0   : > { %v2674_v30 = vpop.f32.mrb[48].mxu0 }
 0x7d1   : > { %v11219_v42 = vpop.f32.mrb[48].mxu1  ;;  %v2676_v2 = vpop.f32.mrb[49].mxu0 }
 0x7d2   : > { %v4699_v15 = vpop.f32.mrb[49].mxu1  ;;  %v2678_v61 = vpop.f32.mrb[50].mxu0 }
 0x7d3   : > { %v11220_v36 = vpop.f32.mrb[50].mxu1  ;;  %v6782_v26 = vpack.c.bf16 %v2678_v61, %v2674_v30  ;;  %v2680_v31 = vpop.f32.mrb[51].mxu0 }
 0x7d4   : > { %v6631_v27 = vpack.c.bf16 %v11220_v36, %v11219_v42  ;;  %v4702_v59 = vpop.f32.mrb[51].mxu1  ;;  %v6783_v49 = vpack.c.bf16 %v2680_v31, %v2676_v2  ;;  %v13560_v31 = vld [vmem:[#allocation4 + $0x348] sm:$0xff] }
 0x7d5   : > { %v6628_v4 = vpack.c.bf16 %v4702_v59, %v4699_v15  ;;  %7550 = vst [vmem:[#allocation5 + $0x720] sm:$0xff] %v6782_v26  ;;  %2943 = vmatmul.mubr.bf16.gmra.mrb[156].mxu0 %v13549_v21 }
 0x7d6   : > { %7399 = vst [vmem:[#allocation5 + $0x268] sm:$0xff] %v6631_v27  ;;  %11326 = vmatmul.mubr.bf16.gmra.mrb[156].mxu1 %v12202_v12  ;;  %7551 = vst [vmem:[#allocation5 + $0x728] sm:$0xff] %v6783_v49  ;;  %2952 = vmatprep.mubr.bf16.mxu0 %v15421_v43 }
 0x7d7   : > { %7396 = vst [vmem:[#allocation5 + $0x250] sm:$0xff] %v6628_v4  ;;  %11329 = vmatprep.mubr.bf16.mxu1 %v13457_v20 }
 0x7d8   : > { %v2684_v34 = vpop.f32.mrb[52].mxu0 }
 0x7d9   : > { %v11223_v29 = vpop.f32.mrb[52].mxu1  ;;  %v2686_v57 = vpop.f32.mrb[53].mxu0 }
 0x7da   : > { %v4715_v24 = vpop.f32.mrb[53].mxu1  ;;  %v2688_v10 = vpop.f32.mrb[54].mxu0 }
 0x7db   : > { %v11224_v25 = vpop.f32.mrb[54].mxu1  ;;  %v6785_v51 = vpack.c.bf16 %v2688_v10, %v2684_v34  ;;  %v2690_v41 = vpop.f32.mrb[55].mxu0 }
 0x7dc   : > { %v6637_v60 = vpack.c.bf16 %v11224_v25, %v11223_v29  ;;  %v4718_v30 = vpop.f32.mrb[55].mxu1  ;;  %v6786_v42 = vpack.c.bf16 %v2690_v41, %v2686_v57 }
 0x7dd   : > { %v6634_v2 = vpack.c.bf16 %v4718_v30, %v4715_v24  ;;  %7553 = vst [vmem:[#allocation5 + $0x738] sm:$0xff] %v6785_v51  ;;  %2953 = vmatmul.mubr.bf16.gmra.mrb[160].mxu0 %v13554_v48  ;;  %v13566_v51 = vld [vmem:[#allocation4 + $0x350] sm:$0xff] }
 0x7de   : > { %7405 = vst [vmem:[#allocation5 + $0x298] sm:$0xff] %v6637_v60  ;;  %11330 = vmatmul.mubr.bf16.gmra.mrb[160].mxu1 %v13461_v18  ;;  %7554 = vst [vmem:[#allocation5 + $0x740] sm:$0xff] %v6786_v42  ;;  %2962 = vmatprep.mubr.bf16.mxu0 %v15421_v43 }
 0x7df   : > { %7402 = vst [vmem:[#allocation5 + $0x280] sm:$0xff] %v6634_v2  ;;  %11333 = vmatprep.mubr.bf16.mxu1 %v13465_v13 }
 0x7e0   : > { %v2694_v20 = vpop.f32.mrb[56].mxu0 }
 0x7e1   : > { %v11227_v15 = vpop.f32.mrb[56].mxu1  ;;  %v2696_v61 = vpop.f32.mrb[57].mxu0 }
 0x7e2   : > { %v4731_v36 = vpop.f32.mrb[57].mxu1  ;;  %v2698_v26 = vpop.f32.mrb[58].mxu0 }
 0x7e3   : > { %v11228_v27 = vpop.f32.mrb[58].mxu1  ;;  %v6788_v59 = vpack.c.bf16 %v2698_v26, %v2694_v20  ;;  %v2700_v4 = vpop.f32.mrb[59].mxu0 }
 0x7e4   : > { %v6643_v49 = vpack.c.bf16 %v11228_v27, %v11227_v15  ;;  %v4734_v12 = vpop.f32.mrb[59].mxu1  ;;  %v6789_v34 = vpack.c.bf16 %v2700_v4, %v2696_v61  ;;  %v13572_v27 = vld [vmem:[#allocation4 + $0x358] sm:$0xff] }
 0x7e5   : > { %v6640_v18 = vpack.c.bf16 %v4734_v12, %v4731_v36  ;;  %7556 = vst [vmem:[#allocation5 + $0x750] sm:$0xff] %v6788_v59  ;;  %2963 = vmatmul.mubr.bf16.gmra.mrb[164].mxu0 %v13560_v31 }
 0x7e6   : > { %7411 = vst [vmem:[#allocation5 + $0x2c8] sm:$0xff] %v6643_v49  ;;  %11334 = vmatmul.mubr.bf16.gmra.mrb[164].mxu1 %v13469_v14  ;;  %7557 = vst [vmem:[#allocation5 + $0x758] sm:$0xff] %v6789_v34  ;;  %2972 = vmatprep.mubr.bf16.mxu0 %v15421_v43 }
 0x7e7   : > { %7408 = vst [vmem:[#allocation5 + $0x2b0] sm:$0xff] %v6640_v18  ;;  %11337 = vmatprep.mubr.bf16.mxu1 %v13473_v63 }
 0x7e8   : > { %v2704_v13 = vpop.f32.mrb[60].mxu0 }
 0x7e9   : > { %v11231_v29 = vpop.f32.mrb[60].mxu1  ;;  %v2706_v57 = vpop.f32.mrb[61].mxu0 }
 0x7ea   : > { %v4747_v24 = vpop.f32.mrb[61].mxu1  ;;  %v2708_v10 = vpop.f32.mrb[62].mxu0 }
 0x7eb   : > { %v11232_v25 = vpop.f32.mrb[62].mxu1  ;;  %v6791_v60 = vpack.c.bf16 %v2708_v10, %v2704_v13  ;;  %v2710_v30 = vpop.f32.mrb[63].mxu0  ;;  %v13578_v10 = vld [vmem:[#allocation4 + $0x360] sm:$0xff] }
 0x7ec   : > { %v6649_v41 = vpack.c.bf16 %v11232_v25, %v11231_v29  ;;  %v4750_v42 = vpop.f32.mrb[63].mxu1  ;;  %v6792_v2 = vpack.c.bf16 %v2710_v30, %v2706_v57 }
 0x7ed   : > { %v6646_v14 = vpack.c.bf16 %v4750_v42, %v4747_v24  ;;  %7559 = vst [vmem:[#allocation5 + $0x768] sm:$0xff] %v6791_v60  ;;  %2973 = vmatmul.mubr.bf16.gmra.mrb[168].mxu0 %v13566_v51 }
 0x7ee   : > { %7417 = vst [vmem:[#allocation5 + $0x2f8] sm:$0xff] %v6649_v41  ;;  %11338 = vmatmul.mubr.bf16.gmra.mrb[168].mxu1 %v13477_v1  ;;  %7560 = vst [vmem:[#allocation5 + $0x770] sm:$0xff] %v6792_v2  ;;  %2982 = vmatprep.mubr.bf16.mxu0 %v15421_v43 }
 0x7ef   : > { %7414 = vst [vmem:[#allocation5 + $0x2e0] sm:$0xff] %v6646_v14  ;;  %11341 = vmatprep.mubr.bf16.mxu1 %v13481_v0 }
 0x7f0   : > { %v2714_v63 = vpop.f32.mrb[64].mxu0 }
 0x7f1   : > { %v11235_v20 = vpop.f32.mrb[64].mxu1  ;;  %v2716_v15 = vpop.f32.mrb[65].mxu0 }
 0x7f2   : > { %v4763_v61 = vpop.f32.mrb[65].mxu1  ;;  %v2718_v36 = vpop.f32.mrb[66].mxu0 }
 0x7f3   : > { %v11236_v26 = vpop.f32.mrb[66].mxu1  ;;  %v6794_v59 = vpack.c.bf16 %v2718_v36, %v2714_v63  ;;  %v2720_v4 = vpop.f32.mrb[67].mxu0 }
 0x7f4   : > { %v6655_v49 = vpack.c.bf16 %v11236_v26, %v11235_v20  ;;  %v4766_v12 = vpop.f32.mrb[67].mxu1  ;;  %v6795_v34 = vpack.c.bf16 %v2720_v4, %v2716_v15 }
 0x7f5   : > { %v6652_v1 = vpack.c.bf16 %v4766_v12, %v4763_v61  ;;  %7562 = vst [vmem:[#allocation5 + $0x780] sm:$0xff] %v6794_v59  ;;  %2983 = vmatmul.mubr.bf16.gmra.mrb[172].mxu0 %v13572_v27  ;;  %v13584_v61 = vld [vmem:[#allocation4 + $0x368] sm:$0xff] }
 0x7f6   : > { %7423 = vst [vmem:[#allocation5 + $0x328] sm:$0xff] %v6655_v49  ;;  %11342 = vmatmul.mubr.bf16.gmra.mrb[172].mxu1 %v13485_v54  ;;  %7563 = vst [vmem:[#allocation5 + $0x788] sm:$0xff] %v6795_v34  ;;  %2992 = vmatprep.mubr.bf16.mxu0 %v15421_v43 }
 0x7f7   : > { %7420 = vst [vmem:[#allocation5 + $0x310] sm:$0xff] %v6652_v1  ;;  %11345 = vmatprep.mubr.bf16.mxu1 %v13489_v39 }
 0x7f8   : > { %v2724_v0 = vpop.f32.mrb[68].mxu0 }
 0x7f9   : > { %v11239_v18 = vpop.f32.mrb[68].mxu1  ;;  %v2726_v13 = vpop.f32.mrb[69].mxu0 }
 0x7fa   : > { %v4779_v29 = vpop.f32.mrb[69].mxu1  ;;  %v2728_v57 = vpop.f32.mrb[70].mxu0 }
 0x7fb   : > { %v11240_v24 = vpop.f32.mrb[70].mxu1  ;;  %v6797_v25 = vpack.c.bf16 %v2728_v57, %v2724_v0  ;;  %v2730_v41 = vpop.f32.mrb[71].mxu0 }
 0x7fc   : > { %v6661_v60 = vpack.c.bf16 %v11240_v24, %v11239_v18  ;;  %v4782_v30 = vpop.f32.mrb[71].mxu1  ;;  %v6798_v42 = vpack.c.bf16 %v2730_v41, %v2726_v13  ;;  %v13590_v13 = vld [vmem:[#allocation4 + $0x370] sm:$0xff] }
 0x7fd   : > { %v6658_v54 = vpack.c.bf16 %v4782_v30, %v4779_v29  ;;  %7565 = vst [vmem:[#allocation5 + $0x798] sm:$0xff] %v6797_v25  ;;  %2993 = vmatmul.mubr.bf16.gmra.mrb[176].mxu0 %v13578_v10 }
 0x7fe   : > { %7429 = vst [vmem:[#allocation5 + $0x358] sm:$0xff] %v6661_v60  ;;  %11346 = vmatmul.mubr.bf16.gmra.mrb[176].mxu1 %v13493_v56  ;;  %7566 = vst [vmem:[#allocation5 + $0x7a0] sm:$0xff] %v6798_v42  ;;  %3002 = vmatprep.mubr.bf16.mxu0 %v15421_v43 }
 0x7ff   : > { %7426 = vst [vmem:[#allocation5 + $0x340] sm:$0xff] %v6658_v54  ;;  %11349 = vmatprep.mubr.bf16.mxu1 %v13497_v28 }
 0x800   : > { %v2734_v39 = vpop.f32.mrb[72].mxu0 }
 0x801   : > { %v11243_v2 = vpop.f32.mrb[72].mxu1  ;;  %v2736_v14 = vpop.f32.mrb[73].mxu0 }
 0x802   : > { %v4795_v63 = vpop.f32.mrb[73].mxu1  ;;  %v2738_v20 = vpop.f32.mrb[74].mxu0 }
 0x803   : > { %v11244_v15 = vpop.f32.mrb[74].mxu1  ;;  %v6800_v36 = vpack.c.bf16 %v2738_v20, %v2734_v39  ;;  %v2740_v59 = vpop.f32.mrb[75].mxu0 }
 0x804   : > { %v6667_v26 = vpack.c.bf16 %v11244_v15, %v11243_v2  ;;  %v4798_v49 = vpop.f32.mrb[75].mxu1  ;;  %v6801_v4 = vpack.c.bf16 %v2740_v59, %v2736_v14  ;;  %v13596_v2 = vld [vmem:[#allocation4 + $0x378] sm:$0xff] }
 0x805   : > { %v6664_v56 = vpack.c.bf16 %v4798_v49, %v4795_v63  ;;  %7568 = vst [vmem:[#allocation5 + $0x7b0] sm:$0xff] %v6800_v36  ;;  %3003 = vmatmul.mubr.bf16.gmra.mrb[180].mxu0 %v13584_v61 }
 0x806   : > { %7435 = vst [vmem:[#allocation5 + $0x388] sm:$0xff] %v6667_v26  ;;  %11350 = vmatmul.mubr.bf16.gmra.mrb[180].mxu1 %v13501_v35  ;;  %7569 = vst [vmem:[#allocation5 + $0x7b8] sm:$0xff] %v6801_v4  ;;  %3012 = vmatprep.mubr.bf16.mxu0 %v15421_v43 }
 0x807   : > { %7432 = vst [vmem:[#allocation5 + $0x370] sm:$0xff] %v6664_v56  ;;  %11353 = vmatprep.mubr.bf16.mxu1 %v13505_v40 }
 0x808   : > { %v2744_v28 = vpop.f32.mrb[76].mxu0 }
 0x809   : > { %v11247_v12 = vpop.f32.mrb[76].mxu1  ;;  %v2746_v34 = vpop.f32.mrb[77].mxu0 }
 0x80a   : > { %v4811_v1 = vpop.f32.mrb[77].mxu1  ;;  %v2748_v0 = vpop.f32.mrb[78].mxu0 }
 0x80b   : > { %v11248_v18 = vpop.f32.mrb[78].mxu1  ;;  %v6803_v29 = vpack.c.bf16 %v2748_v0, %v2744_v28  ;;  %v2750_v24 = vpop.f32.mrb[79].mxu0  ;;  %v13602_v28 = vld [vmem:[#allocation4 + $0x380] sm:$0xff] }
 0x80c   : > { %v6673_v57 = vpack.c.bf16 %v11248_v18, %v11247_v12  ;;  %v4814_v25 = vpop.f32.mrb[79].mxu1  ;;  %v6804_v60 = vpack.c.bf16 %v2750_v24, %v2746_v34 }
 0x80d   : > { %v6670_v35 = vpack.c.bf16 %v4814_v25, %v4811_v1  ;;  %7571 = vst [vmem:[#allocation5 + $0x7c8] sm:$0xff] %v6803_v29  ;;  %3013 = vmatmul.mubr.bf16.gmra.mrb[184].mxu0 %v13590_v13 }
 0x80e   : > { %7441 = vst [vmem:[#allocation5 + $0x3b8] sm:$0xff] %v6673_v57  ;;  %11354 = vmatmul.mubr.bf16.gmra.mrb[184].mxu1 %v13509_v3  ;;  %7572 = vst [vmem:[#allocation5 + $0x7d0] sm:$0xff] %v6804_v60  ;;  %3022 = vmatprep.mubr.bf16.mxu0 %v15421_v43 }
 0x80f   : > { %7438 = vst [vmem:[#allocation5 + $0x3a0] sm:$0xff] %v6670_v35  ;;  %11357 = vmatprep.mubr.bf16.mxu1 %v13513_v44  ;;  %v13608_v35 = vld [vmem:[#allocation4 + $0x388] sm:$0xff] }
 0x810   : > { %v2754_v40 = vpop.f32.mrb[80].mxu0 }
 0x811   : > { %v11251_v41 = vpop.f32.mrb[80].mxu1  ;;  %v2756_v30 = vpop.f32.mrb[81].mxu0 }
 0x812   : > { %v4827_v42 = vpop.f32.mrb[81].mxu1  ;;  %v2758_v54 = vpop.f32.mrb[82].mxu0 }
 0x813   : > { %v11252_v39 = vpop.f32.mrb[82].mxu1  ;;  %v6806_v14 = vpack.c.bf16 %v2758_v54, %v2754_v40  ;;  %v2760_v20 = vpop.f32.mrb[83].mxu0 }
 0x814   : > { %v6679_v63 = vpack.c.bf16 %v11252_v39, %v11251_v41  ;;  %v4830_v15 = vpop.f32.mrb[83].mxu1  ;;  %v6807_v36 = vpack.c.bf16 %v2760_v20, %v2756_v30 }
 0x815   : > { %v6676_v3 = vpack.c.bf16 %v4830_v15, %v4827_v42  ;;  %7574 = vst [vmem:[#allocation5 + $0x7e0] sm:$0xff] %v6806_v14  ;;  %3023 = vmatmul.mubr.bf16.gmra.mrb[188].mxu0 %v13596_v2 }
 0x816   : > { %7447 = vst [vmem:[#allocation5 + $0x3e8] sm:$0xff] %v6679_v63  ;;  %11358 = vmatmul.mubr.bf16.gmra.mrb[188].mxu1 %v13517_v33  ;;  %7575 = vst [vmem:[#allocation5 + $0x7e8] sm:$0xff] %v6807_v36  ;;  %3032 = vmatprep.mubr.bf16.mxu0 %v15421_v43  ;;  %v13614_v36 = vld [vmem:[#allocation4 + $0x390] sm:$0xff] }
 0x817   : > { %7444 = vst [vmem:[#allocation5 + $0x3d0] sm:$0xff] %v6676_v3  ;;  %11361 = vmatprep.mubr.bf16.mxu1 %v13521_v62 }
 0x818   : > { %v2764_v44 = vpop.f32.mrb[84].mxu0 }
 0x819   : > { %v11255_v26 = vpop.f32.mrb[84].mxu1  ;;  %v2766_v59 = vpop.f32.mrb[85].mxu0 }
 0x81a   : > { %v4843_v49 = vpop.f32.mrb[85].mxu1  ;;  %v2768_v4 = vpop.f32.mrb[86].mxu0 }
 0x81b   : > { %v11256_v56 = vpop.f32.mrb[86].mxu1  ;;  %v6809_v12 = vpack.c.bf16 %v2768_v4, %v2764_v44  ;;  %v2770_v1 = vpop.f32.mrb[87].mxu0 }
 0x81c   : > { %v6685_v34 = vpack.c.bf16 %v11256_v56, %v11255_v26  ;;  %v4846_v0 = vpop.f32.mrb[87].mxu1  ;;  %v6810_v18 = vpack.c.bf16 %v2770_v1, %v2766_v59 }
 0x81d   : > { %v6682_v33 = vpack.c.bf16 %v4846_v0, %v4843_v49  ;;  %7577 = vst [vmem:[#allocation5 + $0x7f8] sm:$0xff] %v6809_v12  ;;  %3033 = vmatmul.mubr.bf16.gmra.mrb[192].mxu0 %v13602_v28  ;;  %v13620_v0 = vld [vmem:[#allocation4 + $0x398] sm:$0xff] }
 0x81e   : > { %7453 = vst [vmem:[#allocation5 + $0x418] sm:$0xff] %v6685_v34  ;;  %11362 = vmatmul.mubr.bf16.gmra.mrb[192].mxu1 %v13525_v32  ;;  %7578 = vst [vmem:[#allocation5 + $0x800] sm:$0xff] %v6810_v18  ;;  %3042 = vmatprep.mubr.bf16.mxu0 %v15421_v43 }
 0x81f   : > { %7450 = vst [vmem:[#allocation5 + $0x400] sm:$0xff] %v6682_v33  ;;  %11365 = vmatprep.mubr.bf16.mxu1 %v13529_v47 }
 0x820   : > { %v2774_v62 = vpop.f32.mrb[88].mxu0 }
 0x821   : > { %v11259_v29 = vpop.f32.mrb[88].mxu1  ;;  %v2776_v57 = vpop.f32.mrb[89].mxu0 }
 0x822   : > { %v4859_v24 = vpop.f32.mrb[89].mxu1  ;;  %v2778_v25 = vpop.f32.mrb[90].mxu0 }
 0x823   : > { %v11260_v60 = vpop.f32.mrb[90].mxu1  ;;  %v6812_v40 = vpack.c.bf16 %v2778_v25, %v2774_v62  ;;  %v2780_v30 = vpop.f32.mrb[91].mxu0 }
 0x824   : > { %v6691_v41 = vpack.c.bf16 %v11260_v60, %v11259_v29  ;;  %v4862_v42 = vpop.f32.mrb[91].mxu1  ;;  %v6813_v54 = vpack.c.bf16 %v2780_v30, %v2776_v57  ;;  %v13626_v30 = vld [vmem:[#allocation4 + $0x3a0] sm:$0xff] }
 0x825   : > { %v6688_v32 = vpack.c.bf16 %v4862_v42, %v4859_v24  ;;  %7580 = vst [vmem:[#allocation5 + $0x810] sm:$0xff] %v6812_v40  ;;  %3043 = vmatmul.mubr.bf16.gmra.mrb[196].mxu0 %v13608_v35 }
 0x826   : > { %7459 = vst [vmem:[#allocation5 + $0x448] sm:$0xff] %v6691_v41  ;;  %11366 = vmatmul.mubr.bf16.gmra.mrb[196].mxu1 %v13533_v11  ;;  %7581 = vst [vmem:[#allocation5 + $0x818] sm:$0xff] %v6813_v54  ;;  %3052 = vmatprep.mubr.bf16.mxu0 %v15421_v43 }
 0x827   : > { %7456 = vst [vmem:[#allocation5 + $0x430] sm:$0xff] %v6688_v32  ;;  %11369 = vmatprep.mubr.bf16.mxu1 %v13537_v50 }
 0x828   : > { %v2784_v47 = vpop.f32.mrb[92].mxu0 }
 0x829   : > { %v11263_v39 = vpop.f32.mrb[92].mxu1  ;;  %v2786_v14 = vpop.f32.mrb[93].mxu0 }
 0x82a   : > { %v4875_v63 = vpop.f32.mrb[93].mxu1  ;;  %v2788_v20 = vpop.f32.mrb[94].mxu0 }
 0x82b   : > { %v11264_v15 = vpop.f32.mrb[94].mxu1  ;;  %v6815_v3 = vpack.c.bf16 %v2788_v20, %v2784_v47  ;;  %v2790_v26 = vpop.f32.mrb[95].mxu0 }
 0x82c   : > { %v6697_v44 = vpack.c.bf16 %v11264_v15, %v11263_v39  ;;  %v4878_v59 = vpop.f32.mrb[95].mxu1  ;;  %v6816_v49 = vpack.c.bf16 %v2790_v26, %v2786_v14 }
 0x82d   : > { %v6694_v11 = vpack.c.bf16 %v4878_v59, %v4875_v63  ;;  %7583 = vst [vmem:[#allocation5 + $0x828] sm:$0xff] %v6815_v3  ;;  %3053 = vmatmul.mubr.bf16.gmra.mrb[200].mxu0 %v13614_v36 }
 0x82e   : > { %7465 = vst [vmem:[#allocation5 + $0x478] sm:$0xff] %v6697_v44  ;;  %11370 = vmatmul.mubr.bf16.gmra.mrb[200].mxu1 %v13541_v45  ;;  %7584 = vst [vmem:[#allocation5 + $0x830] sm:$0xff] %v6816_v49  ;;  %3062 = vmatprep.mubr.bf16.mxu0 %v15421_v43  ;;  %v13632_v44 = vld [vmem:[#allocation4 + $0x3a8] sm:$0xff] }
 0x82f   : > { %7462 = vst [vmem:[#allocation5 + $0x460] sm:$0xff] %v6694_v11  ;;  %11373 = vmatprep.mubr.bf16.mxu1 %v13545_v38 }
 0x830   : > { %v2794_v50 = vpop.f32.mrb[96].mxu0 }
 0x831   : > { %v11267_v4 = vpop.f32.mrb[96].mxu1  ;;  %v2796_v56 = vpop.f32.mrb[97].mxu0 }
 0x832   : > { %v4891_v12 = vpop.f32.mrb[97].mxu1  ;;  %v2798_v34 = vpop.f32.mrb[98].mxu0 }
 0x833   : > { %v11268_v1 = vpop.f32.mrb[98].mxu1  ;;  %v6818_v18 = vpack.c.bf16 %v2798_v34, %v2794_v50  ;;  %v2800_v62 = vpop.f32.mrb[99].mxu0 }
 0x834   : > { %v6703_v33 = vpack.c.bf16 %v11268_v1, %v11267_v4  ;;  %v4894_v29 = vpop.f32.mrb[99].mxu1  ;;  %v6819_v57 = vpack.c.bf16 %v2800_v62, %v2796_v56 }
 0x835   : > { %v6700_v45 = vpack.c.bf16 %v4894_v29, %v4891_v12  ;;  %7586 = vst [vmem:[#allocation5 + $0x840] sm:$0xff] %v6818_v18  ;;  %3063 = vmatmul.mubr.bf16.gmra.mrb[204].mxu0 %v13620_v0  ;;  %v13638_v18 = vld [vmem:[#allocation4 + $0x3b0] sm:$0xff] }
 0x836   : > { %7471 = vst [vmem:[#allocation5 + $0x4a8] sm:$0xff] %v6703_v33  ;;  %11374 = vmatmul.mubr.bf16.gmra.mrb[204].mxu1 %v13549_v21  ;;  %7587 = vst [vmem:[#allocation5 + $0x848] sm:$0xff] %v6819_v57  ;;  %3072 = vmatprep.mubr.bf16.mxu0 %v15421_v43 }
 0x837   : > { %7468 = vst [vmem:[#allocation5 + $0x490] sm:$0xff] %v6700_v45  ;;  %11377 = vmatprep.mubr.bf16.mxu1 %v13554_v48 }
 0x838   : > { %v2804_v38 = vpop.f32.mrb[100].mxu0 }
 0x839   : > { %v11271_v24 = vpop.f32.mrb[100].mxu1  ;;  %v2806_v25 = vpop.f32.mrb[101].mxu0 }
 0x83a   : > { %v4907_v60 = vpop.f32.mrb[101].mxu1  ;;  %v2808_v40 = vpop.f32.mrb[102].mxu0 }
 0x83b   : > { %v11272_v41 = vpop.f32.mrb[102].mxu1  ;;  %v6821_v42 = vpack.c.bf16 %v2808_v40, %v2804_v38  ;;  %v2810_v32 = vpop.f32.mrb[103].mxu0 }
 0x83c   : > { %v6709_v54 = vpack.c.bf16 %v11272_v41, %v11271_v24  ;;  %v4910_v47 = vpop.f32.mrb[103].mxu1  ;;  %v6822_v39 = vpack.c.bf16 %v2810_v32, %v2806_v25  ;;  %v13644_v41 = vld [vmem:[#allocation4 + $0x3b8] sm:$0xff] }
 0x83d   : > { %v6706_v21 = vpack.c.bf16 %v4910_v47, %v4907_v60  ;;  %7589 = vst [vmem:[#allocation5 + $0x858] sm:$0xff] %v6821_v42  ;;  %3073 = vmatmul.mubr.bf16.gmra.mrb[208].mxu0 %v13626_v30 }
 0x83e   : > { %7477 = vst [vmem:[#allocation5 + $0x4d8] sm:$0xff] %v6709_v54  ;;  %11378 = vmatmul.mubr.bf16.gmra.mrb[208].mxu1 %v13560_v31  ;;  %7590 = vst [vmem:[#allocation5 + $0x860] sm:$0xff] %v6822_v39  ;;  %3082 = vmatprep.mubr.bf16.mxu0 %v15421_v43 }
 0x83f   : > { %7474 = vst [vmem:[#allocation5 + $0x4c0] sm:$0xff] %v6706_v21  ;;  %11381 = vmatprep.mubr.bf16.mxu1 %v13566_v51 }
 0x840   : > { %v2814_v48 = vpop.f32.mrb[104].mxu0 }
 0x841   : > { %v11275_v14 = vpop.f32.mrb[104].mxu1  ;;  %v2816_v63 = vpop.f32.mrb[105].mxu0 }
 0x842   : > { %v4923_v20 = vpop.f32.mrb[105].mxu1  ;;  %v2818_v15 = vpop.f32.mrb[106].mxu0 }
 0x843   : > { %v11276_v3 = vpop.f32.mrb[106].mxu1  ;;  %v6824_v26 = vpack.c.bf16 %v2818_v15, %v2814_v48  ;;  %v2820_v49 = vpop.f32.mrb[107].mxu0  ;;  %v13650_v15 = vld [vmem:[#allocation4 + $0x3c0] sm:$0xff] }
 0x844   : > { %v6715_v59 = vpack.c.bf16 %v11276_v3, %v11275_v14  ;;  %v4926_v11 = vpop.f32.mrb[107].mxu1  ;;  %v6825_v50 = vpack.c.bf16 %v2820_v49, %v2816_v63 }
 0x845   : > { %v6712_v31 = vpack.c.bf16 %v4926_v11, %v4923_v20  ;;  %7592 = vst [vmem:[#allocation5 + $0x870] sm:$0xff] %v6824_v26  ;;  %3083 = vmatmul.mubr.bf16.gmra.mrb[212].mxu0 %v13632_v44 }
 0x846   : > { %7483 = vst [vmem:[#allocation5 + $0x508] sm:$0xff] %v6715_v59  ;;  %11382 = vmatmul.mubr.bf16.gmra.mrb[212].mxu1 %v13572_v27  ;;  %7593 = vst [vmem:[#allocation5 + $0x878] sm:$0xff] %v6825_v50  ;;  %3092 = vmatprep.mubr.bf16.mxu0 %v15421_v43 }
 0x847   : > { %7480 = vst [vmem:[#allocation5 + $0x4f0] sm:$0xff] %v6712_v31  ;;  %11385 = vmatprep.mubr.bf16.mxu1 %v13578_v10 }
 0x848   : > { %v2824_v51 = vpop.f32.mrb[108].mxu0 }
 0x849   : > { %v11279_v4 = vpop.f32.mrb[108].mxu1  ;;  %v2826_v56 = vpop.f32.mrb[109].mxu0 }
 0x84a   : > { %v4939_v12 = vpop.f32.mrb[109].mxu1  ;;  %v2828_v34 = vpop.f32.mrb[110].mxu0 }
 0x84b   : > { %v11280_v1 = vpop.f32.mrb[110].mxu1  ;;  %v6827_v33 = vpack.c.bf16 %v2828_v34, %v2824_v51  ;;  %v2830_v29 = vpop.f32.mrb[111].mxu0 }
 0x84c   : > { %v6721_v62 = vpack.c.bf16 %v11280_v1, %v11279_v4  ;;  %v4942_v57 = vpop.f32.mrb[111].mxu1  ;;  %v6828_v45 = vpack.c.bf16 %v2830_v29, %v2826_v56 }
 0x84d   : > { %v6718_v27 = vpack.c.bf16 %v4942_v57, %v4939_v12  ;;  %7595 = vst [vmem:[#allocation5 + $0x888] sm:$0xff] %v6827_v33  ;;  %3093 = vmatmul.mubr.bf16.gmra.mrb[216].mxu0 %v13638_v18  ;;  %v13656_v12 = vld [vmem:[#allocation4 + $0x3c8] sm:$0xff] }
 0x84e   : > { %7489 = vst [vmem:[#allocation5 + $0x538] sm:$0xff] %v6721_v62  ;;  %11386 = vmatmul.mubr.bf16.gmra.mrb[216].mxu1 %v13584_v61  ;;  %7596 = vst [vmem:[#allocation5 + $0x890] sm:$0xff] %v6828_v45  ;;  %3102 = vmatprep.mubr.bf16.mxu0 %v15421_v43 }
 0x84f   : > { %7486 = vst [vmem:[#allocation5 + $0x520] sm:$0xff] %v6718_v27  ;;  %11389 = vmatprep.mubr.bf16.mxu1 %v13590_v13 }
 0x850   : > { %v2834_v10 = vpop.f32.mrb[112].mxu0 }
 0x851   : > { %v11283_v38 = vpop.f32.mrb[112].mxu1  ;;  %v2836_v24 = vpop.f32.mrb[113].mxu0 }
 0x852   : > { %v4955_v25 = vpop.f32.mrb[113].mxu1  ;;  %v2838_v60 = vpop.f32.mrb[114].mxu0 }
 0x853   : > { %v11284_v40 = vpop.f32.mrb[114].mxu1  ;;  %v6830_v42 = vpack.c.bf16 %v2838_v60, %v2834_v10  ;;  %v2840_v32 = vpop.f32.mrb[115].mxu0 }
 0x854   : > { %v6727_v54 = vpack.c.bf16 %v11284_v40, %v11283_v38  ;;  %v4958_v47 = vpop.f32.mrb[115].mxu1  ;;  %v6831_v39 = vpack.c.bf16 %v2840_v32, %v2836_v24  ;;  %v1586_v24 = vld [vmem:[#allocation4 + $0x3d0] sm:$0xff] }
 0x855   : > { %v6724_v61 = vpack.c.bf16 %v4958_v47, %v4955_v25  ;;  %7598 = vst [vmem:[#allocation5 + $0x8a0] sm:$0xff] %v6830_v42  ;;  %3103 = vmatmul.mubr.bf16.gmra.mrb[220].mxu0 %v13644_v41 }
 0x856   : > { %7495 = vst [vmem:[#allocation5 + $0x568] sm:$0xff] %v6727_v54  ;;  %11390 = vmatmul.mubr.bf16.gmra.mrb[220].mxu1 %v13596_v2  ;;  %7599 = vst [vmem:[#allocation5 + $0x8a8] sm:$0xff] %v6831_v39  ;;  %3112 = vmatprep.mubr.bf16.mxu0 %v15421_v43 }
 0x857   : > { %7492 = vst [vmem:[#allocation5 + $0x550] sm:$0xff] %v6724_v61  ;;  %11393 = vmatprep.mubr.bf16.mxu1 %v13602_v28 }
 0x858   : > { %v2844_v13 = vpop.f32.mrb[116].mxu0 }
 0x859   : > { %v11287_v21 = vpop.f32.mrb[116].mxu1  ;;  %v2846_v48 = vpop.f32.mrb[117].mxu0 }
 0x85a   : > { %v4971_v14 = vpop.f32.mrb[117].mxu1  ;;  %v2848_v63 = vpop.f32.mrb[118].mxu0 }
 0x85b   : > { %v11288_v20 = vpop.f32.mrb[118].mxu1  ;;  %v6833_v3 = vpack.c.bf16 %v2848_v63, %v2844_v13  ;;  %v2850_v59 = vpop.f32.mrb[119].mxu0 }
 0x85c   : > { %v6733_v26 = vpack.c.bf16 %v11288_v20, %v11287_v21  ;;  %v4974_v49 = vpop.f32.mrb[119].mxu1  ;;  %v6834_v11 = vpack.c.bf16 %v2850_v59, %v2846_v48  ;;  %v1587_v21 = vld [vmem:[#allocation4 + $0x3d8] sm:$0xff] }
 0x85d   : > { %v6730_v2 = vpack.c.bf16 %v4974_v49, %v4971_v14  ;;  %7601 = vst [vmem:[#allocation5 + $0x8b8] sm:$0xff] %v6833_v3  ;;  %3113 = vmatmul.mubr.bf16.gmra.mrb[224].mxu0 %v13650_v15 }
 0x85e   : > { %7501 = vst [vmem:[#allocation5 + $0x598] sm:$0xff] %v6733_v26  ;;  %11394 = vmatmul.mubr.bf16.gmra.mrb[224].mxu1 %v13608_v35  ;;  %7602 = vst [vmem:[#allocation5 + $0x8c0] sm:$0xff] %v6834_v11  ;;  %3122 = vmatprep.mubr.bf16.mxu0 %v15421_v43 }
 0x85f   : > { %7498 = vst [vmem:[#allocation5 + $0x580] sm:$0xff] %v6730_v2  ;;  %11397 = vmatprep.mubr.bf16.mxu1 %v13614_v36 }
 0x860   : > { %v2854_v28 = vpop.f32.mrb[120].mxu0 }
 0x861   : > { %v11291_v50 = vpop.f32.mrb[120].mxu1  ;;  %v2856_v31 = vpop.f32.mrb[121].mxu0 }
 0x862   : > { %v4987_v51 = vpop.f32.mrb[121].mxu1  ;;  %v2858_v4 = vpop.f32.mrb[122].mxu0 }
 0x863   : > { %v11292_v56 = vpop.f32.mrb[122].mxu1  ;;  %v6836_v34 = vpack.c.bf16 %v2858_v4, %v2854_v28  ;;  %v2860_v33 = vpop.f32.mrb[123].mxu0  ;;  %v1588_v28 = vld [vmem:[#allocation4 + $0x3e0] sm:$0xff] }
 0x864   : > { %v6739_v1 = vpack.c.bf16 %v11292_v56, %v11291_v50  ;;  %v4990_v62 = vpop.f32.mrb[123].mxu1  ;;  %v6837_v29 = vpack.c.bf16 %v2860_v33, %v2856_v31 }
 0x865   : > { %v6736_v35 = vpack.c.bf16 %v4990_v62, %v4987_v51  ;;  %7604 = vst [vmem:[#allocation5 + $0x8d0] sm:$0xff] %v6836_v34  ;;  %3123 = vmatmul.mubr.bf16.gmra.mrb[228].mxu0 %v13656_v12 }
 0x866   : > { %7507 = vst [vmem:[#allocation5 + $0x5c8] sm:$0xff] %v6739_v1  ;;  %11398 = vmatmul.mubr.bf16.gmra.mrb[228].mxu1 %v13620_v0  ;;  %7605 = vst [vmem:[#allocation5 + $0x8d8] sm:$0xff] %v6837_v29  ;;  %3132 = vmatprep.mubr.bf16.mxu0 %v15421_v43 }
 0x867   : > { %7504 = vst [vmem:[#allocation5 + $0x5b0] sm:$0xff] %v6736_v35  ;;  %11401 = vmatprep.mubr.bf16.mxu1 %v13626_v30  ;;  %v1589_v35 = vld [vmem:[#allocation4 + $0x3e8] sm:$0xff] }
 0x868   : > { %v2864_v36 = vpop.f32.mrb[124].mxu0 }
 0x869   : > { %v11295_v57 = vpop.f32.mrb[124].mxu1  ;;  %v2866_v45 = vpop.f32.mrb[125].mxu0 }
 0x86a   : > { %v5003_v27 = vpop.f32.mrb[125].mxu1  ;;  %v2868_v10 = vpop.f32.mrb[126].mxu0 }
 0x86b   : > { %v11296_v38 = vpop.f32.mrb[126].mxu1  ;;  %v6839_v25 = vpack.c.bf16 %v2868_v10, %v2864_v36  ;;  %v2870_v40 = vpop.f32.mrb[127].mxu0 }
 0x86c   : > { %v6745_v60 = vpack.c.bf16 %v11296_v38, %v11295_v57  ;;  %v5006_v42 = vpop.f32.mrb[127].mxu1  ;;  %v6840_v54 = vpack.c.bf16 %v2870_v40, %v2866_v45 }
 0x86d   : > { %v6742_v32 = vpack.c.bf16 %v5006_v42, %v5003_v27  ;;  %7607 = vst [vmem:[#allocation5 + $0x8e8] sm:$0xff] %v6839_v25  ;;  %3133 = vmatmul.mubr.bf16.gmra.mrb[232].mxu0 %v1586_v24 }
 0x86e   : > { %7513 = vst [vmem:[#allocation5 + $0x5f8] sm:$0xff] %v6745_v60  ;;  %11402 = vmatmul.mubr.bf16.gmra.mrb[232].mxu1 %v13632_v44  ;;  %7608 = vst [vmem:[#allocation5 + $0x8f0] sm:$0xff] %v6840_v54  ;;  %3142 = vmatprep.mubr.bf16.mxu0 %v15421_v43  ;;  %v1590_v54 = vld [vmem:[#allocation4 + $0x3f0] sm:$0xff] }
 0x86f   : > { %7510 = vst [vmem:[#allocation5 + $0x5e0] sm:$0xff] %v6742_v32  ;;  %11405 = vmatprep.mubr.bf16.mxu1 %v13638_v18 }
 0x870   : > { %v2874_v0 = vpop.f32.mrb[128].mxu0 }
 0x871   : > { %v11299_v30 = vpop.f32.mrb[128].mxu1  ;;  %v2876_v47 = vpop.f32.mrb[129].mxu0 }
 0x872   : > { %v5019_v39 = vpop.f32.mrb[129].mxu1  ;;  %v2878_v61 = vpop.f32.mrb[130].mxu0 }
 0x873   : > { %v11300_v13 = vpop.f32.mrb[130].mxu1  ;;  %v6842_v48 = vpack.c.bf16 %v2878_v61, %v2874_v0  ;;  %v2880_v63 = vpop.f32.mrb[131].mxu0 }
 0x874   : > { %v6751_v14 = vpack.c.bf16 %v11300_v13, %v11299_v30  ;;  %v5022_v20 = vpop.f32.mrb[131].mxu1  ;;  %v6843_v3 = vpack.c.bf16 %v2880_v63, %v2876_v47 }
 0x875   : > { %v6748_v26 = vpack.c.bf16 %v5022_v20, %v5019_v39  ;;  %7610 = vst [vmem:[#allocation5 + $0x900] sm:$0xff] %v6842_v48  ;;  %3143 = vmatmul.mubr.bf16.gmra.mrb[236].mxu0 %v1587_v21 }
 0x876   : > { %7519 = vst [vmem:[#allocation5 + $0x628] sm:$0xff] %v6751_v14  ;;  %11406 = vmatmul.mubr.bf16.gmra.mrb[236].mxu1 %v13644_v41  ;;  %7611 = vst [vmem:[#allocation5 + $0x908] sm:$0xff] %v6843_v3  ;;  %3152 = vmatprep.mubr.bf16.mxu0 %v15421_v43  ;;  %v1591_v3 = vld [vmem:[#allocation4 + $0x3f8] sm:$0xff] }
 0x877   : > { %7516 = vst [vmem:[#allocation5 + $0x610] sm:$0xff] %v6748_v26  ;;  %11409 = vmatprep.mubr.bf16.mxu1 %v13650_v15 }
 0x878   : > { %v2884_v44 = vpop.f32.mrb[132].mxu0 }
 0x879   : > { %v11303_v18 = vpop.f32.mrb[132].mxu1  ;;  %v2886_v59 = vpop.f32.mrb[133].mxu0 }
 0x87a   : > { %v5035_v49 = vpop.f32.mrb[133].mxu1  ;;  %v2888_v11 = vpop.f32.mrb[134].mxu0 }
 0x87b   : > { %v11304_v2 = vpop.f32.mrb[134].mxu1  ;;  %v6845_v50 = vpack.c.bf16 %v2888_v11, %v2884_v44  ;;  %v2890_v51 = vpop.f32.mrb[135].mxu0 }
 0x87c   : > { %v6757_v31 = vpack.c.bf16 %v11304_v2, %v11303_v18  ;;  %v5038_v4 = vpop.f32.mrb[135].mxu1  ;;  %v6846_v56 = vpack.c.bf16 %v2890_v51, %v2886_v59 }
 0x87d   : > { %v6754_v34 = vpack.c.bf16 %v5038_v4, %v5035_v49  ;;  %7613 = vst [vmem:[#allocation5 + $0x918] sm:$0xff] %v6845_v50  ;;  %3153 = vmatmul.mubr.bf16.gmra.mrb[240].mxu0 %v1588_v28  ;;  %v1592_v49 = vld [vmem:[#allocation4 + $0x400] sm:$0xff] }
 0x87e   : > { %7525 = vst [vmem:[#allocation5 + $0x658] sm:$0xff] %v6757_v31  ;;  %11410 = vmatmul.mubr.bf16.gmra.mrb[240].mxu1 %v13656_v12  ;;  %7614 = vst [vmem:[#allocation5 + $0x920] sm:$0xff] %v6846_v56  ;;  %3162 = vmatprep.mubr.bf16.mxu0 %v15421_v43 }
 0x87f   : > { %7522 = vst [vmem:[#allocation5 + $0x640] sm:$0xff] %v6754_v34  ;;  %11413 = vmatprep.mubr.bf16.mxu1 %v1586_v24  ;;  %v1593_v34 = vld [vmem:[#allocation4 + $0x408] sm:$0xff] }
 0x880   : > { %v2894_v41 = vpop.f32.mrb[136].mxu0 }
 0x881   : > { %v11307_v15 = vpop.f32.mrb[136].mxu1  ;;  %v2896_v1 = vpop.f32.mrb[137].mxu0 }
 0x882   : > { %v5051_v33 = vpop.f32.mrb[137].mxu1  ;;  %v2898_v62 = vpop.f32.mrb[138].mxu0 }
 0x883   : > { %v11308_v29 = vpop.f32.mrb[138].mxu1  ;;  %v6848_v36 = vpack.c.bf16 %v2898_v62, %v2894_v41  ;;  %v2900_v45 = vpop.f32.mrb[139].mxu0  ;;  %v1594_v62 = vld [vmem:[#allocation4 + $0x410] sm:$0xff] }
 0x884   : > { %v6763_v57 = vpack.c.bf16 %v11308_v29, %v11307_v15  ;;  %v5054_v27 = vpop.f32.mrb[139].mxu1  ;;  %v6849_v10 = vpack.c.bf16 %v2900_v45, %v2896_v1 }
 0x885   : > { %v6760_v38 = vpack.c.bf16 %v5054_v27, %v5051_v33  ;;  %7616 = vst [vmem:[#allocation5 + $0x930] sm:$0xff] %v6848_v36  ;;  %3163 = vmatmul.mubr.bf16.gmra.mrb[244].mxu0 %v1589_v35 }
 0x886   : > { %7531 = vst [vmem:[#allocation5 + $0x688] sm:$0xff] %v6763_v57  ;;  %11414 = vmatmul.mubr.bf16.gmra.mrb[244].mxu1 %v1587_v21  ;;  %7617 = vst [vmem:[#allocation5 + $0x938] sm:$0xff] %v6849_v10  ;;  %3172 = vmatprep.mubr.bf16.mxu0 %v15421_v43 }
 0x887   : > { %7528 = vst [vmem:[#allocation5 + $0x670] sm:$0xff] %v6760_v38  ;;  %11417 = vmatprep.mubr.bf16.mxu1 %v1588_v28 }
 0x888   : > { %v2904_v12 = vpop.f32.mrb[140].mxu0 }
 0x889   : > { %v11311_v24 = vpop.f32.mrb[140].mxu1  ;;  %v2906_v25 = vpop.f32.mrb[141].mxu0 }
 0x88a   : > { %v5067_v60 = vpop.f32.mrb[141].mxu1  ;;  %v2908_v40 = vpop.f32.mrb[142].mxu0 }
 0x88b   : > { %v11312_v42 = vpop.f32.mrb[142].mxu1  ;;  %v6851_v32 = vpack.c.bf16 %v2908_v40, %v2904_v12  ;;  %v2910_v30 = vpop.f32.mrb[143].mxu0  ;;  %v1595_v12 = vld [vmem:[#allocation4 + $0x418] sm:$0xff] }
 0x88c   : > { %v6769_v0 = vpack.c.bf16 %v11312_v42, %v11311_v24  ;;  %v5070_v47 = vpop.f32.mrb[143].mxu1  ;;  %v6852_v39 = vpack.c.bf16 %v2910_v30, %v2906_v25  ;;  %v13674_v42 = vld [vmem:[#allocation4 + $0x420] sm:$0xff] }
 0x88d   : > { %v6766_v61 = vpack.c.bf16 %v5070_v47, %v5067_v60  ;;  %7619 = vst [vmem:[#allocation5 + $0x948] sm:$0xff] %v6851_v32  ;;  %3173 = vmatmul.mubr.bf16.gmra.mrb[248].mxu0 %v1590_v54 }
 0x88e   : > { %7537 = vst [vmem:[#allocation5 + $0x6b8] sm:$0xff] %v6769_v0  ;;  %11418 = vmatmul.mubr.bf16.gmra.mrb[248].mxu1 %v1589_v35  ;;  %7620 = vst [vmem:[#allocation5 + $0x950] sm:$0xff] %v6852_v39  ;;  %3182 = vmatprep.mubr.bf16.mxu0 %v15421_v43 }
 0x88f   : > { %7534 = vst [vmem:[#allocation5 + $0x6a0] sm:$0xff] %v6766_v61  ;;  %11421 = vmatprep.mubr.bf16.mxu1 %v1590_v54 }
 0x890   : > { %v2914_v13 = vpop.f32.mrb[144].mxu0 }
 0x891   : > { %v11315_v21 = vpop.f32.mrb[144].mxu1  ;;  %v2916_v48 = vpop.f32.mrb[145].mxu0 }
 0x892   : > { %v5083_v14 = vpop.f32.mrb[145].mxu1  ;;  %v2918_v63 = vpop.f32.mrb[146].mxu0 }
 0x893   : > { %v11316_v20 = vpop.f32.mrb[146].mxu1  ;;  %v6854_v26 = vpack.c.bf16 %v2918_v63, %v2914_v13  ;;  %v2920_v18 = vpop.f32.mrb[147].mxu0 }
 0x894   : > { %v6775_v44 = vpack.c.bf16 %v11316_v20, %v11315_v21  ;;  %v5086_v59 = vpop.f32.mrb[147].mxu1  ;;  %v6855_v11 = vpack.c.bf16 %v2920_v18, %v2916_v48  ;;  %v13678_v21 = vld [vmem:[#allocation4 + $0x428] sm:$0xff] }
 0x895   : > { %v6772_v2 = vpack.c.bf16 %v5086_v59, %v5083_v14  ;;  %7622 = vst [vmem:[#allocation5 + $0x960] sm:$0xff] %v6854_v26  ;;  %3183 = vmatmul.mubr.bf16.gmra.mrb[252].mxu0 %v1591_v3 }
 0x896   : > { %7543 = vst [vmem:[#allocation5 + $0x6e8] sm:$0xff] %v6775_v44  ;;  %11422 = vmatmul.mubr.bf16.gmra.mrb[252].mxu1 %v1591_v3  ;;  %7623 = vst [vmem:[#allocation5 + $0x968] sm:$0xff] %v6855_v11  ;;  %3192 = vmatprep.mubr.bf16.mxu0 %v15421_v43  ;;  %v13680_v3 = vld [vmem:[#allocation4 + $0x430] sm:$0xff] }
 0x897   : > { %7540 = vst [vmem:[#allocation5 + $0x6d0] sm:$0xff] %v6772_v2  ;;  %11425 = vmatprep.mubr.bf16.mxu1 %v1592_v49 }
 0x898   : > { %v2924_v28 = vpop.f32.mrb[148].mxu0 }
 0x899   : > { %v11319_v50 = vpop.f32.mrb[148].mxu1  ;;  %v2926_v31 = vpop.f32.mrb[149].mxu0 }
 0x89a   : > { %v5099_v51 = vpop.f32.mrb[149].mxu1  ;;  %v2928_v4 = vpop.f32.mrb[150].mxu0 }
 0x89b   : > { %v11320_v56 = vpop.f32.mrb[150].mxu1  ;;  %v6857_v41 = vpack.c.bf16 %v2928_v4, %v2924_v28  ;;  %v2930_v1 = vpop.f32.mrb[151].mxu0 }
 0x89c   : > { %v6781_v15 = vpack.c.bf16 %v11320_v56, %v11319_v50  ;;  %v5102_v33 = vpop.f32.mrb[151].mxu1  ;;  %v6858_v29 = vpack.c.bf16 %v2930_v1, %v2926_v31  ;;  %v13685_v50 = vld [vmem:[#allocation4 + $0x438] sm:$0xff] }
 0x89d   : > { %v6778_v35 = vpack.c.bf16 %v5102_v33, %v5099_v51  ;;  %7625 = vst [vmem:[#allocation5 + $0x978] sm:$0xff] %v6857_v41  ;;  %3193 = vmatmul.mubr.bf16.gmra.mrb[0].mxu0 %v1592_v49 }
 0x89e   : > { %7549 = vst [vmem:[#allocation5 + $0x718] sm:$0xff] %v6781_v15  ;;  %11426 = vmatmul.mubr.bf16.gmra.mrb[0].mxu1 %v1593_v34  ;;  %7626 = vst [vmem:[#allocation5 + $0x980] sm:$0xff] %v6858_v29  ;;  %3202 = vmatprep.mubr.bf16.mxu0 %v15421_v43 }
 0x89f   : > { %7546 = vst [vmem:[#allocation5 + $0x700] sm:$0xff] %v6778_v35  ;;  %11429 = vmatprep.mubr.bf16.mxu1 %v1594_v62 }
 0x8a0   : > { %v2934_v36 = vpop.f32.mrb[152].mxu0 }
 0x8a1   : > { %v11323_v57 = vpop.f32.mrb[152].mxu1  ;;  %v2936_v45 = vpop.f32.mrb[153].mxu0 }
 0x8a2   : > { %v5115_v27 = vpop.f32.mrb[153].mxu1  ;;  %v2938_v10 = vpop.f32.mrb[154].mxu0 }
 0x8a3   : > { %v11324_v38 = vpop.f32.mrb[154].mxu1  ;;  %v6860_v24 = vpack.c.bf16 %v2938_v10, %v2934_v36  ;;  %v2940_v60 = vpop.f32.mrb[155].mxu0 }
 0x8a4   : > { %v6787_v25 = vpack.c.bf16 %v11324_v38, %v11323_v57  ;;  %v5118_v40 = vpop.f32.mrb[155].mxu1  ;;  %v6861_v54 = vpack.c.bf16 %v2940_v60, %v2936_v45  ;;  %v13692_v57 = vld [vmem:[#allocation4 + $0x448] sm:$0xff] }
 0x8a5   : > { %v6784_v32 = vpack.c.bf16 %v5118_v40, %v5115_v27  ;;  %7628 = vst [vmem:[#allocation5 + $0x990] sm:$0xff] %v6860_v24  ;;  %3203 = vmatmul.mubr.bf16.gmra.mrb[4].mxu0 %v1593_v34  ;;  %v13687_v34 = vld [vmem:[#allocation4 + $0x440] sm:$0xff] }
 0x8a6   : > { %7555 = vst [vmem:[#allocation5 + $0x748] sm:$0xff] %v6787_v25  ;;  %11430 = vmatmul.mubr.bf16.gmra.mrb[4].mxu1 %v1595_v12  ;;  %7629 = vst [vmem:[#allocation5 + $0x998] sm:$0xff] %v6861_v54  ;;  %3212 = vmatprep.mubr.bf16.mxu0 %v15421_v43 }
 0x8a7   : > { %7552 = vst [vmem:[#allocation5 + $0x730] sm:$0xff] %v6784_v32  ;;  %11433 = vmatprep.mubr.bf16.mxu1 %v13674_v42 }
 0x8a8   : > { %v2944_v0 = vpop.f32.mrb[156].mxu0 }
 0x8a9   : > { %v11327_v30 = vpop.f32.mrb[156].mxu1  ;;  %v2946_v47 = vpop.f32.mrb[157].mxu0 }
 0x8aa   : > { %v5131_v39 = vpop.f32.mrb[157].mxu1  ;;  %v2948_v61 = vpop.f32.mrb[158].mxu0 }
 0x8ab   : > { %v11328_v13 = vpop.f32.mrb[158].mxu1  ;;  %v6863_v48 = vpack.c.bf16 %v2948_v61, %v2944_v0  ;;  %v2950_v63 = vpop.f32.mrb[159].mxu0 }
 0x8ac   : > { %v6793_v14 = vpack.c.bf16 %v11328_v13, %v11327_v30  ;;  %v5134_v20 = vpop.f32.mrb[159].mxu1  ;;  %v6864_v26 = vpack.c.bf16 %v2950_v63, %v2946_v47  ;;  %v13700_v47 = vld [vmem:[#allocation4 + $0x458] sm:$0xff] }
 0x8ad   : > { %v6790_v44 = vpack.c.bf16 %v5134_v20, %v5131_v39  ;;  %7631 = vst [vmem:[#allocation5 + $0x9a8] sm:$0xff] %v6863_v48  ;;  %3213 = vmatmul.mubr.bf16.gmra.mrb[8].mxu0 %v1594_v62  ;;  %v13702_v48 = vld [vmem:[#allocation4 + $0x460] sm:$0xff] }
 0x8ae   : > { %7561 = vst [vmem:[#allocation5 + $0x778] sm:$0xff] %v6793_v14  ;;  %11434 = vmatmul.mubr.bf16.gmra.mrb[8].mxu1 %v13678_v21  ;;  %7632 = vst [vmem:[#allocation5 + $0x9b0] sm:$0xff] %v6864_v26  ;;  %3222 = vmatprep.mubr.bf16.mxu0 %v15421_v43 }
 0x8af   : > { %7558 = vst [vmem:[#allocation5 + $0x760] sm:$0xff] %v6790_v44  ;;  %11437 = vmatprep.mubr.bf16.mxu1 %v13680_v3 }
 0x8b0   : > { %v2954_v18 = vpop.f32.mrb[160].mxu0 }
 0x8b1   : > { %v11331_v59 = vpop.f32.mrb[160].mxu1  ;;  %v2956_v49 = vpop.f32.mrb[161].mxu0 }
 0x8b2   : > { %v5147_v11 = vpop.f32.mrb[161].mxu1  ;;  %v2958_v2 = vpop.f32.mrb[162].mxu0 }
 0x8b3   : > { %v11332_v28 = vpop.f32.mrb[162].mxu1  ;;  %v6866_v31 = vpack.c.bf16 %v2958_v2, %v2954_v18  ;;  %v2960_v4 = vpop.f32.mrb[163].mxu0 }
 0x8b4   : > { %v6799_v51 = vpack.c.bf16 %v11332_v28, %v11331_v59  ;;  %v5150_v56 = vpop.f32.mrb[163].mxu1  ;;  %v6867_v41 = vpack.c.bf16 %v2960_v4, %v2956_v49 }
 0x8b5   : > { %v6796_v15 = vpack.c.bf16 %v5150_v56, %v5147_v11  ;;  %7634 = vst [vmem:[#allocation5 + $0x9c0] sm:$0xff] %v6866_v31  ;;  %3223 = vmatmul.mubr.bf16.gmra.mrb[12].mxu0 %v1595_v12  ;;  %v13694_v12 = vld [vmem:[#allocation4 + $0x450] sm:$0xff]  ;;  %v13708_v11 = vld [vmem:[#allocation4 + $0x468] sm:$0xff] }
 0x8b6   : > { %7567 = vst [vmem:[#allocation5 + $0x7a8] sm:$0xff] %v6799_v51  ;;  %11438 = vmatmul.mubr.bf16.gmra.mrb[12].mxu1 %v13685_v50  ;;  %7635 = vst [vmem:[#allocation5 + $0x9c8] sm:$0xff] %v6867_v41  ;;  %3232 = vmatprep.mubr.bf16.mxu0 %v15421_v43  ;;  %v13710_v51 = vld [vmem:[#allocation4 + $0x470] sm:$0xff] }
 0x8b7   : > { %7564 = vst [vmem:[#allocation5 + $0x790] sm:$0xff] %v6796_v15  ;;  %11441 = vmatprep.mubr.bf16.mxu1 %v13687_v34 }
 0x8b8   : > { %v2964_v1 = vpop.f32.mrb[164].mxu0 }
 0x8b9   : > { %v11335_v33 = vpop.f32.mrb[164].mxu1  ;;  %v2966_v62 = vpop.f32.mrb[165].mxu0 }
 0x8ba   : > { %v5163_v29 = vpop.f32.mrb[165].mxu1  ;;  %v2968_v35 = vpop.f32.mrb[166].mxu0 }
 0x8bb   : > { %v11336_v36 = vpop.f32.mrb[166].mxu1  ;;  %v6869_v45 = vpack.c.bf16 %v2968_v35, %v2964_v1  ;;  %v2970_v10 = vpop.f32.mrb[167].mxu0  ;;  %v13716_v35 = vld [vmem:[#allocation4 + $0x478] sm:$0xff] }
 0x8bc   : > { %v6805_v27 = vpack.c.bf16 %v11336_v36, %v11335_v33  ;;  %v5166_v38 = vpop.f32.mrb[167].mxu1  ;;  %v6870_v24 = vpack.c.bf16 %v2970_v10, %v2966_v62  ;;  %v13718_v10 = vld [vmem:[#allocation4 + $0x480] sm:$0xff] }
 0x8bd   : > { %v6802_v25 = vpack.c.bf16 %v5166_v38, %v5163_v29  ;;  %7637 = vst [vmem:[#allocation5 + $0x9d8] sm:$0xff] %v6869_v45  ;;  %3233 = vmatmul.mubr.bf16.gmra.mrb[16].mxu0 %v13674_v42 }
 0x8be   : > { %7573 = vst [vmem:[#allocation5 + $0x7d8] sm:$0xff] %v6805_v27  ;;  %11442 = vmatmul.mubr.bf16.gmra.mrb[16].mxu1 %v13692_v57  ;;  %7638 = vst [vmem:[#allocation5 + $0x9e0] sm:$0xff] %v6870_v24  ;;  %3242 = vmatprep.mubr.bf16.mxu0 %v15421_v43 }
 0x8bf   : > { %7570 = vst [vmem:[#allocation5 + $0x7c0] sm:$0xff] %v6802_v25  ;;  %11445 = vmatprep.mubr.bf16.mxu1 %v13694_v12 }
 0x8c0   : > { %v2974_v60 = vpop.f32.mrb[168].mxu0 }
 0x8c1   : > { %v11339_v40 = vpop.f32.mrb[168].mxu1  ;;  %v2976_v54 = vpop.f32.mrb[169].mxu0 }
 0x8c2   : > { %v5179_v32 = vpop.f32.mrb[169].mxu1  ;;  %v2978_v0 = vpop.f32.mrb[170].mxu0 }
 0x8c3   : > { %v11340_v30 = vpop.f32.mrb[170].mxu1  ;;  %v6872_v39 = vpack.c.bf16 %v2978_v0, %v2974_v60  ;;  %v2980_v13 = vpop.f32.mrb[171].mxu0 }
 0x8c4   : > { %v6811_v61 = vpack.c.bf16 %v11340_v30, %v11339_v40  ;;  %v5182_v42 = vpop.f32.mrb[171].mxu1  ;;  %v6873_v14 = vpack.c.bf16 %v2980_v13, %v2976_v54  ;;  %v13724_v30 = vld [vmem:[#allocation4 + $0x488] sm:$0xff] }
 0x8c5   : > { %v6808_v63 = vpack.c.bf16 %v5182_v42, %v5179_v32  ;;  %7640 = vst [vmem:[#allocation5 + $0x9f0] sm:$0xff] %v6872_v39  ;;  %3243 = vmatmul.mubr.bf16.gmra.mrb[20].mxu0 %v13678_v21  ;;  %v13726_v42 = vld [vmem:[#allocation4 + $0x490] sm:$0xff] }
 0x8c6   : > { %7579 = vst [vmem:[#allocation5 + $0x808] sm:$0xff] %v6811_v61  ;;  %11446 = vmatmul.mubr.bf16.gmra.mrb[20].mxu1 %v13700_v47  ;;  %7641 = vst [vmem:[#allocation5 + $0x9f8] sm:$0xff] %v6873_v14  ;;  %3252 = vmatprep.mubr.bf16.mxu0 %v15421_v43 }
 0x8c7   : > { %7576 = vst [vmem:[#allocation5 + $0x7f0] sm:$0xff] %v6808_v63  ;;  %11449 = vmatprep.mubr.bf16.mxu1 %v13702_v48 }
 0x8c8   : > { %v2984_v20 = vpop.f32.mrb[172].mxu0 }
 0x8c9   : > { %v11343_v26 = vpop.f32.mrb[172].mxu1  ;;  %v2986_v44 = vpop.f32.mrb[173].mxu0 }
 0x8ca   : > { %v5195_v18 = vpop.f32.mrb[173].mxu1  ;;  %v2988_v59 = vpop.f32.mrb[174].mxu0 }
 0x8cb   : > { %v11344_v49 = vpop.f32.mrb[174].mxu1  ;;  %v6875_v2 = vpack.c.bf16 %v2988_v59, %v2984_v20  ;;  %v2990_v31 = vpop.f32.mrb[175].mxu0 }
 0x8cc   : > { %v6817_v28 = vpack.c.bf16 %v11344_v49, %v11343_v26  ;;  %v5198_v21 = vpop.f32.mrb[175].mxu1  ;;  %v6876_v4 = vpack.c.bf16 %v2990_v31, %v2986_v44 }
 0x8cd   : > { %v6814_v56 = vpack.c.bf16 %v5198_v21, %v5195_v18  ;;  %7643 = vst [vmem:[#allocation5 + $0xa08] sm:$0xff] %v6875_v2  ;;  %3253 = vmatmul.mubr.bf16.gmra.mrb[24].mxu0 %v13680_v3  ;;  %v13732_v2 = vld [vmem:[#allocation4 + $0x498] sm:$0xff] }
 0x8ce   : > { %7585 = vst [vmem:[#allocation5 + $0x838] sm:$0xff] %v6817_v28  ;;  %11450 = vmatmul.mubr.bf16.gmra.mrb[24].mxu1 %v13708_v11  ;;  %7644 = vst [vmem:[#allocation5 + $0xa10] sm:$0xff] %v6876_v4  ;;  %3262 = vmatprep.mubr.bf16.mxu0 %v15421_v43  ;;  %v13734_v4 = vld [vmem:[#allocation4 + $0x4a0] sm:$0xff] }
 0x8cf   : > { %7582 = vst [vmem:[#allocation5 + $0x820] sm:$0xff] %v6814_v56  ;;  %11453 = vmatprep.mubr.bf16.mxu1 %v13710_v51 }
 0x8d0   : > { %v2994_v41 = vpop.f32.mrb[176].mxu0 }
 0x8d1   : > { %v11347_v15 = vpop.f32.mrb[176].mxu1  ;;  %v2996_v1 = vpop.f32.mrb[177].mxu0 }
 0x8d2   : > { %v5211_v33 = vpop.f32.mrb[177].mxu1  ;;  %v2998_v62 = vpop.f32.mrb[178].mxu0 }
 0x8d3   : > { %v11348_v29 = vpop.f32.mrb[178].mxu1  ;;  %v6878_v36 = vpack.c.bf16 %v2998_v62, %v2994_v41  ;;  %v3000_v27 = vpop.f32.mrb[179].mxu0 }
 0x8d4   : > { %v6823_v45 = vpack.c.bf16 %v11348_v29, %v11347_v15  ;;  %v5214_v3 = vpop.f32.mrb[179].mxu1  ;;  %v6879_v38 = vpack.c.bf16 %v3000_v27, %v2996_v1 }
 0x8d5   : > { %v6820_v24 = vpack.c.bf16 %v5214_v3, %v5211_v33  ;;  %7646 = vst [vmem:[#allocation5 + $0xa20] sm:$0xff] %v6878_v36  ;;  %3263 = vmatmul.mubr.bf16.gmra.mrb[28].mxu0 %v13685_v50 }
 0x8d6   : > { %7591 = vst [vmem:[#allocation5 + $0x868] sm:$0xff] %v6823_v45  ;;  %11454 = vmatmul.mubr.bf16.gmra.mrb[28].mxu1 %v13716_v35  ;;  %7647 = vst [vmem:[#allocation5 + $0xa28] sm:$0xff] %v6879_v38  ;;  %3272 = vmatprep.mubr.bf16.mxu0 %v15421_v43  ;;  %v13740_v45 = vld [vmem:[#allocation4 + $0x4a8] sm:$0xff] }
 0x8d7   : > { %7588 = vst [vmem:[#allocation5 + $0x850] sm:$0xff] %v6820_v24  ;;  %11457 = vmatprep.mubr.bf16.mxu1 %v13718_v10  ;;  %v13742_v24 = vld [vmem:[#allocation4 + $0x4b0] sm:$0xff] }
 0x8d8   : > { %v3004_v25 = vpop.f32.mrb[180].mxu0 }
 0x8d9   : > { %v11351_v60 = vpop.f32.mrb[180].mxu1  ;;  %v3006_v40 = vpop.f32.mrb[181].mxu0 }
 0x8da   : > { %v5227_v54 = vpop.f32.mrb[181].mxu1  ;;  %v3008_v32 = vpop.f32.mrb[182].mxu0 }
 0x8db   : > { %v11352_v0 = vpop.f32.mrb[182].mxu1  ;;  %v6881_v39 = vpack.c.bf16 %v3008_v32, %v3004_v25  ;;  %v3010_v13 = vpop.f32.mrb[183].mxu0 }
 0x8dc   : > { %v6829_v61 = vpack.c.bf16 %v11352_v0, %v11351_v60  ;;  %v5230_v50 = vpop.f32.mrb[183].mxu1  ;;  %v6882_v14 = vpack.c.bf16 %v3010_v13, %v3006_v40  ;;  %v13748_v13 = vld [vmem:[#allocation4 + $0x4b8] sm:$0xff] }
 0x8dd   : > { %v6826_v63 = vpack.c.bf16 %v5230_v50, %v5227_v54  ;;  %7649 = vst [vmem:[#allocation5 + $0xa38] sm:$0xff] %v6881_v39  ;;  %3273 = vmatmul.mubr.bf16.gmra.mrb[32].mxu0 %v13687_v34 }
 0x8de   : > { %7597 = vst [vmem:[#allocation5 + $0x898] sm:$0xff] %v6829_v61  ;;  %11458 = vmatmul.mubr.bf16.gmra.mrb[32].mxu1 %v13724_v30  ;;  %7650 = vst [vmem:[#allocation5 + $0xa40] sm:$0xff] %v6882_v14  ;;  %3282 = vmatprep.mubr.bf16.mxu0 %v15421_v43 }
 0x8df   : > { %7594 = vst [vmem:[#allocation5 + $0x880] sm:$0xff] %v6826_v63  ;;  %11461 = vmatprep.mubr.bf16.mxu1 %v13726_v42 }
 0x8e0   : > { %v3014_v20 = vpop.f32.mrb[184].mxu0 }
 0x8e1   : > { %v11355_v26 = vpop.f32.mrb[184].mxu1  ;;  %v3016_v44 = vpop.f32.mrb[185].mxu0 }
 0x8e2   : > { %v5243_v18 = vpop.f32.mrb[185].mxu1  ;;  %v3018_v59 = vpop.f32.mrb[186].mxu0 }
 0x8e3   : > { %v11356_v49 = vpop.f32.mrb[186].mxu1  ;;  %v6884_v28 = vpack.c.bf16 %v3018_v59, %v3014_v20  ;;  %v3020_v21 = vpop.f32.mrb[187].mxu0  ;;  %v13750_v20 = vld [vmem:[#allocation4 + $0x4c0] sm:$0xff] }
 0x8e4   : > { %v6835_v31 = vpack.c.bf16 %v11356_v49, %v11355_v26  ;;  %v5246_v34 = vpop.f32.mrb[187].mxu1  ;;  %v6885_v56 = vpack.c.bf16 %v3020_v21, %v3016_v44 }
 0x8e5   : > { %v6832_v41 = vpack.c.bf16 %v5246_v34, %v5243_v18  ;;  %7652 = vst [vmem:[#allocation5 + $0xa50] sm:$0xff] %v6884_v28  ;;  %3283 = vmatmul.mubr.bf16.gmra.mrb[36].mxu0 %v13692_v57  ;;  %v13756_v34 = vld [vmem:[#allocation4 + $0x4c8] sm:$0xff] }
 0x8e6   : > { %7603 = vst [vmem:[#allocation5 + $0x8c8] sm:$0xff] %v6835_v31  ;;  %11462 = vmatmul.mubr.bf16.gmra.mrb[36].mxu1 %v13732_v2  ;;  %7653 = vst [vmem:[#allocation5 + $0xa58] sm:$0xff] %v6885_v56  ;;  %3292 = vmatprep.mubr.bf16.mxu0 %v15421_v43 }
 0x8e7   : > { %7600 = vst [vmem:[#allocation5 + $0x8b0] sm:$0xff] %v6832_v41  ;;  %11465 = vmatprep.mubr.bf16.mxu1 %v13734_v4 }
 0x8e8   : > { %v3024_v15 = vpop.f32.mrb[188].mxu0 }
 0x8e9   : > { %v11359_v1 = vpop.f32.mrb[188].mxu1  ;;  %v3026_v33 = vpop.f32.mrb[189].mxu0 }
 0x8ea   : > { %v5259_v62 = vpop.f32.mrb[189].mxu1  ;;  %v3028_v29 = vpop.f32.mrb[190].mxu0 }
 0x8eb   : > { %v11360_v36 = vpop.f32.mrb[190].mxu1  ;;  %v6887_v27 = vpack.c.bf16 %v3028_v29, %v3024_v15  ;;  %v3030_v38 = vpop.f32.mrb[191].mxu0 }
 0x8ec   : > { %v6841_v3 = vpack.c.bf16 %v11360_v36, %v11359_v1  ;;  %v5262_v57 = vpop.f32.mrb[191].mxu1  ;;  %v6888_v25 = vpack.c.bf16 %v3030_v38, %v3026_v33  ;;  %v13758_v1 = vld [vmem:[#allocation4 + $0x4d0] sm:$0xff] }
 0x8ed   : > { %v6838_v60 = vpack.c.bf16 %v5262_v57, %v5259_v62  ;;  %7655 = vst [vmem:[#allocation5 + $0xa68] sm:$0xff] %v6887_v27  ;;  %3293 = vmatmul.mubr.bf16.gmra.mrb[40].mxu0 %v13694_v12 }
 0x8ee   : > { %7609 = vst [vmem:[#allocation5 + $0x8f8] sm:$0xff] %v6841_v3  ;;  %11466 = vmatmul.mubr.bf16.gmra.mrb[40].mxu1 %v13740_v45  ;;  %7656 = vst [vmem:[#allocation5 + $0xa70] sm:$0xff] %v6888_v25  ;;  %3302 = vmatprep.mubr.bf16.mxu0 %v15421_v43  ;;  %v13764_v25 = vld [vmem:[#allocation4 + $0x4d8] sm:$0xff] }
 0x8ef   : > { %7606 = vst [vmem:[#allocation5 + $0x8e0] sm:$0xff] %v6838_v60  ;;  %11469 = vmatprep.mubr.bf16.mxu1 %v13742_v24 }
 0x8f0   : > { %v3034_v40 = vpop.f32.mrb[192].mxu0 }
 0x8f1   : > { %v11363_v54 = vpop.f32.mrb[192].mxu1  ;;  %v3036_v32 = vpop.f32.mrb[193].mxu0 }
 0x8f2   : > { %v5275_v0 = vpop.f32.mrb[193].mxu1  ;;  %v3038_v39 = vpop.f32.mrb[194].mxu0 }
 0x8f3   : > { %v11364_v61 = vpop.f32.mrb[194].mxu1  ;;  %v6890_v50 = vpack.c.bf16 %v3038_v39, %v3034_v40  ;;  %v3040_v63 = vpop.f32.mrb[195].mxu0 }
 0x8f4   : > { %v6847_v14 = vpack.c.bf16 %v11364_v61, %v11363_v54  ;;  %v5278_v12 = vpop.f32.mrb[195].mxu1  ;;  %v6891_v26 = vpack.c.bf16 %v3040_v63, %v3036_v32  ;;  %v13766_v32 = vld [vmem:[#allocation4 + $0x4e0] sm:$0xff] }
 0x8f5   : > { %v6844_v44 = vpack.c.bf16 %v5278_v12, %v5275_v0  ;;  %7658 = vst [vmem:[#allocation5 + $0xa80] sm:$0xff] %v6890_v50  ;;  %3303 = vmatmul.mubr.bf16.gmra.mrb[44].mxu0 %v13700_v47 }
 0x8f6   : > { %7615 = vst [vmem:[#allocation5 + $0x928] sm:$0xff] %v6847_v14  ;;  %11470 = vmatmul.mubr.bf16.gmra.mrb[44].mxu1 %v13748_v13  ;;  %7659 = vst [vmem:[#allocation5 + $0xa88] sm:$0xff] %v6891_v26  ;;  %3312 = vmatprep.mubr.bf16.mxu0 %v15421_v43 }
 0x8f7   : > { %7612 = vst [vmem:[#allocation5 + $0x910] sm:$0xff] %v6844_v44  ;;  %11473 = vmatprep.mubr.bf16.mxu1 %v13750_v20  ;;  %v13772_v44 = vld [vmem:[#allocation4 + $0x4e8] sm:$0xff] }
 0x8f8   : > { %v3044_v18 = vpop.f32.mrb[196].mxu0 }
 0x8f9   : > { %v11367_v59 = vpop.f32.mrb[196].mxu1  ;;  %v3046_v49 = vpop.f32.mrb[197].mxu0 }
 0x8fa   : > { %v5291_v28 = vpop.f32.mrb[197].mxu1  ;;  %v3048_v31 = vpop.f32.mrb[198].mxu0 }
 0x8fb   : > { %v11368_v21 = vpop.f32.mrb[198].mxu1  ;;  %v6893_v56 = vpack.c.bf16 %v3048_v31, %v3044_v18  ;;  %v3050_v15 = vpop.f32.mrb[199].mxu0 }
 0x8fc   : > { %v6853_v41 = vpack.c.bf16 %v11368_v21, %v11367_v59  ;;  %v5294_v47 = vpop.f32.mrb[199].mxu1  ;;  %v6894_v33 = vpack.c.bf16 %v3050_v15, %v3046_v49 }
 0x8fd   : > { %v6850_v62 = vpack.c.bf16 %v5294_v47, %v5291_v28  ;;  %7661 = vst [vmem:[#allocation5 + $0xa98] sm:$0xff] %v6893_v56  ;;  %3313 = vmatmul.mubr.bf16.gmra.mrb[48].mxu0 %v13702_v48  ;;  %v13774_v28 = vld [vmem:[#allocation4 + $0x4f0] sm:$0xff] }
 0x8fe   : > { %7621 = vst [vmem:[#allocation5 + $0x958] sm:$0xff] %v6853_v41  ;;  %11474 = vmatmul.mubr.bf16.gmra.mrb[48].mxu1 %v13756_v34  ;;  %7662 = vst [vmem:[#allocation5 + $0xaa0] sm:$0xff] %v6894_v33  ;;  %3322 = vmatprep.mubr.bf16.mxu0 %v15421_v43 }
 0x8ff   : > { %7618 = vst [vmem:[#allocation5 + $0x940] sm:$0xff] %v6850_v62  ;;  %11477 = vmatprep.mubr.bf16.mxu1 %v13758_v1 }
 0x900   : > { %v3054_v29 = vpop.f32.mrb[200].mxu0 }
 0x901   : > { %v11371_v36 = vpop.f32.mrb[200].mxu1  ;;  %v3056_v27 = vpop.f32.mrb[201].mxu0 }
 0x902   : > { %v5307_v3 = vpop.f32.mrb[201].mxu1  ;;  %v3058_v38 = vpop.f32.mrb[202].mxu0 }
 0x903   : > { %v11372_v57 = vpop.f32.mrb[202].mxu1  ;;  %v6896_v60 = vpack.c.bf16 %v3058_v38, %v3054_v29  ;;  %v3060_v54 = vpop.f32.mrb[203].mxu0  ;;  %v13780_v29 = vld [vmem:[#allocation4 + $0x4f8] sm:$0xff]  ;;  %v13782_v38 = vld [vmem:[#allocation4 + $0x500] sm:$0xff] }
 0x904   : > { %v6859_v40 = vpack.c.bf16 %v11372_v57, %v11371_v36  ;;  %v5310_v48 = vpop.f32.mrb[203].mxu1  ;;  %v6897_v0 = vpack.c.bf16 %v3060_v54, %v3056_v27 }
 0x905   : > { %v6856_v39 = vpack.c.bf16 %v5310_v48, %v5307_v3  ;;  %7664 = vst [vmem:[#allocation5 + $0xab0] sm:$0xff] %v6896_v60  ;;  %3323 = vmatmul.mubr.bf16.gmra.mrb[52].mxu0 %v13708_v11 }
 0x906   : > { %7627 = vst [vmem:[#allocation5 + $0x988] sm:$0xff] %v6859_v40  ;;  %11478 = vmatmul.mubr.bf16.gmra.mrb[52].mxu1 %v13764_v25  ;;  %7665 = vst [vmem:[#allocation5 + $0xab8] sm:$0xff] %v6897_v0  ;;  %3332 = vmatprep.mubr.bf16.mxu0 %v15421_v43 }
 0x907   : > { %7624 = vst [vmem:[#allocation5 + $0x970] sm:$0xff] %v6856_v39  ;;  %11481 = vmatprep.mubr.bf16.mxu1 %v13766_v32 }
 0x908   : > { %v3064_v61 = vpop.f32.mrb[204].mxu0 }
 0x909   : > { %v11375_v50 = vpop.f32.mrb[204].mxu1  ;;  %v3066_v14 = vpop.f32.mrb[205].mxu0 }
 0x90a   : > { %v5323_v63 = vpop.f32.mrb[205].mxu1  ;;  %v3068_v12 = vpop.f32.mrb[206].mxu0 }
 0x90b   : > { %v11376_v26 = vpop.f32.mrb[206].mxu1  ;;  %v6899_v18 = vpack.c.bf16 %v3068_v12, %v3064_v61  ;;  %v3070_v49 = vpop.f32.mrb[207].mxu0 }
 0x90c   : > { %v6865_v59 = vpack.c.bf16 %v11376_v26, %v11375_v50  ;;  %v5326_v11 = vpop.f32.mrb[207].mxu1  ;;  %v6900_v31 = vpack.c.bf16 %v3070_v49, %v3066_v14  ;;  %v13788_v50 = vld [vmem:[#allocation4 + $0x508] sm:$0xff]  ;;  %v13790_v26 = vld [vmem:[#allocation4 + $0x510] sm:$0xff] }
 0x90d   : > { %v6862_v21 = vpack.c.bf16 %v5326_v11, %v5323_v63  ;;  %7667 = vst [vmem:[#allocation5 + $0xac8] sm:$0xff] %v6899_v18  ;;  %3333 = vmatmul.mubr.bf16.gmra.mrb[56].mxu0 %v13710_v51 }
 0x90e   : > { %7633 = vst [vmem:[#allocation5 + $0x9b8] sm:$0xff] %v6865_v59  ;;  %11482 = vmatmul.mubr.bf16.gmra.mrb[56].mxu1 %v13772_v44  ;;  %7668 = vst [vmem:[#allocation5 + $0xad0] sm:$0xff] %v6900_v31  ;;  %3342 = vmatprep.mubr.bf16.mxu0 %v15421_v43 }
 0x90f   : > { %7630 = vst [vmem:[#allocation5 + $0x9a0] sm:$0xff] %v6862_v21  ;;  %11485 = vmatprep.mubr.bf16.mxu1 %v13774_v28 }
 0x910   : > { %v3074_v56 = vpop.f32.mrb[208].mxu0 }
 0x911   : > { %v11379_v41 = vpop.f32.mrb[208].mxu1  ;;  %v3076_v15 = vpop.f32.mrb[209].mxu0 }
 0x912   : > { %v5339_v47 = vpop.f32.mrb[209].mxu1  ;;  %v3078_v33 = vpop.f32.mrb[210].mxu0 }
 0x913   : > { %v11380_v62 = vpop.f32.mrb[210].mxu1  ;;  %v6902_v36 = vpack.c.bf16 %v3078_v33, %v3074_v56  ;;  %v3080_v3 = vpop.f32.mrb[211].mxu0 }
 0x914   : > { %v6871_v27 = vpack.c.bf16 %v11380_v62, %v11379_v41  ;;  %v5342_v51 = vpop.f32.mrb[211].mxu1  ;;  %v6903_v57 = vpack.c.bf16 %v3080_v3, %v3076_v15  ;;  %v13796_v15 = vld [vmem:[#allocation4 + $0x518] sm:$0xff] }
 0x915   : > { %v6868_v60 = vpack.c.bf16 %v5342_v51, %v5339_v47  ;;  %7670 = vst [vmem:[#allocation5 + $0xae0] sm:$0xff] %v6902_v36  ;;  %3343 = vmatmul.mubr.bf16.gmra.mrb[60].mxu0 %v13716_v35  ;;  %v13798_v36 = vld [vmem:[#allocation4 + $0x520] sm:$0xff] }
 0x916   : > { %7639 = vst [vmem:[#allocation5 + $0x9e8] sm:$0xff] %v6871_v27  ;;  %11486 = vmatmul.mubr.bf16.gmra.mrb[60].mxu1 %v13780_v29  ;;  %7671 = vst [vmem:[#allocation5 + $0xae8] sm:$0xff] %v6903_v57  ;;  %3352 = vmatprep.mubr.bf16.mxu0 %v15421_v43 }
 0x917   : > { %7636 = vst [vmem:[#allocation5 + $0x9d0] sm:$0xff] %v6868_v60  ;;  %11489 = vmatprep.mubr.bf16.mxu1 %v13782_v38 }
 0x918   : > { %v3084_v40 = vpop.f32.mrb[212].mxu0 }
 0x919   : > { %v11383_v54 = vpop.f32.mrb[212].mxu1  ;;  %v3086_v48 = vpop.f32.mrb[213].mxu0 }
 0x91a   : > { %v5355_v0 = vpop.f32.mrb[213].mxu1  ;;  %v3088_v39 = vpop.f32.mrb[214].mxu0 }
 0x91b   : > { %v11384_v61 = vpop.f32.mrb[214].mxu1  ;;  %v6905_v14 = vpack.c.bf16 %v3088_v39, %v3084_v40  ;;  %v3090_v12 = vpop.f32.mrb[215].mxu0 }
 0x91c   : > { %v6877_v63 = vpack.c.bf16 %v11384_v61, %v11383_v54  ;;  %v5358_v35 = vpop.f32.mrb[215].mxu1  ;;  %v6906_v18 = vpack.c.bf16 %v3090_v12, %v3086_v48 }
 0x91d   : > { %v6874_v59 = vpack.c.bf16 %v5358_v35, %v5355_v0  ;;  %7673 = vst [vmem:[#allocation5 + $0xaf8] sm:$0xff] %v6905_v14  ;;  %3353 = vmatmul.mubr.bf16.gmra.mrb[64].mxu0 %v13718_v10  ;;  %v13804_v0 = vld [vmem:[#allocation4 + $0x528] sm:$0xff] }
 0x91e   : > { %7645 = vst [vmem:[#allocation5 + $0xa18] sm:$0xff] %v6877_v63  ;;  %11490 = vmatmul.mubr.bf16.gmra.mrb[64].mxu1 %v13788_v50  ;;  %7674 = vst [vmem:[#allocation5 + $0xb00] sm:$0xff] %v6906_v18  ;;  %3362 = vmatprep.mubr.bf16.mxu0 %v15421_v43  ;;  %v13806_v63 = vld [vmem:[#allocation4 + $0x530] sm:$0xff] }
 0x91f   : > { %7642 = vst [vmem:[#allocation5 + $0xa00] sm:$0xff] %v6874_v59  ;;  %11493 = vmatprep.mubr.bf16.mxu1 %v13790_v26 }
 0x920   : > { %v3094_v49 = vpop.f32.mrb[216].mxu0 }
 0x921   : > { %v11387_v11 = vpop.f32.mrb[216].mxu1  ;;  %v3096_v31 = vpop.f32.mrb[217].mxu0 }
 0x922   : > { %v5371_v21 = vpop.f32.mrb[217].mxu1  ;;  %v3098_v56 = vpop.f32.mrb[218].mxu0 }
 0x923   : > { %v11388_v41 = vpop.f32.mrb[218].mxu1  ;;  %v6908_v47 = vpack.c.bf16 %v3098_v56, %v3094_v49  ;;  %v3100_v62 = vpop.f32.mrb[219].mxu0  ;;  %v13812_v56 = vld [vmem:[#allocation4 + $0x538] sm:$0xff] }
 0x924   : > { %v6883_v33 = vpack.c.bf16 %v11388_v41, %v11387_v11  ;;  %v5374_v10 = vpop.f32.mrb[219].mxu1  ;;  %v6909_v27 = vpack.c.bf16 %v3100_v62, %v3096_v31  ;;  %v13814_v62 = vld [vmem:[#allocation4 + $0x540] sm:$0xff] }
 0x925   : > { %v6880_v3 = vpack.c.bf16 %v5374_v10, %v5371_v21  ;;  %7676 = vst [vmem:[#allocation5 + $0xb10] sm:$0xff] %v6908_v47  ;;  %3363 = vmatmul.mubr.bf16.gmra.mrb[68].mxu0 %v13724_v30 }
 0x926   : > { %7651 = vst [vmem:[#allocation5 + $0xa48] sm:$0xff] %v6883_v33  ;;  %11494 = vmatmul.mubr.bf16.gmra.mrb[68].mxu1 %v13796_v15  ;;  %7677 = vst [vmem:[#allocation5 + $0xb18] sm:$0xff] %v6909_v27  ;;  %3372 = vmatprep.mubr.bf16.mxu0 %v15421_v43 }
 0x927   : > { %7648 = vst [vmem:[#allocation5 + $0xa30] sm:$0xff] %v6880_v3  ;;  %11497 = vmatprep.mubr.bf16.mxu1 %v13798_v36 }
 0x928   : > { %v3104_v51 = vpop.f32.mrb[220].mxu0 }
 0x929   : > { %v11391_v57 = vpop.f32.mrb[220].mxu1  ;;  %v3106_v60 = vpop.f32.mrb[221].mxu0 }
 0x92a   : > { %v5387_v40 = vpop.f32.mrb[221].mxu1  ;;  %v3108_v54 = vpop.f32.mrb[222].mxu0 }
 0x92b   : > { %v11392_v48 = vpop.f32.mrb[222].mxu1  ;;  %v6911_v39 = vpack.c.bf16 %v3108_v54, %v3104_v51  ;;  %v3110_v14 = vpop.f32.mrb[223].mxu0 }
 0x92c   : > { %v6889_v61 = vpack.c.bf16 %v11392_v48, %v11391_v57  ;;  %v5390_v30 = vpop.f32.mrb[223].mxu1  ;;  %v6912_v12 = vpack.c.bf16 %v3110_v14, %v3106_v60  ;;  %v13820_v48 = vld [vmem:[#allocation4 + $0x548] sm:$0xff] }
 0x92d   : > { %v6886_v35 = vpack.c.bf16 %v5390_v30, %v5387_v40  ;;  %7679 = vst [vmem:[#allocation5 + $0xb28] sm:$0xff] %v6911_v39  ;;  %3373 = vmatmul.mubr.bf16.gmra.mrb[72].mxu0 %v13726_v42  ;;  %v13822_v30 = vld [vmem:[#allocation4 + $0x550] sm:$0xff] }
 0x92e   : > { %7657 = vst [vmem:[#allocation5 + $0xa78] sm:$0xff] %v6889_v61  ;;  %11498 = vmatmul.mubr.bf16.gmra.mrb[72].mxu1 %v13804_v0  ;;  %7680 = vst [vmem:[#allocation5 + $0xb30] sm:$0xff] %v6912_v12  ;;  %3382 = vmatprep.mubr.bf16.mxu0 %v15421_v43 }
 0x92f   : > { %7654 = vst [vmem:[#allocation5 + $0xa60] sm:$0xff] %v6886_v35  ;;  %11501 = vmatprep.mubr.bf16.mxu1 %v13806_v63 }
 0x930   : > { %v3114_v18 = vpop.f32.mrb[224].mxu0 }
 0x931   : > { %v11395_v59 = vpop.f32.mrb[224].mxu1  ;;  %v3116_v49 = vpop.f32.mrb[225].mxu0 }
 0x932   : > { %v5403_v11 = vpop.f32.mrb[225].mxu1  ;;  %v3118_v31 = vpop.f32.mrb[226].mxu0 }
 0x933   : > { %v11396_v21 = vpop.f32.mrb[226].mxu1  ;;  %v6914_v41 = vpack.c.bf16 %v3118_v31, %v3114_v18  ;;  %v3120_v33 = vpop.f32.mrb[227].mxu0 }
 0x934   : > { %v6895_v47 = vpack.c.bf16 %v11396_v21, %v11395_v59  ;;  %v5406_v42 = vpop.f32.mrb[227].mxu1  ;;  %v6915_v10 = vpack.c.bf16 %v3120_v33, %v3116_v49 }
 0x935   : > { %v6892_v27 = vpack.c.bf16 %v5406_v42, %v5403_v11  ;;  %7682 = vst [vmem:[#allocation5 + $0xb40] sm:$0xff] %v6914_v41  ;;  %3383 = vmatmul.mubr.bf16.gmra.mrb[76].mxu0 %v13732_v2  ;;  %v13828_v41 = vld [vmem:[#allocation4 + $0x558] sm:$0xff] }
 0x936   : > { %7663 = vst [vmem:[#allocation5 + $0xaa8] sm:$0xff] %v6895_v47  ;;  %11502 = vmatmul.mubr.bf16.gmra.mrb[76].mxu1 %v13812_v56  ;;  %7683 = vst [vmem:[#allocation5 + $0xb48] sm:$0xff] %v6915_v10  ;;  %3392 = vmatprep.mubr.bf16.mxu0 %v15421_v43  ;;  %v13830_v10 = vld [vmem:[#allocation4 + $0x560] sm:$0xff] }
 0x937   : > { %7660 = vst [vmem:[#allocation5 + $0xa90] sm:$0xff] %v6892_v27  ;;  %11505 = vmatprep.mubr.bf16.mxu1 %v13814_v62 }
 0x938   : > { %v3124_v3 = vpop.f32.mrb[228].mxu0 }
 0x939   : > { %v11399_v51 = vpop.f32.mrb[228].mxu1  ;;  %v3126_v57 = vpop.f32.mrb[229].mxu0 }
 0x93a   : > { %v5419_v60 = vpop.f32.mrb[229].mxu1  ;;  %v3128_v40 = vpop.f32.mrb[230].mxu0 }
 0x93b   : > { %v11400_v54 = vpop.f32.mrb[230].mxu1  ;;  %v6917_v39 = vpack.c.bf16 %v3128_v40, %v3124_v3  ;;  %v3130_v14 = vpop.f32.mrb[231].mxu0 }
 0x93c   : > { %v6901_v61 = vpack.c.bf16 %v11400_v54, %v11399_v51  ;;  %v5422_v2 = vpop.f32.mrb[231].mxu1  ;;  %v6918_v12 = vpack.c.bf16 %v3130_v14, %v3126_v57 }
 0x93d   : > { %v6898_v35 = vpack.c.bf16 %v5422_v2, %v5419_v60  ;;  %7685 = vst [vmem:[#allocation5 + $0xb58] sm:$0xff] %v6917_v39  ;;  %3393 = vmatmul.mubr.bf16.gmra.mrb[80].mxu0 %v13734_v4 }
 0x93e   : > { %7669 = vst [vmem:[#allocation5 + $0xad8] sm:$0xff] %v6901_v61  ;;  %11506 = vmatmul.mubr.bf16.gmra.mrb[80].mxu1 %v13820_v48  ;;  %7686 = vst [vmem:[#allocation5 + $0xb60] sm:$0xff] %v6918_v12  ;;  %3402 = vmatprep.mubr.bf16.mxu0 %v15421_v43  ;;  %v13836_v61 = vld [vmem:[#allocation4 + $0x568] sm:$0xff] }
 0x93f   : > { %7666 = vst [vmem:[#allocation5 + $0xac0] sm:$0xff] %v6898_v35  ;;  %11509 = vmatprep.mubr.bf16.mxu1 %v13822_v30  ;;  %v13838_v35 = vld [vmem:[#allocation4 + $0x570] sm:$0xff] }
 0x940   : > { %v3134_v18 = vpop.f32.mrb[232].mxu0 }
 0x941   : > { %v11403_v59 = vpop.f32.mrb[232].mxu1  ;;  %v3136_v49 = vpop.f32.mrb[233].mxu0 }
 0x942   : > { %v5435_v11 = vpop.f32.mrb[233].mxu1  ;;  %v3138_v31 = vpop.f32.mrb[234].mxu0 }
 0x943   : > { %v11404_v21 = vpop.f32.mrb[234].mxu1  ;;  %v6920_v47 = vpack.c.bf16 %v3138_v31, %v3134_v18  ;;  %v3140_v42 = vpop.f32.mrb[235].mxu0 }
 0x944   : > { %v6907_v33 = vpack.c.bf16 %v11404_v21, %v11403_v59  ;;  %v5438_v4 = vpop.f32.mrb[235].mxu1  ;;  %v6921_v27 = vpack.c.bf16 %v3140_v42, %v3136_v49  ;;  %v13844_v42 = vld [vmem:[#allocation4 + $0x578] sm:$0xff] }
 0x945   : > { %v6904_v3 = vpack.c.bf16 %v5438_v4, %v5435_v11  ;;  %7688 = vst [vmem:[#allocation5 + $0xb70] sm:$0xff] %v6920_v47  ;;  %3403 = vmatmul.mubr.bf16.gmra.mrb[84].mxu0 %v13740_v45 }
 0x946   : > { %7675 = vst [vmem:[#allocation5 + $0xb08] sm:$0xff] %v6907_v33  ;;  %11510 = vmatmul.mubr.bf16.gmra.mrb[84].mxu1 %v13828_v41  ;;  %7689 = vst [vmem:[#allocation5 + $0xb78] sm:$0xff] %v6921_v27  ;;  %3412 = vmatprep.mubr.bf16.mxu0 %v15421_v43 }
 0x947   : > { %7672 = vst [vmem:[#allocation5 + $0xaf0] sm:$0xff] %v6904_v3  ;;  %11513 = vmatprep.mubr.bf16.mxu1 %v13830_v10 }
 0x948   : > { %v3144_v51 = vpop.f32.mrb[236].mxu0 }
 0x949   : > { %v11407_v57 = vpop.f32.mrb[236].mxu1  ;;  %v3146_v60 = vpop.f32.mrb[237].mxu0 }
 0x94a   : > { %v5451_v40 = vpop.f32.mrb[237].mxu1  ;;  %v3148_v54 = vpop.f32.mrb[238].mxu0 }
 0x94b   : > { %v11408_v39 = vpop.f32.mrb[238].mxu1  ;;  %v6923_v14 = vpack.c.bf16 %v3148_v54, %v3144_v51  ;;  %v3150_v12 = vpop.f32.mrb[239].mxu0  ;;  %v1640_v51 = vld [vmem:[#allocation4 + $0x580] sm:$0xff] }
 0x94c   : > { %v6913_v2 = vpack.c.bf16 %v11408_v39, %v11407_v57  ;;  %v5454_v45 = vpop.f32.mrb[239].mxu1  ;;  %v6924_v18 = vpack.c.bf16 %v3150_v12, %v3146_v60 }
 0x94d   : > { %v6910_v59 = vpack.c.bf16 %v5454_v45, %v5451_v40  ;;  %7691 = vst [vmem:[#allocation5 + $0xb88] sm:$0xff] %v6923_v14  ;;  %3413 = vmatmul.mubr.bf16.gmra.mrb[88].mxu0 %v13742_v24  ;;  %v1641_v45 = vld [vmem:[#allocation4 + $0x588] sm:$0xff] }
 0x94e   : > { %7681 = vst [vmem:[#allocation5 + $0xb38] sm:$0xff] %v6913_v2  ;;  %11514 = vmatmul.mubr.bf16.gmra.mrb[88].mxu1 %v13836_v61  ;;  %7692 = vst [vmem:[#allocation5 + $0xb90] sm:$0xff] %v6924_v18  ;;  %3422 = vmatprep.mubr.bf16.mxu0 %v15421_v43 }
 0x94f   : > { %7678 = vst [vmem:[#allocation5 + $0xb20] sm:$0xff] %v6910_v59  ;;  %11517 = vmatprep.mubr.bf16.mxu1 %v13838_v35 }
 0x950   : > { %v3154_v49 = vpop.f32.mrb[240].mxu0 }
 0x951   : > { %v11411_v11 = vpop.f32.mrb[240].mxu1  ;;  %v3156_v31 = vpop.f32.mrb[241].mxu0 }
 0x952   : > { %v5467_v21 = vpop.f32.mrb[241].mxu1  ;;  %v3158_v47 = vpop.f32.mrb[242].mxu0 }
 0x953   : > { %v11412_v33 = vpop.f32.mrb[242].mxu1  ;;  %v6926_v4 = vpack.c.bf16 %v3158_v47, %v3154_v49  ;;  %v3160_v3 = vpop.f32.mrb[243].mxu0 }
 0x954   : > { %v6919_v27 = vpack.c.bf16 %v11412_v33, %v11411_v11  ;;  %v5470_v24 = vpop.f32.mrb[243].mxu1  ;;  %v6927_v57 = vpack.c.bf16 %v3160_v3, %v3156_v31  ;;  %v1642_v31 = vld [vmem:[#allocation4 + $0x590] sm:$0xff] }
 0x955   : > { %v6916_v60 = vpack.c.bf16 %v5470_v24, %v5467_v21  ;;  %7694 = vst [vmem:[#allocation5 + $0xba0] sm:$0xff] %v6926_v4  ;;  %3423 = vmatmul.mubr.bf16.gmra.mrb[92].mxu0 %v13748_v13 }
 0x956   : > { %7687 = vst [vmem:[#allocation5 + $0xb68] sm:$0xff] %v6919_v27  ;;  %11518 = vmatmul.mubr.bf16.gmra.mrb[92].mxu1 %v13844_v42  ;;  %7695 = vst [vmem:[#allocation5 + $0xba8] sm:$0xff] %v6927_v57  ;;  %3432 = vmatprep.mubr.bf16.mxu0 %v15421_v43 }
 0x957   : > { %7684 = vst [vmem:[#allocation5 + $0xb50] sm:$0xff] %v6916_v60  ;;  %11521 = vmatprep.mubr.bf16.mxu1 %v1640_v51  ;;  %v1643_v51 = vld [vmem:[#allocation4 + $0x598] sm:$0xff] }
 0x958   : > { %v3164_v40 = vpop.f32.mrb[244].mxu0 }
 0x959   : > { %v11415_v54 = vpop.f32.mrb[244].mxu1  ;;  %v3166_v39 = vpop.f32.mrb[245].mxu0 }
 0x95a   : > { %v5483_v14 = vpop.f32.mrb[245].mxu1  ;;  %v3168_v2 = vpop.f32.mrb[246].mxu0 }
 0x95b   : > { %v11416_v12 = vpop.f32.mrb[246].mxu1  ;;  %v6929_v18 = vpack.c.bf16 %v3168_v2, %v3164_v40  ;;  %v3170_v49 = vpop.f32.mrb[247].mxu0 }
 0x95c   : > { %v6925_v59 = vpack.c.bf16 %v11416_v12, %v11415_v54  ;;  %v5486_v11 = vpop.f32.mrb[247].mxu1  ;;  %v6930_v13 = vpack.c.bf16 %v3170_v49, %v3166_v39  ;;  %v1644_v39 = vld [vmem:[#allocation4 + $0x5a0] sm:$0xff] }
 0x95d   : > { %v6922_v21 = vpack.c.bf16 %v5486_v11, %v5483_v14  ;;  %7697 = vst [vmem:[#allocation5 + $0xbb8] sm:$0xff] %v6929_v18  ;;  %3433 = vmatmul.mubr.bf16.gmra.mrb[96].mxu0 %v13750_v20  ;;  %v1645_v11 = vld [vmem:[#allocation4 + $0x5a8] sm:$0xff] }
 0x95e   : > { %7693 = vst [vmem:[#allocation5 + $0xb98] sm:$0xff] %v6925_v59  ;;  %11522 = vmatmul.mubr.bf16.gmra.mrb[96].mxu1 %v1641_v45  ;;  %7698 = vst [vmem:[#allocation5 + $0xbc0] sm:$0xff] %v6930_v13  ;;  %3442 = vmatprep.mubr.bf16.mxu0 %v15421_v43 }
 0x95f   : > { %7690 = vst [vmem:[#allocation5 + $0xb80] sm:$0xff] %v6922_v21  ;;  %11525 = vmatprep.mubr.bf16.mxu1 %v1642_v31 }
 0x960   : > { %v3174_v47 = vpop.f32.mrb[248].mxu0 }
 0x961   : > { %v11419_v33 = vpop.f32.mrb[248].mxu1  ;;  %v3176_v4 = vpop.f32.mrb[249].mxu0 }
 0x962   : > { %v5499_v27 = vpop.f32.mrb[249].mxu1  ;;  %v3178_v3 = vpop.f32.mrb[250].mxu0 }
 0x963   : > { %v11420_v24 = vpop.f32.mrb[250].mxu1  ;;  %v6932_v57 = vpack.c.bf16 %v3178_v3, %v3174_v47  ;;  %v3180_v40 = vpop.f32.mrb[251].mxu0 }
 0x964   : > { %v6931_v60 = vpack.c.bf16 %v11420_v24, %v11419_v33  ;;  %v5502_v54 = vpop.f32.mrb[251].mxu1  ;;  %v6933_v14 = vpack.c.bf16 %v3180_v40, %v3176_v4  ;;  %v1646_v33 = vld [vmem:[#allocation4 + $0x5b0] sm:$0xff]  ;;  %v1647_v40 = vld [vmem:[#allocation4 + $0x5b8] sm:$0xff] }
 0x965   : > { %v6928_v20 = vpack.c.bf16 %v5502_v54, %v5499_v27  ;;  %7700 = vst [vmem:[#allocation5 + $0xbd0] sm:$0xff] %v6932_v57  ;;  %3443 = vmatmul.mubr.bf16.gmra.mrb[100].mxu0 %v13756_v34 }
 0x966   : > { %7699 = vst [vmem:[#allocation5 + $0xbc8] sm:$0xff] %v6931_v60  ;;  %11526 = vmatmul.mubr.bf16.gmra.mrb[100].mxu1 %v1643_v51  ;;  %7701 = vst [vmem:[#allocation5 + $0xbd8] sm:$0xff] %v6933_v14  ;;  %3452 = vmatprep.mubr.bf16.mxu0 %v15421_v43 }
 0x967   : > { %7696 = vst [vmem:[#allocation5 + $0xbb0] sm:$0xff] %v6928_v20  ;;  %11529 = vmatprep.mubr.bf16.mxu1 %v1644_v39 }
 0x968   : > { %v3184_v2 = vpop.f32.mrb[252].mxu0 }
 0x969   : > { %v11423_v12 = vpop.f32.mrb[252].mxu1  ;;  %v3186_v45 = vpop.f32.mrb[253].mxu0 }
 0x96a   : > { %v5515_v18 = vpop.f32.mrb[253].mxu1  ;;  %v3188_v59 = vpop.f32.mrb[254].mxu0 }
 0x96b   : > { %v11424_v49 = vpop.f32.mrb[254].mxu1  ;;  %v6935_v31 = vpack.c.bf16 %v3188_v59, %v3184_v2  ;;  %v3190_v21 = vpop.f32.mrb[255].mxu0  ;;  %v1648_v2 = vld [vmem:[#allocation4 + $0x5c0] sm:$0xff] }
 0x96c   : > { %v6937_v13 = vpack.c.bf16 %v11424_v49, %v11423_v12  ;;  %v5518_v47 = vpop.f32.mrb[255].mxu1  ;;  %v6936_v4 = vpack.c.bf16 %v3190_v21, %v3186_v45 }
 0x96d   : > { %v6934_v34 = vpack.c.bf16 %v5518_v47, %v5515_v18  ;;  %7703 = vst [vmem:[#allocation5 + $0xbe8] sm:$0xff] %v6935_v31  ;;  %3453 = vmatmul.mubr.bf16.gmra.mrb[104].mxu0 %v13758_v1 }
 0x96e   : > { %7705 = vst [vmem:[#allocation5 + $0xbf8] sm:$0xff] %v6937_v13  ;;  %11530 = vmatmul.mubr.bf16.gmra.mrb[104].mxu1 %v1645_v11  ;;  %7704 = vst [vmem:[#allocation5 + $0xbf0] sm:$0xff] %v6936_v4  ;;  %3462 = vmatprep.mubr.bf16.mxu0 %v15421_v43  ;;  %v1649_v13 = vld [vmem:[#allocation4 + $0x5c8] sm:$0xff] }
 0x96f   : > { %7702 = vst [vmem:[#allocation5 + $0xbe0] sm:$0xff] %v6934_v34  ;;  %11533 = vmatprep.mubr.bf16.mxu1 %v1646_v33  ;;  %v1650_v34 = vld [vmem:[#allocation4 + $0x5d0] sm:$0xff] }
 0x970   : > { %v3194_v27 = vpop.f32.mrb[0].mxu0 }
 0x971   : > { %v11427_v3 = vpop.f32.mrb[0].mxu1  ;;  %v3196_v24 = vpop.f32.mrb[1].mxu0 }
 0x972   : > { %v5531_v51 = vpop.f32.mrb[1].mxu1  ;;  %v3198_v57 = vpop.f32.mrb[2].mxu0 }
 0x973   : > { %v11428_v60 = vpop.f32.mrb[2].mxu1  ;;  %v6938_v54 = vpack.c.bf16 %v3198_v57, %v3194_v27  ;;  %v3200_v14 = vpop.f32.mrb[3].mxu0 }
 0x974   : > { %v6943_v39 = vpack.c.bf16 %v11428_v60, %v11427_v3  ;;  %v5534_v20 = vpop.f32.mrb[3].mxu1  ;;  %v6939_v12 = vpack.c.bf16 %v3200_v14, %v3196_v24 }
 0x975   : > { %v6940_v1 = vpack.c.bf16 %v5534_v20, %v5531_v51  ;;  %7706 = vst [vmem:[#allocation5 + $0xc00] sm:$0xff] %v6938_v54  ;;  %3463 = vmatmul.mubr.bf16.gmra.mrb[108].mxu0 %v13764_v25  ;;  %v1651_v54 = vld [vmem:[#allocation4 + $0x5d8] sm:$0xff] }
 0x976   : > { %7711 = vst [vmem:[#allocation5 + $0xc28] sm:$0xff] %v6943_v39  ;;  %11534 = vmatmul.mubr.bf16.gmra.mrb[108].mxu1 %v1647_v40  ;;  %7707 = vst [vmem:[#allocation5 + $0xc08] sm:$0xff] %v6939_v12  ;;  %3472 = vmatprep.mubr.bf16.mxu0 %v15421_v43  ;;  %v1652_v12 = vld [vmem:[#allocation4 + $0x5e0] sm:$0xff] }
 0x977   : > { %7708 = vst [vmem:[#allocation5 + $0xc10] sm:$0xff] %v6940_v1  ;;  %11537 = vmatprep.mubr.bf16.mxu1 %v1648_v2 }
 0x978   : > { %v3204_v45 = vpop.f32.mrb[4].mxu0 }
 0x979   : > { %v11431_v18 = vpop.f32.mrb[4].mxu1  ;;  %v3206_v59 = vpop.f32.mrb[5].mxu0 }
 0x97a   : > { %v5547_v49 = vpop.f32.mrb[5].mxu1  ;;  %v3208_v11 = vpop.f32.mrb[6].mxu0 }
 0x97b   : > { %v11432_v31 = vpop.f32.mrb[6].mxu1  ;;  %v6941_v21 = vpack.c.bf16 %v3208_v11, %v3204_v45  ;;  %v3210_v33 = vpop.f32.mrb[7].mxu0 }
 0x97c   : > { %v6949_v47 = vpack.c.bf16 %v11432_v31, %v11431_v18  ;;  %v5550_v4 = vpop.f32.mrb[7].mxu1  ;;  %v6942_v27 = vpack.c.bf16 %v3210_v33, %v3206_v59 }
 0x97d   : > { %v6946_v25 = vpack.c.bf16 %v5550_v4, %v5547_v49  ;;  %7709 = vst [vmem:[#allocation5 + $0xc18] sm:$0xff] %v6941_v21  ;;  %3473 = vmatmul.mubr.bf16.gmra.mrb[112].mxu0 %v13766_v32 }
 0x97e   : > { %7717 = vst [vmem:[#allocation5 + $0xc58] sm:$0xff] %v6949_v47  ;;  %11538 = vmatmul.mubr.bf16.gmra.mrb[112].mxu1 %v1649_v13  ;;  %7710 = vst [vmem:[#allocation5 + $0xc20] sm:$0xff] %v6942_v27  ;;  %3482 = vmatprep.mubr.bf16.mxu0 %v15421_v43  ;;  %v1653_v13 = vld [vmem:[#allocation4 + $0x5e8] sm:$0xff] }
 0x97f   : > { %7714 = vst [vmem:[#allocation5 + $0xc40] sm:$0xff] %v6946_v25  ;;  %11541 = vmatprep.mubr.bf16.mxu1 %v1650_v34  ;;  %v1654_v34 = vld [vmem:[#allocation4 + $0x5f0] sm:$0xff] }
 0x980   : > { %v3214_v3 = vpop.f32.mrb[8].mxu0 }
 0x981   : > { %v11435_v24 = vpop.f32.mrb[8].mxu1  ;;  %v3216_v51 = vpop.f32.mrb[9].mxu0 }
 0x982   : > { %v5563_v57 = vpop.f32.mrb[9].mxu1  ;;  %v3218_v60 = vpop.f32.mrb[10].mxu0 }
 0x983   : > { %v11436_v40 = vpop.f32.mrb[10].mxu1  ;;  %v6944_v39 = vpack.c.bf16 %v3218_v60, %v3214_v3  ;;  %v3220_v20 = vpop.f32.mrb[11].mxu0 }
 0x984   : > { %v6955_v14 = vpack.c.bf16 %v11436_v40, %v11435_v24  ;;  %v5566_v2 = vpop.f32.mrb[11].mxu1  ;;  %v6945_v1 = vpack.c.bf16 %v3220_v20, %v3216_v51  ;;  %v1655_v40 = vld [vmem:[#allocation4 + $0x5f8] sm:$0xff] }
 0x985   : > { %v6952_v32 = vpack.c.bf16 %v5566_v2, %v5563_v57  ;;  %7712 = vst [vmem:[#allocation5 + $0xc30] sm:$0xff] %v6944_v39  ;;  %3483 = vmatmul.mubr.bf16.gmra.mrb[116].mxu0 %v13772_v44 }
 0x986   : > { %7723 = vst [vmem:[#allocation5 + $0xc88] sm:$0xff] %v6955_v14  ;;  %11542 = vmatmul.mubr.bf16.gmra.mrb[116].mxu1 %v1651_v54  ;;  %7713 = vst [vmem:[#allocation5 + $0xc38] sm:$0xff] %v6945_v1  ;;  %3492 = vmatprep.mubr.bf16.mxu0 %v15421_v43 }
 0x987   : > { %7720 = vst [vmem:[#allocation5 + $0xc70] sm:$0xff] %v6952_v32  ;;  %11545 = vmatprep.mubr.bf16.mxu1 %v1652_v12 }
 0x988   : > { %v3224_v45 = vpop.f32.mrb[12].mxu0 }
 0x989   : > { %v11439_v18 = vpop.f32.mrb[12].mxu1  ;;  %v3226_v59 = vpop.f32.mrb[13].mxu0 }
 0x98a   : > { %v5579_v49 = vpop.f32.mrb[13].mxu1  ;;  %v3228_v11 = vpop.f32.mrb[14].mxu0 }
 0x98b   : > { %v11440_v31 = vpop.f32.mrb[14].mxu1  ;;  %v6947_v21 = vpack.c.bf16 %v3228_v11, %v3224_v45  ;;  %v3230_v33 = vpop.f32.mrb[15].mxu0 }
 0x98c   : > { %v6961_v47 = vpack.c.bf16 %v11440_v31, %v11439_v18  ;;  %v5582_v4 = vpop.f32.mrb[15].mxu1  ;;  %v6948_v27 = vpack.c.bf16 %v3230_v33, %v3226_v59 }
 0x98d   : > { %v6958_v44 = vpack.c.bf16 %v5582_v4, %v5579_v49  ;;  %7715 = vst [vmem:[#allocation5 + $0xc48] sm:$0xff] %v6947_v21  ;;  %3493 = vmatmul.mubr.bf16.gmra.mrb[120].mxu0 %v13774_v28  ;;  %v12203_v28 = vld [vmem:[#allocation4 + $0x600] sm:$0xff]  ;;  %v12205_v4 = vld [vmem:[#allocation4 + $0x610] sm:$0xff] }
 0x98e   : > { %7729 = vst [vmem:[#allocation5 + $0xcb8] sm:$0xff] %v6961_v47  ;;  %11546 = vmatmul.mubr.bf16.gmra.mrb[120].mxu1 %v1653_v13  ;;  %7716 = vst [vmem:[#allocation5 + $0xc50] sm:$0xff] %v6948_v27  ;;  %3502 = vmatprep.mubr.bf16.mxu0 %v15421_v43 }
 0x98f   : > { %7726 = vst [vmem:[#allocation5 + $0xca0] sm:$0xff] %v6958_v44  ;;  %11549 = vmatprep.mubr.bf16.mxu1 %v1654_v34 }
 0x990   : > { %v3234_v25 = vpop.f32.mrb[16].mxu0 }
 0x991   : > { %v11443_v3 = vpop.f32.mrb[16].mxu1  ;;  %v3236_v24 = vpop.f32.mrb[17].mxu0 }
 0x992   : > { %v5595_v51 = vpop.f32.mrb[17].mxu1  ;;  %v3238_v57 = vpop.f32.mrb[18].mxu0 }
 0x993   : > { %v11444_v60 = vpop.f32.mrb[18].mxu1  ;;  %v6950_v54 = vpack.c.bf16 %v3238_v57, %v3234_v25  ;;  %v3240_v14 = vpop.f32.mrb[19].mxu0 }
 0x994   : > { %v6967_v39 = vpack.c.bf16 %v11444_v60, %v11443_v3  ;;  %v5598_v20 = vpop.f32.mrb[19].mxu1  ;;  %v6951_v2 = vpack.c.bf16 %v3240_v14, %v3236_v24  ;;  %v12207_v14 = vld [vmem:[#allocation4 + $0x620] sm:$0xff] }
 0x995   : > { %v6964_v12 = vpack.c.bf16 %v5598_v20, %v5595_v51  ;;  %7718 = vst [vmem:[#allocation5 + $0xc60] sm:$0xff] %v6950_v54  ;;  %3503 = vmatmul.mubr.bf16.gmra.mrb[124].mxu0 %v13780_v29  ;;  %v12204_v29 = vld [vmem:[#allocation4 + $0x608] sm:$0xff] }
 0x996   : > { %7735 = vst [vmem:[#allocation5 + $0xce8] sm:$0xff] %v6967_v39  ;;  %11550 = vmatmul.mubr.bf16.gmra.mrb[124].mxu1 %v1655_v40  ;;  %7719 = vst [vmem:[#allocation5 + $0xc68] sm:$0xff] %v6951_v2  ;;  %3512 = vmatprep.mubr.bf16.mxu0 %v15421_v43  ;;  %v12206_v39 = vld [vmem:[#allocation4 + $0x618] sm:$0xff] }
 0x997   : > { %7732 = vst [vmem:[#allocation5 + $0xcd0] sm:$0xff] %v6964_v12  ;;  %11553 = vmatprep.mubr.bf16.mxu1 %v12203_v28 }
 0x998   : > { %v3244_v1 = vpop.f32.mrb[20].mxu0 }
 0x999   : > { %v11447_v32 = vpop.f32.mrb[20].mxu1  ;;  %v3246_v45 = vpop.f32.mrb[21].mxu0 }
 0x99a   : > { %v5611_v18 = vpop.f32.mrb[21].mxu1  ;;  %v3248_v59 = vpop.f32.mrb[22].mxu0 }
 0x99b   : > { %v11448_v49 = vpop.f32.mrb[22].mxu1  ;;  %v6953_v11 = vpack.c.bf16 %v3248_v59, %v3244_v1  ;;  %v3250_v13 = vpop.f32.mrb[23].mxu0 }
 0x99c   : > { %v6973_v31 = vpack.c.bf16 %v11448_v49, %v11447_v32  ;;  %v5614_v21 = vpop.f32.mrb[23].mxu1  ;;  %v6954_v47 = vpack.c.bf16 %v3250_v13, %v3246_v45  ;;  %v12209_v13 = vld [vmem:[#allocation4 + $0x630] sm:$0xff] }
 0x99d   : > { %v6970_v33 = vpack.c.bf16 %v5614_v21, %v5611_v18  ;;  %7721 = vst [vmem:[#allocation5 + $0xc78] sm:$0xff] %v6953_v11  ;;  %3513 = vmatmul.mubr.bf16.gmra.mrb[128].mxu0 %v13782_v38 }
 0x99e   : > { %7741 = vst [vmem:[#allocation5 + $0xd18] sm:$0xff] %v6973_v31  ;;  %11554 = vmatmul.mubr.bf16.gmra.mrb[128].mxu1 %v12204_v29  ;;  %7722 = vst [vmem:[#allocation5 + $0xc80] sm:$0xff] %v6954_v47  ;;  %3522 = vmatprep.mubr.bf16.mxu0 %v15421_v43  ;;  %v12208_v31 = vld [vmem:[#allocation4 + $0x628] sm:$0xff] }
 0x99f   : > { %7738 = vst [vmem:[#allocation5 + $0xd00] sm:$0xff] %v6970_v33  ;;  %11557 = vmatprep.mubr.bf16.mxu1 %v12205_v4 }
 0x9a0   : > { %v3254_v34 = vpop.f32.mrb[24].mxu0 }
 0x9a1   : > { %v11451_v27 = vpop.f32.mrb[24].mxu1  ;;  %v3256_v44 = vpop.f32.mrb[25].mxu0 }
 0x9a2   : > { %v5627_v25 = vpop.f32.mrb[25].mxu1  ;;  %v3258_v3 = vpop.f32.mrb[26].mxu0 }
 0x9a3   : > { %v11452_v24 = vpop.f32.mrb[26].mxu1  ;;  %v6956_v51 = vpack.c.bf16 %v3258_v3, %v3254_v34  ;;  %v3260_v60 = vpop.f32.mrb[27].mxu0 }
 0x9a4   : > { %v6979_v57 = vpack.c.bf16 %v11452_v24, %v11451_v27  ;;  %v5630_v40 = vpop.f32.mrb[27].mxu1  ;;  %v6957_v54 = vpack.c.bf16 %v3260_v60, %v3256_v44 }
 0x9a5   : > { %v6976_v38 = vpack.c.bf16 %v5630_v40, %v5627_v25  ;;  %7724 = vst [vmem:[#allocation5 + $0xc90] sm:$0xff] %v6956_v51  ;;  %3523 = vmatmul.mubr.bf16.gmra.mrb[132].mxu0 %v13788_v50  ;;  %v12210_v51 = vld [vmem:[#allocation4 + $0x638] sm:$0xff] }
 0x9a6   : > { %7747 = vst [vmem:[#allocation5 + $0xd48] sm:$0xff] %v6979_v57  ;;  %11558 = vmatmul.mubr.bf16.gmra.mrb[132].mxu1 %v12206_v39  ;;  %7725 = vst [vmem:[#allocation5 + $0xc98] sm:$0xff] %v6957_v54  ;;  %3532 = vmatprep.mubr.bf16.mxu0 %v15421_v43  ;;  %v12211_v57 = vld [vmem:[#allocation4 + $0x640] sm:$0xff] }
 0x9a7   : > { %7744 = vst [vmem:[#allocation5 + $0xd30] sm:$0xff] %v6976_v38  ;;  %11561 = vmatprep.mubr.bf16.mxu1 %v12207_v14 }
 0x9a8   : > { %v3264_v20 = vpop.f32.mrb[28].mxu0 }
 0x9a9   : > { %v11455_v2 = vpop.f32.mrb[28].mxu1  ;;  %v3266_v12 = vpop.f32.mrb[29].mxu0 }
 0x9aa   : > { %v5643_v28 = vpop.f32.mrb[29].mxu1  ;;  %v3268_v1 = vpop.f32.mrb[30].mxu0 }
 0x9ab   : > { %v11456_v32 = vpop.f32.mrb[30].mxu1  ;;  %v6959_v45 = vpack.c.bf16 %v3268_v1, %v3264_v20  ;;  %v3270_v59 = vpop.f32.mrb[31].mxu0 }
 0x9ac   : > { %v6985_v18 = vpack.c.bf16 %v11456_v32, %v11455_v2  ;;  %v5646_v49 = vpop.f32.mrb[31].mxu1  ;;  %v6960_v11 = vpack.c.bf16 %v3270_v59, %v3266_v12  ;;  %v12212_v32 = vld [vmem:[#allocation4 + $0x648] sm:$0xff] }
 0x9ad   : > { %v6982_v50 = vpack.c.bf16 %v5646_v49, %v5643_v28  ;;  %7727 = vst [vmem:[#allocation5 + $0xca8] sm:$0xff] %v6959_v45  ;;  %3533 = vmatmul.mubr.bf16.gmra.mrb[136].mxu0 %v13790_v26  ;;  %v12213_v45 = vld [vmem:[#allocation4 + $0x650] sm:$0xff] }
 0x9ae   : > { %7753 = vst [vmem:[#allocation5 + $0xd78] sm:$0xff] %v6985_v18  ;;  %11562 = vmatmul.mubr.bf16.gmra.mrb[136].mxu1 %v12208_v31  ;;  %7728 = vst [vmem:[#allocation5 + $0xcb0] sm:$0xff] %v6960_v11  ;;  %3542 = vmatprep.mubr.bf16.mxu0 %v15421_v43 }
 0x9af   : > { %7750 = vst [vmem:[#allocation5 + $0xd60] sm:$0xff] %v6982_v50  ;;  %11565 = vmatprep.mubr.bf16.mxu1 %v12209_v13 }
 0x9b0   : > { %v3274_v21 = vpop.f32.mrb[32].mxu0 }
 0x9b1   : > { %v11459_v47 = vpop.f32.mrb[32].mxu1  ;;  %v3276_v33 = vpop.f32.mrb[33].mxu0 }
 0x9b2   : > { %v5659_v29 = vpop.f32.mrb[33].mxu1  ;;  %v3278_v4 = vpop.f32.mrb[34].mxu0 }
 0x9b3   : > { %v11460_v34 = vpop.f32.mrb[34].mxu1  ;;  %v6962_v27 = vpack.c.bf16 %v3278_v4, %v3274_v21  ;;  %v3280_v25 = vpop.f32.mrb[35].mxu0  ;;  %v12214_v4 = vld [vmem:[#allocation4 + $0x658] sm:$0xff] }
 0x9b4   : > { %v6991_v44 = vpack.c.bf16 %v11460_v34, %v11459_v47  ;;  %v5662_v3 = vpop.f32.mrb[35].mxu1  ;;  %v6963_v24 = vpack.c.bf16 %v3280_v25, %v3276_v33  ;;  %v12215_v34 = vld [vmem:[#allocation4 + $0x660] sm:$0xff] }
 0x9b5   : > { %v6988_v26 = vpack.c.bf16 %v5662_v3, %v5659_v29  ;;  %7730 = vst [vmem:[#allocation5 + $0xcc0] sm:$0xff] %v6962_v27  ;;  %3543 = vmatmul.mubr.bf16.gmra.mrb[140].mxu0 %v13796_v15 }
 0x9b6   : > { %7759 = vst [vmem:[#allocation5 + $0xda8] sm:$0xff] %v6991_v44  ;;  %11566 = vmatmul.mubr.bf16.gmra.mrb[140].mxu1 %v12210_v51  ;;  %7731 = vst [vmem:[#allocation5 + $0xcc8] sm:$0xff] %v6963_v24  ;;  %3552 = vmatprep.mubr.bf16.mxu0 %v15421_v43 }
 0x9b7   : > { %7756 = vst [vmem:[#allocation5 + $0xd90] sm:$0xff] %v6988_v26  ;;  %11569 = vmatprep.mubr.bf16.mxu1 %v12211_v57 }
 0x9b8   : > { %v3284_v60 = vpop.f32.mrb[36].mxu0 }
 0x9b9   : > { %v11463_v40 = vpop.f32.mrb[36].mxu1  ;;  %v3286_v54 = vpop.f32.mrb[37].mxu0 }
 0x9ba   : > { %v5675_v38 = vpop.f32.mrb[37].mxu1  ;;  %v3288_v39 = vpop.f32.mrb[38].mxu0 }
 0x9bb   : > { %v11464_v14 = vpop.f32.mrb[38].mxu1  ;;  %v6965_v20 = vpack.c.bf16 %v3288_v39, %v3284_v60  ;;  %v3290_v12 = vpop.f32.mrb[39].mxu0  ;;  %v12217_v39 = vld [vmem:[#allocation4 + $0x670] sm:$0xff] }
 0x9bc   : > { %v6997_v2 = vpack.c.bf16 %v11464_v14, %v11463_v40  ;;  %v5678_v28 = vpop.f32.mrb[39].mxu1  ;;  %v6966_v1 = vpack.c.bf16 %v3290_v12, %v3286_v54 }
 0x9bd   : > { %v6994_v15 = vpack.c.bf16 %v5678_v28, %v5675_v38  ;;  %7733 = vst [vmem:[#allocation5 + $0xcd8] sm:$0xff] %v6965_v20  ;;  %3553 = vmatmul.mubr.bf16.gmra.mrb[144].mxu0 %v13798_v36  ;;  %v12216_v38 = vld [vmem:[#allocation4 + $0x668] sm:$0xff] }
 0x9be   : > { %7765 = vst [vmem:[#allocation5 + $0xdd8] sm:$0xff] %v6997_v2  ;;  %11570 = vmatmul.mubr.bf16.gmra.mrb[144].mxu1 %v12212_v32  ;;  %7734 = vst [vmem:[#allocation5 + $0xce0] sm:$0xff] %v6966_v1  ;;  %3562 = vmatprep.mubr.bf16.mxu0 %v15421_v43 }
 0x9bf   : > { %7762 = vst [vmem:[#allocation5 + $0xdc0] sm:$0xff] %v6994_v15  ;;  %11573 = vmatprep.mubr.bf16.mxu1 %v12213_v45 }
 0x9c0   : > { %v3294_v18 = vpop.f32.mrb[40].mxu0 }
 0x9c1   : > { %v11467_v59 = vpop.f32.mrb[40].mxu1  ;;  %v3296_v49 = vpop.f32.mrb[41].mxu0 }
 0x9c2   : > { %v5691_v11 = vpop.f32.mrb[41].mxu1  ;;  %v3298_v50 = vpop.f32.mrb[42].mxu0 }
 0x9c3   : > { %v11468_v31 = vpop.f32.mrb[42].mxu1  ;;  %v6968_v13 = vpack.c.bf16 %v3298_v50, %v3294_v18  ;;  %v3300_v47 = vpop.f32.mrb[43].mxu0 }
 0x9c4   : > { %v7003_v21 = vpack.c.bf16 %v11468_v31, %v11467_v59  ;;  %v5694_v33 = vpop.f32.mrb[43].mxu1  ;;  %v6969_v29 = vpack.c.bf16 %v3300_v47, %v3296_v49  ;;  %v12218_v49 = vld [vmem:[#allocation4 + $0x678] sm:$0xff] }
 0x9c5   : > { %v7000_v36 = vpack.c.bf16 %v5694_v33, %v5691_v11  ;;  %7736 = vst [vmem:[#allocation5 + $0xcf0] sm:$0xff] %v6968_v13  ;;  %3563 = vmatmul.mubr.bf16.gmra.mrb[148].mxu0 %v13804_v0  ;;  %v12219_v11 = vld [vmem:[#allocation4 + $0x680] sm:$0xff] }
 0x9c6   : > { %7771 = vst [vmem:[#allocation5 + $0xe08] sm:$0xff] %v7003_v21  ;;  %11574 = vmatmul.mubr.bf16.gmra.mrb[148].mxu1 %v12214_v4  ;;  %7737 = vst [vmem:[#allocation5 + $0xcf8] sm:$0xff] %v6969_v29  ;;  %3572 = vmatprep.mubr.bf16.mxu0 %v15421_v43 }
 0x9c7   : > { %7768 = vst [vmem:[#allocation5 + $0xdf0] sm:$0xff] %v7000_v36  ;;  %11577 = vmatprep.mubr.bf16.mxu1 %v12215_v34 }
 0x9c8   : > { %v3304_v27 = vpop.f32.mrb[44].mxu0 }
 0x9c9   : > { %v11471_v44 = vpop.f32.mrb[44].mxu1  ;;  %v3306_v25 = vpop.f32.mrb[45].mxu0 }
 0x9ca   : > { %v5707_v3 = vpop.f32.mrb[45].mxu1  ;;  %v3308_v24 = vpop.f32.mrb[46].mxu0 }
 0x9cb   : > { %v11472_v26 = vpop.f32.mrb[46].mxu1  ;;  %v6971_v51 = vpack.c.bf16 %v3308_v24, %v3304_v27  ;;  %v3310_v60 = vpop.f32.mrb[47].mxu0 }
 0x9cc   : > { %v7009_v57 = vpack.c.bf16 %v11472_v26, %v11471_v44  ;;  %v5710_v40 = vpop.f32.mrb[47].mxu1  ;;  %v6972_v54 = vpack.c.bf16 %v3310_v60, %v3306_v25  ;;  %v12220_v44 = vld [vmem:[#allocation4 + $0x688] sm:$0xff]  ;;  %v12221_v25 = vld [vmem:[#allocation4 + $0x690] sm:$0xff] }
 0x9cd   : > { %v7006_v0 = vpack.c.bf16 %v5710_v40, %v5707_v3  ;;  %7739 = vst [vmem:[#allocation5 + $0xd08] sm:$0xff] %v6971_v51  ;;  %3573 = vmatmul.mubr.bf16.gmra.mrb[152].mxu0 %v13806_v63 }
 0x9ce   : > { %7777 = vst [vmem:[#allocation5 + $0xe38] sm:$0xff] %v7009_v57  ;;  %11578 = vmatmul.mubr.bf16.gmra.mrb[152].mxu1 %v12216_v38  ;;  %7740 = vst [vmem:[#allocation5 + $0xd10] sm:$0xff] %v6972_v54  ;;  %3582 = vmatprep.mubr.bf16.mxu0 %v15421_v43 }
 0x9cf   : > { %7774 = vst [vmem:[#allocation5 + $0xe20] sm:$0xff] %v7006_v0  ;;  %11581 = vmatprep.mubr.bf16.mxu1 %v12217_v39 }
 0x9d0   : > { %v3314_v14 = vpop.f32.mrb[48].mxu0 }
 0x9d1   : > { %v11475_v20 = vpop.f32.mrb[48].mxu1  ;;  %v3316_v2 = vpop.f32.mrb[49].mxu0 }
 0x9d2   : > { %v5723_v12 = vpop.f32.mrb[49].mxu1  ;;  %v3318_v28 = vpop.f32.mrb[50].mxu0 }
 0x9d3   : > { %v11476_v1 = vpop.f32.mrb[50].mxu1  ;;  %v6974_v15 = vpack.c.bf16 %v3318_v28, %v3314_v14  ;;  %v3320_v45 = vpop.f32.mrb[51].mxu0  ;;  %v12222_v14 = vld [vmem:[#allocation4 + $0x698] sm:$0xff] }
 0x9d4   : > { %v7015_v32 = vpack.c.bf16 %v11476_v1, %v11475_v20  ;;  %v5726_v18 = vpop.f32.mrb[51].mxu1  ;;  %v6975_v59 = vpack.c.bf16 %v3320_v45, %v3316_v2  ;;  %v12223_v20 = vld [vmem:[#allocation4 + $0x6a0] sm:$0xff] }
 0x9d5   : > { %v7012_v63 = vpack.c.bf16 %v5726_v18, %v5723_v12  ;;  %7742 = vst [vmem:[#allocation5 + $0xd20] sm:$0xff] %v6974_v15  ;;  %3583 = vmatmul.mubr.bf16.gmra.mrb[156].mxu0 %v13812_v56 }
 0x9d6   : > { %7783 = vst [vmem:[#allocation5 + $0xe68] sm:$0xff] %v7015_v32  ;;  %11582 = vmatmul.mubr.bf16.gmra.mrb[156].mxu1 %v12218_v49  ;;  %7743 = vst [vmem:[#allocation5 + $0xd28] sm:$0xff] %v6975_v59  ;;  %3592 = vmatprep.mubr.bf16.mxu0 %v15421_v43 }
 0x9d7   : > { %7780 = vst [vmem:[#allocation5 + $0xe50] sm:$0xff] %v7012_v63  ;;  %11585 = vmatprep.mubr.bf16.mxu1 %v12219_v11  ;;  %v12224_v11 = vld [vmem:[#allocation4 + $0x6a8] sm:$0xff] }
 0x9d8   : > { %v3324_v50 = vpop.f32.mrb[52].mxu0 }
 0x9d9   : > { %v11479_v31 = vpop.f32.mrb[52].mxu1  ;;  %v3326_v13 = vpop.f32.mrb[53].mxu0 }
 0x9da   : > { %v5739_v21 = vpop.f32.mrb[53].mxu1  ;;  %v3328_v47 = vpop.f32.mrb[54].mxu0 }
 0x9db   : > { %v11480_v33 = vpop.f32.mrb[54].mxu1  ;;  %v6977_v29 = vpack.c.bf16 %v3328_v47, %v3324_v50  ;;  %v3330_v4 = vpop.f32.mrb[55].mxu0  ;;  %v12225_v50 = vld [vmem:[#allocation4 + $0x6b0] sm:$0xff] }
 0x9dc   : > { %v7021_v36 = vpack.c.bf16 %v11480_v33, %v11479_v31  ;;  %v5742_v34 = vpop.f32.mrb[55].mxu1  ;;  %v6978_v27 = vpack.c.bf16 %v3330_v4, %v3326_v13 }
 0x9dd   : > { %v7018_v56 = vpack.c.bf16 %v5742_v34, %v5739_v21  ;;  %7745 = vst [vmem:[#allocation5 + $0xd38] sm:$0xff] %v6977_v29  ;;  %3593 = vmatmul.mubr.bf16.gmra.mrb[160].mxu0 %v13814_v62 }
 0x9de   : > { %7789 = vst [vmem:[#allocation5 + $0xe98] sm:$0xff] %v7021_v36  ;;  %11586 = vmatmul.mubr.bf16.gmra.mrb[160].mxu1 %v12220_v44  ;;  %7746 = vst [vmem:[#allocation5 + $0xd40] sm:$0xff] %v6978_v27  ;;  %3602 = vmatprep.mubr.bf16.mxu0 %v15421_v43  ;;  %v12226_v44 = vld [vmem:[#allocation4 + $0x6b8] sm:$0xff] }
 0x9df   : > { %7786 = vst [vmem:[#allocation5 + $0xe80] sm:$0xff] %v7018_v56  ;;  %11589 = vmatprep.mubr.bf16.mxu1 %v12221_v25  ;;  %v12227_v25 = vld [vmem:[#allocation4 + $0x6c0] sm:$0xff] }
 0x9e0   : > { %v3334_v3 = vpop.f32.mrb[56].mxu0 }
 0x9e1   : > { %v11483_v24 = vpop.f32.mrb[56].mxu1  ;;  %v3336_v26 = vpop.f32.mrb[57].mxu0 }
 0x9e2   : > { %v5755_v51 = vpop.f32.mrb[57].mxu1  ;;  %v3338_v57 = vpop.f32.mrb[58].mxu0 }
 0x9e3   : > { %v11484_v60 = vpop.f32.mrb[58].mxu1  ;;  %v6980_v40 = vpack.c.bf16 %v3338_v57, %v3334_v3  ;;  %v3340_v0 = vpop.f32.mrb[59].mxu0 }
 0x9e4   : > { %v7027_v54 = vpack.c.bf16 %v11484_v60, %v11483_v24  ;;  %v5758_v38 = vpop.f32.mrb[59].mxu1  ;;  %v6981_v39 = vpack.c.bf16 %v3340_v0, %v3336_v26 }
 0x9e5   : > { %v7024_v62 = vpack.c.bf16 %v5758_v38, %v5755_v51  ;;  %7748 = vst [vmem:[#allocation5 + $0xd50] sm:$0xff] %v6980_v40  ;;  %3603 = vmatmul.mubr.bf16.gmra.mrb[164].mxu0 %v13820_v48 }
 0x9e6   : > { %7795 = vst [vmem:[#allocation5 + $0xec8] sm:$0xff] %v7027_v54  ;;  %11590 = vmatmul.mubr.bf16.gmra.mrb[164].mxu1 %v12222_v14  ;;  %7749 = vst [vmem:[#allocation5 + $0xd58] sm:$0xff] %v6981_v39  ;;  %3612 = vmatprep.mubr.bf16.mxu0 %v15421_v43  ;;  %v12229_v14 = vld [vmem:[#allocation4 + $0x6d0] sm:$0xff] }
 0x9e7   : > { %7792 = vst [vmem:[#allocation5 + $0xeb0] sm:$0xff] %v7024_v62  ;;  %11593 = vmatprep.mubr.bf16.mxu1 %v12223_v20  ;;  %v12228_v62 = vld [vmem:[#allocation4 + $0x6c8] sm:$0xff] }
 0x9e8   : > { %v3344_v2 = vpop.f32.mrb[60].mxu0 }
 0x9e9   : > { %v11487_v12 = vpop.f32.mrb[60].mxu1  ;;  %v3346_v28 = vpop.f32.mrb[61].mxu0 }
 0x9ea   : > { %v5771_v1 = vpop.f32.mrb[61].mxu1  ;;  %v3348_v15 = vpop.f32.mrb[62].mxu0 }
 0x9eb   : > { %v11488_v32 = vpop.f32.mrb[62].mxu1  ;;  %v6983_v45 = vpack.c.bf16 %v3348_v15, %v3344_v2  ;;  %v3350_v59 = vpop.f32.mrb[63].mxu0 }
 0x9ec   : > { %v7033_v18 = vpack.c.bf16 %v11488_v32, %v11487_v12  ;;  %v5774_v63 = vpop.f32.mrb[63].mxu1  ;;  %v6984_v49 = vpack.c.bf16 %v3350_v59, %v3346_v28 }
 0x9ed   : > { %v7030_v48 = vpack.c.bf16 %v5774_v63, %v5771_v1  ;;  %7751 = vst [vmem:[#allocation5 + $0xd68] sm:$0xff] %v6983_v45  ;;  %3613 = vmatmul.mubr.bf16.gmra.mrb[168].mxu0 %v13822_v30 }
 0x9ee   : > { %7801 = vst [vmem:[#allocation5 + $0xef8] sm:$0xff] %v7033_v18  ;;  %11594 = vmatmul.mubr.bf16.gmra.mrb[168].mxu1 %v12224_v11  ;;  %7752 = vst [vmem:[#allocation5 + $0xd70] sm:$0xff] %v6984_v49  ;;  %3622 = vmatprep.mubr.bf16.mxu0 %v15421_v43  ;;  %v12230_v49 = vld [vmem:[#allocation4 + $0x6d8] sm:$0xff] }
 0x9ef   : > { %7798 = vst [vmem:[#allocation5 + $0xee0] sm:$0xff] %v7030_v48  ;;  %11597 = vmatprep.mubr.bf16.mxu1 %v12225_v50  ;;  %v12231_v48 = vld [vmem:[#allocation4 + $0x6e0] sm:$0xff] }
 0x9f0   : > { %v3354_v31 = vpop.f32.mrb[64].mxu0 }
 0x9f1   : > { %v11491_v13 = vpop.f32.mrb[64].mxu1  ;;  %v3356_v21 = vpop.f32.mrb[65].mxu0 }
 0x9f2   : > { %v5787_v47 = vpop.f32.mrb[65].mxu1  ;;  %v3358_v33 = vpop.f32.mrb[66].mxu0 }
 0x9f3   : > { %v11492_v29 = vpop.f32.mrb[66].mxu1  ;;  %v6986_v36 = vpack.c.bf16 %v3358_v33, %v3354_v31  ;;  %v3360_v34 = vpop.f32.mrb[67].mxu0 }
 0x9f4   : > { %v7039_v4 = vpack.c.bf16 %v11492_v29, %v11491_v13  ;;  %v5790_v27 = vpop.f32.mrb[67].mxu1  ;;  %v6987_v56 = vpack.c.bf16 %v3360_v34, %v3356_v21 }
 0x9f5   : > { %v7036_v30 = vpack.c.bf16 %v5790_v27, %v5787_v47  ;;  %7754 = vst [vmem:[#allocation5 + $0xd80] sm:$0xff] %v6986_v36  ;;  %3623 = vmatmul.mubr.bf16.gmra.mrb[172].mxu0 %v13828_v41  ;;  %v12232_v27 = vld [vmem:[#allocation4 + $0x6e8] sm:$0xff] }
 0x9f6   : > { %7807 = vst [vmem:[#allocation5 + $0xf28] sm:$0xff] %v7039_v4  ;;  %11598 = vmatmul.mubr.bf16.gmra.mrb[172].mxu1 %v12226_v44  ;;  %7755 = vst [vmem:[#allocation5 + $0xd88] sm:$0xff] %v6987_v56  ;;  %3632 = vmatprep.mubr.bf16.mxu0 %v15421_v43  ;;  %v12233_v56 = vld [vmem:[#allocation4 + $0x6f0] sm:$0xff] }
 0x9f7   : > { %7804 = vst [vmem:[#allocation5 + $0xf10] sm:$0xff] %v7036_v30  ;;  %11601 = vmatprep.mubr.bf16.mxu1 %v12227_v25 }
 0x9f8   : > { %v3364_v3 = vpop.f32.mrb[68].mxu0 }
 0x9f9   : > { %v11495_v24 = vpop.f32.mrb[68].mxu1  ;;  %v3366_v26 = vpop.f32.mrb[69].mxu0 }
 0x9fa   : > { %v5803_v51 = vpop.f32.mrb[69].mxu1  ;;  %v3368_v57 = vpop.f32.mrb[70].mxu0 }
 0x9fb   : > { %v11496_v60 = vpop.f32.mrb[70].mxu1  ;;  %v6989_v40 = vpack.c.bf16 %v3368_v57, %v3364_v3  ;;  %v3370_v0 = vpop.f32.mrb[71].mxu0 }
 0x9fc   : > { %v7045_v54 = vpack.c.bf16 %v11496_v60, %v11495_v24  ;;  %v5806_v38 = vpop.f32.mrb[71].mxu1  ;;  %v6990_v39 = vpack.c.bf16 %v3370_v0, %v3366_v26  ;;  %v12234_v0 = vld [vmem:[#allocation4 + $0x6f8] sm:$0xff] }
 0x9fd   : > { %v7042_v41 = vpack.c.bf16 %v5806_v38, %v5803_v51  ;;  %7757 = vst [vmem:[#allocation5 + $0xd98] sm:$0xff] %v6989_v40  ;;  %3633 = vmatmul.mubr.bf16.gmra.mrb[176].mxu0 %v13830_v10  ;;  %v12235_v38 = vld [vmem:[#allocation4 + $0x700] sm:$0xff] }
 0x9fe   : > { %7813 = vst [vmem:[#allocation5 + $0xf58] sm:$0xff] %v7045_v54  ;;  %11602 = vmatmul.mubr.bf16.gmra.mrb[176].mxu1 %v12228_v62  ;;  %7758 = vst [vmem:[#allocation5 + $0xda0] sm:$0xff] %v6990_v39  ;;  %3642 = vmatprep.mubr.bf16.mxu0 %v15421_v43 }
 0x9ff   : > { %7810 = vst [vmem:[#allocation5 + $0xf40] sm:$0xff] %v7042_v41  ;;  %11605 = vmatprep.mubr.bf16.mxu1 %v12229_v14 }
 0xa00   : > { %v3374_v20 = vpop.f32.mrb[72].mxu0 }
 0xa01   : > { %v11499_v2 = vpop.f32.mrb[72].mxu1  ;;  %v3376_v12 = vpop.f32.mrb[73].mxu0 }
 0xa02   : > { %v5819_v28 = vpop.f32.mrb[73].mxu1  ;;  %v3378_v1 = vpop.f32.mrb[74].mxu0 }
 0xa03   : > { %v11500_v15 = vpop.f32.mrb[74].mxu1  ;;  %v6992_v32 = vpack.c.bf16 %v3378_v1, %v3374_v20  ;;  %v3380_v18 = vpop.f32.mrb[75].mxu0 }
 0xa04   : > { %v7051_v45 = vpack.c.bf16 %v11500_v15, %v11499_v2  ;;  %v5822_v59 = vpop.f32.mrb[75].mxu1  ;;  %v6993_v63 = vpack.c.bf16 %v3380_v18, %v3376_v12  ;;  %v12237_v18 = vld [vmem:[#allocation4 + $0x708] sm:$0xff] }
 0xa05   : > { %v7048_v10 = vpack.c.bf16 %v5822_v59, %v5819_v28  ;;  %7760 = vst [vmem:[#allocation5 + $0xdb0] sm:$0xff] %v6992_v32  ;;  %3643 = vmatmul.mubr.bf16.gmra.mrb[180].mxu0 %v13836_v61  ;;  %v12238_v59 = vld [vmem:[#allocation4 + $0x710] sm:$0xff] }
 0xa06   : > { %7819 = vst [vmem:[#allocation5 + $0xf88] sm:$0xff] %v7051_v45  ;;  %11606 = vmatmul.mubr.bf16.gmra.mrb[180].mxu1 %v12230_v49  ;;  %7761 = vst [vmem:[#allocation5 + $0xdb8] sm:$0xff] %v6993_v63  ;;  %3652 = vmatprep.mubr.bf16.mxu0 %v15421_v43  ;;  %v12236_v45 = vld [vmem:[#allocation4 + $0x580] sm:$0xff] }
 0xa07   : > { %7816 = vst [vmem:[#allocation5 + $0xf70] sm:$0xff] %v7048_v10  ;;  %11609 = vmatprep.mubr.bf16.mxu1 %v12231_v48 }
 0xa08   : > { %v3384_v11 = vpop.f32.mrb[76].mxu0 }
 0xa09   : > { %v11503_v50 = vpop.f32.mrb[76].mxu1  ;;  %v3386_v31 = vpop.f32.mrb[77].mxu0 }
 0xa0a   : > { %v5835_v13 = vpop.f32.mrb[77].mxu1  ;;  %v3388_v21 = vpop.f32.mrb[78].mxu0 }
 0xa0b   : > { %v11504_v47 = vpop.f32.mrb[78].mxu1  ;;  %v6995_v33 = vpack.c.bf16 %v3388_v21, %v3384_v11  ;;  %v3390_v36 = vpop.f32.mrb[79].mxu0 }
 0xa0c   : > { %v7057_v29 = vpack.c.bf16 %v11504_v47, %v11503_v50  ;;  %v5838_v4 = vpop.f32.mrb[79].mxu1  ;;  %v6996_v34 = vpack.c.bf16 %v3390_v36, %v3386_v31  ;;  %v12239_v36 = vld [vmem:[#allocation4 + $0x588] sm:$0xff] }
 0xa0d   : > { %v7054_v61 = vpack.c.bf16 %v5838_v4, %v5835_v13  ;;  %7763 = vst [vmem:[#allocation5 + $0xdc8] sm:$0xff] %v6995_v33  ;;  %3653 = vmatmul.mubr.bf16.gmra.mrb[184].mxu0 %v13838_v35  ;;  %v12240_v4 = vld [vmem:[#allocation4 + $0x718] sm:$0xff] }
 0xa0e   : > { %7825 = vst [vmem:[#allocation5 + $0xfb8] sm:$0xff] %v7057_v29  ;;  %11610 = vmatmul.mubr.bf16.gmra.mrb[184].mxu1 %v12232_v27  ;;  %7764 = vst [vmem:[#allocation5 + $0xdd0] sm:$0xff] %v6996_v34  ;;  %3662 = vmatprep.mubr.bf16.mxu0 %v15421_v43  ;;  %v12241_v34 = vld [vmem:[#allocation4 + $0x720] sm:$0xff] }
 0xa0f   : > { %7822 = vst [vmem:[#allocation5 + $0xfa0] sm:$0xff] %v7054_v61  ;;  %11613 = vmatprep.mubr.bf16.mxu1 %v12233_v56 }
 0xa10   : > { %v3394_v30 = vpop.f32.mrb[80].mxu0 }
 0xa11   : > { %v11507_v44 = vpop.f32.mrb[80].mxu1  ;;  %v3396_v25 = vpop.f32.mrb[81].mxu0 }
 0xa12   : > { %v5851_v3 = vpop.f32.mrb[81].mxu1  ;;  %v3398_v24 = vpop.f32.mrb[82].mxu0 }
 0xa13   : > { %v11508_v26 = vpop.f32.mrb[82].mxu1  ;;  %v6998_v51 = vpack.c.bf16 %v3398_v24, %v3394_v30  ;;  %v3400_v60 = vpop.f32.mrb[83].mxu0 }
 0xa14   : > { %v7063_v57 = vpack.c.bf16 %v11508_v26, %v11507_v44  ;;  %v5854_v40 = vpop.f32.mrb[83].mxu1  ;;  %v6999_v54 = vpack.c.bf16 %v3400_v60, %v3396_v25 }
 0xa15   : > { %v7060_v35 = vpack.c.bf16 %v5854_v40, %v5851_v3  ;;  %7766 = vst [vmem:[#allocation5 + $0xde0] sm:$0xff] %v6998_v51  ;;  %3663 = vmatmul.mubr.bf16.gmra.mrb[188].mxu0 %v13844_v42  ;;  %v12242_v40 = vld [vmem:[#allocation4 + $0x590] sm:$0xff] }
 0xa16   : > { %7831 = vst [vmem:[#allocation5 + $0xfe8] sm:$0xff] %v7063_v57  ;;  %11614 = vmatmul.mubr.bf16.gmra.mrb[188].mxu1 %v12234_v0  ;;  %7767 = vst [vmem:[#allocation5 + $0xde8] sm:$0xff] %v6999_v54  ;;  %3672 = vmatprep.mubr.bf16.mxu0 %v15421_v43  ;;  %v12243_v54 = vld [vmem:[#allocation4 + $0x728] sm:$0xff] }
 0xa17   : > { %7828 = vst [vmem:[#allocation5 + $0xfd0] sm:$0xff] %v7060_v35  ;;  %11617 = vmatprep.mubr.bf16.mxu1 %v12235_v38  ;;  %v12244_v35 = vld [vmem:[#allocation4 + $0x730] sm:$0xff] }
 0xa18   : > { %v3404_v39 = vpop.f32.mrb[84].mxu0 }
 0xa19   : > { %v11511_v41 = vpop.f32.mrb[84].mxu1  ;;  %v3406_v62 = vpop.f32.mrb[85].mxu0 }
 0xa1a   : > { %v5867_v14 = vpop.f32.mrb[85].mxu1  ;;  %v3408_v20 = vpop.f32.mrb[86].mxu0 }
 0xa1b   : > { %v11512_v2 = vpop.f32.mrb[86].mxu1  ;;  %v7001_v12 = vpack.c.bf16 %v3408_v20, %v3404_v39  ;;  %v3410_v1 = vpop.f32.mrb[87].mxu0 }
 0xa1c   : > { %v7069_v28 = vpack.c.bf16 %v11512_v2, %v11511_v41  ;;  %v5870_v15 = vpop.f32.mrb[87].mxu1  ;;  %v7002_v32 = vpack.c.bf16 %v3410_v1, %v3406_v62 }
 0xa1d   : > { %v7066_v42 = vpack.c.bf16 %v5870_v15, %v5867_v14  ;;  %7769 = vst [vmem:[#allocation5 + $0xdf8] sm:$0xff] %v7001_v12  ;;  %3673 = vmatmul.mubr.bf16.gmra.mrb[192].mxu0 %v12236_v45  ;;  %v12247_v45 = vld [vmem:[#allocation4 + $0x740] sm:$0xff] }
 0xa1e   : > { %7837 = vst [vmem:[#allocation5 + $0x1018] sm:$0xff] %v7069_v28  ;;  %11618 = vmatmul.mubr.bf16.gmra.mrb[192].mxu1 %v12237_v18  ;;  %7770 = vst [vmem:[#allocation5 + $0xe00] sm:$0xff] %v7002_v32  ;;  %3682 = vmatprep.mubr.bf16.mxu0 %v15421_v43  ;;  %v12245_v32 = vld [vmem:[#allocation4 + $0x598] sm:$0xff] }
 0xa1f   : > { %7834 = vst [vmem:[#allocation5 + $0x1000] sm:$0xff] %v7066_v42  ;;  %11621 = vmatprep.mubr.bf16.mxu1 %v12238_v59  ;;  %v12246_v42 = vld [vmem:[#allocation4 + $0x738] sm:$0xff] }
 0xa20   : > { %v3414_v63 = vpop.f32.mrb[88].mxu0 }
 0xa21   : > { %v11515_v10 = vpop.f32.mrb[88].mxu1  ;;  %v3416_v49 = vpop.f32.mrb[89].mxu0 }
 0xa22   : > { %v5883_v48 = vpop.f32.mrb[89].mxu1  ;;  %v3418_v11 = vpop.f32.mrb[90].mxu0 }
 0xa23   : > { %v11516_v50 = vpop.f32.mrb[90].mxu1  ;;  %v7004_v31 = vpack.c.bf16 %v3418_v11, %v3414_v63  ;;  %v3420_v21 = vpop.f32.mrb[91].mxu0 }
 0xa24   : > { %v7075_v13 = vpack.c.bf16 %v11516_v50, %v11515_v10  ;;  %v5886_v47 = vpop.f32.mrb[91].mxu1  ;;  %v7005_v33 = vpack.c.bf16 %v3420_v21, %v3416_v49 }
 0xa25   : > { %v7072_v29 = vpack.c.bf16 %v5886_v47, %v5883_v48  ;;  %7772 = vst [vmem:[#allocation5 + $0xe10] sm:$0xff] %v7004_v31  ;;  %3683 = vmatmul.mubr.bf16.gmra.mrb[196].mxu0 %v12239_v36  ;;  %v12250_v36 = vld [vmem:[#allocation4 + $0x750] sm:$0xff] }
 0xa26   : > { %7843 = vst [vmem:[#allocation5 + $0x1048] sm:$0xff] %v7075_v13  ;;  %11622 = vmatmul.mubr.bf16.gmra.mrb[196].mxu1 %v12240_v4  ;;  %7773 = vst [vmem:[#allocation5 + $0xe18] sm:$0xff] %v7005_v33  ;;  %3692 = vmatprep.mubr.bf16.mxu0 %v15421_v43  ;;  %v12248_v33 = vld [vmem:[#allocation4 + $0x5a0] sm:$0xff] }
 0xa27   : > { %7840 = vst [vmem:[#allocation5 + $0x1030] sm:$0xff] %v7072_v29  ;;  %11625 = vmatprep.mubr.bf16.mxu1 %v12241_v34  ;;  %v12249_v29 = vld [vmem:[#allocation4 + $0x748] sm:$0xff] }
 0xa28   : > { %v3424_v61 = vpop.f32.mrb[92].mxu0 }
 0xa29   : > { %v11519_v27 = vpop.f32.mrb[92].mxu1  ;;  %v3426_v56 = vpop.f32.mrb[93].mxu0 }
 0xa2a   : > { %v5899_v30 = vpop.f32.mrb[93].mxu1  ;;  %v3428_v44 = vpop.f32.mrb[94].mxu0 }
 0xa2b   : > { %v11520_v25 = vpop.f32.mrb[94].mxu1  ;;  %v7007_v3 = vpack.c.bf16 %v3428_v44, %v3424_v61  ;;  %v3430_v26 = vpop.f32.mrb[95].mxu0 }
 0xa2c   : > { %v7081_v24 = vpack.c.bf16 %v11520_v25, %v11519_v27  ;;  %v5902_v51 = vpop.f32.mrb[95].mxu1  ;;  %v7008_v57 = vpack.c.bf16 %v3430_v26, %v3426_v56 }
 0xa2d   : > { %v7078_v60 = vpack.c.bf16 %v5902_v51, %v5899_v30  ;;  %7775 = vst [vmem:[#allocation5 + $0xe28] sm:$0xff] %v7007_v3  ;;  %3693 = vmatmul.mubr.bf16.gmra.mrb[200].mxu0 %v12242_v40  ;;  %v12253_v40 = vld [vmem:[#allocation4 + $0x760] sm:$0xff] }
 0xa2e   : > { %7849 = vst [vmem:[#allocation5 + $0x1078] sm:$0xff] %v7081_v24  ;;  %11626 = vmatmul.mubr.bf16.gmra.mrb[200].mxu1 %v12243_v54  ;;  %7776 = vst [vmem:[#allocation5 + $0xe30] sm:$0xff] %v7008_v57  ;;  %3702 = vmatprep.mubr.bf16.mxu0 %v15421_v43  ;;  %v12251_v57 = vld [vmem:[#allocation4 + $0x5a8] sm:$0xff] }
 0xa2f   : > { %7846 = vst [vmem:[#allocation5 + $0x1060] sm:$0xff] %v7078_v60  ;;  %11629 = vmatprep.mubr.bf16.mxu1 %v12244_v35  ;;  %v12252_v60 = vld [vmem:[#allocation4 + $0x758] sm:$0xff] }
 0xa30   : > { %v3434_v0 = vpop.f32.mrb[96].mxu0 }
 0xa31   : > { %v11523_v38 = vpop.f32.mrb[96].mxu1  ;;  %v3436_v39 = vpop.f32.mrb[97].mxu0 }
 0xa32   : > { %v5915_v41 = vpop.f32.mrb[97].mxu1  ;;  %v3438_v62 = vpop.f32.mrb[98].mxu0 }
 0xa33   : > { %v11524_v14 = vpop.f32.mrb[98].mxu1  ;;  %v7010_v20 = vpack.c.bf16 %v3438_v62, %v3434_v0  ;;  %v3440_v12 = vpop.f32.mrb[99].mxu0 }
 0xa34   : > { %v7087_v2 = vpack.c.bf16 %v11524_v14, %v11523_v38  ;;  %v5918_v28 = vpop.f32.mrb[99].mxu1  ;;  %v7011_v1 = vpack.c.bf16 %v3440_v12, %v3436_v39 }
 0xa35   : > { %v7084_v15 = vpack.c.bf16 %v5918_v28, %v5915_v41  ;;  %7778 = vst [vmem:[#allocation5 + $0xe40] sm:$0xff] %v7010_v20  ;;  %3703 = vmatmul.mubr.bf16.gmra.mrb[204].mxu0 %v12245_v32  ;;  %v12256_v32 = vld [vmem:[#allocation4 + $0x770] sm:$0xff] }
 0xa36   : > { %7855 = vst [vmem:[#allocation5 + $0x10a8] sm:$0xff] %v7087_v2  ;;  %11630 = vmatmul.mubr.bf16.gmra.mrb[204].mxu1 %v12246_v42  ;;  %7779 = vst [vmem:[#allocation5 + $0xe48] sm:$0xff] %v7011_v1  ;;  %3712 = vmatprep.mubr.bf16.mxu0 %v15421_v43  ;;  %v12254_v1 = vld [vmem:[#allocation4 + $0x5b0] sm:$0xff] }
 0xa37   : > { %7852 = vst [vmem:[#allocation5 + $0x1090] sm:$0xff] %v7084_v15  ;;  %11633 = vmatprep.mubr.bf16.mxu1 %v12247_v45  ;;  %v12255_v15 = vld [vmem:[#allocation4 + $0x768] sm:$0xff] }
 0xa38   : > { %v3444_v18 = vpop.f32.mrb[100].mxu0 }
 0xa39   : > { %v11527_v59 = vpop.f32.mrb[100].mxu1  ;;  %v3446_v63 = vpop.f32.mrb[101].mxu0 }
 0xa3a   : > { %v5931_v10 = vpop.f32.mrb[101].mxu1  ;;  %v3448_v49 = vpop.f32.mrb[102].mxu0 }
 0xa3b   : > { %v11528_v48 = vpop.f32.mrb[102].mxu1  ;;  %v7013_v11 = vpack.c.bf16 %v3448_v49, %v3444_v18  ;;  %v3450_v31 = vpop.f32.mrb[103].mxu0 }
 0xa3c   : > { %v7093_v50 = vpack.c.bf16 %v11528_v48, %v11527_v59  ;;  %v5934_v13 = vpop.f32.mrb[103].mxu1  ;;  %v7014_v21 = vpack.c.bf16 %v3450_v31, %v3446_v63 }
 0xa3d   : > { %v7090_v47 = vpack.c.bf16 %v5934_v13, %v5931_v10  ;;  %7781 = vst [vmem:[#allocation5 + $0xe58] sm:$0xff] %v7013_v11  ;;  %3713 = vmatmul.mubr.bf16.gmra.mrb[208].mxu0 %v12248_v33  ;;  %v12259_v33 = vld [vmem:[#allocation4 + $0x780] sm:$0xff] }
 0xa3e   : > { %7861 = vst [vmem:[#allocation5 + $0x10d8] sm:$0xff] %v7093_v50  ;;  %11634 = vmatmul.mubr.bf16.gmra.mrb[208].mxu1 %v12249_v29  ;;  %7782 = vst [vmem:[#allocation5 + $0xe60] sm:$0xff] %v7014_v21  ;;  %3722 = vmatprep.mubr.bf16.mxu0 %v15421_v43  ;;  %v12257_v21 = vld [vmem:[#allocation4 + $0x5b8] sm:$0xff] }
 0xa3f   : > { %7858 = vst [vmem:[#allocation5 + $0x10c0] sm:$0xff] %v7090_v47  ;;  %11637 = vmatprep.mubr.bf16.mxu1 %v12250_v36  ;;  %v12258_v47 = vld [vmem:[#allocation4 + $0x778] sm:$0xff] }
 0xa40   : > { %v3454_v4 = vpop.f32.mrb[104].mxu0 }
 0xa41   : > { %v11531_v34 = vpop.f32.mrb[104].mxu1  ;;  %v3456_v61 = vpop.f32.mrb[105].mxu0 }
 0xa42   : > { %v5947_v27 = vpop.f32.mrb[105].mxu1  ;;  %v3458_v56 = vpop.f32.mrb[106].mxu0 }
 0xa43   : > { %v11532_v30 = vpop.f32.mrb[106].mxu1  ;;  %v7016_v44 = vpack.c.bf16 %v3458_v56, %v3454_v4  ;;  %v3460_v3 = vpop.f32.mrb[107].mxu0 }
 0xa44   : > { %v7099_v25 = vpack.c.bf16 %v11532_v30, %v11531_v34  ;;  %v5950_v24 = vpop.f32.mrb[107].mxu1  ;;  %v7017_v26 = vpack.c.bf16 %v3460_v3, %v3456_v61 }
 0xa45   : > { %v7096_v51 = vpack.c.bf16 %v5950_v24, %v5947_v27  ;;  %7784 = vst [vmem:[#allocation5 + $0xe70] sm:$0xff] %v7016_v44  ;;  %3723 = vmatmul.mubr.bf16.gmra.mrb[212].mxu0 %v12251_v57  ;;  %v12262_v57 = vld [vmem:[#allocation4 + $0x790] sm:$0xff] }
 0xa46   : > { %7867 = vst [vmem:[#allocation5 + $0x1108] sm:$0xff] %v7099_v25  ;;  %11638 = vmatmul.mubr.bf16.gmra.mrb[212].mxu1 %v12252_v60  ;;  %7785 = vst [vmem:[#allocation5 + $0xe78] sm:$0xff] %v7017_v26  ;;  %3732 = vmatprep.mubr.bf16.mxu0 %v15421_v43  ;;  %v12260_v26 = vld [vmem:[#allocation4 + $0x5c0] sm:$0xff] }
 0xa47   : > { %7864 = vst [vmem:[#allocation5 + $0x10f0] sm:$0xff] %v7096_v51  ;;  %11641 = vmatprep.mubr.bf16.mxu1 %v12253_v40  ;;  %v12261_v51 = vld [vmem:[#allocation4 + $0x788] sm:$0xff] }
 0xa48   : > { %v3464_v54 = vpop.f32.mrb[108].mxu0 }
 0xa49   : > { %v11535_v35 = vpop.f32.mrb[108].mxu1  ;;  %v3466_v0 = vpop.f32.mrb[109].mxu0 }
 0xa4a   : > { %v5963_v38 = vpop.f32.mrb[109].mxu1  ;;  %v3468_v39 = vpop.f32.mrb[110].mxu0 }
 0xa4b   : > { %v11536_v41 = vpop.f32.mrb[110].mxu1  ;;  %v7019_v62 = vpack.c.bf16 %v3468_v39, %v3464_v54  ;;  %v3470_v20 = vpop.f32.mrb[111].mxu0 }
 0xa4c   : > { %v7105_v14 = vpack.c.bf16 %v11536_v41, %v11535_v35  ;;  %v5966_v2 = vpop.f32.mrb[111].mxu1  ;;  %v7020_v12 = vpack.c.bf16 %v3470_v20, %v3466_v0 }
 0xa4d   : > { %v7102_v28 = vpack.c.bf16 %v5966_v2, %v5963_v38  ;;  %7787 = vst [vmem:[#allocation5 + $0xe88] sm:$0xff] %v7019_v62  ;;  %3733 = vmatmul.mubr.bf16.gmra.mrb[216].mxu0 %v12254_v1  ;;  %v12265_v1 = vld [vmem:[#allocation4 + $0x7a0] sm:$0xff] }
 0xa4e   : > { %7873 = vst [vmem:[#allocation5 + $0x1138] sm:$0xff] %v7105_v14  ;;  %11642 = vmatmul.mubr.bf16.gmra.mrb[216].mxu1 %v12255_v15  ;;  %7788 = vst [vmem:[#allocation5 + $0xe90] sm:$0xff] %v7020_v12  ;;  %3742 = vmatprep.mubr.bf16.mxu0 %v15421_v43  ;;  %v12263_v12 = vld [vmem:[#allocation4 + $0x5c8] sm:$0xff] }
 0xa4f   : > { %7870 = vst [vmem:[#allocation5 + $0x1120] sm:$0xff] %v7102_v28  ;;  %11645 = vmatprep.mubr.bf16.mxu1 %v12256_v32  ;;  %v12264_v28 = vld [vmem:[#allocation4 + $0x798] sm:$0xff] }
 0xa50   : > { %v3474_v42 = vpop.f32.mrb[112].mxu0 }
 0xa51   : > { %v11539_v45 = vpop.f32.mrb[112].mxu1  ;;  %v3476_v18 = vpop.f32.mrb[113].mxu0 }
 0xa52   : > { %v5979_v59 = vpop.f32.mrb[113].mxu1  ;;  %v3478_v63 = vpop.f32.mrb[114].mxu0 }
 0xa53   : > { %v11540_v10 = vpop.f32.mrb[114].mxu1  ;;  %v7022_v49 = vpack.c.bf16 %v3478_v63, %v3474_v42  ;;  %v3480_v11 = vpop.f32.mrb[115].mxu0 }
 0xa54   : > { %v7111_v48 = vpack.c.bf16 %v11540_v10, %v11539_v45  ;;  %v5982_v50 = vpop.f32.mrb[115].mxu1  ;;  %v7023_v31 = vpack.c.bf16 %v3480_v11, %v3476_v18 }
 0xa55   : > { %v7108_v13 = vpack.c.bf16 %v5982_v50, %v5979_v59  ;;  %7790 = vst [vmem:[#allocation5 + $0xea0] sm:$0xff] %v7022_v49  ;;  %3743 = vmatmul.mubr.bf16.gmra.mrb[220].mxu0 %v12257_v21  ;;  %v12268_v21 = vld [vmem:[#allocation4 + $0x7b0] sm:$0xff] }
 0xa56   : > { %7879 = vst [vmem:[#allocation5 + $0x1168] sm:$0xff] %v7111_v48  ;;  %11646 = vmatmul.mubr.bf16.gmra.mrb[220].mxu1 %v12258_v47  ;;  %7791 = vst [vmem:[#allocation5 + $0xea8] sm:$0xff] %v7023_v31  ;;  %3752 = vmatprep.mubr.bf16.mxu0 %v15421_v43  ;;  %v12266_v31 = vld [vmem:[#allocation4 + $0x5d0] sm:$0xff] }
 0xa57   : > { %7876 = vst [vmem:[#allocation5 + $0x1150] sm:$0xff] %v7108_v13  ;;  %11649 = vmatprep.mubr.bf16.mxu1 %v12259_v33  ;;  %v12267_v13 = vld [vmem:[#allocation4 + $0x7a8] sm:$0xff] }
 0xa58   : > { %v3484_v29 = vpop.f32.mrb[116].mxu0 }
 0xa59   : > { %v11543_v36 = vpop.f32.mrb[116].mxu1  ;;  %v3486_v4 = vpop.f32.mrb[117].mxu0 }
 0xa5a   : > { %v5995_v34 = vpop.f32.mrb[117].mxu1  ;;  %v3488_v61 = vpop.f32.mrb[118].mxu0 }
 0xa5b   : > { %v11544_v27 = vpop.f32.mrb[118].mxu1  ;;  %v7025_v56 = vpack.c.bf16 %v3488_v61, %v3484_v29  ;;  %v3490_v44 = vpop.f32.mrb[119].mxu0 }
 0xa5c   : > { %v7117_v30 = vpack.c.bf16 %v11544_v27, %v11543_v36  ;;  %v5998_v25 = vpop.f32.mrb[119].mxu1  ;;  %v7026_v3 = vpack.c.bf16 %v3490_v44, %v3486_v4 }
 0xa5d   : > { %v7114_v24 = vpack.c.bf16 %v5998_v25, %v5995_v34  ;;  %7793 = vst [vmem:[#allocation5 + $0xeb8] sm:$0xff] %v7025_v56  ;;  %3753 = vmatmul.mubr.bf16.gmra.mrb[224].mxu0 %v12260_v26  ;;  %v12271_v26 = vld [vmem:[#allocation4 + $0x7c0] sm:$0xff] }
 0xa5e   : > { %7885 = vst [vmem:[#allocation5 + $0x1198] sm:$0xff] %v7117_v30  ;;  %11650 = vmatmul.mubr.bf16.gmra.mrb[224].mxu1 %v12261_v51  ;;  %7794 = vst [vmem:[#allocation5 + $0xec0] sm:$0xff] %v7026_v3  ;;  %3762 = vmatprep.mubr.bf16.mxu0 %v15421_v43  ;;  %v12269_v3 = vld [vmem:[#allocation4 + $0x5d8] sm:$0xff] }
 0xa5f   : > { %7882 = vst [vmem:[#allocation5 + $0x1180] sm:$0xff] %v7114_v24  ;;  %11653 = vmatprep.mubr.bf16.mxu1 %v12262_v57  ;;  %v12270_v24 = vld [vmem:[#allocation4 + $0x7b8] sm:$0xff] }
 0xa60   : > { %v3494_v60 = vpop.f32.mrb[120].mxu0 }
 0xa61   : > { %v11547_v40 = vpop.f32.mrb[120].mxu1  ;;  %v3496_v54 = vpop.f32.mrb[121].mxu0 }
 0xa62   : > { %v6011_v35 = vpop.f32.mrb[121].mxu1  ;;  %v3498_v0 = vpop.f32.mrb[122].mxu0 }
 0xa63   : > { %v11548_v38 = vpop.f32.mrb[122].mxu1  ;;  %v7028_v39 = vpack.c.bf16 %v3498_v0, %v3494_v60  ;;  %v3500_v62 = vpop.f32.mrb[123].mxu0 }
 0xa64   : > { %v7123_v41 = vpack.c.bf16 %v11548_v38, %v11547_v40  ;;  %v6014_v14 = vpop.f32.mrb[123].mxu1  ;;  %v7029_v20 = vpack.c.bf16 %v3500_v62, %v3496_v54 }
 0xa65   : > { %v7120_v2 = vpack.c.bf16 %v6014_v14, %v6011_v35  ;;  %7796 = vst [vmem:[#allocation5 + $0xed0] sm:$0xff] %v7028_v39  ;;  %3763 = vmatmul.mubr.bf16.gmra.mrb[228].mxu0 %v12263_v12  ;;  %v12274_v12 = vld [vmem:[#allocation4 + $0x7d0] sm:$0xff] }
 0xa66   : > { %7891 = vst [vmem:[#allocation5 + $0x11c8] sm:$0xff] %v7123_v41  ;;  %11654 = vmatmul.mubr.bf16.gmra.mrb[228].mxu1 %v12264_v28  ;;  %7797 = vst [vmem:[#allocation5 + $0xed8] sm:$0xff] %v7029_v20  ;;  %3772 = vmatprep.mubr.bf16.mxu0 %v15421_v43  ;;  %v12272_v20 = vld [vmem:[#allocation4 + $0x5e0] sm:$0xff] }
 0xa67   : > { %7888 = vst [vmem:[#allocation5 + $0x11b0] sm:$0xff] %v7120_v2  ;;  %11657 = vmatprep.mubr.bf16.mxu1 %v12265_v1  ;;  %v12273_v2 = vld [vmem:[#allocation4 + $0x7c8] sm:$0xff] }
 0xa68   : > { %v3504_v15 = vpop.f32.mrb[124].mxu0 }
 0xa69   : > { %v11551_v32 = vpop.f32.mrb[124].mxu1  ;;  %v3506_v42 = vpop.f32.mrb[125].mxu0 }
 0xa6a   : > { %v6027_v45 = vpop.f32.mrb[125].mxu1  ;;  %v3508_v18 = vpop.f32.mrb[126].mxu0 }
 0xa6b   : > { %v11552_v59 = vpop.f32.mrb[126].mxu1  ;;  %v7031_v63 = vpack.c.bf16 %v3508_v18, %v3504_v15  ;;  %v3510_v49 = vpop.f32.mrb[127].mxu0 }
 0xa6c   : > { %v7129_v10 = vpack.c.bf16 %v11552_v59, %v11551_v32  ;;  %v6030_v48 = vpop.f32.mrb[127].mxu1  ;;  %v7032_v11 = vpack.c.bf16 %v3510_v49, %v3506_v42 }
 0xa6d   : > { %v7126_v50 = vpack.c.bf16 %v6030_v48, %v6027_v45  ;;  %7799 = vst [vmem:[#allocation5 + $0xee8] sm:$0xff] %v7031_v63  ;;  %3773 = vmatmul.mubr.bf16.gmra.mrb[232].mxu0 %v12266_v31  ;;  %v12277_v31 = vld [vmem:[#allocation4 + $0x7e0] sm:$0xff] }
 0xa6e   : > { %7897 = vst [vmem:[#allocation5 + $0x11f8] sm:$0xff] %v7129_v10  ;;  %11658 = vmatmul.mubr.bf16.gmra.mrb[232].mxu1 %v12267_v13  ;;  %7800 = vst [vmem:[#allocation5 + $0xef0] sm:$0xff] %v7032_v11  ;;  %3782 = vmatprep.mubr.bf16.mxu0 %v15421_v43  ;;  %v12275_v11 = vld [vmem:[#allocation4 + $0x5e8] sm:$0xff] }
 0xa6f   : > { %7894 = vst [vmem:[#allocation5 + $0x11e0] sm:$0xff] %v7126_v50  ;;  %11661 = vmatprep.mubr.bf16.mxu1 %v12268_v21  ;;  %v12276_v50 = vld [vmem:[#allocation4 + $0x7d8] sm:$0xff] }
 0xa70   : > { %v3514_v47 = vpop.f32.mrb[128].mxu0 }
 0xa71   : > { %v11555_v33 = vpop.f32.mrb[128].mxu1  ;;  %v3516_v29 = vpop.f32.mrb[129].mxu0 }
 0xa72   : > { %v6043_v36 = vpop.f32.mrb[129].mxu1  ;;  %v3518_v4 = vpop.f32.mrb[130].mxu0 }
 0xa73   : > { %v11556_v34 = vpop.f32.mrb[130].mxu1  ;;  %v7034_v61 = vpack.c.bf16 %v3518_v4, %v3514_v47  ;;  %v3520_v56 = vpop.f32.mrb[131].mxu0 }
 0xa74   : > { %v7135_v27 = vpack.c.bf16 %v11556_v34, %v11555_v33  ;;  %v6046_v30 = vpop.f32.mrb[131].mxu1  ;;  %v7035_v44 = vpack.c.bf16 %v3520_v56, %v3516_v29 }
 0xa75   : > { %v7132_v25 = vpack.c.bf16 %v6046_v30, %v6043_v36  ;;  %7802 = vst [vmem:[#allocation5 + $0xf00] sm:$0xff] %v7034_v61  ;;  %3783 = vmatmul.mubr.bf16.gmra.mrb[236].mxu0 %v12269_v3  ;;  %v12280_v3 = vld [vmem:[#allocation4 + $0x7f0] sm:$0xff] }
 0xa76   : > { %7903 = vst [vmem:[#allocation5 + $0x1228] sm:$0xff] %v7135_v27  ;;  %11662 = vmatmul.mubr.bf16.gmra.mrb[236].mxu1 %v12270_v24  ;;  %7803 = vst [vmem:[#allocation5 + $0xf08] sm:$0xff] %v7035_v44  ;;  %3792 = vmatprep.mubr.bf16.mxu0 %v15421_v43  ;;  %v12278_v44 = vld [vmem:[#allocation4 + $0x5f0] sm:$0xff] }
 0xa77   : > { %7900 = vst [vmem:[#allocation5 + $0x1210] sm:$0xff] %v7132_v25  ;;  %11665 = vmatprep.mubr.bf16.mxu1 %v12271_v26  ;;  %v12279_v25 = vld [vmem:[#allocation4 + $0x7e8] sm:$0xff] }
 0xa78   : > { %v3524_v51 = vpop.f32.mrb[132].mxu0 }
 0xa79   : > { %v11559_v57 = vpop.f32.mrb[132].mxu1  ;;  %v3526_v60 = vpop.f32.mrb[133].mxu0 }
 0xa7a   : > { %v6059_v40 = vpop.f32.mrb[133].mxu1  ;;  %v3528_v54 = vpop.f32.mrb[134].mxu0 }
 0xa7b   : > { %v11560_v35 = vpop.f32.mrb[134].mxu1  ;;  %v7037_v0 = vpack.c.bf16 %v3528_v54, %v3524_v51  ;;  %v3530_v39 = vpop.f32.mrb[135].mxu0 }
 0xa7c   : > { %v7141_v38 = vpack.c.bf16 %v11560_v35, %v11559_v57  ;;  %v6062_v41 = vpop.f32.mrb[135].mxu1  ;;  %v7038_v62 = vpack.c.bf16 %v3530_v39, %v3526_v60 }
 0xa7d   : > { %v7138_v14 = vpack.c.bf16 %v6062_v41, %v6059_v40  ;;  %7805 = vst [vmem:[#allocation5 + $0xf18] sm:$0xff] %v7037_v0  ;;  %3793 = vmatmul.mubr.bf16.gmra.mrb[240].mxu0 %v12272_v20 }
 0xa7e   : > { %7909 = vst [vmem:[#allocation5 + $0x1258] sm:$0xff] %v7141_v38  ;;  %11666 = vmatmul.mubr.bf16.gmra.mrb[240].mxu1 %v12273_v2  ;;  %7806 = vst [vmem:[#allocation5 + $0xf20] sm:$0xff] %v7038_v62  ;;  %3802 = vmatprep.mubr.bf16.mxu0 %v15421_v43  ;;  %v12281_v62 = vld [vmem:[#allocation4 + $0x5f8] sm:$0xff] }
 0xa7f   : > { %7906 = vst [vmem:[#allocation5 + $0x1240] sm:$0xff] %v7138_v14  ;;  %11669 = vmatprep.mubr.bf16.mxu1 %v12274_v12  ;;  %v12282_v14 = vld [vmem:[#allocation4 + $0x7f8] sm:$0xff] }
 0xa80   : > { %v3534_v28 = vpop.f32.mrb[136].mxu0 }
 0xa81   : > { %v11563_v1 = vpop.f32.mrb[136].mxu1  ;;  %v3536_v15 = vpop.f32.mrb[137].mxu0 }
 0xa82   : > { %v6075_v32 = vpop.f32.mrb[137].mxu1  ;;  %v3538_v42 = vpop.f32.mrb[138].mxu0 }
 0xa83   : > { %v11564_v45 = vpop.f32.mrb[138].mxu1  ;;  %v7040_v18 = vpack.c.bf16 %v3538_v42, %v3534_v28  ;;  %v3540_v63 = vpop.f32.mrb[139].mxu0 }
 0xa84   : > { %v7147_v59 = vpack.c.bf16 %v11564_v45, %v11563_v1  ;;  %v6078_v10 = vpop.f32.mrb[139].mxu1  ;;  %v7041_v49 = vpack.c.bf16 %v3540_v63, %v3536_v15 }
 0xa85   : > { %v7144_v48 = vpack.c.bf16 %v6078_v10, %v6075_v32  ;;  %7808 = vst [vmem:[#allocation5 + $0xf30] sm:$0xff] %v7040_v18  ;;  %3803 = vmatmul.mubr.bf16.gmra.mrb[244].mxu0 %v12275_v11 }
 0xa86   : > { %7915 = vst [vmem:[#allocation5 + $0x1288] sm:$0xff] %v7147_v59  ;;  %11670 = vmatmul.mubr.bf16.gmra.mrb[244].mxu1 %v12276_v50  ;;  %7809 = vst [vmem:[#allocation5 + $0xf38] sm:$0xff] %v7041_v49  ;;  %3812 = vmatprep.mubr.bf16.mxu0 %v15421_v43 }
 0xa87   : > { %7912 = vst [vmem:[#allocation5 + $0x1270] sm:$0xff] %v7144_v48  ;;  %11673 = vmatprep.mubr.bf16.mxu1 %v12277_v31 }
 0xa88   : > { %v3544_v13 = vpop.f32.mrb[140].mxu0 }
 0xa89   : > { %v11567_v21 = vpop.f32.mrb[140].mxu1  ;;  %v3546_v47 = vpop.f32.mrb[141].mxu0 }
 0xa8a   : > { %v6091_v33 = vpop.f32.mrb[141].mxu1  ;;  %v3548_v29 = vpop.f32.mrb[142].mxu0 }
 0xa8b   : > { %v11568_v36 = vpop.f32.mrb[142].mxu1  ;;  %v7043_v4 = vpack.c.bf16 %v3548_v29, %v3544_v13  ;;  %v3550_v61 = vpop.f32.mrb[143].mxu0 }
 0xa8c   : > { %v7153_v34 = vpack.c.bf16 %v11568_v36, %v11567_v21  ;;  %v6094_v27 = vpop.f32.mrb[143].mxu1  ;;  %v7044_v56 = vpack.c.bf16 %v3550_v61, %v3546_v47 }
 0xa8d   : > { %v7150_v30 = vpack.c.bf16 %v6094_v27, %v6091_v33  ;;  %7811 = vst [vmem:[#allocation5 + $0xf48] sm:$0xff] %v7043_v4  ;;  %3813 = vmatmul.mubr.bf16.gmra.mrb[248].mxu0 %v12278_v44 }
 0xa8e   : > { %7921 = vst [vmem:[#allocation5 + $0x12b8] sm:$0xff] %v7153_v34  ;;  %11674 = vmatmul.mubr.bf16.gmra.mrb[248].mxu1 %v12279_v25  ;;  %7812 = vst [vmem:[#allocation5 + $0xf50] sm:$0xff] %v7044_v56  ;;  %3822 = vmatprep.mubr.bf16.mxu0 %v15421_v43 }
 0xa8f   : > { %7918 = vst [vmem:[#allocation5 + $0x12a0] sm:$0xff] %v7150_v30  ;;  %11677 = vmatprep.mubr.bf16.mxu1 %v12280_v3 }
 0xa90   : > { %v3554_v24 = vpop.f32.mrb[144].mxu0 }
 0xa91   : > { %v11571_v26 = vpop.f32.mrb[144].mxu1  ;;  %v3556_v51 = vpop.f32.mrb[145].mxu0 }
 0xa92   : > { %v6107_v57 = vpop.f32.mrb[145].mxu1  ;;  %v3558_v60 = vpop.f32.mrb[146].mxu0 }
 0xa93   : > { %v11572_v40 = vpop.f32.mrb[146].mxu1  ;;  %v7046_v54 = vpack.c.bf16 %v3558_v60, %v3554_v24  ;;  %v3560_v0 = vpop.f32.mrb[147].mxu0 }
 0xa94   : > { %v7159_v35 = vpack.c.bf16 %v11572_v40, %v11571_v26  ;;  %v6110_v38 = vpop.f32.mrb[147].mxu1  ;;  %v7047_v39 = vpack.c.bf16 %v3560_v0, %v3556_v51 }
 0xa95   : > { %v7156_v41 = vpack.c.bf16 %v6110_v38, %v6107_v57  ;;  %7814 = vst [vmem:[#allocation5 + $0xf60] sm:$0xff] %v7046_v54  ;;  %3823 = vmatmul.mubr.bf16.gmra.mrb[252].mxu0 %v12281_v62 }
 0xa96   : > { %7927 = vst [vmem:[#allocation5 + $0x12e8] sm:$0xff] %v7159_v35  ;;  %11678 = vmatmul.mubr.bf16.gmra.mrb[252].mxu1 %v12282_v14  ;;  %7815 = vst [vmem:[#allocation5 + $0xf68] sm:$0xff] %v7047_v39 }
 0xa97   : > { %7924 = vst [vmem:[#allocation5 + $0x12d0] sm:$0xff] %v7156_v41 }
 0xa98   : > { %v3564_v43 = vpop.f32.mrb[148].mxu0 }
 0xa99   : > { %v11575_v20 = vpop.f32.mrb[148].mxu1  ;;  %v3566_v2 = vpop.f32.mrb[149].mxu0 }
 0xa9a   : > { %v6123_v12 = vpop.f32.mrb[149].mxu1  ;;  %v3568_v28 = vpop.f32.mrb[150].mxu0 }
 0xa9b   : > { %v11576_v1 = vpop.f32.mrb[150].mxu1  ;;  %v7049_v15 = vpack.c.bf16 %v3568_v28, %v3564_v43  ;;  %v3570_v42 = vpop.f32.mrb[151].mxu0 }
 0xa9c   : > { %v7165_v32 = vpack.c.bf16 %v11576_v1, %v11575_v20  ;;  %v6126_v45 = vpop.f32.mrb[151].mxu1  ;;  %v7050_v18 = vpack.c.bf16 %v3570_v42, %v3566_v2 }
 0xa9d   : > { %v7162_v59 = vpack.c.bf16 %v6126_v45, %v6123_v12  ;;  %7817 = vst [vmem:[#allocation5 + $0xf78] sm:$0xff] %v7049_v15 }
 0xa9e   : > { %7933 = vst [vmem:[#allocation5 + $0x1318] sm:$0xff] %v7165_v32  ;;  %7818 = vst [vmem:[#allocation5 + $0xf80] sm:$0xff] %v7050_v18 }
 0xa9f   : > { %7930 = vst [vmem:[#allocation5 + $0x1300] sm:$0xff] %v7162_v59 }
 0xaa0   : > { %v3574_v63 = vpop.f32.mrb[152].mxu0 }
 0xaa1   : > { %v11579_v10 = vpop.f32.mrb[152].mxu1  ;;  %v3576_v49 = vpop.f32.mrb[153].mxu0 }
 0xaa2   : > { %v6139_v48 = vpop.f32.mrb[153].mxu1  ;;  %v3578_v11 = vpop.f32.mrb[154].mxu0 }
 0xaa3   : > { %v11580_v50 = vpop.f32.mrb[154].mxu1  ;;  %v7052_v31 = vpack.c.bf16 %v3578_v11, %v3574_v63  ;;  %v3580_v21 = vpop.f32.mrb[155].mxu0 }
 0xaa4   : > { %v7171_v13 = vpack.c.bf16 %v11580_v50, %v11579_v10  ;;  %v6142_v47 = vpop.f32.mrb[155].mxu1  ;;  %v7053_v33 = vpack.c.bf16 %v3580_v21, %v3576_v49 }
 0xaa5   : > { %v7168_v29 = vpack.c.bf16 %v6142_v47, %v6139_v48  ;;  %7820 = vst [vmem:[#allocation5 + $0xf90] sm:$0xff] %v7052_v31 }
 0xaa6   : > { %7939 = vst [vmem:[#allocation5 + $0x1348] sm:$0xff] %v7171_v13  ;;  %7821 = vst [vmem:[#allocation5 + $0xf98] sm:$0xff] %v7053_v33 }
 0xaa7   : > { %7936 = vst [vmem:[#allocation5 + $0x1330] sm:$0xff] %v7168_v29 }
 0xaa8   : > { %v3584_v36 = vpop.f32.mrb[156].mxu0 }
 0xaa9   : > { %v11583_v4 = vpop.f32.mrb[156].mxu1  ;;  %v3586_v34 = vpop.f32.mrb[157].mxu0 }
 0xaaa   : > { %v6155_v61 = vpop.f32.mrb[157].mxu1  ;;  %v3588_v27 = vpop.f32.mrb[158].mxu0 }
 0xaab   : > { %v11584_v56 = vpop.f32.mrb[158].mxu1  ;;  %v7055_v30 = vpack.c.bf16 %v3588_v27, %v3584_v36  ;;  %v3590_v25 = vpop.f32.mrb[159].mxu0 }
 0xaac   : > { %v7177_v44 = vpack.c.bf16 %v11584_v56, %v11583_v4  ;;  %v6158_v3 = vpop.f32.mrb[159].mxu1  ;;  %v7056_v24 = vpack.c.bf16 %v3590_v25, %v3586_v34 }
 0xaad   : > { %v7174_v26 = vpack.c.bf16 %v6158_v3, %v6155_v61  ;;  %7823 = vst [vmem:[#allocation5 + $0xfa8] sm:$0xff] %v7055_v30 }
 0xaae   : > { %7945 = vst [vmem:[#allocation5 + $0x1378] sm:$0xff] %v7177_v44  ;;  %7824 = vst [vmem:[#allocation5 + $0xfb0] sm:$0xff] %v7056_v24 }
 0xaaf   : > { %7942 = vst [vmem:[#allocation5 + $0x1360] sm:$0xff] %v7174_v26 }
 0xab0   : > { %v3594_v51 = vpop.f32.mrb[160].mxu0 }
 0xab1   : > { %v11587_v57 = vpop.f32.mrb[160].mxu1  ;;  %v3596_v60 = vpop.f32.mrb[161].mxu0 }
 0xab2   : > { %v6171_v40 = vpop.f32.mrb[161].mxu1  ;;  %v3598_v54 = vpop.f32.mrb[162].mxu0 }
 0xab3   : > { %v11588_v35 = vpop.f32.mrb[162].mxu1  ;;  %v7058_v0 = vpack.c.bf16 %v3598_v54, %v3594_v51  ;;  %v3600_v39 = vpop.f32.mrb[163].mxu0 }
 0xab4   : > { %v7183_v38 = vpack.c.bf16 %v11588_v35, %v11587_v57  ;;  %v6174_v41 = vpop.f32.mrb[163].mxu1  ;;  %v7059_v62 = vpack.c.bf16 %v3600_v39, %v3596_v60 }
 0xab5   : > { %v7180_v14 = vpack.c.bf16 %v6174_v41, %v6171_v40  ;;  %7826 = vst [vmem:[#allocation5 + $0xfc0] sm:$0xff] %v7058_v0 }
 0xab6   : > { %7951 = vst [vmem:[#allocation5 + $0x13a8] sm:$0xff] %v7183_v38  ;;  %7827 = vst [vmem:[#allocation5 + $0xfc8] sm:$0xff] %v7059_v62 }
 0xab7   : > { %7948 = vst [vmem:[#allocation5 + $0x1390] sm:$0xff] %v7180_v14 }
 0xab8   : > { %v3604_v43 = vpop.f32.mrb[164].mxu0 }
 0xab9   : > { %v11591_v20 = vpop.f32.mrb[164].mxu1  ;;  %v3606_v2 = vpop.f32.mrb[165].mxu0 }
 0xaba   : > { %v6187_v12 = vpop.f32.mrb[165].mxu1  ;;  %v3608_v28 = vpop.f32.mrb[166].mxu0 }
 0xabb   : > { %v11592_v1 = vpop.f32.mrb[166].mxu1  ;;  %v7061_v15 = vpack.c.bf16 %v3608_v28, %v3604_v43  ;;  %v3610_v42 = vpop.f32.mrb[167].mxu0 }
 0xabc   : > { %v7189_v32 = vpack.c.bf16 %v11592_v1, %v11591_v20  ;;  %v6190_v45 = vpop.f32.mrb[167].mxu1  ;;  %v7062_v18 = vpack.c.bf16 %v3610_v42, %v3606_v2 }
 0xabd   : > { %v7186_v59 = vpack.c.bf16 %v6190_v45, %v6187_v12  ;;  %7829 = vst [vmem:[#allocation5 + $0xfd8] sm:$0xff] %v7061_v15 }
 0xabe   : > { %7957 = vst [vmem:[#allocation5 + $0x13d8] sm:$0xff] %v7189_v32  ;;  %7830 = vst [vmem:[#allocation5 + $0xfe0] sm:$0xff] %v7062_v18 }
 0xabf   : > { %7954 = vst [vmem:[#allocation5 + $0x13c0] sm:$0xff] %v7186_v59 }
 0xac0   : > { %v3614_v63 = vpop.f32.mrb[168].mxu0 }
 0xac1   : > { %v11595_v10 = vpop.f32.mrb[168].mxu1  ;;  %v3616_v49 = vpop.f32.mrb[169].mxu0 }
 0xac2   : > { %v6203_v48 = vpop.f32.mrb[169].mxu1  ;;  %v3618_v11 = vpop.f32.mrb[170].mxu0 }
 0xac3   : > { %v11596_v50 = vpop.f32.mrb[170].mxu1  ;;  %v7064_v31 = vpack.c.bf16 %v3618_v11, %v3614_v63  ;;  %v3620_v21 = vpop.f32.mrb[171].mxu0 }
 0xac4   : > { %v7195_v13 = vpack.c.bf16 %v11596_v50, %v11595_v10  ;;  %v6206_v47 = vpop.f32.mrb[171].mxu1  ;;  %v7065_v33 = vpack.c.bf16 %v3620_v21, %v3616_v49 }
 0xac5   : > { %v7192_v29 = vpack.c.bf16 %v6206_v47, %v6203_v48  ;;  %7832 = vst [vmem:[#allocation5 + $0xff0] sm:$0xff] %v7064_v31 }
 0xac6   : > { %7963 = vst [vmem:[#allocation5 + $0x1408] sm:$0xff] %v7195_v13  ;;  %7833 = vst [vmem:[#allocation5 + $0xff8] sm:$0xff] %v7065_v33 }
 0xac7   : > { %7960 = vst [vmem:[#allocation5 + $0x13f0] sm:$0xff] %v7192_v29 }
 0xac8   : > { %v3624_v36 = vpop.f32.mrb[172].mxu0 }
 0xac9   : > { %v11599_v4 = vpop.f32.mrb[172].mxu1  ;;  %v3626_v34 = vpop.f32.mrb[173].mxu0 }
 0xaca   : > { %v6219_v61 = vpop.f32.mrb[173].mxu1  ;;  %v3628_v27 = vpop.f32.mrb[174].mxu0 }
 0xacb   : > { %v11600_v56 = vpop.f32.mrb[174].mxu1  ;;  %v7067_v30 = vpack.c.bf16 %v3628_v27, %v3624_v36  ;;  %v3630_v25 = vpop.f32.mrb[175].mxu0 }
 0xacc   : > { %v7201_v44 = vpack.c.bf16 %v11600_v56, %v11599_v4  ;;  %v6222_v3 = vpop.f32.mrb[175].mxu1  ;;  %v7068_v24 = vpack.c.bf16 %v3630_v25, %v3626_v34 }
 0xacd   : > { %v7198_v26 = vpack.c.bf16 %v6222_v3, %v6219_v61  ;;  %7835 = vst [vmem:[#allocation5 + $0x1008] sm:$0xff] %v7067_v30 }
 0xace   : > { %7969 = vst [vmem:[#allocation5 + $0x1438] sm:$0xff] %v7201_v44  ;;  %7836 = vst [vmem:[#allocation5 + $0x1010] sm:$0xff] %v7068_v24 }
 0xacf   : > { %7966 = vst [vmem:[#allocation5 + $0x1420] sm:$0xff] %v7198_v26 }
 0xad0   : > { %v3634_v51 = vpop.f32.mrb[176].mxu0 }
 0xad1   : > { %v11603_v57 = vpop.f32.mrb[176].mxu1  ;;  %v3636_v60 = vpop.f32.mrb[177].mxu0 }
 0xad2   : > { %v6235_v40 = vpop.f32.mrb[177].mxu1  ;;  %v3638_v54 = vpop.f32.mrb[178].mxu0 }
 0xad3   : > { %v11604_v35 = vpop.f32.mrb[178].mxu1  ;;  %v7070_v0 = vpack.c.bf16 %v3638_v54, %v3634_v51  ;;  %v3640_v39 = vpop.f32.mrb[179].mxu0 }
 0xad4   : > { %v7207_v38 = vpack.c.bf16 %v11604_v35, %v11603_v57  ;;  %v6238_v41 = vpop.f32.mrb[179].mxu1  ;;  %v7071_v62 = vpack.c.bf16 %v3640_v39, %v3636_v60 }
 0xad5   : > { %v7204_v14 = vpack.c.bf16 %v6238_v41, %v6235_v40  ;;  %7838 = vst [vmem:[#allocation5 + $0x1020] sm:$0xff] %v7070_v0 }
 0xad6   : > { %7975 = vst [vmem:[#allocation5 + $0x1468] sm:$0xff] %v7207_v38  ;;  %7839 = vst [vmem:[#allocation5 + $0x1028] sm:$0xff] %v7071_v62 }
 0xad7   : > { %7972 = vst [vmem:[#allocation5 + $0x1450] sm:$0xff] %v7204_v14 }
 0xad8   : > { %v3644_v43 = vpop.f32.mrb[180].mxu0 }
 0xad9   : > { %v11607_v20 = vpop.f32.mrb[180].mxu1  ;;  %v3646_v2 = vpop.f32.mrb[181].mxu0 }
 0xada   : > { %v6251_v12 = vpop.f32.mrb[181].mxu1  ;;  %v3648_v28 = vpop.f32.mrb[182].mxu0 }
 0xadb   : > { %v11608_v1 = vpop.f32.mrb[182].mxu1  ;;  %v7073_v15 = vpack.c.bf16 %v3648_v28, %v3644_v43  ;;  %v3650_v42 = vpop.f32.mrb[183].mxu0 }
 0xadc   : > { %v7213_v32 = vpack.c.bf16 %v11608_v1, %v11607_v20  ;;  %v6254_v45 = vpop.f32.mrb[183].mxu1  ;;  %v7074_v18 = vpack.c.bf16 %v3650_v42, %v3646_v2 }
 0xadd   : > { %v7210_v59 = vpack.c.bf16 %v6254_v45, %v6251_v12  ;;  %7841 = vst [vmem:[#allocation5 + $0x1038] sm:$0xff] %v7073_v15 }
 0xade   : > { %7981 = vst [vmem:[#allocation5 + $0x1498] sm:$0xff] %v7213_v32  ;;  %7842 = vst [vmem:[#allocation5 + $0x1040] sm:$0xff] %v7074_v18 }
 0xadf   : > { %7978 = vst [vmem:[#allocation5 + $0x1480] sm:$0xff] %v7210_v59 }
 0xae0   : > { %v3654_v63 = vpop.f32.mrb[184].mxu0 }
 0xae1   : > { %v11611_v10 = vpop.f32.mrb[184].mxu1  ;;  %v3656_v49 = vpop.f32.mrb[185].mxu0 }
 0xae2   : > { %v6267_v48 = vpop.f32.mrb[185].mxu1  ;;  %v3658_v11 = vpop.f32.mrb[186].mxu0 }
 0xae3   : > { %v11612_v50 = vpop.f32.mrb[186].mxu1  ;;  %v7076_v31 = vpack.c.bf16 %v3658_v11, %v3654_v63  ;;  %v3660_v21 = vpop.f32.mrb[187].mxu0 }
 0xae4   : > { %v7219_v13 = vpack.c.bf16 %v11612_v50, %v11611_v10  ;;  %v6270_v47 = vpop.f32.mrb[187].mxu1  ;;  %v7077_v33 = vpack.c.bf16 %v3660_v21, %v3656_v49 }
 0xae5   : > { %v7216_v29 = vpack.c.bf16 %v6270_v47, %v6267_v48  ;;  %7844 = vst [vmem:[#allocation5 + $0x1050] sm:$0xff] %v7076_v31 }
 0xae6   : > { %7987 = vst [vmem:[#allocation5 + $0x14c8] sm:$0xff] %v7219_v13  ;;  %7845 = vst [vmem:[#allocation5 + $0x1058] sm:$0xff] %v7077_v33 }
 0xae7   : > { %7984 = vst [vmem:[#allocation5 + $0x14b0] sm:$0xff] %v7216_v29 }
 0xae8   : > { %v3664_v36 = vpop.f32.mrb[188].mxu0 }
 0xae9   : > { %v11615_v4 = vpop.f32.mrb[188].mxu1  ;;  %v3666_v34 = vpop.f32.mrb[189].mxu0 }
 0xaea   : > { %v6283_v61 = vpop.f32.mrb[189].mxu1  ;;  %v3668_v27 = vpop.f32.mrb[190].mxu0 }
 0xaeb   : > { %v11616_v56 = vpop.f32.mrb[190].mxu1  ;;  %v7079_v30 = vpack.c.bf16 %v3668_v27, %v3664_v36  ;;  %v3670_v25 = vpop.f32.mrb[191].mxu0 }
 0xaec   : > { %v7225_v44 = vpack.c.bf16 %v11616_v56, %v11615_v4  ;;  %v6286_v3 = vpop.f32.mrb[191].mxu1  ;;  %v7080_v24 = vpack.c.bf16 %v3670_v25, %v3666_v34 }
 0xaed   : > { %v7222_v26 = vpack.c.bf16 %v6286_v3, %v6283_v61  ;;  %7847 = vst [vmem:[#allocation5 + $0x1068] sm:$0xff] %v7079_v30 }
 0xaee   : > { %7993 = vst [vmem:[#allocation5 + $0x14f8] sm:$0xff] %v7225_v44  ;;  %7848 = vst [vmem:[#allocation5 + $0x1070] sm:$0xff] %v7080_v24 }
 0xaef   : > { %7990 = vst [vmem:[#allocation5 + $0x14e0] sm:$0xff] %v7222_v26 }
 0xaf0   : > { %v3674_v51 = vpop.f32.mrb[192].mxu0 }
 0xaf1   : > { %v11619_v57 = vpop.f32.mrb[192].mxu1  ;;  %v3676_v60 = vpop.f32.mrb[193].mxu0 }
 0xaf2   : > { %v6299_v40 = vpop.f32.mrb[193].mxu1  ;;  %v3678_v54 = vpop.f32.mrb[194].mxu0 }
 0xaf3   : > { %v11620_v35 = vpop.f32.mrb[194].mxu1  ;;  %v7082_v0 = vpack.c.bf16 %v3678_v54, %v3674_v51  ;;  %v3680_v39 = vpop.f32.mrb[195].mxu0 }
 0xaf4   : > { %v7231_v38 = vpack.c.bf16 %v11620_v35, %v11619_v57  ;;  %v6302_v41 = vpop.f32.mrb[195].mxu1  ;;  %v7083_v62 = vpack.c.bf16 %v3680_v39, %v3676_v60 }
 0xaf5   : > { %v7228_v14 = vpack.c.bf16 %v6302_v41, %v6299_v40  ;;  %7850 = vst [vmem:[#allocation5 + $0x1080] sm:$0xff] %v7082_v0 }
 0xaf6   : > { %7999 = vst [vmem:[#allocation5 + $0x1528] sm:$0xff] %v7231_v38  ;;  %7851 = vst [vmem:[#allocation5 + $0x1088] sm:$0xff] %v7083_v62 }
 0xaf7   : > { %7996 = vst [vmem:[#allocation5 + $0x1510] sm:$0xff] %v7228_v14 }
 0xaf8   : > { %v3684_v43 = vpop.f32.mrb[196].mxu0 }
 0xaf9   : > { %v11623_v20 = vpop.f32.mrb[196].mxu1  ;;  %v3686_v2 = vpop.f32.mrb[197].mxu0 }
 0xafa   : > { %v6315_v12 = vpop.f32.mrb[197].mxu1  ;;  %v3688_v28 = vpop.f32.mrb[198].mxu0 }
 0xafb   : > { %v11624_v1 = vpop.f32.mrb[198].mxu1  ;;  %v7085_v15 = vpack.c.bf16 %v3688_v28, %v3684_v43  ;;  %v3690_v42 = vpop.f32.mrb[199].mxu0 }
 0xafc   : > { %v7237_v32 = vpack.c.bf16 %v11624_v1, %v11623_v20  ;;  %v6318_v45 = vpop.f32.mrb[199].mxu1  ;;  %v7086_v18 = vpack.c.bf16 %v3690_v42, %v3686_v2 }
 0xafd   : > { %v7234_v59 = vpack.c.bf16 %v6318_v45, %v6315_v12  ;;  %7853 = vst [vmem:[#allocation5 + $0x1098] sm:$0xff] %v7085_v15 }
 0xafe   : > { %8005 = vst [vmem:[#allocation5 + $0x1558] sm:$0xff] %v7237_v32  ;;  %7854 = vst [vmem:[#allocation5 + $0x10a0] sm:$0xff] %v7086_v18 }
 0xaff   : > { %8002 = vst [vmem:[#allocation5 + $0x1540] sm:$0xff] %v7234_v59 }
 0xb00   : > { %v3694_v63 = vpop.f32.mrb[200].mxu0 }
 0xb01   : > { %v11627_v10 = vpop.f32.mrb[200].mxu1  ;;  %v3696_v49 = vpop.f32.mrb[201].mxu0 }
 0xb02   : > { %v6331_v48 = vpop.f32.mrb[201].mxu1  ;;  %v3698_v11 = vpop.f32.mrb[202].mxu0 }
 0xb03   : > { %v11628_v50 = vpop.f32.mrb[202].mxu1  ;;  %v7088_v31 = vpack.c.bf16 %v3698_v11, %v3694_v63  ;;  %v3700_v21 = vpop.f32.mrb[203].mxu0 }
 0xb04   : > { %v7243_v13 = vpack.c.bf16 %v11628_v50, %v11627_v10  ;;  %v6334_v47 = vpop.f32.mrb[203].mxu1  ;;  %v7089_v33 = vpack.c.bf16 %v3700_v21, %v3696_v49 }
 0xb05   : > { %v7240_v29 = vpack.c.bf16 %v6334_v47, %v6331_v48  ;;  %7856 = vst [vmem:[#allocation5 + $0x10b0] sm:$0xff] %v7088_v31 }
 0xb06   : > { %8011 = vst [vmem:[#allocation5 + $0x1588] sm:$0xff] %v7243_v13  ;;  %7857 = vst [vmem:[#allocation5 + $0x10b8] sm:$0xff] %v7089_v33 }
 0xb07   : > { %8008 = vst [vmem:[#allocation5 + $0x1570] sm:$0xff] %v7240_v29 }
 0xb08   : > { %v3704_v36 = vpop.f32.mrb[204].mxu0 }
 0xb09   : > { %v11631_v4 = vpop.f32.mrb[204].mxu1  ;;  %v3706_v34 = vpop.f32.mrb[205].mxu0 }
 0xb0a   : > { %v6347_v61 = vpop.f32.mrb[205].mxu1  ;;  %v3708_v27 = vpop.f32.mrb[206].mxu0 }
 0xb0b   : > { %v11632_v56 = vpop.f32.mrb[206].mxu1  ;;  %v7091_v30 = vpack.c.bf16 %v3708_v27, %v3704_v36  ;;  %v3710_v25 = vpop.f32.mrb[207].mxu0 }
 0xb0c   : > { %v7249_v44 = vpack.c.bf16 %v11632_v56, %v11631_v4  ;;  %v6350_v3 = vpop.f32.mrb[207].mxu1  ;;  %v7092_v24 = vpack.c.bf16 %v3710_v25, %v3706_v34 }
 0xb0d   : > { %v7246_v26 = vpack.c.bf16 %v6350_v3, %v6347_v61  ;;  %7859 = vst [vmem:[#allocation5 + $0x10c8] sm:$0xff] %v7091_v30 }
 0xb0e   : > { %8017 = vst [vmem:[#allocation5 + $0x15b8] sm:$0xff] %v7249_v44  ;;  %7860 = vst [vmem:[#allocation5 + $0x10d0] sm:$0xff] %v7092_v24 }
 0xb0f   : > { %8014 = vst [vmem:[#allocation5 + $0x15a0] sm:$0xff] %v7246_v26 }
 0xb10   : > { %v3714_v51 = vpop.f32.mrb[208].mxu0 }
 0xb11   : > { %v11635_v57 = vpop.f32.mrb[208].mxu1  ;;  %v3716_v60 = vpop.f32.mrb[209].mxu0 }
 0xb12   : > { %v6363_v40 = vpop.f32.mrb[209].mxu1  ;;  %v3718_v54 = vpop.f32.mrb[210].mxu0 }
 0xb13   : > { %v11636_v35 = vpop.f32.mrb[210].mxu1  ;;  %v7094_v0 = vpack.c.bf16 %v3718_v54, %v3714_v51  ;;  %v3720_v39 = vpop.f32.mrb[211].mxu0 }
 0xb14   : > { %v7255_v38 = vpack.c.bf16 %v11636_v35, %v11635_v57  ;;  %v6366_v41 = vpop.f32.mrb[211].mxu1  ;;  %v7095_v62 = vpack.c.bf16 %v3720_v39, %v3716_v60 }
 0xb15   : > { %v7252_v14 = vpack.c.bf16 %v6366_v41, %v6363_v40  ;;  %7862 = vst [vmem:[#allocation5 + $0x10e0] sm:$0xff] %v7094_v0 }
 0xb16   : > { %8023 = vst [vmem:[#allocation5 + $0x15e8] sm:$0xff] %v7255_v38  ;;  %7863 = vst [vmem:[#allocation5 + $0x10e8] sm:$0xff] %v7095_v62 }
 0xb17   : > { %8020 = vst [vmem:[#allocation5 + $0x15d0] sm:$0xff] %v7252_v14 }
 0xb18   : > { %v3724_v43 = vpop.f32.mrb[212].mxu0 }
 0xb19   : > { %v11639_v20 = vpop.f32.mrb[212].mxu1  ;;  %v3726_v2 = vpop.f32.mrb[213].mxu0 }
 0xb1a   : > { %v6379_v12 = vpop.f32.mrb[213].mxu1  ;;  %v3728_v28 = vpop.f32.mrb[214].mxu0 }
 0xb1b   : > { %v11640_v1 = vpop.f32.mrb[214].mxu1  ;;  %v7097_v15 = vpack.c.bf16 %v3728_v28, %v3724_v43  ;;  %v3730_v42 = vpop.f32.mrb[215].mxu0 }
 0xb1c   : > { %v7261_v32 = vpack.c.bf16 %v11640_v1, %v11639_v20  ;;  %v6382_v45 = vpop.f32.mrb[215].mxu1  ;;  %v7098_v18 = vpack.c.bf16 %v3730_v42, %v3726_v2 }
 0xb1d   : > { %v7258_v59 = vpack.c.bf16 %v6382_v45, %v6379_v12  ;;  %7865 = vst [vmem:[#allocation5 + $0x10f8] sm:$0xff] %v7097_v15 }
 0xb1e   : > { %8029 = vst [vmem:[#allocation5 + $0x1618] sm:$0xff] %v7261_v32  ;;  %7866 = vst [vmem:[#allocation5 + $0x1100] sm:$0xff] %v7098_v18 }
 0xb1f   : > { %8026 = vst [vmem:[#allocation5 + $0x1600] sm:$0xff] %v7258_v59 }
 0xb20   : > { %v3734_v63 = vpop.f32.mrb[216].mxu0 }
 0xb21   : > { %v11643_v10 = vpop.f32.mrb[216].mxu1  ;;  %v3736_v49 = vpop.f32.mrb[217].mxu0 }
 0xb22   : > { %v6395_v48 = vpop.f32.mrb[217].mxu1  ;;  %v3738_v11 = vpop.f32.mrb[218].mxu0 }
 0xb23   : > { %v11644_v50 = vpop.f32.mrb[218].mxu1  ;;  %v7100_v31 = vpack.c.bf16 %v3738_v11, %v3734_v63  ;;  %v3740_v21 = vpop.f32.mrb[219].mxu0 }
 0xb24   : > { %v7267_v13 = vpack.c.bf16 %v11644_v50, %v11643_v10  ;;  %v6398_v47 = vpop.f32.mrb[219].mxu1  ;;  %v7101_v33 = vpack.c.bf16 %v3740_v21, %v3736_v49 }
 0xb25   : > { %v7264_v29 = vpack.c.bf16 %v6398_v47, %v6395_v48  ;;  %7868 = vst [vmem:[#allocation5 + $0x1110] sm:$0xff] %v7100_v31 }
 0xb26   : > { %8035 = vst [vmem:[#allocation5 + $0x1648] sm:$0xff] %v7267_v13  ;;  %7869 = vst [vmem:[#allocation5 + $0x1118] sm:$0xff] %v7101_v33 }
 0xb27   : > { %8032 = vst [vmem:[#allocation5 + $0x1630] sm:$0xff] %v7264_v29 }
 0xb28   : > { %v3744_v36 = vpop.f32.mrb[220].mxu0 }
 0xb29   : > { %v11647_v4 = vpop.f32.mrb[220].mxu1  ;;  %v3746_v34 = vpop.f32.mrb[221].mxu0 }
 0xb2a   : > { %v6411_v61 = vpop.f32.mrb[221].mxu1  ;;  %v3748_v27 = vpop.f32.mrb[222].mxu0 }
 0xb2b   : > { %v11648_v56 = vpop.f32.mrb[222].mxu1  ;;  %v7103_v30 = vpack.c.bf16 %v3748_v27, %v3744_v36  ;;  %v3750_v25 = vpop.f32.mrb[223].mxu0 }
 0xb2c   : > { %v7273_v44 = vpack.c.bf16 %v11648_v56, %v11647_v4  ;;  %v6414_v3 = vpop.f32.mrb[223].mxu1  ;;  %v7104_v24 = vpack.c.bf16 %v3750_v25, %v3746_v34 }
 0xb2d   : > { %v7270_v26 = vpack.c.bf16 %v6414_v3, %v6411_v61  ;;  %7871 = vst [vmem:[#allocation5 + $0x1128] sm:$0xff] %v7103_v30 }
 0xb2e   : > { %8041 = vst [vmem:[#allocation5 + $0x1678] sm:$0xff] %v7273_v44  ;;  %7872 = vst [vmem:[#allocation5 + $0x1130] sm:$0xff] %v7104_v24 }
 0xb2f   : > { %8038 = vst [vmem:[#allocation5 + $0x1660] sm:$0xff] %v7270_v26 }
 0xb30   : > { %v3754_v51 = vpop.f32.mrb[224].mxu0 }
 0xb31   : > { %v11651_v57 = vpop.f32.mrb[224].mxu1  ;;  %v3756_v60 = vpop.f32.mrb[225].mxu0 }
 0xb32   : > { %v6427_v40 = vpop.f32.mrb[225].mxu1  ;;  %v3758_v54 = vpop.f32.mrb[226].mxu0 }
 0xb33   : > { %v11652_v35 = vpop.f32.mrb[226].mxu1  ;;  %v7106_v0 = vpack.c.bf16 %v3758_v54, %v3754_v51  ;;  %v3760_v39 = vpop.f32.mrb[227].mxu0 }
 0xb34   : > { %v7279_v38 = vpack.c.bf16 %v11652_v35, %v11651_v57  ;;  %v6430_v41 = vpop.f32.mrb[227].mxu1  ;;  %v7107_v62 = vpack.c.bf16 %v3760_v39, %v3756_v60 }
 0xb35   : > { %v7276_v14 = vpack.c.bf16 %v6430_v41, %v6427_v40  ;;  %7874 = vst [vmem:[#allocation5 + $0x1140] sm:$0xff] %v7106_v0 }
 0xb36   : > { %8047 = vst [vmem:[#allocation5 + $0x16a8] sm:$0xff] %v7279_v38  ;;  %7875 = vst [vmem:[#allocation5 + $0x1148] sm:$0xff] %v7107_v62 }
 0xb37   : > { %8044 = vst [vmem:[#allocation5 + $0x1690] sm:$0xff] %v7276_v14 }
 0xb38   : > { %v3764_v43 = vpop.f32.mrb[228].mxu0 }
 0xb39   : > { %v11655_v20 = vpop.f32.mrb[228].mxu1  ;;  %v3766_v2 = vpop.f32.mrb[229].mxu0 }
 0xb3a   : > { %v6443_v12 = vpop.f32.mrb[229].mxu1  ;;  %v3768_v28 = vpop.f32.mrb[230].mxu0 }
 0xb3b   : > { %v11656_v1 = vpop.f32.mrb[230].mxu1  ;;  %v7109_v15 = vpack.c.bf16 %v3768_v28, %v3764_v43  ;;  %v3770_v42 = vpop.f32.mrb[231].mxu0 }
 0xb3c   : > { %v7285_v32 = vpack.c.bf16 %v11656_v1, %v11655_v20  ;;  %v6446_v45 = vpop.f32.mrb[231].mxu1  ;;  %v7110_v18 = vpack.c.bf16 %v3770_v42, %v3766_v2 }
 0xb3d   : > { %v7282_v59 = vpack.c.bf16 %v6446_v45, %v6443_v12  ;;  %7877 = vst [vmem:[#allocation5 + $0x1158] sm:$0xff] %v7109_v15 }
 0xb3e   : > { %8053 = vst [vmem:[#allocation5 + $0x16d8] sm:$0xff] %v7285_v32  ;;  %7878 = vst [vmem:[#allocation5 + $0x1160] sm:$0xff] %v7110_v18 }
 0xb3f   : > { %8050 = vst [vmem:[#allocation5 + $0x16c0] sm:$0xff] %v7282_v59 }
 0xb40   : > { %v3774_v63 = vpop.f32.mrb[232].mxu0 }
 0xb41   : > { %v11659_v10 = vpop.f32.mrb[232].mxu1  ;;  %v3776_v49 = vpop.f32.mrb[233].mxu0 }
 0xb42   : > { %v6459_v48 = vpop.f32.mrb[233].mxu1  ;;  %v3778_v11 = vpop.f32.mrb[234].mxu0 }
 0xb43   : > { %v11660_v50 = vpop.f32.mrb[234].mxu1  ;;  %v7112_v31 = vpack.c.bf16 %v3778_v11, %v3774_v63  ;;  %v3780_v21 = vpop.f32.mrb[235].mxu0 }
 0xb44   : > { %v7291_v13 = vpack.c.bf16 %v11660_v50, %v11659_v10  ;;  %v6462_v47 = vpop.f32.mrb[235].mxu1  ;;  %v7113_v33 = vpack.c.bf16 %v3780_v21, %v3776_v49 }
 0xb45   : > { %v7288_v29 = vpack.c.bf16 %v6462_v47, %v6459_v48  ;;  %7880 = vst [vmem:[#allocation5 + $0x1170] sm:$0xff] %v7112_v31 }
 0xb46   : > { %8059 = vst [vmem:[#allocation5 + $0x1708] sm:$0xff] %v7291_v13  ;;  %7881 = vst [vmem:[#allocation5 + $0x1178] sm:$0xff] %v7113_v33 }
 0xb47   : > { %8056 = vst [vmem:[#allocation5 + $0x16f0] sm:$0xff] %v7288_v29 }
 0xb48   : > { %v3784_v36 = vpop.f32.mrb[236].mxu0 }
 0xb49   : > { %v11663_v4 = vpop.f32.mrb[236].mxu1  ;;  %v3786_v34 = vpop.f32.mrb[237].mxu0 }
 0xb4a   : > { %v6475_v61 = vpop.f32.mrb[237].mxu1  ;;  %v3788_v27 = vpop.f32.mrb[238].mxu0 }
 0xb4b   : > { %v11664_v56 = vpop.f32.mrb[238].mxu1  ;;  %v7115_v30 = vpack.c.bf16 %v3788_v27, %v3784_v36  ;;  %v3790_v25 = vpop.f32.mrb[239].mxu0 }
 0xb4c   : > { %v7297_v44 = vpack.c.bf16 %v11664_v56, %v11663_v4  ;;  %v6478_v3 = vpop.f32.mrb[239].mxu1  ;;  %v7116_v24 = vpack.c.bf16 %v3790_v25, %v3786_v34 }
 0xb4d   : > { %v7294_v26 = vpack.c.bf16 %v6478_v3, %v6475_v61  ;;  %7883 = vst [vmem:[#allocation5 + $0x1188] sm:$0xff] %v7115_v30 }
 0xb4e   : > { %8065 = vst [vmem:[#allocation5 + $0x1738] sm:$0xff] %v7297_v44  ;;  %7884 = vst [vmem:[#allocation5 + $0x1190] sm:$0xff] %v7116_v24 }
 0xb4f   : > { %8062 = vst [vmem:[#allocation5 + $0x1720] sm:$0xff] %v7294_v26 }
 0xb50   : > { %v3794_v51 = vpop.f32.mrb[240].mxu0 }
 0xb51   : > { %v11667_v57 = vpop.f32.mrb[240].mxu1  ;;  %v3796_v60 = vpop.f32.mrb[241].mxu0 }
 0xb52   : > { %v6491_v40 = vpop.f32.mrb[241].mxu1  ;;  %v3798_v54 = vpop.f32.mrb[242].mxu0 }
 0xb53   : > { %v11668_v35 = vpop.f32.mrb[242].mxu1  ;;  %v7118_v0 = vpack.c.bf16 %v3798_v54, %v3794_v51  ;;  %v3800_v39 = vpop.f32.mrb[243].mxu0 }
 0xb54   : > { %v7303_v38 = vpack.c.bf16 %v11668_v35, %v11667_v57  ;;  %v6494_v41 = vpop.f32.mrb[243].mxu1  ;;  %v7119_v62 = vpack.c.bf16 %v3800_v39, %v3796_v60 }
 0xb55   : > { %v7300_v14 = vpack.c.bf16 %v6494_v41, %v6491_v40  ;;  %7886 = vst [vmem:[#allocation5 + $0x11a0] sm:$0xff] %v7118_v0 }
 0xb56   : > { %8071 = vst [vmem:[#allocation5 + $0x1768] sm:$0xff] %v7303_v38  ;;  %7887 = vst [vmem:[#allocation5 + $0x11a8] sm:$0xff] %v7119_v62 }
 0xb57   : > { %8068 = vst [vmem:[#allocation5 + $0x1750] sm:$0xff] %v7300_v14 }
 0xb58   : > { %v3804_v43 = vpop.f32.mrb[244].mxu0 }
 0xb59   : > { %v11671_v20 = vpop.f32.mrb[244].mxu1  ;;  %v3806_v2 = vpop.f32.mrb[245].mxu0 }
 0xb5a   : > { %v6507_v12 = vpop.f32.mrb[245].mxu1  ;;  %v3808_v28 = vpop.f32.mrb[246].mxu0 }
 0xb5b   : > { %v11672_v1 = vpop.f32.mrb[246].mxu1  ;;  %v7121_v15 = vpack.c.bf16 %v3808_v28, %v3804_v43  ;;  %v3810_v42 = vpop.f32.mrb[247].mxu0 }
 0xb5c   : > { %v7309_v32 = vpack.c.bf16 %v11672_v1, %v11671_v20  ;;  %v6510_v45 = vpop.f32.mrb[247].mxu1  ;;  %v7122_v18 = vpack.c.bf16 %v3810_v42, %v3806_v2 }
 0xb5d   : > { %v7306_v59 = vpack.c.bf16 %v6510_v45, %v6507_v12  ;;  %7889 = vst [vmem:[#allocation5 + $0x11b8] sm:$0xff] %v7121_v15 }
 0xb5e   : > { %8077 = vst [vmem:[#allocation5 + $0x1798] sm:$0xff] %v7309_v32  ;;  %7890 = vst [vmem:[#allocation5 + $0x11c0] sm:$0xff] %v7122_v18 }
 0xb5f   : > { %8074 = vst [vmem:[#allocation5 + $0x1780] sm:$0xff] %v7306_v59 }
 0xb60   : > { %v3814_v63 = vpop.f32.mrb[248].mxu0 }
 0xb61   : > { %v11675_v10 = vpop.f32.mrb[248].mxu1  ;;  %v3816_v49 = vpop.f32.mrb[249].mxu0 }
 0xb62   : > { %v6523_v48 = vpop.f32.mrb[249].mxu1  ;;  %v3818_v11 = vpop.f32.mrb[250].mxu0 }
 0xb63   : > { %v11676_v50 = vpop.f32.mrb[250].mxu1  ;;  %v7124_v31 = vpack.c.bf16 %v3818_v11, %v3814_v63  ;;  %v3820_v21 = vpop.f32.mrb[251].mxu0 }
 0xb64   : > { %v7315_v13 = vpack.c.bf16 %v11676_v50, %v11675_v10  ;;  %v6526_v47 = vpop.f32.mrb[251].mxu1  ;;  %v7125_v33 = vpack.c.bf16 %v3820_v21, %v3816_v49 }
 0xb65   : > { %v7312_v29 = vpack.c.bf16 %v6526_v47, %v6523_v48  ;;  %7892 = vst [vmem:[#allocation5 + $0x11d0] sm:$0xff] %v7124_v31 }
 0xb66   : > { %8083 = vst [vmem:[#allocation5 + $0x17c8] sm:$0xff] %v7315_v13  ;;  %7893 = vst [vmem:[#allocation5 + $0x11d8] sm:$0xff] %v7125_v33 }
 0xb67   : > { %8080 = vst [vmem:[#allocation5 + $0x17b0] sm:$0xff] %v7312_v29 }
 0xb68   : > { %v3824_v36 = vpop.f32.mrb[252].mxu0 }
 0xb69   : > { %v11679_v4 = vpop.f32.mrb[252].mxu1  ;;  %v3826_v34 = vpop.f32.mrb[253].mxu0 }
 0xb6a   : > { %v6539_v61 = vpop.f32.mrb[253].mxu1  ;;  %v3828_v27 = vpop.f32.mrb[254].mxu0 }
 0xb6b   : > { %v11680_v56 = vpop.f32.mrb[254].mxu1  ;;  %v7127_v30 = vpack.c.bf16 %v3828_v27, %v3824_v36  ;;  %v3830_v25 = vpop.f32.mrb[255].mxu0 }
 0xb6c   : > { %v7321_v44 = vpack.c.bf16 %v11680_v56, %v11679_v4  ;;  %v6542_v3 = vpop.f32.mrb[255].mxu1  ;;  %v7128_v24 = vpack.c.bf16 %v3830_v25, %v3826_v34 }
 0xb6d   : > { %v7318_v26 = vpack.c.bf16 %v6542_v3, %v6539_v61  ;;  %7895 = vst [vmem:[#allocation5 + $0x11e8] sm:$0xff] %v7127_v30 }
 0xb6e   : > { %8089 = vst [vmem:[#allocation5 + $0x17f8] sm:$0xff] %v7321_v44  ;;  %7896 = vst [vmem:[#allocation5 + $0x11f0] sm:$0xff] %v7128_v24 }
 0xb6f   : > { %8086 = vst [vmem:[#allocation5 + $0x17e0] sm:$0xff] %v7318_v26 }
 0xb70 LB: >> { %s10613_s17 = sshll.u32 %s12509_s16, 7  ;;  %vm12513_vm2 = vmmov 0   ;;  %s10612_s21 = sshll.u32 %s12509_s16, 3  ;;  %s12509_s16 = sphi %s13912_s16, %s8095_s16  }
 0xb71   : >> { %s8098_s18 = sshra.s32 %s10613_s17, 4  ;;  %s8521_s23 = scalar_lea.vmem [#allocation2], %s10612_s21 }
 0xb72   : >> { %s10672_s19 = smul.u32 24, %s8098_s18  ;;  %s8572_s24 = scalar_lea.vmem [#allocation6], %s10612_s21 }
 0xb73   : >> { %s8095_s16 = sadd.s32 1, %s12509_s16  }
 0xb74   : >> { %s13918_s20 = scalar_lea.vmem [#allocation5], %s10672_s19  ;;  %p8092_p5 = scmp.ge.s32.totalorder %s8095_s16, 32  }
 0xb76   : >> { %v8104_v51 = vld [vmem:[%s13918_s20 + $0x8] sm:$0xff]  ;;  %v8107_v57 = vld [vmem:[%s13918_s20 + $0x20] sm:$0xff]  ;;  %v8110_v40 = vld [vmem:[%s13918_s20 + $0x38] sm:$0xff] }
 0xb77   : >> { %11681 = vmatprep.subr.bf16.mxu0 %v8104_v51  ;;  %v8103_v60 = vld [vmem:[%s13918_s20] sm:$0xff]  ;;  %v8113_v54 = vld [vmem:[%s13918_s20 + $0x50] sm:$0xff]  ;;  %v8116_v35 = vld [vmem:[%s13918_s20 + $0x68] sm:$0xff] }
 0xb78   : >> { %11682 = vmatpush3.bf16.xpose.msra.mxu0 %v8104_v51  ;;  %11697 = vmatprep.mubr.bf16.mxu0 %v8103_v60  ;;  %v8119_v0 = vld [vmem:[%s13918_s20 + $0x80] sm:$0xff]  ;;  %v8122_v38 = vld [vmem:[%s13918_s20 + $0x98] sm:$0xff]  ;;  %v8125_v39 = vld [vmem:[%s13918_s20 + $0xb0] sm:$0xff] }
 0xb79   : >> { %11683 = vmatprep.subr.bf16.mxu0 %v8107_v57  ;;  %v8106_v41 = vld [vmem:[%s13918_s20 + $0x18] sm:$0xff]  ;;  %v8109_v62 = vld [vmem:[%s13918_s20 + $0x30] sm:$0xff]  ;;  %v8112_v14 = vld [vmem:[%s13918_s20 + $0x48] sm:$0xff] }
 0xb7a   : >> { %v8115_v43 = vld [vmem:[%s13918_s20 + $0x60] sm:$0xff]  ;;  %v8118_v20 = vld [vmem:[%s13918_s20 + $0x78] sm:$0xff]  ;;  %v8121_v2 = vld [vmem:[%s13918_s20 + $0x90] sm:$0xff] }
 0xb7b   : >> { %v8124_v12 = vld [vmem:[%s13918_s20 + $0xa8] sm:$0xff]  ;;  %v8105_v51 = vld [vmem:[%s13918_s20 + $0x10] sm:$0xff] }
 0xb7c   : >> { %11713 = vmatprep.subr.bf16.mxu1 %v8105_v51 }
 0xb7d   : >> { %11714 = vmatpush3.bf16.msra.mxu1 %v8105_v51 }
 0xb80   : >> { %11684 = vmatpush3.bf16.xpose.msra.mxu0 %v8107_v57  ;;  %v8108_v57 = vld [vmem:[%s13918_s20 + $0x28] sm:$0xff] }
 0xb81   : >> { %11685 = vmatprep.subr.bf16.mxu0 %v8110_v40  ;;  %11715 = vmatprep.subr.bf16.mxu1 %v8108_v57 }
 0xb82   : >> { %11716 = vmatpush3.bf16.msra.mxu1 %v8108_v57 }
 0xb88   : >> { %11686 = vmatpush3.bf16.xpose.msra.mxu0 %v8110_v40 }
 0xb89   : >> { %11687 = vmatprep.subr.bf16.mxu0 %v8113_v54 }
 0xb90   : >> { %11688 = vmatpush3.bf16.xpose.msra.mxu0 %v8113_v54 }
 0xb91   : >> { %11689 = vmatprep.subr.bf16.mxu0 %v8116_v35 }
 0xb98   : >> { %11690 = vmatpush3.bf16.xpose.msra.mxu0 %v8116_v35 }
 0xb99   : >> { %11691 = vmatprep.subr.bf16.mxu0 %v8119_v0 }
 0xba0   : >> { %11692 = vmatpush3.bf16.xpose.msra.mxu0 %v8119_v0 }
 0xba1   : >> { %11693 = vmatprep.subr.bf16.mxu0 %v8122_v38 }
 0xba8   : >> { %11694 = vmatpush3.bf16.xpose.msra.mxu0 %v8122_v38 }
 0xba9   : >> { %11695 = vmatprep.subr.bf16.mxu0 %v8125_v39 }
 0xbb0   : >> { %11696 = vmatpush3.bf16.xpose.msra.mxu0 %v8125_v39 }
 0xbb7   : >> { %11698 = vmatmul.mubr.bf16.vlgmr.msra.gmra.mrb[0].mxu0 %v8106_v41 }
 0xbb8   : >> { %11701 = vmatprep.mubr.bf16.mxu0 %v8109_v62 }
 0xbbf   : >> { %11702 = vmatmul.mubr.bf16.gmra.mrb[4].mxu0 %v8112_v14 }
 0xbc0   : >> { %11705 = vmatprep.mubr.bf16.mxu0 %v8115_v43 }
 0xbc7   : >> { %11706 = vmatmul.mubr.bf16.gmra.mrb[8].mxu0 %v8118_v20 }
 0xbc8   : >> { %11709 = vmatprep.mubr.bf16.mxu0 %v8121_v2 }
 0xbcf   : >> { %11710 = vmatmul.mubr.bf16.gmra.mrb[12].mxu0 %v8124_v12 }
 0xc8a   : >> { %v11699_v28 = vpop.f32.mrb[0].mxu0 }
 0xc8b   : >> { %v8226_v1 = vmul.f32 0.17677669, %v11699_v28  ;;  %v8161_v15 = vpop.f32.mrb[1].mxu0 }
 0xc8c   : >> { %v8224_v32 = vmul.f32 0.17677669, %v8161_v15  ;;  %v11700_v42 = vpop.f32.mrb[2].mxu0 }
 0xc8d   : >> { %8244 = vmax.xlane.f32.xlu1 %v8226_v1  ;;  %v8164_v45 = vpop.f32.mrb[3].mxu0  ;;  %v8227_v18 = vmul.f32 0.17677669, %v11700_v42 }
 0xc8e   : >> { %8240 = vmax.xlane.f32.xlu0 %v8224_v32  ;;  %v8225_v59 = vmul.f32 0.17677669, %v8164_v45 }
 0xc91   : >> { %8246 = vmax.xlane.f32.xlu1 %v8227_v18 }
 0xc92   : >> { %8242 = vmax.xlane.f32.xlu0 %v8225_v59  ;;  %v11703_v63 = vpop.f32.mrb[4].mxu0 }
 0xc93   : >> { %v8177_v10 = vpop.f32.mrb[5].mxu0  ;;  %v13936_v31 = vmul.f32 0.17677669, %v11703_v63 }
 0xc94   : >> { %v8228_v49 = vmul.f32 0.17677669, %v8177_v10  ;;  %v11704_v48 = vpop.f32.mrb[6].mxu0 }
 0xc95   : >> { %v8180_v11 = vpop.f32.mrb[7].mxu0  ;;  %v13938_v13 = vmul.f32 0.17677669, %v11704_v48 }
 0xc96   : >> { %v8229_v50 = vmul.f32 0.17677669, %v8180_v11  ;;  %8248 = vmax.xlane.f32.xlu0 %v8228_v49  ;;  %v15422_v11 = vunpack.c.l.bf16 %v12752_v53 }
 0xc98   : >> { %8250 = vmax.xlane.f32.xlu1 %v8229_v50 }
 0xc9a   : >> { %8252 = vmax.xlane.f32.xlu0 %v13936_v31  ;;  %v11707_v21 = vpop.f32.mrb[8].mxu0 }
 0xc9b   : >> { %v8193_v47 = vpop.f32.mrb[9].mxu0  ;;  %v13947_v34 = vmul.f32 0.17677669, %v11707_v21 }
 0xc9c   : >> { %v13941_v33 = vmul.f32 0.17677669, %v8193_v47  ;;  %8254 = vmax.xlane.f32.xlu1 %v13938_v13  ;;  %v11708_v29 = vpop.f32.mrb[10].mxu0 }
 0xc9d   : >> { %v8196_v36 = vpop.f32.mrb[11].mxu0  ;;  %v13950_v61 = vmul.f32 0.17677669, %v11708_v29 }
 0xc9e   : >> { %v13944_v4 = vmul.f32 0.17677669, %v8196_v36  ;;  %8256 = vmax.xlane.f32.xlu0 %v13941_v33 }
 0xca0   : >> { %8258 = vmax.xlane.f32.xlu1 %v13944_v4 }
 0xca2   : >> { %8260 = vmax.xlane.f32.xlu0 %v13947_v34  ;;  %v11711_v27 = vpop.f32.mrb[12].mxu0 }
 0xca3   : >> { %v8209_v56 = vpop.f32.mrb[13].mxu0  ;;  %v13959_v24 = vmul.f32 0.17677669, %v11711_v27 }
 0xca4   : >> { %v13953_v30 = vmul.f32 0.17677669, %v8209_v56  ;;  %8262 = vmax.xlane.f32.xlu1 %v13950_v61  ;;  %v11712_v44 = vpop.f32.mrb[14].mxu0 }
 0xca5   : >> { %v8212_v25 = vpop.f32.mrb[15].mxu0  ;;  %v13962_v26 = vmul.f32 0.17677669, %v11712_v44 }
 0xca6   : >> { %v13956_v3 = vmul.f32 0.17677669, %v8212_v25  ;;  %8264 = vmax.xlane.f32.xlu0 %v13953_v30  ;;  %v15424_v25 = vunpack.c.h.bf16 %v12752_v53  ;;  %v12350_v53 = vld [vmem:[%s15350_s4 + $0x18] sm:$0xff] (%p8092_p5)  }
 0xca8   : >> { %8266 = vmax.xlane.f32.xlu1 %v13956_v3 }
 0xcaa   : >> { %8268 = vmax.xlane.f32.xlu0 %v13959_v24 }
 0xcac   : >> { %8270 = vmax.xlane.f32.xlu1 %v13962_v26 }
 0xd1a   : >> { %v8245_v60 = vpop.xlane.xlu1 %8244 }
 0xd1b   : >> { %v8274_v40 = vsub.f32 %v8226_v1, %v8245_v60  ;;  %v8241_v54 = vpop.xlane.xlu0 %8240 }
 0xd1c   : >> { %v8272_v35 = vsub.f32 %v8224_v32, %v8241_v54 }
 0xd1d   : >> { %v8292_v0 = vmul.f32 1.442695, %v8274_v40 }
 0xd1e   : >> { %v8288_v38 = vmul.f32 1.442695, %v8272_v35  ;;  %v8247_v39 = vpop.xlane.xlu1 %8246 }
 0xd1f   : >> { %v8275_v41 = vsub.f32 %v8227_v18, %v8247_v39  ;;  %v8243_v62 = vpop.xlane.xlu0 %8242 }
 0xd20   : >> { %12283 = vpow2.f32 %v8288_v38  ;;  %v8273_v14 = vsub.f32 %v8225_v59, %v8243_v62  ;;  %v15425_v38 = vunpack.c.l.bf16 %v12815_v37 }
 0xd21   : >> { %12285 = vpow2.f32 %v8292_v0  ;;  %v8294_v43 = vmul.f32 1.442695, %v8275_v41  ;;  %v15426_v41 = vunpack.c.h.bf16 %v12796_v58 }
 0xd22   : >> { %v8290_v20 = vmul.f32 1.442695, %v8273_v14 }
 0xd23   : >> { %v8249_v2 = vpop.xlane.xlu0 %8248 }
 0xd24   : >> { %12287 = vpow2.f32 %v8290_v20  ;;  %v8276_v12 = vsub.f32 %v8228_v49, %v8249_v2 }
 0xd25   : >> { %v8251_v28 = vpop.xlane.xlu1 %8250  ;;  %12289 = vpow2.f32 %v8294_v43 }
 0xd26   : >> { %v8296_v15 = vmul.f32 1.442695, %v8276_v12  ;;  %v8277_v42 = vsub.f32 %v8229_v50, %v8251_v28 }
 0xd27   : >> { %v8253_v1 = vpop.xlane.xlu0 %8252 }
 0xd28   : >> { %12291 = vpow2.f32 %v8296_v15  ;;  %v8298_v32 = vmul.f32 1.442695, %v8277_v42  ;;  %v8278_v45 = vsub.f32 %v13936_v31, %v8253_v1  ;;  %v15427_v15 = vunpack.c.l.bf16 %v12828_v52 }
 0xd29   : >> { %v8255_v63 = vpop.xlane.xlu1 %8254  ;;  %v15428_v1 = vunpack.c.h.bf16 %v12815_v37 }
 0xd2a   : >> { %v12284_v18 = vpop.eup %12283  ;;  %12293 = vpow2.f32 %v8298_v32  ;;  %v8300_v10 = vmul.f32 1.442695, %v8278_v45  ;;  %v8279_v59 = vsub.f32 %v13938_v13, %v8255_v63  ;;  %v15423_v13 = vunpack.c.l.bf16 %v12796_v58 }
 0xd2b   : >> { %v8257_v48 = vpop.xlane.xlu0 %8256  ;;  %v13972_v21 = vmul.f32 %v12284_v18, %v15422_v11  ;;  %v12286_v49 = vpop.eup %12285 }
 0xd2c   : >> { %12295 = vpow2.f32 %v8300_v10  ;;  %v8302_v47 = vmul.f32 1.442695, %v8279_v59  ;;  %v8280_v50 = vsub.f32 %v13941_v33, %v8257_v48  ;;  %v13979_v44 = vmul.f32 %v12286_v49, %v15423_v13 }
 0xd2d   : >> { %v8259_v29 = vpop.xlane.xlu1 %8258  ;;  %8336 = vadd.xlane.f32.xlu0 %v13972_v21  ;;  %v15429_v48 = vunpack.c.l.bf16 %v12849_v19  ;;  %v15430_v49 = vunpack.c.h.bf16 %v12828_v52  ;;  %v12351_v52 = vld [vmem:[%s15350_s4 + $0x20] sm:$0xff] (%p8092_p5)  }
 0xd2e   : >> { %v12288_v31 = vpop.eup %12287  ;;  %12297 = vpow2.f32 %v8302_v47  ;;  %v8304_v36 = vmul.f32 1.442695, %v8280_v50  ;;  %v8281_v27 = vsub.f32 %v13944_v4, %v8259_v29 }
 0xd2f   : >> { %v8261_v56 = vpop.xlane.xlu0 %8260  ;;  %v13983_v51 = vmul.f32 %v12288_v31, %v15424_v25  ;;  %v12290_v57 = vpop.eup %12289  ;;  %v15431_v31 = vunpack.c.l.bf16 %v12862_v7  ;;  %v8114_v25 = vld [vmem:[%s13918_s20 + $0x58] sm:$0xff] }
 0xd30   : >> { %12299 = vpow2.f32 %v8304_v36  ;;  %v8306_v33 = vmul.f32 1.442695, %v8281_v27  ;;  %v8282_v60 = vsub.f32 %v13947_v34, %v8261_v56  ;;  %v13995_v62 = vmul.f32 %v12290_v57, %v15426_v41 }
 0xd31   : >> { %v8263_v40 = vpop.xlane.xlu1 %8262  ;;  %8340 = vadd.xlane.f32.xlu0 %v13979_v44  ;;  %8338 = vadd.xlane.f32.xlu1 %v13983_v51  ;;  %v15432_v27 = vunpack.c.h.bf16 %v12849_v19  ;;  %v12352_v19 = vld [vmem:[%s15350_s4 + $0x28] sm:$0xff] (%p8092_p5)  }
 0xd32   : >> { %v12292_v4 = vpop.eup %12291  ;;  %12301 = vpow2.f32 %v8306_v33  ;;  %v8308_v54 = vmul.f32 1.442695, %v8282_v60  ;;  %v8283_v35 = vsub.f32 %v13950_v61, %v8263_v40  ;;  %v15433_v33 = vunpack.c.l.bf16 %v12883_v46 }
 0xd33   : >> { %v8265_v0 = vpop.xlane.xlu0 %8264  ;;  %v13991_v39 = vmul.f32 %v12292_v4, %v15425_v38  ;;  %v15434_v40 = vunpack.c.h.bf16 %v12862_v7  ;;  %v15435_v38 = vunpack.c.l.bf16 %v12896_v55  ;;  %v12353_v7 = vld [vmem:[%s15350_s4 + $0x30] sm:$0xff] (%p8092_p5)  }
 0xd34   : >> { %v12294_v34 = vpop.eup %12293  ;;  %12303 = vpow2.f32 %v8308_v54  ;;  %v8310_v14 = vmul.f32 1.442695, %v8283_v35  ;;  %v8284_v43 = vsub.f32 %v13953_v30, %v8265_v0  ;;  %v8117_v35 = vld [vmem:[%s13918_s20 + $0x70] sm:$0xff] }
 0xd35   : >> { %8344 = vadd.xlane.f32.xlu0 %v13991_v39  ;;  %8342 = vadd.xlane.f32.xlu1 %v13995_v62  ;;  %v8267_v20 = vpop.xlane.xlu1 %8266  ;;  %v14007_v32 = vmul.f32 %v12294_v34, %v15428_v1  ;;  %v15436_v34 = vunpack.c.h.bf16 %v12883_v46 }
 0xd36   : >> { %v12296_v61 = vpop.eup %12295  ;;  %12305 = vpow2.f32 %v8310_v14  ;;  %v8312_v2 = vmul.f32 1.442695, %v8284_v43  ;;  %v8285_v12 = vsub.f32 %v13956_v3, %v8267_v20  ;;  %v8120_v20 = vld [vmem:[%s13918_s20 + $0x88] sm:$0xff] }
 0xd37   : >> { %v8269_v28 = vpop.xlane.xlu0 %8268  ;;  %v14003_v42 = vmul.f32 %v12296_v61, %v15427_v15  ;;  %v15437_v61 = vunpack.c.h.bf16 %v12896_v55  ;;  %v12354_v55 = vld [vmem:[%s15350_s4 + $0x38] sm:$0xff] (%p8092_p5)  }
 0xd38   : >> { %v12298_v30 = vpop.eup %12297  ;;  %12307 = vpow2.f32 %v8312_v2  ;;  %v8314_v45 = vmul.f32 1.442695, %v8285_v12  ;;  %v8286_v63 = vsub.f32 %v13959_v24, %v8269_v28  ;;  %v8111_v24 = vld [vmem:[%s13918_s20 + $0x40] sm:$0xff]  ;;  %v8126_v28 = vld [vmem:[%s13918_s20 + $0xb8] sm:$0xff] }
 0xd39   : >> { %8348 = vadd.xlane.f32.xlu0 %v14003_v42  ;;  %8346 = vadd.xlane.f32.xlu1 %v14007_v32  ;;  %v8271_v3 = vpop.xlane.xlu1 %8270  ;;  %v14019_v47 = vmul.f32 %v12298_v30, %v15430_v49  ;;  %v8123_v12 = vld [vmem:[%s13918_s20 + $0xa0] sm:$0xff] }
 0xd3a   : >> { %v12300_v18 = vpop.eup %12299  ;;  %12309 = vpow2.f32 %v8314_v45  ;;  %v8316_v10 = vmul.f32 1.442695, %v8286_v63  ;;  %v8287_v59 = vsub.f32 %v13962_v26, %v8271_v3  ;;  %11717 = vmatprep.subr.bf16.mxu1 %v8111_v24 }
 0xd3b   : >> { %v14015_v11 = vmul.f32 %v12300_v18, %v15429_v48  ;;  %11718 = vmatpush3.bf16.msra.mxu1 %v8111_v24 }
 0xd3c   : >> { %v12302_v50 = vpop.eup %12301  ;;  %12311 = vpow2.f32 %v8316_v10  ;;  %v8318_v29 = vmul.f32 1.442695, %v8287_v59  ;;  %11719 = vmatprep.subr.bf16.mxu1 %v8114_v25 }
 0xd3d   : >> { %8352 = vadd.xlane.f32.xlu0 %v14015_v11  ;;  %8350 = vadd.xlane.f32.xlu1 %v14019_v47  ;;  %v14030_v56 = vmul.f32 %v12302_v50, %v15432_v27 }
 0xd3e   : >> { %v12304_v26 = vpop.eup %12303  ;;  %12313 = vpow2.f32 %v8318_v29 }
 0xd3f   : >> { %v14026_v36 = vmul.f32 %v12304_v26, %v15431_v31  ;;  %11720 = vmatpush3.bf16.msra.mxu1 %v8114_v25 }
 0xd40   : >> { %v12306_v13 = vpop.eup %12305  ;;  %11721 = vmatprep.subr.bf16.mxu1 %v8117_v35 }
 0xd41   : >> { %8356 = vadd.xlane.f32.xlu0 %v14026_v36  ;;  %8354 = vadd.xlane.f32.xlu1 %v14030_v56  ;;  %v14041_v4 = vmul.f32 %v12306_v13, %v15434_v40 }
 0xd42   : >> { %v12308_v57 = vpop.eup %12307 }
 0xd43   : >> { %v14037_v60 = vmul.f32 %v12308_v57, %v15433_v33  ;;  %11722 = vmatpush3.bf16.msra.mxu1 %v8117_v35 }
 0xd44   : >> { %v12310_v54 = vpop.eup %12309  ;;  %11723 = vmatprep.subr.bf16.mxu1 %v8120_v20 }
 0xd45   : >> { %8360 = vadd.xlane.f32.xlu0 %v14037_v60  ;;  %8358 = vadd.xlane.f32.xlu1 %v14041_v4  ;;  %v14052_v14 = vmul.f32 %v12310_v54, %v15436_v34 }
 0xd46   : >> { %v12312_v0 = vpop.eup %12311 }
 0xd47   : >> { %v14048_v41 = vmul.f32 %v12312_v0, %v15435_v38  ;;  %11724 = vmatpush3.bf16.msra.mxu1 %v8120_v20 }
 0xd48   : >> { %v12314_v43 = vpop.eup %12313  ;;  %11725 = vmatprep.subr.bf16.mxu1 %v8123_v12 }
 0xd49   : >> { %8364 = vadd.xlane.f32.xlu0 %v14048_v41  ;;  %8362 = vadd.xlane.f32.xlu1 %v14052_v14  ;;  %v14059_v2 = vmul.f32 %v12314_v43, %v15437_v61 }
 0xd4b   : >> { %11726 = vmatpush3.bf16.msra.mxu1 %v8123_v12 }
 0xd4c   : >> { %11727 = vmatprep.subr.bf16.mxu1 %v8126_v28 }
 0xd4d   : >> { %8366 = vadd.xlane.f32.xlu1 %v14059_v2 }
 0xd4f   : >> { %11728 = vmatpush3.bf16.msra.mxu1 %v8126_v28 }
 0xdba   : >> { %v8337_v15 = vpop.xlane.xlu0 %8336 }
 0xdbb   : >> { %v8368_v1 = vadd.f32 1e-30, %v8337_v15 }
 0xdbd   : >> { %12315 = vrcp.f32 %v8368_v1 }
 0xdbe   : >> { %v8341_v30 = vpop.xlane.xlu0 %8340  ;;  %v8339_v45 = vpop.xlane.xlu1 %8338 }
 0xdbf   : >> { %v8369_v63 = vadd.f32 1e-30, %v8339_v45  ;;  %v8370_v3 = vadd.f32 1e-30, %v8341_v30 }
 0xdc1   : >> { %12317 = vrcp.f32 %v8369_v63 }
 0xdc2   : >> { %v8345_v18 = vpop.xlane.xlu0 %8344  ;;  %v8343_v10 = vpop.xlane.xlu1 %8342  ;;  %12319 = vrcp.f32 %v8370_v3 }
 0xdc3   : >> { %v8371_v59 = vadd.f32 1e-30, %v8343_v10  ;;  %v8372_v48 = vadd.f32 1e-30, %v8345_v18 }
 0xdc5   : >> { %12321 = vrcp.f32 %v8371_v59 }
 0xdc6   : >> { %v8349_v49 = vpop.xlane.xlu0 %8348  ;;  %v8347_v24 = vpop.xlane.xlu1 %8346  ;;  %12323 = vrcp.f32 %v8372_v48 }
 0xdc7   : >> { %v8373_v50 = vadd.f32 1e-30, %v8347_v24  ;;  %v8374_v29 = vadd.f32 1e-30, %v8349_v49  ;;  %v12316_v26 = vpop.eup %12315 }
 0xdc8   : >> { %v8400_v33 = vmul.f32 %v12316_v26, %v13972_v21 }
 0xdc9   : >> { %12325 = vrcp.f32 %v8373_v50 }
 0xdca   : >> { %v8353_v31 = vpop.xlane.xlu0 %8352  ;;  %v8351_v27 = vpop.xlane.xlu1 %8350  ;;  %12327 = vrcp.f32 %v8374_v29 }
 0xdcb   : >> { %v8375_v13 = vadd.f32 1e-30, %v8351_v27  ;;  %v12318_v25 = vpop.eup %12317  ;;  %v8376_v57 = vadd.f32 1e-30, %v8353_v31 }
 0xdcc   : >> { %v8401_v40 = vmul.f32 %v12318_v25, %v13983_v51  ;;  %v12320_v54 = vpop.eup %12319 }
 0xdcd   : >> { %12329 = vrcp.f32 %v8375_v13  ;;  %v8402_v61 = vmul.f32 %v12320_v54, %v13979_v44 }
 0xdce   : >> { %v8357_v35 = vpop.xlane.xlu0 %8356  ;;  %v8355_v0 = vpop.xlane.xlu1 %8354  ;;  %v8416_v34 = vpack.c.bf16 %v8401_v40, %v8400_v33  ;;  %12331 = vrcp.f32 %v8376_v57 }
 0xdcf   : >> { %v8377_v38 = vadd.f32 1e-30, %v8355_v0  ;;  %v12322_v43 = vpop.eup %12321  ;;  %v8378_v20 = vadd.f32 1e-30, %v8357_v35 }
 0xdd0   : >> { %11729 = vmatprep.mubr.bf16.mxu1 %v8416_v34  ;;  %v8403_v12 = vmul.f32 %v12322_v43, %v13995_v62  ;;  %v12324_v28 = vpop.eup %12323 }
 0xdd1   : >> { %12333 = vrcp.f32 %v8377_v38  ;;  %v8404_v63 = vmul.f32 %v12324_v28, %v13991_v39 }
 0xdd2   : >> { %v8361_v15 = vpop.xlane.xlu0 %8360  ;;  %v8359_v21 = vpop.xlane.xlu1 %8358  ;;  %v8417_v51 = vpack.c.bf16 %v8403_v12, %v8402_v61  ;;  %12335 = vrcp.f32 %v8378_v20 }
 0xdd3   : >> { %v8379_v1 = vadd.f32 1e-30, %v8359_v21  ;;  %v12326_v30 = vpop.eup %12325  ;;  %v8380_v45 = vadd.f32 1e-30, %v8361_v15 }
 0xdd4   : >> { %11730 = vmatmul.mubr.bf16.vlgmr.msra.gmra.mrb[0].mxu1 %v8417_v51  ;;  %v8405_v3 = vmul.f32 %v12326_v30, %v14007_v32  ;;  %v12328_v18 = vpop.eup %12327 }
 0xdd5   : >> { %12337 = vrcp.f32 %v8379_v1  ;;  %v8406_v24 = vmul.f32 %v12328_v18, %v14003_v42 }
 0xdd6   : >> { %v8365_v10 = vpop.xlane.xlu0 %8364  ;;  %v8363_v44 = vpop.xlane.xlu1 %8362  ;;  %v8418_v48 = vpack.c.bf16 %v8405_v3, %v8404_v63  ;;  %12339 = vrcp.f32 %v8380_v45 }
 0xdd7   : >> { %v8382_v59 = vadd.f32 1e-30, %v8365_v10  ;;  %v8381_v62 = vadd.f32 1e-30, %v8363_v44  ;;  %v12330_v49 = vpop.eup %12329 }
 0xdd8   : >> { %11733 = vmatprep.mubr.bf16.mxu1 %v8418_v48  ;;  %v8407_v50 = vmul.f32 %v12330_v49, %v14019_v47  ;;  %v12332_v29 = vpop.eup %12331 }
 0xdd9   : >> { %12341 = vrcp.f32 %v8381_v62  ;;  %v8408_v27 = vmul.f32 %v12332_v29, %v14015_v11  ;;  %v8522_v29 = vld [vmem:[%s8521_s23] sm:$0xff] }
 0xdda   : >> { %v8367_v26 = vpop.xlane.xlu1 %8366  ;;  %12343 = vrcp.f32 %v8382_v59  ;;  %v8419_v32 = vpack.c.bf16 %v8407_v50, %v8406_v24 }
 0xddb   : >> { %v8383_v39 = vadd.f32 1e-30, %v8367_v26  ;;  %v12334_v31 = vpop.eup %12333  ;;  %v8523_v26 = vpack.c.bf16 %v8522_v29, %v8522_v29 }
 0xddc   : >> { %11734 = vmatmul.mubr.bf16.gmra.mrb[4].mxu1 %v8419_v32  ;;  %v8409_v13 = vmul.f32 %v12334_v31, %v14030_v56  ;;  %v12336_v25 = vpop.eup %12335 }
 0xddd   : >> { %12345 = vrcp.f32 %v8383_v39  ;;  %v8410_v42 = vmul.f32 %v12336_v25, %v14026_v36  ;;  %v12512_v36 = vmov 0.0   ;;  %v12348_v25 = vld [vmem:[%s15350_s4 + $0x8] sm:$0xff] (%p8092_p5)  }
 0xdde   : >> { %v8420_v57 = vpack.c.bf16 %v8409_v13, %v8408_v27  ;;  %11745 = vmatprep.subr.bf16.mxu1 %v12512_v36  ;;  %v12347_v13 = vld [vmem:[%s15350_s4] sm:$0xff] (%p8092_p5)  }
 0xddf   : >> { %v12338_v33 = vpop.eup %12337  ;;  %11765 = vmatprep.subr.bf16.mxu0 (%p8092_p5), %v12347_v13 }
 0xde0   : >> { %11737 = vmatprep.mubr.bf16.mxu1 %v8420_v57  ;;  %v8411_v47 = vmul.f32 %v12338_v33, %v14041_v4  ;;  %v12340_v40 = vpop.eup %12339  ;;  %11766 = vmatpush3.bf16.msra.mxu0 (%p8092_p5), %v12347_v13  ;;  %v12349_v57 = vld [vmem:[%s15350_s4 + $0x10] sm:$0xff] (%p8092_p5)   ;;  %v14111_v13 = vld [vmem:[%s15352_s6] ss:$0 sm:$0xff] (%p8092_p5) }
 0xde1   : >> { %v8412_v38 = vmul.f32 %v12340_v40, %v14037_v60  ;;  %11767 = vmatprep.subr.bf16.mxu0 (%p8092_p5), %v12348_v25 }
 0xde2   : >> { %v8421_v54 = vpack.c.bf16 %v8411_v47, %v8410_v42 }
 0xde3   : >> { %v12342_v35 = vpop.eup %12341 }
 0xde4   : >> { %v12344_v0 = vpop.eup %12343  ;;  %11738 = vmatmul.mubr.bf16.gmra.mrb[8].mxu1 %v8421_v54  ;;  %v8413_v34 = vmul.f32 %v12342_v35, %v14052_v14  ;;  %11768 = vmatpush3.bf16.msra.mxu0 (%p8092_p5), %v12348_v25 }
 0xde5   : >> { %v8414_v56 = vmul.f32 %v12344_v0, %v14048_v41  ;;  %11769 = vmatprep.subr.bf16.mxu0 (%p8092_p5), %v12349_v57 }
 0xde6   : >> { %v8422_v43 = vpack.c.bf16 %v8413_v34, %v8412_v38 }
 0xde7   : >> { %v12346_v11 = vpop.eup %12345 }
 0xde8   : >> { %v8415_v20 = vmul.f32 %v12346_v11, %v14059_v2  ;;  %11741 = vmatprep.mubr.bf16.mxu1 %v8422_v43  ;;  %11770 = vmatpush3.bf16.msra.mxu0 (%p8092_p5), %v12349_v57 }
 0xde9   : > { %11771 = vmatprep.subr.bf16.mxu0 (%p8092_p5), %v12350_v53 }
 0xdea   : >> { %v8423_v61 = vpack.c.bf16 %v8415_v20, %v8414_v56 }
 0xdec   : >> { %11742 = vmatmul.mubr.bf16.gmra.mrb[12].mxu1 %v8423_v61  ;;  %11772 = vmatpush3.bf16.msra.mxu0 (%p8092_p5), %v12350_v53 }
 0xded   : >> { %11761 = vmatprep.mubr.msk.bf16.mxu1 %vm12513_vm2, %v12512_v36  ;;  %11773 = vmatprep.subr.bf16.mxu0 (%p8092_p5), %v12351_v52 }
 0xdf0   : > { %11774 = vmatpush3.bf16.msra.mxu0 (%p8092_p5), %v12351_v52 }
 0xdf1   : > { %11775 = vmatprep.subr.bf16.mxu0 (%p8092_p5), %v12352_v19 }
 0xdf4   : > { %11776 = vmatpush3.bf16.msra.mxu0 (%p8092_p5), %v12352_v19 }
 0xdf5   : > { %11777 = vmatprep.subr.bf16.mxu0 (%p8092_p5), %v12353_v7 }
 0xdf8   : > { %11778 = vmatpush3.bf16.msra.mxu0 (%p8092_p5), %v12353_v7 }
 0xdf9   : > { %11779 = vmatprep.subr.bf16.mxu0 (%p8092_p5), %v12354_v55 }
 0xdfc   : > { %11780 = vmatpush3.bf16.msra.mxu0 (%p8092_p5), %v12354_v55 }
 0xea7   : >> { %v11731_v4 = vpop.f32.mrb[0].mxu1 }
 0xea8   : >> { %v8458_v12 = vpop.f32.mrb[1].mxu1 }
 0xea9   : >> { %v11732_v28 = vpop.f32.mrb[2].mxu1 }
 0xeaa   : >> { %v8525_v15 = vpack.c.bf16 %v11732_v28, %v11731_v4  ;;  %v8461_v60 = vpop.f32.mrb[3].mxu1 }
 0xeab   : >> { %v8524_v21 = vpack.c.bf16 %v8461_v60, %v8458_v12 }
 0xead   : >> { %11746 = vmatpush3.bf16.msra.mxu1 %v8524_v21 }
 0xeae   : >> { %11747 = vmatprep.subr.bf16.mxu1 %v12512_v36 }
 0xeaf   : >> { %v11735_v14 = vpop.f32.mrb[4].mxu1 }
 0xeb0   : >> { %v8474_v1 = vpop.f32.mrb[5].mxu1 }
 0xeb1   : >> { %v11736_v41 = vpop.f32.mrb[6].mxu1  ;;  %11748 = vmatpush3.bf16.msra.mxu1 %v8525_v15 }
 0xeb2   : >> { %v8527_v2 = vpack.c.bf16 %v11736_v41, %v11735_v14  ;;  %v8477_v51 = vpop.f32.mrb[7].mxu1  ;;  %11749 = vmatprep.subr.bf16.mxu1 %v12512_v36 }
 0xeb3   : >> { %v8526_v30 = vpack.c.bf16 %v8477_v51, %v8474_v1 }
 0xeb5   : >> { %11750 = vmatpush3.bf16.msra.mxu1 %v8526_v30 }
 0xeb6   : >> { %11751 = vmatprep.subr.bf16.mxu1 %v12512_v36 }
 0xeb7   : >> { %v11739_v45 = vpop.f32.mrb[8].mxu1 }
 0xeb8   : >> { %v8490_v63 = vpop.f32.mrb[9].mxu1 }
 0xeb9   : >> { %v11740_v3 = vpop.f32.mrb[10].mxu1  ;;  %11752 = vmatpush3.bf16.msra.mxu1 %v8527_v2 }
 0xeba   : >> { %v8529_v18 = vpack.c.bf16 %v11740_v3, %v11739_v45  ;;  %v8493_v10 = vpop.f32.mrb[11].mxu1  ;;  %11753 = vmatprep.subr.bf16.mxu1 %v12512_v36 }
 0xebb   : >> { %v8528_v44 = vpack.c.bf16 %v8493_v10, %v8490_v63 }
 0xebd   : >> { %11754 = vmatpush3.bf16.msra.mxu1 %v8528_v44 }
 0xebe   : >> { %11755 = vmatprep.subr.bf16.mxu1 %v12512_v36 }
 0xebf   : >> { %v11743_v59 = vpop.f32.mrb[12].mxu1 }
 0xec0   : >> { %v8506_v62 = vpop.f32.mrb[13].mxu1 }
 0xec1   : >> { %v11744_v48 = vpop.f32.mrb[14].mxu1  ;;  %11756 = vmatpush3.bf16.msra.mxu1 %v8529_v18 }
 0xec2   : >> { %v8531_v49 = vpack.c.bf16 %v11744_v48, %v11743_v59  ;;  %v8509_v24 = vpop.f32.mrb[15].mxu1  ;;  %11757 = vmatprep.subr.bf16.mxu1 %v12512_v36 }
 0xec3   : >> { %v8530_v50 = vpack.c.bf16 %v8509_v24, %v8506_v62 }
 0xec5   : >> { %11758 = vmatpush3.bf16.msra.mxu1 %v8530_v50 }
 0xec6   : >> { %11759 = vmatprep.subr.bf16.mxu1 %v12512_v36 }
 0xec9   : >> { %11760 = vmatpush3.bf16.msra.mxu1 %v8531_v49 }
 0xecc   : >> { %11762 = vmatmul.mubr.bf16.vlgmr.msra.gmra.mrb[16].mxu1 %v8523_v26 }
 0xf9c   : > { %8094 = sbr.rel (!%p8092_p5) target bundleno = 2928 (0xb70), region = 114 }
 0xf9f   : >> { %v8566_v39 = vpop.f32.mrb[16].mxu1 }
 0xfa0   : >> { %8573 = vst [vmem:[%s8572_s24] sm:$0xff] %v8566_v39  ;;  %v11763_v32 = vpop.f32.mrb[17].mxu1 }
 0xfa1   : >> { %v8569_v31 = vpop.f32.mrb[18].mxu1 }
 0xfa2   : >> { %v11764_v27 = vpop.f32.mrb[19].mxu1 }
 0xfa7   : > { %v8574_v58 = vld [vmem:[#allocation6] sm:$0xff]  ;;  %v8575_v37 = vld [vmem:[#allocation6 + $0x8] sm:$0xff]  ;;  %v8576_v33 = vld [vmem:[#allocation6 + $0x10] sm:$0xff] }
 0xfa8   : > { %v8606_v46 = vpack.c.bf16 %v8575_v37, %v8574_v58  ;;  %v8577_v42 = vld [vmem:[#allocation6 + $0x18] sm:$0xff]  ;;  %v8578_v47 = vld [vmem:[#allocation6 + $0x20] sm:$0xff]  ;;  %v8579_v40 = vld [vmem:[#allocation6 + $0x28] sm:$0xff] }
 0xfa9   : > { %v8607_v54 = vpack.c.bf16 %v8577_v42, %v8576_v33  ;;  %v8608_v35 = vpack.c.bf16 %v8579_v40, %v8578_v47  ;;  %v8580_v0 = vld [vmem:[#allocation6 + $0x30] sm:$0xff]  ;;  %v8581_v38 = vld [vmem:[#allocation6 + $0x38] sm:$0xff]  ;;  %v8582_v34 = vld [vmem:[#allocation6 + $0x40] sm:$0xff] }
 0xfaa   : > { %11781 = vmatprep.mubr.bf16.mxu0 %v8606_v46  ;;  %v8583_v11 = vld [vmem:[#allocation6 + $0x48] sm:$0xff]  ;;  %v8609_v43 = vpack.c.bf16 %v8581_v38, %v8580_v0  ;;  %v8584_v20 = vld [vmem:[#allocation6 + $0x50] sm:$0xff]  ;;  %v8585_v61 = vld [vmem:[#allocation6 + $0x58] sm:$0xff] }
 0xfab   : > { %11782 = vmatmul.mubr.bf16.vlgmr.msra.gmra.mrb[0].mxu0 %v8607_v54  ;;  %v8610_v56 = vpack.c.bf16 %v8583_v11, %v8582_v34  ;;  %v8586_v36 = vld [vmem:[#allocation6 + $0x60] sm:$0xff]  ;;  %v8587_v4 = vld [vmem:[#allocation6 + $0x68] sm:$0xff]  ;;  %v8611_v12 = vpack.c.bf16 %v8585_v61, %v8584_v20  ;;  %v8588_v15 = vld [vmem:[#allocation6 + $0x70] sm:$0xff] }
 0xfac   : > { %11785 = vmatprep.mubr.bf16.mxu0 %v8608_v35  ;;  %v8612_v28 = vpack.c.bf16 %v8587_v4, %v8586_v36  ;;  %v8589_v60 = vld [vmem:[#allocation6 + $0x78] sm:$0xff]  ;;  %v8590_v21 = vld [vmem:[#allocation6 + $0x80] sm:$0xff]  ;;  %v8591_v14 = vld [vmem:[#allocation6 + $0x88] sm:$0xff] }
 0xfad   : > { %v8613_v1 = vpack.c.bf16 %v8589_v60, %v8588_v15  ;;  %v8614_v41 = vpack.c.bf16 %v8591_v14, %v8590_v21  ;;  %v8592_v2 = vld [vmem:[#allocation6 + $0x90] sm:$0xff]  ;;  %v8593_v51 = vld [vmem:[#allocation6 + $0x98] sm:$0xff]  ;;  %v8594_v30 = vld [vmem:[#allocation6 + $0xa0] sm:$0xff] }
 0xfae   : > { %v8595_v45 = vld [vmem:[#allocation6 + $0xa8] sm:$0xff]  ;;  %v8615_v63 = vpack.c.bf16 %v8593_v51, %v8592_v2  ;;  %v8596_v18 = vld [vmem:[#allocation6 + $0xb0] sm:$0xff]  ;;  %v8597_v10 = vld [vmem:[#allocation6 + $0xb8] sm:$0xff] }
 0xfaf   : > { %v8616_v3 = vpack.c.bf16 %v8595_v45, %v8594_v30  ;;  %v8598_v44 = vld [vmem:[#allocation6 + $0xc0] sm:$0xff]  ;;  %v8599_v59 = vld [vmem:[#allocation6 + $0xc8] sm:$0xff]  ;;  %v8617_v62 = vpack.c.bf16 %v8597_v10, %v8596_v18  ;;  %v8600_v49 = vld [vmem:[#allocation6 + $0xd0] sm:$0xff] }
 0xfb0   : > { %v8618_v48 = vpack.c.bf16 %v8599_v59, %v8598_v44  ;;  %v8601_v24 = vld [vmem:[#allocation6 + $0xd8] sm:$0xff]  ;;  %v8602_v50 = vld [vmem:[#allocation6 + $0xe0] sm:$0xff]  ;;  %v8603_v29 = vld [vmem:[#allocation6 + $0xe8] sm:$0xff] }
 0xfb1   : > { %v8619_v26 = vpack.c.bf16 %v8601_v24, %v8600_v49  ;;  %v8620_v39 = vpack.c.bf16 %v8603_v29, %v8602_v50  ;;  %v8604_v32 = vld [vmem:[#allocation6 + $0xf0] sm:$0xff]  ;;  %v8605_v31 = vld [vmem:[#allocation6 + $0xf8] sm:$0xff]  ;;  %v15438_v21 = vld [vmem:[#allocation15_spill] sm:$0xff] }
 0xfb2   : > { %v8621_v27 = vpack.c.bf16 %v8605_v31, %v8604_v32  ;;  %v15439_v2 = vld [vmem:[#allocation17_spill] sm:$0xff]  ;;  %v15440_v30 = vld [vmem:[#allocation16_spill] sm:$0xff]  ;;  %v15442_v29 = vld [vmem:[#allocation19_spill] sm:$0xff] }
 0xfb3   : > { %11786 = vmatmul.mubr.bf16.gmra.mrb[4].mxu0 %v8609_v43 }
 0xfb4   : > { %11789 = vmatprep.mubr.bf16.mxu0 %v8610_v56 }
 0xfbb   : > { %11790 = vmatmul.mubr.bf16.gmra.mrb[8].mxu0 %v8611_v12 }
 0xfbc   : > { %11793 = vmatprep.mubr.bf16.mxu0 %v8612_v28 }
 0xfc3   : > { %11794 = vmatmul.mubr.bf16.gmra.mrb[12].mxu0 %v8613_v1 }
 0xfc4   : > { %11797 = vmatprep.mubr.bf16.mxu0 %v8614_v41 }
 0xfcb   : > { %11798 = vmatmul.mubr.bf16.gmra.mrb[16].mxu0 %v8615_v63 }
 0xfcc   : > { %11801 = vmatprep.mubr.bf16.mxu0 %v8616_v3  ;;  %v15441_v3 = vld [vmem:[#allocation18_spill] sm:$0xff] }
 0xfd3   : > { %11802 = vmatmul.mubr.bf16.gmra.mrb[20].mxu0 %v8617_v62 }
 0xfd4   : > { %11805 = vmatprep.mubr.bf16.mxu0 %v8618_v48 }
 0xfdb   : > { %11806 = vmatmul.mubr.bf16.gmra.mrb[24].mxu0 %v8619_v26 }
 0xfdc   : > { %11809 = vmatprep.mubr.bf16.mxu0 %v8620_v39 }
 0xfe3   : > { %11810 = vmatmul.mubr.bf16.gmra.mrb[28].mxu0 %v8621_v27  ;;  %v15443_v27 = vld [vmem:[#allocation21_spill] sm:$0xff] }
0x107e   : > { %v11783_v25 = vpop.f32.mrb[0].mxu0 }
0x107f   : > { %v8734_v57 = vadd.f32 %v11783_v25, %v14111_v13  ;;  %v8725_v53 = vpop.f32.mrb[1].mxu0 }
0x1080   : > { %v8726_v58 = vadd.f32 %v14111_v13, %v8725_v53  ;;  %v11784_v37 = vpop.f32.mrb[2].mxu0 }
0x1081   : > { %v14116_v46 = vadd.f32 %v8734_v57, %v12602_v8  ;;  %v8737_v52 = vadd.f32 %v11784_v37, %v14111_v13  ;;  %v8728_v19 = vpop.f32.mrb[3].mxu0  ;;  %v15444_v57 = vld [vmem:[#allocation20_spill] sm:$0xff]  ;;  %v15445_v37 = vld [vmem:[#allocation22_spill] sm:$0xff] }
0x1082   : > { %v14120_v7 = vadd.f32 %v8726_v58, %v12592_v5  ;;  %v8729_v55 = vadd.f32 %v14111_v13, %v8728_v19 }
0x1083   : > { %v14124_v33 = vadd.f32 %v8737_v52, %v12605_v9  ;;  %v8890_v42 = vsel %vm426_vm0, %v14116_v46, 0.0 }
0x1084   : > { %v14129_v47 = vadd.f32 %v8729_v55, %v12595_v6  ;;  %8891 = vadd.xlane.f32.xlu1 %v8890_v42  ;;  %v8884_v8 = vsel %vm426_vm0, %v14120_v7, 0.0 }
0x1085   : > { %8885 = vadd.xlane.f32.xlu0 %v8884_v8  ;;  %v8893_v5 = vsel %vm426_vm0, %v14124_v33, 0.0 }
0x1086   : > { %v11787_v40 = vpop.f32.mrb[4].mxu0  ;;  %v8887_v6 = vsel %vm426_vm0, %v14129_v47, 0.0 }
0x1087   : > { %v8741_v54 = vpop.f32.mrb[5].mxu0  ;;  %v8750_v35 = vadd.f32 %v11787_v40, %v14111_v13 }
0x1088   : > { %v8742_v9 = vadd.f32 %v14111_v13, %v8741_v54  ;;  %8894 = vadd.xlane.f32.xlu1 %v8893_v5  ;;  %v11788_v0 = vpop.f32.mrb[6].mxu0 }
0x1089   : > { %v8744_v38 = vpop.f32.mrb[7].mxu0  ;;  %8888 = vadd.xlane.f32.xlu0 %v8887_v6  ;;  %v8753_v11 = vadd.f32 %v11788_v0, %v14111_v13  ;;  %v14145_v56 = vadd.f32 %v8750_v35, %v12648_v22 }
0x108a   : > { %v14140_v34 = vadd.f32 %v8742_v9, %v12628_v16  ;;  %v8745_v43 = vadd.f32 %v14111_v13, %v8744_v38  ;;  %v15446_v9 = vld [vmem:[#allocation23_spill] sm:$0xff] }
0x108b   : > { %v14153_v36 = vadd.f32 %v8753_v11, %v12651_v23 }
0x108c   : > { %v14148_v20 = vadd.f32 %v8745_v43, %v12631_v17  ;;  %v8896_v61 = vsel %vm426_vm0, %v14140_v34, 0.0  ;;  %v8902_v17 = vsel %vm426_vm0, %v14145_v56, 0.0  ;;  %v15447_v43 = vld [vmem:[#allocation25_spill] sm:$0xff] }
0x108d   : > { %8897 = vadd.xlane.f32.xlu0 %v8896_v61  ;;  %v8905_v41 = vsel %vm426_vm0, %v14153_v36, 0.0 }
0x108e   : > { %v11791_v4 = vpop.f32.mrb[8].mxu0  ;;  %v8899_v16 = vsel %vm426_vm0, %v14148_v20, 0.0 }
0x108f   : > { %v8757_v12 = vpop.f32.mrb[9].mxu0  ;;  %8900 = vadd.xlane.f32.xlu1 %v8899_v16  ;;  %v8766_v28 = vadd.f32 %v11791_v4, %v14111_v13  ;;  %v15448_v4 = vld [vmem:[#allocation24_spill] sm:$0xff] }
0x1090   : > { %v8758_v22 = vadd.f32 %v14111_v13, %v8757_v12  ;;  %v11792_v15 = vpop.f32.mrb[10].mxu0 }
0x1091   : > { %v8760_v60 = vpop.f32.mrb[11].mxu0  ;;  %8903 = vadd.xlane.f32.xlu0 %v8902_v17  ;;  %v8769_v23 = vadd.f32 %v11792_v15, %v14111_v13  ;;  %v14169_v51 = vadd.f32 %v8766_v28, %v15439_v2  ;;  %v15449_v28 = vld [vmem:[#allocation26_spill] sm:$0xff] }
0x1092   : > { %v14162_v14 = vadd.f32 %v8758_v22, %v15438_v21  ;;  %v8761_v1 = vadd.f32 %v14111_v13, %v8760_v60 }
0x1093   : > { %8906 = vadd.xlane.f32.xlu1 %v8905_v41  ;;  %v14177_v18 = vadd.f32 %v8769_v23, %v15441_v3  ;;  %v8914_v24 = vsel %vm426_vm0, %v14169_v51, 0.0 }
0x1094   : > { %v14172_v45 = vadd.f32 %v8761_v1, %v15440_v30  ;;  %v8908_v63 = vsel %vm426_vm0, %v14162_v14, 0.0  ;;  %v15450_v30 = vld [vmem:[#allocation27_spill] sm:$0xff] }
0x1095   : > { %8909 = vadd.xlane.f32.xlu0 %v8908_v63  ;;  %v8917_v31 = vsel %vm426_vm0, %v14177_v18, 0.0 }
0x1096   : > { %v11795_v10 = vpop.f32.mrb[12].mxu0  ;;  %v8911_v44 = vsel %vm426_vm0, %v14172_v45, 0.0 }
0x1097   : > { %v8773_v59 = vpop.f32.mrb[13].mxu0  ;;  %8912 = vadd.xlane.f32.xlu1 %v8911_v44  ;;  %v8782_v62 = vadd.f32 %v11795_v10, %v14111_v13 }
0x1098   : > { %v8774_v48 = vadd.f32 %v14111_v13, %v8773_v59  ;;  %v11796_v49 = vpop.f32.mrb[14].mxu0  ;;  %v15451_v59 = vld [vmem:[#allocation29_spill] sm:$0xff] }
0x1099   : > { %v8776_v50 = vpop.f32.mrb[15].mxu0  ;;  %8915 = vadd.xlane.f32.xlu0 %v8914_v24  ;;  %v8785_v39 = vadd.f32 %v11796_v49, %v14111_v13  ;;  %v14193_v25 = vadd.f32 %v8782_v62, %v15443_v27 }
0x109a   : > { %v14186_v26 = vadd.f32 %v8774_v48, %v15442_v29  ;;  %v8777_v32 = vadd.f32 %v14111_v13, %v8776_v50  ;;  %v15452_v48 = vld [vmem:[#allocation28_spill] sm:$0xff]  ;;  %v15453_v50 = vld [vmem:[#allocation30_spill] sm:$0xff] }
0x109b   : > { %8918 = vadd.xlane.f32.xlu1 %v8917_v31  ;;  %v14201_v52 = vadd.f32 %v8785_v39, %v15445_v37  ;;  %v8926_v5 = vsel %vm426_vm0, %v14193_v25, 0.0 }
0x109c   : > { %v14196_v53 = vadd.f32 %v8777_v32, %v15444_v57  ;;  %v8920_v58 = vsel %vm426_vm0, %v14186_v26, 0.0 }
0x109d   : > { %8921 = vadd.xlane.f32.xlu0 %v8920_v58  ;;  %v8929_v11 = vsel %vm426_vm0, %v14201_v52, 0.0 }
0x109e   : > { %v11799_v19 = vpop.f32.mrb[16].mxu0  ;;  %v8923_v55 = vsel %vm426_vm0, %v14196_v53, 0.0 }
0x109f   : > { %v8789_v42 = vpop.f32.mrb[17].mxu0  ;;  %8924 = vadd.xlane.f32.xlu1 %v8923_v55  ;;  %v8798_v8 = vadd.f32 %v11799_v19, %v14111_v13  ;;  %v15454_v55 = vld [vmem:[#allocation7_spill] sm:$0xff] }
0x10a0   : > { %v8790_v40 = vadd.f32 %v14111_v13, %v8789_v42  ;;  %v11800_v54 = vpop.f32.mrb[18].mxu0 }
0x10a1   : > { %v8792_v35 = vpop.f32.mrb[19].mxu0  ;;  %8927 = vadd.xlane.f32.xlu0 %v8926_v5  ;;  %v8801_v6 = vadd.f32 %v11800_v54, %v14111_v13  ;;  %v14217_v61 = vadd.f32 %v8798_v8, %v15447_v43  ;;  %v15455_v5 = vld [vmem:[#allocation9_spill] sm:$0xff] }
0x10a2   : > { %v14210_v0 = vadd.f32 %v8790_v40, %v15446_v9  ;;  %v8793_v38 = vadd.f32 %v14111_v13, %v8792_v35  ;;  %v15456_v9 = vld [vmem:[#allocation8_spill] sm:$0xff] }
0x10a3   : > { %8930 = vadd.xlane.f32.xlu1 %v8929_v11  ;;  %v14225_v22 = vadd.f32 %v8801_v6, %v15449_v28  ;;  %v8938_v41 = vsel %vm426_vm0, %v14217_v61, 0.0  ;;  %v15457_v11 = vld [vmem:[#allocation10_spill] sm:$0xff] }
0x10a4   : > { %v14220_v16 = vadd.f32 %v8793_v38, %v15448_v4  ;;  %v8932_v12 = vsel %vm426_vm0, %v14210_v0, 0.0 }
0x10a5   : > { %8933 = vadd.xlane.f32.xlu0 %v8932_v12  ;;  %v8941_v44 = vsel %vm426_vm0, %v14225_v22, 0.0 }
0x10a6   : > { %v11803_v15 = vpop.f32.mrb[20].mxu0  ;;  %v8935_v17 = vsel %vm426_vm0, %v14220_v16, 0.0 }
0x10a7   : > { %v8805_v60 = vpop.f32.mrb[21].mxu0  ;;  %8936 = vadd.xlane.f32.xlu1 %v8935_v17  ;;  %v8814_v21 = vadd.f32 %v11803_v15, %v14111_v13 }
0x10a8   : > { %v8806_v23 = vadd.f32 %v14111_v13, %v8805_v60  ;;  %v11804_v1 = vpop.f32.mrb[22].mxu0 }
0x10a9   : > { %v8808_v2 = vpop.f32.mrb[23].mxu0  ;;  %8939 = vadd.xlane.f32.xlu0 %v8938_v41  ;;  %v8817_v3 = vadd.f32 %v11804_v1, %v14111_v13  ;;  %v14241_v62 = vadd.f32 %v8814_v21, %v15451_v59  ;;  %v15458_v1 = vld [vmem:[#allocation11_spill] sm:$0xff]  ;;  %v15460_v59 = vld [vmem:[#allocation12_spill] sm:$0xff] }
0x10aa   : > { %v14234_v63 = vadd.f32 %v8806_v23, %v15450_v30  ;;  %v8809_v10 = vadd.f32 %v14111_v13, %v8808_v2 }
0x10ab   : > { %8942 = vadd.xlane.f32.xlu1 %v8941_v44  ;;  %v14249_v29 = vadd.f32 %v8817_v3, %v15453_v50  ;;  %v8950_v37 = vsel %vm426_vm0, %v14241_v62, 0.0  ;;  %v15461_v50 = vld [vmem:[#allocation14_spill] sm:$0xff] }
0x10ac   : > { %v14244_v49 = vadd.f32 %v8809_v10, %v15452_v48  ;;  %v8944_v24 = vsel %vm426_vm0, %v14234_v63, 0.0  ;;  %v15459_v10 = vld [vmem:[#allocation13_spill] sm:$0xff] }
0x10ad   : > { %8945 = vadd.xlane.f32.xlu0 %v8944_v24  ;;  %v8953_v54 = vsel %vm426_vm0, %v14249_v29, 0.0 }
0x10ae   : > { %v11807_v39 = vpop.f32.mrb[24].mxu0  ;;  %v8947_v32 = vsel %vm426_vm0, %v14244_v49, 0.0 }
0x10af   : > { %v8821_v31 = vpop.f32.mrb[25].mxu0  ;;  %8948 = vadd.xlane.f32.xlu1 %v8947_v32  ;;  %v8830_v27 = vadd.f32 %v11807_v39, %v14111_v13 }
0x10b0   : > { %v8822_v57 = vadd.f32 %v14111_v13, %v8821_v31  ;;  %v11808_v58 = vpop.f32.mrb[26].mxu0 }
0x10b1   : > { %v8824_v19 = vpop.f32.mrb[27].mxu0  ;;  %8951 = vadd.xlane.f32.xlu0 %v8950_v37  ;;  %v8833_v8 = vadd.f32 %v11808_v58, %v14111_v13  ;;  %v14265_v35 = vadd.f32 %v8830_v27, %v15455_v5  ;;  %v12355_v27 = vld [vmem:[%s15351_s5] sm:$0xff]  }
0x10b2   : > { %v14258_v42 = vadd.f32 %v8822_v57, %v15454_v55  ;;  %v8825_v40 = vadd.f32 %v14111_v13, %v8824_v19  ;;  %v12356_v57 = vld [vmem:[%s15351_s5 + $0x8] sm:$0xff]   ;;  %11813 = vmatprep.subr.bf16.mxu0 %v12355_v27  ;;  %11907 = vmatprep.subr.bf16.mxu1 %v12355_v27 }
0x10b3   : > { %8954 = vadd.xlane.f32.xlu1 %v8953_v54  ;;  %v14273_v43 = vadd.f32 %v8833_v8, %v15457_v11  ;;  %v8962_v21 = vsel %vm426_vm0, %v14265_v35, 0.0  ;;  %11814 = vmatpush3.bf16.msra.mxu0 %v12355_v27 }
0x10b4   : > { %v14268_v6 = vadd.f32 %v8825_v40, %v15456_v9  ;;  %v8956_v38 = vsel %vm426_vm0, %v14258_v42, 0.0  ;;  %11909 = vmatpush3.bf16.msra.mxu1 %v12355_v27  ;;  %11815 = vmatprep.subr.bf16.mxu0 %v12356_v57 }
0x10b5   : > { %8957 = vadd.xlane.f32.xlu0 %v8956_v38  ;;  %v8965_v3 = vsel %vm426_vm0, %v14273_v43, 0.0  ;;  %11908 = vmatprep.subr.bf16.mxu1 %v12356_v57 }
0x10b6   : > { %v11811_v4 = vpop.f32.mrb[28].mxu0  ;;  %v8959_v12 = vsel %vm426_vm0, %v14268_v6, 0.0 }
0x10b7   : > { %v8837_v28 = vpop.f32.mrb[29].mxu0  ;;  %8960 = vadd.xlane.f32.xlu1 %v8959_v12  ;;  %v8846_v15 = vadd.f32 %v11811_v4, %v14111_v13  ;;  %11816 = vmatpush3.bf16.msra.mxu0 %v12356_v57 }
0x10b8   : > { %v8838_v17 = vadd.f32 %v14111_v13, %v8837_v28  ;;  %v11812_v60 = vpop.f32.mrb[30].mxu0  ;;  %11910 = vmatpush3.bf16.msra.mxu1 %v12356_v57 }
0x10b9   : > { %v8840_v23 = vpop.f32.mrb[31].mxu0  ;;  %8963 = vadd.xlane.f32.xlu0 %v8962_v21  ;;  %v8849_v2 = vadd.f32 %v11812_v60, %v14111_v13  ;;  %v14289_v44 = vadd.f32 %v8846_v15, %v15459_v10 }
0x10ba   : > { %v14282_v41 = vadd.f32 %v8838_v17, %v15458_v1  ;;  %v8841_v30 = vadd.f32 %v14111_v13, %v8840_v23 }
0x10bb   : > { %8966 = vadd.xlane.f32.xlu1 %v8965_v3  ;;  %v14297_v39 = vadd.f32 %v8849_v2, %v15461_v50  ;;  %v8974_v32 = vsel %vm426_vm0, %v14289_v44, 0.0 }
0x10bc   : > { %v14292_v48 = vadd.f32 %v8841_v30, %v15460_v59  ;;  %v8968_v24 = vsel %vm426_vm0, %v14282_v41, 0.0 }
0x10bd   : > { %8969 = vadd.xlane.f32.xlu0 %v8968_v24  ;;  %v8977_v31 = vsel %vm426_vm0, %v14297_v39, 0.0 }
0x10be   : > { %v8971_v13 = vsel %vm426_vm0, %v14292_v48, 0.0 }
0x10bf   : > { %8972 = vadd.xlane.f32.xlu1 %v8971_v13 }
0x10c1   : > { %8975 = vadd.xlane.f32.xlu0 %v8974_v32 }
0x10c3   : > { %8978 = vadd.xlane.f32.xlu1 %v8977_v31 }
0x1111   : > { %v8892_v58 = vpop.xlane.xlu1 %8891 }
0x1112   : > { %v8983_v37 = vmul.f32 0.03125, %v8892_v58  ;;  %v8886_v19 = vpop.xlane.xlu0 %8885 }
0x1113   : > { %v8981_v55 = vmul.f32 0.03125, %v8886_v19 }
0x1114   : > { %v14315_v54 = vsub.f32 %v14116_v46, %v8983_v37 }
0x1115   : > { %v8895_v8 = vpop.xlane.xlu1 %8894  ;;  %v14312_v40 = vsub.f32 %v14120_v7, %v8981_v55 }
0x1116   : > { %v8984_v5 = vmul.f32 0.03125, %v8895_v8  ;;  %v8889_v9 = vpop.xlane.xlu0 %8888  ;;  %v9047_v28 = vmul.f32 %v14315_v54, %v14315_v54 }
0x1117   : > { %v8982_v38 = vmul.f32 0.03125, %v8889_v9  ;;  %v9045_v11 = vmul.f32 %v14312_v40, %v14312_v40 }
0x1118   : > { %v14320_v4 = vsub.f32 %v14124_v33, %v8984_v5  ;;  %v9083_v23 = vsel %vm426_vm0, %v9047_v28, 0.0 }
0x1119   : > { %v9077_v12 = vsel %vm426_vm0, %v9045_v11, 0.0  ;;  %v14326_v7 = vsub.f32 %v14129_v47, %v8982_v38 }
0x111a   : > { %9078 = vadd.xlane.f32.xlu0 %v9077_v12  ;;  %v8898_v46 = vpop.xlane.xlu0 %8897  ;;  %v9048_v21 = vmul.f32 %v14320_v4, %v14320_v4 }
0x111b   : > { %v8985_v15 = vmul.f32 0.03125, %v8898_v46  ;;  %v9046_v17 = vmul.f32 %v14326_v7, %v14326_v7 }
0x111c   : > { %v8901_v60 = vpop.xlane.xlu1 %8900  ;;  %v9086_v24 = vsel %vm426_vm0, %v9048_v21, 0.0 }
0x111d   : > { %v8986_v33 = vmul.f32 0.03125, %v8901_v60  ;;  %v9080_v1 = vsel %vm426_vm0, %v9046_v17, 0.0  ;;  %v14335_v2 = vsub.f32 %v14140_v34, %v8985_v15 }
0x111e   : > { %9084 = vadd.xlane.f32.xlu0 %v9083_v23  ;;  %9081 = vadd.xlane.f32.xlu1 %v9080_v1  ;;  %v8904_v47 = vpop.xlane.xlu0 %8903 }
0x111f   : > { %v8987_v30 = vmul.f32 0.03125, %v8904_v47  ;;  %v9049_v3 = vmul.f32 %v14335_v2, %v14335_v2  ;;  %v14340_v10 = vsub.f32 %v14148_v20, %v8986_v33 }
0x1120   : > { %v8907_v59 = vpop.xlane.xlu1 %8906 }
0x1121   : > { %v8988_v50 = vmul.f32 0.03125, %v8907_v59  ;;  %v9089_v13 = vsel %vm426_vm0, %v9049_v3, 0.0  ;;  %v9050_v34 = vmul.f32 %v14340_v10, %v14340_v10  ;;  %v14347_v32 = vsub.f32 %v14145_v56, %v8987_v30 }
0x1122   : > { %9087 = vadd.xlane.f32.xlu1 %v9086_v24  ;;  %9090 = vadd.xlane.f32.xlu0 %v9089_v13  ;;  %v8910_v31 = vpop.xlane.xlu0 %8909 }
0x1123   : > { %v8989_v27 = vmul.f32 0.03125, %v8910_v31  ;;  %v9051_v20 = vmul.f32 %v14347_v32, %v14347_v32  ;;  %v14352_v57 = vsub.f32 %v14153_v36, %v8988_v50  ;;  %v9092_v37 = vsel %vm426_vm0, %v9050_v34, 0.0 }
0x1124   : > { %v8913_v58 = vpop.xlane.xlu1 %8912 }
0x1125   : > { %v8990_v19 = vmul.f32 0.03125, %v8913_v58  ;;  %v9095_v55 = vsel %vm426_vm0, %v9051_v20, 0.0  ;;  %v9052_v56 = vmul.f32 %v14352_v57, %v14352_v57  ;;  %v14359_v8 = vsub.f32 %v14162_v14, %v8989_v27 }
0x1126   : > { %9093 = vadd.xlane.f32.xlu1 %v9092_v37  ;;  %9096 = vadd.xlane.f32.xlu0 %v9095_v55  ;;  %v8916_v5 = vpop.xlane.xlu0 %8915 }
0x1127   : > { %v8991_v9 = vmul.f32 0.03125, %v8916_v5  ;;  %v9053_v36 = vmul.f32 %v14359_v8, %v14359_v8  ;;  %v14364_v38 = vsub.f32 %v14172_v45, %v8990_v19  ;;  %v9098_v12 = vsel %vm426_vm0, %v9052_v56, 0.0 }
0x1128   : > { %v8919_v11 = vpop.xlane.xlu1 %8918 }
0x1129   : > { %v8992_v28 = vmul.f32 0.03125, %v8919_v11  ;;  %v9101_v46 = vsel %vm426_vm0, %v9053_v36, 0.0  ;;  %v9054_v14 = vmul.f32 %v14364_v38, %v14364_v38  ;;  %v14371_v15 = vsub.f32 %v14169_v51, %v8991_v9 }
0x112a   : > { %9099 = vadd.xlane.f32.xlu1 %v9098_v12  ;;  %9102 = vadd.xlane.f32.xlu0 %v9101_v46  ;;  %v8922_v17 = vpop.xlane.xlu0 %8921 }
0x112b   : > { %v8993_v60 = vmul.f32 0.03125, %v8922_v17  ;;  %v9055_v45 = vmul.f32 %v14371_v15, %v14371_v15  ;;  %v14376_v21 = vsub.f32 %v14177_v18, %v8992_v28  ;;  %v9104_v23 = vsel %vm426_vm0, %v9054_v14, 0.0 }
0x112c   : > { %v8925_v33 = vpop.xlane.xlu1 %8924 }
0x112d   : > { %v8994_v1 = vmul.f32 0.03125, %v8925_v33  ;;  %v9107_v47 = vsel %vm426_vm0, %v9055_v45, 0.0  ;;  %v9056_v51 = vmul.f32 %v14376_v21, %v14376_v21  ;;  %v14383_v30 = vsub.f32 %v14186_v26, %v8993_v60 }
0x112e   : > { %9105 = vadd.xlane.f32.xlu1 %v9104_v23  ;;  %9108 = vadd.xlane.f32.xlu0 %v9107_v47  ;;  %v8928_v3 = vpop.xlane.xlu0 %8927 }
0x112f   : > { %v8995_v59 = vmul.f32 0.03125, %v8928_v3  ;;  %v9057_v18 = vmul.f32 %v14383_v30, %v14383_v30  ;;  %v14388_v24 = vsub.f32 %v14196_v53, %v8994_v1  ;;  %v9110_v13 = vsel %vm426_vm0, %v9056_v51, 0.0 }
0x1130   : > { %v8931_v50 = vpop.xlane.xlu1 %8930 }
0x1131   : > { %v8996_v34 = vmul.f32 0.03125, %v8931_v50  ;;  %v9113_v31 = vsel %vm426_vm0, %v9057_v18, 0.0  ;;  %v9058_v26 = vmul.f32 %v14388_v24, %v14388_v24  ;;  %v14395_v27 = vsub.f32 %v14193_v25, %v8995_v59 }
0x1132   : > { %9111 = vadd.xlane.f32.xlu1 %v9110_v13  ;;  %9114 = vadd.xlane.f32.xlu0 %v9113_v31  ;;  %v8934_v20 = vpop.xlane.xlu0 %8933 }
0x1133   : > { %v8997_v58 = vmul.f32 0.03125, %v8934_v20  ;;  %v9059_v53 = vmul.f32 %v14395_v27, %v14395_v27  ;;  %v14400_v37 = vsub.f32 %v14201_v52, %v8996_v34  ;;  %v9116_v55 = vsel %vm426_vm0, %v9058_v26, 0.0 }
0x1134   : > { %v8937_v19 = vpop.xlane.xlu1 %8936 }
0x1135   : > { %v8998_v56 = vmul.f32 0.03125, %v8937_v19  ;;  %v9119_v5 = vsel %vm426_vm0, %v9059_v53, 0.0  ;;  %v9060_v25 = vmul.f32 %v14400_v37, %v14400_v37  ;;  %v14407_v9 = vsub.f32 %v14210_v0, %v8997_v58 }
0x1136   : > { %9117 = vadd.xlane.f32.xlu1 %v9116_v55  ;;  %9120 = vadd.xlane.f32.xlu0 %v9119_v5  ;;  %v8940_v36 = vpop.xlane.xlu0 %8939 }
0x1137   : > { %v8999_v11 = vmul.f32 0.03125, %v8940_v36  ;;  %v9061_v52 = vmul.f32 %v14407_v9, %v14407_v9  ;;  %v14412_v12 = vsub.f32 %v14220_v16, %v8998_v56  ;;  %v9122_v46 = vsel %vm426_vm0, %v9060_v25, 0.0 }
0x1138   : > { %v8943_v28 = vpop.xlane.xlu1 %8942 }
0x1139   : > { %v9000_v14 = vmul.f32 0.03125, %v8943_v28  ;;  %v9125_v17 = vsel %vm426_vm0, %v9061_v52, 0.0  ;;  %v9062_v0 = vmul.f32 %v14412_v12, %v14412_v12  ;;  %v14419_v60 = vsub.f32 %v14217_v61, %v8999_v11 }
0x113a   : > { %9123 = vadd.xlane.f32.xlu1 %v9122_v46  ;;  %9126 = vadd.xlane.f32.xlu0 %v9125_v17  ;;  %v8946_v45 = vpop.xlane.xlu0 %8945 }
0x113b   : > { %v9001_v33 = vmul.f32 0.03125, %v8946_v45  ;;  %v9063_v16 = vmul.f32 %v14419_v60, %v14419_v60  ;;  %v14424_v23 = vsub.f32 %v14225_v22, %v9000_v14  ;;  %v9128_v47 = vsel %vm426_vm0, %v9062_v0, 0.0 }
0x113c   : > { %v8949_v1 = vpop.xlane.xlu1 %8948 }
0x113d   : > { %v9002_v51 = vmul.f32 0.03125, %v8949_v1  ;;  %v9131_v3 = vsel %vm426_vm0, %v9063_v16, 0.0  ;;  %v9064_v61 = vmul.f32 %v14424_v23, %v14424_v23  ;;  %v14431_v59 = vsub.f32 %v14234_v63, %v9001_v33 }
0x113e   : > { %9129 = vadd.xlane.f32.xlu1 %v9128_v47  ;;  %9132 = vadd.xlane.f32.xlu0 %v9131_v3  ;;  %v8952_v18 = vpop.xlane.xlu0 %8951 }
0x113f   : > { %v9003_v50 = vmul.f32 0.03125, %v8952_v18  ;;  %v9065_v22 = vmul.f32 %v14431_v59, %v14431_v59  ;;  %v14436_v13 = vsub.f32 %v14244_v49, %v9002_v51  ;;  %v9134_v31 = vsel %vm426_vm0, %v9064_v61, 0.0 }
0x1140   : > { %v8955_v34 = vpop.xlane.xlu1 %8954 }
0x1141   : > { %v9004_v26 = vmul.f32 0.03125, %v8955_v34  ;;  %v9137_v20 = vsel %vm426_vm0, %v9065_v22, 0.0  ;;  %v9066_v63 = vmul.f32 %v14436_v13, %v14436_v13  ;;  %v14443_v58 = vsub.f32 %v14241_v62, %v9003_v50 }
0x1142   : > { %9135 = vadd.xlane.f32.xlu1 %v9134_v31  ;;  %9138 = vadd.xlane.f32.xlu0 %v9137_v20  ;;  %v8958_v53 = vpop.xlane.xlu0 %8957 }
0x1143   : > { %v9005_v19 = vmul.f32 0.03125, %v8958_v53  ;;  %v9067_v49 = vmul.f32 %v14443_v58, %v14443_v58  ;;  %v14448_v55 = vsub.f32 %v14249_v29, %v9004_v26  ;;  %v9140_v5 = vsel %vm426_vm0, %v9066_v63, 0.0 }
0x1144   : > { %v8961_v56 = vpop.xlane.xlu1 %8960 }
0x1145   : > { %v9006_v25 = vmul.f32 0.03125, %v8961_v56  ;;  %v9143_v36 = vsel %vm426_vm0, %v9067_v49, 0.0  ;;  %v9068_v62 = vmul.f32 %v14448_v55, %v14448_v55  ;;  %v14455_v11 = vsub.f32 %v14258_v42, %v9005_v19 }
0x1146   : > { %9141 = vadd.xlane.f32.xlu1 %v9140_v5  ;;  %9144 = vadd.xlane.f32.xlu0 %v9143_v36  ;;  %v8964_v52 = vpop.xlane.xlu0 %8963 }
0x1147   : > { %v9007_v28 = vmul.f32 0.03125, %v8964_v52  ;;  %v9069_v29 = vmul.f32 %v14455_v11, %v14455_v11  ;;  %v14460_v46 = vsub.f32 %v14268_v6, %v9006_v25  ;;  %v9146_v17 = vsel %vm426_vm0, %v9068_v62, 0.0 }
0x1148   : > { %v8967_v14 = vpop.xlane.xlu1 %8966 }
0x1149   : > { %v9008_v0 = vmul.f32 0.03125, %v8967_v14  ;;  %v9149_v45 = vsel %vm426_vm0, %v9069_v29, 0.0  ;;  %v9070_v42 = vmul.f32 %v14460_v46, %v14460_v46  ;;  %v14467_v33 = vsub.f32 %v14265_v35, %v9007_v28 }
0x114a   : > { %9147 = vadd.xlane.f32.xlu1 %v9146_v17  ;;  %9150 = vadd.xlane.f32.xlu0 %v9149_v45  ;;  %v8970_v16 = vpop.xlane.xlu0 %8969 }
0x114b   : > { %v9009_v1 = vmul.f32 0.03125, %v8970_v16  ;;  %v9071_v6 = vmul.f32 %v14467_v33, %v14467_v33  ;;  %v14472_v47 = vsub.f32 %v14273_v43, %v9008_v0  ;;  %v9152_v3 = vsel %vm426_vm0, %v9070_v42, 0.0 }
0x114c   : > { %v8973_v51 = vpop.xlane.xlu1 %8972 }
0x114d   : > { %v9010_v61 = vmul.f32 0.03125, %v8973_v51  ;;  %v9155_v18 = vsel %vm426_vm0, %v9071_v6, 0.0  ;;  %v9072_v35 = vmul.f32 %v14472_v47, %v14472_v47  ;;  %v14479_v50 = vsub.f32 %v14282_v41, %v9009_v1 }
0x114e   : > { %9153 = vadd.xlane.f32.xlu1 %v9152_v3  ;;  %9156 = vadd.xlane.f32.xlu0 %v9155_v18  ;;  %v8976_v22 = vpop.xlane.xlu0 %8975 }
0x114f   : > { %v9011_v34 = vmul.f32 0.03125, %v8976_v22  ;;  %v9073_v43 = vmul.f32 %v14479_v50, %v14479_v50  ;;  %v14484_v31 = vsub.f32 %v14292_v48, %v9010_v61  ;;  %v9158_v20 = vsel %vm426_vm0, %v9072_v35, 0.0 }
0x1150   : > { %v8979_v26 = vpop.xlane.xlu1 %8978 }
0x1151   : > { %v14488_v63 = vsub.f32 %v14289_v44, %v9011_v34  ;;  %v9012_v53 = vmul.f32 0.03125, %v8979_v26  ;;  %v9161_v41 = vsel %vm426_vm0, %v9073_v43, 0.0  ;;  %v9074_v19 = vmul.f32 %v14484_v31, %v14484_v31 }
0x1152   : > { %9159 = vadd.xlane.f32.xlu1 %v9158_v20  ;;  %9162 = vadd.xlane.f32.xlu0 %v9161_v41 }
0x1153   : > { %v14494_v49 = vsub.f32 %v14297_v39, %v9012_v53  ;;  %v9075_v48 = vmul.f32 %v14488_v63, %v14488_v63  ;;  %v9164_v56 = vsel %vm426_vm0, %v9074_v19, 0.0  ;;  %v14506_v39 = vld [vmem:[%s15351_s5 + $0x10] sm:$0xff]   ;;  %v14513_v19 = vld [vmem:[%s15352_s6 + $0x1] ss:$0 sm:$0xff] }
0x1154   : > { %11849 = vmatprep.subr.bf16.mxu1 %v14506_v39 }
0x1155   : > { %v9167_v5 = vsel %vm426_vm0, %v9075_v48, 0.0  ;;  %v9076_v44 = vmul.f32 %v14494_v49, %v14494_v49 }
0x1156   : > { %9165 = vadd.xlane.f32.xlu1 %v9164_v56  ;;  %9168 = vadd.xlane.f32.xlu0 %v9167_v5 }
0x1157   : > { %v9170_v25 = vsel %vm426_vm0, %v9076_v44, 0.0 }
0x115a   : > { %9171 = vadd.xlane.f32.xlu1 %v9170_v25 }
0x11a7   : > { %v9079_v36 = vpop.xlane.xlu0 %9078 }
0x11a8   : > { %v9173_v62 = vmul.f32 0.03125, %v9079_v36 }
0x11aa   : > { %v9205_v52 = vadd.f32 1e-05, %v9173_v62 }
0x11ab   : > { %v9082_v28 = vpop.xlane.xlu1 %9081  ;;  %v9085_v29 = vpop.xlane.xlu0 %9084 }
0x11ac   : > { %12359 = vrsqrt.f32 %v9205_v52  ;;  %v9174_v14 = vmul.f32 0.03125, %v9082_v28  ;;  %v9175_v17 = vmul.f32 0.03125, %v9085_v29 }
0x11ae   : > { %v9206_v0 = vadd.f32 1e-05, %v9174_v14  ;;  %v9207_v45 = vadd.f32 1e-05, %v9175_v17 }
0x11af   : > { %v9088_v42 = vpop.xlane.xlu1 %9087  ;;  %v9091_v16 = vpop.xlane.xlu0 %9090 }
0x11b0   : > { %12361 = vrsqrt.f32 %v9206_v0  ;;  %v9176_v1 = vmul.f32 0.03125, %v9088_v42  ;;  %v9177_v6 = vmul.f32 0.03125, %v9091_v16  ;;  %v14521_v0 = vld [vmem:[%s15352_s6 + $0x2] ss:$0 sm:$0xff] }
0x11b1   : > { %12363 = vrsqrt.f32 %v9207_v45 }
0x11b2   : > { %v9208_v51 = vadd.f32 1e-05, %v9176_v1  ;;  %v9209_v3 = vadd.f32 1e-05, %v9177_v6 }
0x11b3   : > { %v9094_v61 = vpop.xlane.xlu1 %9093  ;;  %v9097_v18 = vpop.xlane.xlu0 %9096 }
0x11b4   : > { %12365 = vrsqrt.f32 %v9208_v51  ;;  %v9178_v35 = vmul.f32 0.03125, %v9094_v61  ;;  %v9179_v22 = vmul.f32 0.03125, %v9097_v18 }
0x11b5   : > { %12367 = vrsqrt.f32 %v9209_v3 }
0x11b6   : > { %v12360_v34 = vpop.eup %12359  ;;  %v9210_v43 = vadd.f32 1e-05, %v9178_v35  ;;  %v9211_v26 = vadd.f32 1e-05, %v9179_v22 }
0x11b7   : > { %v9100_v20 = vpop.xlane.xlu1 %9099  ;;  %v9103_v53 = vpop.xlane.xlu0 %9102  ;;  %v9269_v41 = vmul.f32 %v12360_v34, %v14312_v40 }
0x11b8   : > { %12369 = vrsqrt.f32 %v9210_v43  ;;  %v9180_v48 = vmul.f32 0.03125, %v9100_v20  ;;  %v9181_v56 = vmul.f32 0.03125, %v9103_v53 }
0x11b9   : > { %12371 = vrsqrt.f32 %v9211_v26  ;;  %v9306_v29 = vmul.f32 %v14513_v19, %v9269_v41 }
0x11ba   : > { %v12362_v5 = vpop.eup %12361  ;;  %v9212_v44 = vadd.f32 1e-05, %v9180_v48  ;;  %v9213_v25 = vadd.f32 1e-05, %v9181_v56 }
0x11bb   : > { %v12364_v36 = vpop.eup %12363  ;;  %v9106_v62 = vpop.xlane.xlu1 %9105  ;;  %v9270_v28 = vmul.f32 %v12362_v5, %v14326_v7  ;;  %v14527_v61 = vadd.f32 %v14521_v0, %v9306_v29 }
0x11bc   : > { %v9109_v52 = vpop.xlane.xlu0 %9108  ;;  %v9271_v40 = vmul.f32 %v12364_v36, %v14315_v54  ;;  %12373 = vrsqrt.f32 %v9212_v44  ;;  %v9182_v14 = vmul.f32 0.03125, %v9106_v62 }
0x11bd   : > { %v9183_v17 = vmul.f32 0.03125, %v9109_v52  ;;  %12375 = vrsqrt.f32 %v9213_v25  ;;  %v9307_v45 = vmul.f32 %v14513_v19, %v9270_v28 }
0x11be   : > { %v12366_v42 = vpop.eup %12365  ;;  %v9214_v16 = vadd.f32 1e-05, %v9182_v14  ;;  %v9308_v7 = vmul.f32 %v14513_v19, %v9271_v40 }
0x11bf   : > { %v9215_v1 = vadd.f32 1e-05, %v9183_v17  ;;  %v12368_v6 = vpop.eup %12367  ;;  %v9272_v51 = vmul.f32 %v12366_v42, %v14320_v4  ;;  %v9112_v54 = vpop.xlane.xlu1 %9111  ;;  %v14530_v18 = vadd.f32 %v14521_v0, %v9307_v45 }
0x11c0   : > { %v9115_v3 = vpop.xlane.xlu0 %9114  ;;  %12377 = vrsqrt.f32 %v9214_v16  ;;  %v9184_v35 = vmul.f32 0.03125, %v9112_v54  ;;  %v9273_v26 = vmul.f32 %v12368_v6, %v14335_v2  ;;  %v14538_v5 = vadd.f32 %v14521_v0, %v9308_v7 }
0x11c1   : > { %v9185_v22 = vmul.f32 0.03125, %v9115_v3  ;;  %v9309_v34 = vmul.f32 %v14513_v19, %v9272_v51  ;;  %12379 = vrsqrt.f32 %v9215_v1  ;;  %v9375_v43 = vpack.c.bf16 %v14530_v18, %v14527_v61 }
0x11c2   : > { %v12370_v4 = vpop.eup %12369  ;;  %v9216_v20 = vadd.f32 1e-05, %v9184_v35  ;;  %v9310_v36 = vmul.f32 %v14513_v19, %v9273_v26 }
0x11c3   : > { %v9217_v53 = vadd.f32 1e-05, %v9185_v22  ;;  %v12372_v41 = vpop.eup %12371  ;;  %v9118_v48 = vpop.xlane.xlu1 %9117  ;;  %11817 = vmatprep.mubr.msk.bf16.mxu0 %vm426_vm0, %v9375_v43  ;;  %v14541_v44 = vadd.f32 %v14521_v0, %v9309_v34  ;;  %v9274_v25 = vmul.f32 %v12370_v4, %v14340_v10 }
0x11c4   : > { %v9121_v56 = vpop.xlane.xlu0 %9120  ;;  %12381 = vrsqrt.f32 %v9216_v20  ;;  %v9186_v2 = vmul.f32 0.03125, %v9118_v48  ;;  %v9275_v52 = vmul.f32 %v12372_v41, %v14347_v32  ;;  %v14551_v16 = vadd.f32 %v14521_v0, %v9310_v36 }
0x11c5   : > { %v9187_v62 = vmul.f32 0.03125, %v9121_v56  ;;  %12383 = vrsqrt.f32 %v9217_v53  ;;  %v9376_v28 = vpack.c.bf16 %v14541_v44, %v14538_v5  ;;  %v9311_v29 = vmul.f32 %v14513_v19, %v9274_v25 }
0x11c6   : > { %v12374_v40 = vpop.eup %12373  ;;  %v9218_v14 = vadd.f32 1e-05, %v9186_v2  ;;  %v9312_v6 = vmul.f32 %v14513_v19, %v9275_v52 }
0x11c7   : > { %v9219_v17 = vadd.f32 1e-05, %v9187_v62  ;;  %v12376_v45 = vpop.eup %12375  ;;  %v9124_v42 = vpop.xlane.xlu1 %9123  ;;  %11818 = vmatmul.mubr.msk.bf16.vlgmr.msra.gmra.mrb[32].mxu0 %vm426_vm0, %v9376_v28  ;;  %v14554_v1 = vadd.f32 %v14521_v0, %v9311_v29  ;;  %v9276_v32 = vmul.f32 %v12374_v40, %v14352_v57 }
0x11c8   : > { %v9127_v10 = vpop.xlane.xlu0 %9126  ;;  %12385 = vrsqrt.f32 %v9218_v14  ;;  %v9188_v7 = vmul.f32 0.03125, %v9124_v42  ;;  %v9277_v35 = vmul.f32 %v12376_v45, %v14359_v8  ;;  %v14564_v20 = vadd.f32 %v14521_v0, %v9312_v6 }
0x11c9   : > { %v9189_v51 = vmul.f32 0.03125, %v9127_v10  ;;  %12387 = vrsqrt.f32 %v9219_v17  ;;  %v9377_v54 = vpack.c.bf16 %v14554_v1, %v14551_v16  ;;  %v9313_v3 = vmul.f32 %v14513_v19, %v9276_v32 }
0x11ca   : > { %v12378_v22 = vpop.eup %12377  ;;  %v9220_v34 = vadd.f32 1e-05, %v9188_v7  ;;  %v9314_v48 = vmul.f32 %v14513_v19, %v9277_v35 }
0x11cb   : > { %v9221_v43 = vadd.f32 1e-05, %v9189_v51  ;;  %v12380_v26 = vpop.eup %12379  ;;  %v9130_v4 = vpop.xlane.xlu1 %9129  ;;  %11821 = vmatprep.mubr.msk.bf16.mxu0 %vm426_vm0, %v9377_v54  ;;  %v14567_v53 = vadd.f32 %v14521_v0, %v9313_v3  ;;  %v9278_v41 = vmul.f32 %v12378_v22, %v14364_v38 }
0x11cc   : > { %v9133_v57 = vpop.xlane.xlu0 %9132  ;;  %12389 = vrsqrt.f32 %v9220_v34  ;;  %v9190_v8 = vmul.f32 0.03125, %v9130_v4  ;;  %v9279_v25 = vmul.f32 %v12380_v26, %v14371_v15  ;;  %v14577_v14 = vadd.f32 %v14521_v0, %v9314_v48 }
0x11cd   : > { %v9191_v56 = vmul.f32 0.03125, %v9133_v57  ;;  %12391 = vrsqrt.f32 %v9221_v43  ;;  %v9378_v36 = vpack.c.bf16 %v14567_v53, %v14564_v20  ;;  %v9315_v2 = vmul.f32 %v14513_v19, %v9278_v41 }
0x11ce   : > { %v12382_v62 = vpop.eup %12381  ;;  %v9222_v52 = vadd.f32 1e-05, %v9190_v8  ;;  %v9316_v45 = vmul.f32 %v14513_v19, %v9279_v25 }
0x11cf   : > { %v9223_v28 = vadd.f32 1e-05, %v9191_v56  ;;  %v12384_v29 = vpop.eup %12383  ;;  %v9136_v40 = vpop.xlane.xlu1 %9135  ;;  %11822 = vmatmul.mubr.msk.bf16.gmra.mrb[36].mxu0 %vm426_vm0, %v9378_v36  ;;  %v14580_v17 = vadd.f32 %v14521_v0, %v9315_v2  ;;  %v9280_v15 = vmul.f32 %v12382_v62, %v14376_v21  ;;  %v12358_v56 = vld [vmem:[%s15351_s5 + $0x18] sm:$0xff]  }
0x11d0   : > { %v9139_v38 = vpop.xlane.xlu0 %9138  ;;  %12393 = vrsqrt.f32 %v9222_v52  ;;  %v9192_v42 = vmul.f32 0.03125, %v9136_v40  ;;  %v9281_v7 = vmul.f32 %v12384_v29, %v14383_v30  ;;  %v14590_v34 = vadd.f32 %v14521_v0, %v9316_v45 }
0x11d1   : > { %v9193_v10 = vmul.f32 0.03125, %v9139_v38  ;;  %12395 = vrsqrt.f32 %v9223_v28  ;;  %v9379_v32 = vpack.c.bf16 %v14580_v17, %v14577_v14  ;;  %v9317_v6 = vmul.f32 %v14513_v19, %v9280_v15 }
0x11d2   : > { %v12386_v51 = vpop.eup %12385  ;;  %v9224_v54 = vadd.f32 1e-05, %v9192_v42  ;;  %v9318_v4 = vmul.f32 %v14513_v19, %v9281_v7 }
0x11d3   : > { %v9225_v3 = vadd.f32 1e-05, %v9193_v10  ;;  %v12388_v35 = vpop.eup %12387  ;;  %v9142_v22 = vpop.xlane.xlu1 %9141  ;;  %11825 = vmatprep.mubr.msk.bf16.mxu1 %vm426_vm0, %v9379_v32  ;;  %v14593_v43 = vadd.f32 %v14521_v0, %v9317_v6  ;;  %v9282_v26 = vmul.f32 %v12386_v51, %v14388_v24 }
0x11d4   : > { %v9145_v21 = vpop.xlane.xlu0 %9144  ;;  %12397 = vrsqrt.f32 %v9224_v54  ;;  %v9194_v30 = vmul.f32 0.03125, %v9142_v22  ;;  %v9283_v41 = vmul.f32 %v12388_v35, %v14395_v27  ;;  %v14606_v27 = vadd.f32 %v14521_v0, %v9318_v4 }
0x11d5   : > { %v9195_v57 = vmul.f32 0.03125, %v9145_v21  ;;  %12399 = vrsqrt.f32 %v9225_v3  ;;  %v9380_v48 = vpack.c.bf16 %v14593_v43, %v14590_v34  ;;  %v9319_v8 = vmul.f32 %v14513_v19, %v9282_v26 }
0x11d6   : > { %v12390_v25 = vpop.eup %12389  ;;  %v9226_v36 = vadd.f32 1e-05, %v9194_v30  ;;  %v9320_v40 = vmul.f32 %v14513_v19, %v9283_v41 }
0x11d7   : > { %v9227_v24 = vadd.f32 1e-05, %v9195_v57  ;;  %v12392_v2 = vpop.eup %12391  ;;  %v9148_v62 = vpop.xlane.xlu1 %9147  ;;  %11826 = vmatmul.mubr.msk.bf16.vlgmr.msra.gmra.mrb[0].mxu1 %vm426_vm0, %v9380_v48  ;;  %v14609_v28 = vadd.f32 %v14521_v0, %v9319_v8  ;;  %v9284_v29 = vmul.f32 %v12390_v25, %v14400_v37 }
0x11d8   : > { %v9151_v52 = vpop.xlane.xlu0 %9150  ;;  %12401 = vrsqrt.f32 %v9226_v36  ;;  %v9196_v38 = vmul.f32 0.03125, %v9148_v62  ;;  %11850 = vmatpush3.bf16.msra.mxu1 %v14506_v39  ;;  %v9285_v10 = vmul.f32 %v12392_v2, %v14407_v9  ;;  %v14620_v3 = vadd.f32 %v14521_v0, %v9320_v40 }
0x11d9   : > { %v9197_v15 = vmul.f32 0.03125, %v9151_v52  ;;  %12403 = vrsqrt.f32 %v9227_v24  ;;  %v9381_v45 = vpack.c.bf16 %v14609_v28, %v14606_v27  ;;  %v9321_v42 = vmul.f32 %v14513_v19, %v9284_v29  ;;  %11851 = vmatprep.subr.bf16.mxu1 %v12358_v56 }
0x11da   : > { %v12394_v32 = vpop.eup %12393  ;;  %v9228_v6 = vadd.f32 1e-05, %v9196_v38  ;;  %v9322_v22 = vmul.f32 %v14513_v19, %v9285_v10 }
0x11db   : > { %v9229_v7 = vadd.f32 1e-05, %v9197_v15  ;;  %v12396_v37 = vpop.eup %12395  ;;  %v9154_v51 = vpop.xlane.xlu1 %9153  ;;  %11829 = vmatprep.mubr.msk.bf16.mxu1 %vm426_vm0, %v9381_v45  ;;  %v14623_v39 = vadd.f32 %v14521_v0, %v9321_v42  ;;  %v9286_v35 = vmul.f32 %v12394_v32, %v14412_v12 }
0x11dc   : > { %v9157_v54 = vpop.xlane.xlu0 %9156  ;;  %12405 = vrsqrt.f32 %v9228_v6  ;;  %v9198_v9 = vmul.f32 0.03125, %v9154_v51  ;;  %v9287_v26 = vmul.f32 %v12396_v37, %v14419_v60  ;;  %11852 = vmatpush3.bf16.msra.mxu1 %v12358_v56  ;;  %v14633_v36 = vadd.f32 %v14521_v0, %v9322_v22 }
0x11dd   : > { %v9199_v21 = vmul.f32 0.03125, %v9157_v54  ;;  %12407 = vrsqrt.f32 %v9229_v7  ;;  %v9382_v4 = vpack.c.bf16 %v14623_v39, %v14620_v3  ;;  %v9323_v30 = vmul.f32 %v14513_v19, %v9286_v35 }
0x11de   : > { %v12398_v57 = vpop.eup %12397  ;;  %v9230_v41 = vadd.f32 1e-05, %v9198_v9  ;;  %v9324_v24 = vmul.f32 %v14513_v19, %v9287_v26 }
0x11df   : > { %v9231_v48 = vadd.f32 1e-05, %v9199_v21  ;;  %v12400_v8 = vpop.eup %12399  ;;  %v9160_v25 = vpop.xlane.xlu1 %9159  ;;  %11830 = vmatmul.mubr.msk.bf16.gmra.mrb[4].mxu1 %vm426_vm0, %v9382_v4  ;;  %v14636_v60 = vadd.f32 %v14521_v0, %v9323_v30  ;;  %v9288_v56 = vmul.f32 %v12398_v57, %v14424_v23 }
0x11e0   : > { %v9163_v12 = vpop.xlane.xlu0 %9162  ;;  %12409 = vrsqrt.f32 %v9230_v41  ;;  %v9200_v2 = vmul.f32 0.03125, %v9160_v25  ;;  %v9289_v40 = vmul.f32 %v12400_v8, %v14431_v59  ;;  %v14646_v32 = vadd.f32 %v14521_v0, %v9324_v24 }
0x11e1   : > { %v9201_v62 = vmul.f32 0.03125, %v9163_v12  ;;  %12411 = vrsqrt.f32 %v9231_v48  ;;  %v9383_v52 = vpack.c.bf16 %v14636_v60, %v14633_v36  ;;  %v9325_v29 = vmul.f32 %v14513_v19, %v9288_v56 }
0x11e2   : > { %v12402_v38 = vpop.eup %12401  ;;  %v9232_v15 = vadd.f32 1e-05, %v9200_v2  ;;  %v9326_v37 = vmul.f32 %v14513_v19, %v9289_v40 }
0x11e3   : > { %v9233_v45 = vadd.f32 1e-05, %v9201_v62  ;;  %v12404_v42 = vpop.eup %12403  ;;  %v9166_v10 = vpop.xlane.xlu1 %9165  ;;  %11833 = vmatprep.mubr.msk.bf16.mxu1 %vm426_vm0, %v9383_v52  ;;  %v14649_v6 = vadd.f32 %v14521_v0, %v9325_v29  ;;  %v9290_v7 = vmul.f32 %v12402_v38, %v14436_v13 }
0x11e4   : > { %v9169_v23 = vpop.xlane.xlu0 %9168  ;;  %12413 = vrsqrt.f32 %v9232_v15  ;;  %v9202_v59 = vmul.f32 0.03125, %v9166_v10  ;;  %v9291_v54 = vmul.f32 %v12404_v42, %v14443_v58  ;;  %v14659_v13 = vadd.f32 %v14521_v0, %v9326_v37 }
0x11e5   : > { %v9203_v51 = vmul.f32 0.03125, %v9169_v23  ;;  %12415 = vrsqrt.f32 %v9233_v45  ;;  %v9384_v35 = vpack.c.bf16 %v14649_v6, %v14646_v32  ;;  %v9327_v22 = vmul.f32 %v14513_v19, %v9290_v7 }
0x11e6   : > { %v12406_v9 = vpop.eup %12405  ;;  %v9234_v21 = vadd.f32 1e-05, %v9202_v59  ;;  %v9328_v41 = vmul.f32 %v14513_v19, %v9291_v54 }
0x11e7   : > { %v9235_v26 = vadd.f32 1e-05, %v9203_v51  ;;  %v12408_v4 = vpop.eup %12407  ;;  %v9172_v30 = vpop.xlane.xlu1 %9171  ;;  %11834 = vmatmul.mubr.msk.bf16.gmra.mrb[8].mxu1 %vm426_vm0, %v9384_v35  ;;  %v14662_v57 = vadd.f32 %v14521_v0, %v9327_v22  ;;  %v9292_v58 = vmul.f32 %v12406_v9, %v14448_v55 }
0x11e8   : > { %12417 = vrsqrt.f32 %v9234_v21  ;;  %v9204_v48 = vmul.f32 0.03125, %v9172_v30  ;;  %v9293_v8 = vmul.f32 %v12408_v4, %v14455_v11  ;;  %v14672_v62 = vadd.f32 %v14521_v0, %v9328_v41 }
0x11e9   : > { %12419 = vrsqrt.f32 %v9235_v26  ;;  %v9385_v25 = vpack.c.bf16 %v14662_v57, %v14659_v13  ;;  %v9329_v12 = vmul.f32 %v14513_v19, %v9292_v58 }
0x11ea   : > { %v12410_v56 = vpop.eup %12409  ;;  %v9236_v24 = vadd.f32 1e-05, %v9204_v48  ;;  %v9330_v11 = vmul.f32 %v14513_v19, %v9293_v8 }
0x11eb   : > { %v12412_v2 = vpop.eup %12411  ;;  %11837 = vmatprep.mubr.msk.bf16.mxu1 %vm426_vm0, %v9385_v25  ;;  %v14675_v55 = vadd.f32 %v14521_v0, %v9329_v12  ;;  %v9294_v52 = vmul.f32 %v12410_v56, %v14460_v46 }
0x11ec   : > { %12421 = vrsqrt.f32 %v9236_v24  ;;  %v9295_v29 = vmul.f32 %v12412_v2, %v14467_v33  ;;  %v14685_v42 = vadd.f32 %v14521_v0, %v9330_v11 }
0x11ed   : > { %v9386_v40 = vpack.c.bf16 %v14675_v55, %v14672_v62  ;;  %v9331_v38 = vmul.f32 %v14513_v19, %v9294_v52 }
0x11ee   : > { %v12414_v15 = vpop.eup %12413  ;;  %v9332_v23 = vmul.f32 %v14513_v19, %v9295_v29 }
0x11ef   : > { %v12416_v45 = vpop.eup %12415  ;;  %11838 = vmatmul.mubr.msk.bf16.gmra.mrb[12].mxu1 %vm426_vm0, %v9386_v40  ;;  %v14688_v10 = vadd.f32 %v14521_v0, %v9331_v38  ;;  %v9296_v46 = vmul.f32 %v12414_v15, %v14472_v47 }
0x11f0   : > { %v9297_v33 = vmul.f32 %v12416_v45, %v14479_v50  ;;  %v14698_v54 = vadd.f32 %v14521_v0, %v9332_v23 }
0x11f1   : > { %v9387_v7 = vpack.c.bf16 %v14688_v10, %v14685_v42  ;;  %v9333_v37 = vmul.f32 %v14513_v19, %v9296_v46 }
0x11f2   : > { %v12418_v59 = vpop.eup %12417  ;;  %v9334_v22 = vmul.f32 %v14513_v19, %v9297_v33 }
0x11f3   : > { %v12420_v51 = vpop.eup %12419  ;;  %11841 = vmatprep.mubr.msk.bf16.mxu1 %vm426_vm0, %v9387_v7  ;;  %v14701_v35 = vadd.f32 %v14521_v0, %v9333_v37  ;;  %v9298_v47 = vmul.f32 %v12418_v59, %v14484_v31 }
0x11f4   : > { %v9299_v50 = vmul.f32 %v12420_v51, %v14488_v63  ;;  %v14711_v4 = vadd.f32 %v14521_v0, %v9334_v22 }
0x11f5   : > { %v9388_v9 = vpack.c.bf16 %v14701_v35, %v14698_v54  ;;  %v9335_v21 = vmul.f32 %v14513_v19, %v9298_v47 }
0x11f6   : > { %v12422_v26 = vpop.eup %12421  ;;  %v9336_v58 = vmul.f32 %v14513_v19, %v9299_v50 }
0x11f7   : > { %11842 = vmatmul.mubr.msk.bf16.gmra.mrb[16].mxu1 %vm426_vm0, %v9388_v9  ;;  %v14714_v30 = vadd.f32 %v14521_v0, %v9335_v21  ;;  %v9300_v31 = vmul.f32 %v12422_v26, %v14494_v49  ;;  %v14734_v49 = vld [vmem:[%s15352_s6 + $0x3] ss:$0 sm:$0xff] }
0x11f8   : > { %v14723_v48 = vadd.f32 %v14521_v0, %v9336_v58 }
0x11f9   : > { %v9389_v63 = vpack.c.bf16 %v14714_v30, %v14711_v4  ;;  %v9337_v41 = vmul.f32 %v14513_v19, %v9300_v31 }
0x11fb   : > { %11845 = vmatprep.mubr.msk.bf16.mxu1 %vm426_vm0, %v9389_v63  ;;  %v14726_v8 = vadd.f32 %v14521_v0, %v9337_v41 }
0x11fd   : > { %v9390_v25 = vpack.c.bf16 %v14726_v8, %v14723_v48 }
0x11ff   : > { %11846 = vmatmul.mubr.msk.bf16.gmra.mrb[20].mxu1 %vm426_vm0, %v9390_v25 }
0x129a   : > { %v11819_v12 = vpop.f32.mrb[32].mxu0 }
0x129b   : > { %v9503_v19 = vadd.f32 %v11819_v12, %v14734_v49  ;;  %v9494_v56 = vpop.f32.mrb[33].mxu0 }
0x129c   : > { %v9495_v24 = vadd.f32 %v14734_v49, %v9494_v56  ;;  %v11820_v2 = vpop.f32.mrb[34].mxu0 }
0x129d   : > { %v9506_v0 = vadd.f32 %v11820_v2, %v14734_v49  ;;  %v9497_v52 = vpop.f32.mrb[35].mxu0  ;;  %v9623_v29 = vmax.f32 %v9503_v19, 0.0 }
0x129e   : > { %v9498_v11 = vadd.f32 %v14734_v49, %v9497_v52  ;;  %v9621_v38 = vmax.f32 %v9495_v24, 0.0 }
0x129f   : > { %v9624_v40 = vmax.f32 %v9506_v0, 0.0 }
0x12a0   : > { %v9622_v15 = vmax.f32 %v9498_v11, 0.0 }
0x12a1   : > { %v9654_v45 = vpack.c.bf16 %v9624_v40, %v9623_v29 }
0x12a2   : > { %v9653_v46 = vpack.c.bf16 %v9622_v15, %v9621_v38  ;;  %v11823_v23 = vpop.f32.mrb[36].mxu0 }
0x12a3   : > { %v9519_v33 = vadd.f32 %v11823_v23, %v14734_v49  ;;  %v9510_v7 = vpop.f32.mrb[37].mxu0 }
0x12a4   : > { %v9511_v37 = vadd.f32 %v14734_v49, %v9510_v7  ;;  %v11824_v59 = vpop.f32.mrb[38].mxu0  ;;  %11853 = vmatprep.mubr.msk.bf16.mxu1 %vm426_vm0, %v9653_v46 }
0x12a5   : > { %v9522_v51 = vadd.f32 %v11824_v59, %v14734_v49  ;;  %v9513_v47 = vpop.f32.mrb[39].mxu0  ;;  %11854 = vmatmul.mubr.msk.bf16.vlgmr.msra.gmra.mrb[24].mxu1 %vm426_vm0, %v9654_v45  ;;  %v9627_v50 = vmax.f32 %v9519_v33, 0.0 }
0x12a6   : > { %v9514_v22 = vadd.f32 %v14734_v49, %v9513_v47  ;;  %v9625_v21 = vmax.f32 %v9511_v37, 0.0 }
0x12a7   : > { %v9628_v9 = vmax.f32 %v9522_v51, 0.0 }
0x12a8   : > { %v9626_v26 = vmax.f32 %v9514_v22, 0.0 }
0x12a9   : > { %v9656_v31 = vpack.c.bf16 %v9628_v9, %v9627_v50 }
0x12aa   : > { %v9655_v58 = vpack.c.bf16 %v9626_v26, %v9625_v21  ;;  %v11827_v63 = vpop.f32.mrb[0].mxu1 }
0x12ab   : > { %v9535_v41 = vadd.f32 %v11827_v63, %v14734_v49  ;;  %v9526_v25 = vpop.f32.mrb[1].mxu1 }
0x12ac   : > { %v9527_v12 = vadd.f32 %v14734_v49, %v9526_v25  ;;  %v11828_v19 = vpop.f32.mrb[2].mxu1  ;;  %11857 = vmatprep.mubr.msk.bf16.mxu1 %vm426_vm0, %v9655_v58 }
0x12ad   : > { %v9538_v56 = vadd.f32 %v11828_v19, %v14734_v49  ;;  %v9529_v24 = vpop.f32.mrb[3].mxu1  ;;  %11858 = vmatmul.mubr.msk.bf16.gmra.mrb[28].mxu1 %vm426_vm0, %v9656_v31  ;;  %v9631_v0 = vmax.f32 %v9535_v41, 0.0 }
0x12ae   : > { %v9530_v2 = vadd.f32 %v14734_v49, %v9529_v24  ;;  %v9629_v11 = vmax.f32 %v9527_v12, 0.0 }
0x12af   : > { %v9632_v52 = vmax.f32 %v9538_v56, 0.0 }
0x12b0   : > { %v9630_v29 = vmax.f32 %v9530_v2, 0.0 }
0x12b1   : > { %v9658_v40 = vpack.c.bf16 %v9632_v52, %v9631_v0 }
0x12b2   : > { %v9657_v38 = vpack.c.bf16 %v9630_v29, %v9629_v11  ;;  %v11831_v15 = vpop.f32.mrb[4].mxu1 }
0x12b3   : > { %v9551_v45 = vadd.f32 %v11831_v15, %v14734_v49  ;;  %v9542_v46 = vpop.f32.mrb[5].mxu1 }
0x12b4   : > { %v9543_v23 = vadd.f32 %v14734_v49, %v9542_v46  ;;  %v11832_v33 = vpop.f32.mrb[6].mxu1  ;;  %11861 = vmatprep.mubr.msk.bf16.mxu1 %vm426_vm0, %v9657_v38 }
0x12b5   : > { %v9554_v7 = vadd.f32 %v11832_v33, %v14734_v49  ;;  %v9545_v37 = vpop.f32.mrb[7].mxu1  ;;  %11862 = vmatmul.mubr.msk.bf16.gmra.mrb[32].mxu1 %vm426_vm0, %v9658_v40  ;;  %v9635_v51 = vmax.f32 %v9551_v45, 0.0 }
0x12b6   : > { %v9546_v59 = vadd.f32 %v14734_v49, %v9545_v37  ;;  %v9633_v22 = vmax.f32 %v9543_v23, 0.0 }
0x12b7   : > { %v9636_v47 = vmax.f32 %v9554_v7, 0.0 }
0x12b8   : > { %v9634_v50 = vmax.f32 %v9546_v59, 0.0 }
0x12b9   : > { %v9660_v9 = vpack.c.bf16 %v9636_v47, %v9635_v51 }
0x12ba   : > { %v9659_v21 = vpack.c.bf16 %v9634_v50, %v9633_v22  ;;  %v11835_v26 = vpop.f32.mrb[8].mxu1 }
0x12bb   : > { %v9567_v31 = vadd.f32 %v11835_v26, %v14734_v49  ;;  %v9558_v58 = vpop.f32.mrb[9].mxu1 }
0x12bc   : > { %v9559_v63 = vadd.f32 %v14734_v49, %v9558_v58  ;;  %v11836_v41 = vpop.f32.mrb[10].mxu1  ;;  %11865 = vmatprep.mubr.msk.bf16.mxu1 %vm426_vm0, %v9659_v21 }
0x12bd   : > { %v9570_v25 = vadd.f32 %v11836_v41, %v14734_v49  ;;  %v9561_v12 = vpop.f32.mrb[11].mxu1  ;;  %11866 = vmatmul.mubr.msk.bf16.gmra.mrb[36].mxu1 %vm426_vm0, %v9660_v9  ;;  %v9639_v56 = vmax.f32 %v9567_v31, 0.0 }
0x12be   : > { %v9562_v19 = vadd.f32 %v14734_v49, %v9561_v12  ;;  %v9637_v2 = vmax.f32 %v9559_v63, 0.0 }
0x12bf   : > { %v9640_v24 = vmax.f32 %v9570_v25, 0.0 }
0x12c0   : > { %v9638_v0 = vmax.f32 %v9562_v19, 0.0 }
0x12c1   : > { %v9662_v52 = vpack.c.bf16 %v9640_v24, %v9639_v56 }
0x12c2   : > { %v9661_v11 = vpack.c.bf16 %v9638_v0, %v9637_v2  ;;  %v11839_v29 = vpop.f32.mrb[12].mxu1 }
0x12c3   : > { %v9583_v40 = vadd.f32 %v11839_v29, %v14734_v49  ;;  %v9574_v38 = vpop.f32.mrb[13].mxu1 }
0x12c4   : > { %v9575_v15 = vadd.f32 %v14734_v49, %v9574_v38  ;;  %v11840_v45 = vpop.f32.mrb[14].mxu1  ;;  %11869 = vmatprep.mubr.msk.bf16.mxu1 %vm426_vm0, %v9661_v11 }
0x12c5   : > { %v9586_v46 = vadd.f32 %v11840_v45, %v14734_v49  ;;  %v9577_v23 = vpop.f32.mrb[15].mxu1  ;;  %11870 = vmatmul.mubr.msk.bf16.gmra.mrb[40].mxu1 %vm426_vm0, %v9662_v52  ;;  %v9643_v7 = vmax.f32 %v9583_v40, 0.0 }
0x12c6   : > { %v9578_v33 = vadd.f32 %v14734_v49, %v9577_v23  ;;  %v9641_v59 = vmax.f32 %v9575_v15, 0.0 }
0x12c7   : > { %v9644_v37 = vmax.f32 %v9586_v46, 0.0 }
0x12c8   : > { %v9642_v51 = vmax.f32 %v9578_v33, 0.0 }
0x12c9   : > { %v9664_v47 = vpack.c.bf16 %v9644_v37, %v9643_v7 }
0x12ca   : > { %v9663_v22 = vpack.c.bf16 %v9642_v51, %v9641_v59  ;;  %v11843_v50 = vpop.f32.mrb[16].mxu1  ;;  %v14787_v51 = vld [vmem:[%s15352_s6 + $0x4] ss:$0 sm:$0xff] }
0x12cb   : > { %v9599_v9 = vadd.f32 %v11843_v50, %v14734_v49  ;;  %v9590_v21 = vpop.f32.mrb[17].mxu1 }
0x12cc   : > { %v9591_v26 = vadd.f32 %v14734_v49, %v9590_v21  ;;  %v11844_v31 = vpop.f32.mrb[18].mxu1  ;;  %11873 = vmatprep.mubr.msk.bf16.mxu1 %vm426_vm0, %v9663_v22 }
0x12cd   : > { %v9602_v58 = vadd.f32 %v11844_v31, %v14734_v49  ;;  %v9593_v63 = vpop.f32.mrb[19].mxu1  ;;  %11874 = vmatmul.mubr.msk.bf16.gmra.mrb[44].mxu1 %vm426_vm0, %v9664_v47  ;;  %v9647_v25 = vmax.f32 %v9599_v9, 0.0 }
0x12ce   : > { %v9594_v41 = vadd.f32 %v14734_v49, %v9593_v63  ;;  %v9645_v19 = vmax.f32 %v9591_v26, 0.0 }
0x12cf   : > { %v9648_v12 = vmax.f32 %v9602_v58, 0.0 }
0x12d0   : > { %v9646_v56 = vmax.f32 %v9594_v41, 0.0 }
0x12d1   : > { %v9666_v24 = vpack.c.bf16 %v9648_v12, %v9647_v25 }
0x12d2   : > { %v9665_v2 = vpack.c.bf16 %v9646_v56, %v9645_v19  ;;  %v11847_v0 = vpop.f32.mrb[20].mxu1 }
0x12d3   : > { %v9615_v52 = vadd.f32 %v11847_v0, %v14734_v49  ;;  %v9606_v11 = vpop.f32.mrb[21].mxu1 }
0x12d4   : > { %v9607_v29 = vadd.f32 %v14734_v49, %v9606_v11  ;;  %v11848_v40 = vpop.f32.mrb[22].mxu1  ;;  %11877 = vmatprep.mubr.msk.bf16.mxu1 %vm426_vm0, %v9665_v2 }
0x12d5   : > { %v9618_v38 = vadd.f32 %v11848_v40, %v14734_v49  ;;  %v9609_v15 = vpop.f32.mrb[23].mxu1  ;;  %11878 = vmatmul.mubr.msk.bf16.gmra.mrb[48].mxu1 %vm426_vm0, %v9666_v24  ;;  %v9651_v46 = vmax.f32 %v9615_v52, 0.0 }
0x12d6   : > { %v9610_v45 = vadd.f32 %v14734_v49, %v9609_v15  ;;  %v9649_v33 = vmax.f32 %v9607_v29, 0.0 }
0x12d7   : > { %v9652_v23 = vmax.f32 %v9618_v38, 0.0 }
0x12d8   : > { %v9650_v7 = vmax.f32 %v9610_v45, 0.0 }
0x12d9   : > { %v9668_v37 = vpack.c.bf16 %v9652_v23, %v9651_v46 }
0x12da   : > { %v9667_v59 = vpack.c.bf16 %v9650_v7, %v9649_v33 }
0x12dc   : > { %11881 = vmatprep.mubr.msk.bf16.mxu1 %vm426_vm0, %v9667_v59 }
0x12dd   : > { %11882 = vmatmul.mubr.msk.bf16.gmra.mrb[52].mxu1 %vm426_vm0, %v9668_v37 }
0x1378   : > { %v11855_v47 = vpop.f32.mrb[24].mxu1 }
0x1379   : > { %v9782_v22 = vadd.f32 %v11855_v47, %v14787_v51  ;;  %v9773_v50 = vpop.f32.mrb[25].mxu1 }
0x137a   : > { %v9774_v49 = vadd.f32 %v14787_v51, %v9773_v50  ;;  %v11856_v9 = vpop.f32.mrb[26].mxu1 }
0x137b   : > { %v9785_v21 = vadd.f32 %v11856_v9, %v14787_v51  ;;  %v9776_v26 = vpop.f32.mrb[27].mxu1  ;;  %v14793_v31 = vadd.f32 %v9782_v22, %v14538_v5 }
0x137c   : > { %v9777_v58 = vadd.f32 %v14787_v51, %v9776_v26  ;;  %v14802_v25 = vadd.f32 %v9774_v49, %v14527_v61 }
0x137d   : > { %v9938_v63 = vsel %vm426_vm0, %v14793_v31, 0.0  ;;  %v14799_v41 = vadd.f32 %v9785_v21, %v14541_v44 }
0x137e   : > { %9939 = vadd.xlane.f32.xlu0 %v9938_v63  ;;  %v14807_v19 = vadd.f32 %v9777_v58, %v14530_v18  ;;  %v9932_v2 = vsel %vm426_vm0, %v14802_v25, 0.0 }
0x137f   : > { %v9941_v12 = vsel %vm426_vm0, %v14799_v41, 0.0 }
0x1380   : > { %9942 = vadd.xlane.f32.xlu1 %v9941_v12  ;;  %v11859_v5 = vpop.f32.mrb[28].mxu1  ;;  %v9935_v11 = vsel %vm426_vm0, %v14807_v19, 0.0 }
0x1381   : > { %v9798_v56 = vadd.f32 %v11859_v5, %v14787_v51  ;;  %v9789_v24 = vpop.f32.mrb[29].mxu1 }
0x1382   : > { %v9790_v44 = vadd.f32 %v14787_v51, %v9789_v24  ;;  %v11860_v0 = vpop.f32.mrb[30].mxu1  ;;  %9933 = vadd.xlane.f32.xlu0 %v9932_v2 }
0x1383   : > { %v9801_v61 = vadd.f32 %v11860_v0, %v14787_v51  ;;  %v9792_v52 = vpop.f32.mrb[31].mxu1  ;;  %v14817_v18 = vadd.f32 %v9798_v56, %v14564_v20 }
0x1384   : > { %v9793_v29 = vadd.f32 %v14787_v51, %v9792_v52  ;;  %9936 = vadd.xlane.f32.xlu1 %v9935_v11  ;;  %v14826_v15 = vadd.f32 %v9790_v44, %v14551_v16 }
0x1385   : > { %v9950_v40 = vsel %vm426_vm0, %v14817_v18, 0.0  ;;  %v14823_v38 = vadd.f32 %v9801_v61, %v14567_v53 }
0x1386   : > { %9951 = vadd.xlane.f32.xlu0 %v9950_v40  ;;  %v14831_v46 = vadd.f32 %v9793_v29, %v14554_v1  ;;  %v9944_v7 = vsel %vm426_vm0, %v14826_v15, 0.0 }
0x1387   : > { %v9953_v45 = vsel %vm426_vm0, %v14823_v38, 0.0 }
0x1388   : > { %v11863_v20 = vpop.f32.mrb[32].mxu1  ;;  %9954 = vadd.xlane.f32.xlu1 %v9953_v45  ;;  %v9947_v47 = vsel %vm426_vm0, %v14831_v46, 0.0 }
0x1389   : > { %v9814_v23 = vadd.f32 %v11863_v20, %v14787_v51  ;;  %v9805_v33 = vpop.f32.mrb[33].mxu1 }
0x138a   : > { %v9806_v53 = vadd.f32 %v14787_v51, %v9805_v33  ;;  %v11864_v37 = vpop.f32.mrb[34].mxu1  ;;  %9945 = vadd.xlane.f32.xlu0 %v9944_v7 }
0x138b   : > { %v9817_v16 = vadd.f32 %v11864_v37, %v14787_v51  ;;  %v9808_v59 = vpop.f32.mrb[35].mxu1  ;;  %v14841_v1 = vadd.f32 %v9814_v23, %v14590_v34 }
0x138c   : > { %v9809_v22 = vadd.f32 %v14787_v51, %v9808_v59  ;;  %9948 = vadd.xlane.f32.xlu1 %v9947_v47  ;;  %v14850_v9 = vadd.f32 %v9806_v53, %v14577_v14 }
0x138d   : > { %v9962_v50 = vsel %vm426_vm0, %v14841_v1, 0.0  ;;  %v14847_v49 = vadd.f32 %v9817_v16, %v14593_v43 }
0x138e   : > { %9963 = vadd.xlane.f32.xlu0 %v9962_v50  ;;  %v14855_v26 = vadd.f32 %v9809_v22, %v14580_v17  ;;  %v9956_v12 = vsel %vm426_vm0, %v14850_v9, 0.0 }
0x138f   : > { %v9965_v21 = vsel %vm426_vm0, %v14847_v49, 0.0 }
0x1390   : > { %v11867_v34 = vpop.f32.mrb[36].mxu1  ;;  %9966 = vadd.xlane.f32.xlu1 %v9965_v21  ;;  %v9959_v24 = vsel %vm426_vm0, %v14855_v26, 0.0 }
0x1391   : > { %v9830_v58 = vadd.f32 %v11867_v34, %v14787_v51  ;;  %v9821_v63 = vpop.f32.mrb[37].mxu1 }
0x1392   : > { %v9822_v43 = vadd.f32 %v14787_v51, %v9821_v63  ;;  %v11868_v5 = vpop.f32.mrb[38].mxu1  ;;  %9957 = vadd.xlane.f32.xlu0 %v9956_v12 }
0x1393   : > { %v9833_v14 = vadd.f32 %v11868_v5, %v14787_v51  ;;  %v9824_v56 = vpop.f32.mrb[39].mxu1  ;;  %v14865_v17 = vadd.f32 %v9830_v58, %v14620_v3 }
0x1394   : > { %v9825_v2 = vadd.f32 %v14787_v51, %v9824_v56  ;;  %9960 = vadd.xlane.f32.xlu1 %v9959_v24  ;;  %v14874_v61 = vadd.f32 %v9822_v43, %v14606_v27 }
0x1395   : > { %v9974_v44 = vsel %vm426_vm0, %v14865_v17, 0.0  ;;  %v14871_v0 = vadd.f32 %v9833_v14, %v14623_v39 }
0x1396   : > { %9975 = vadd.xlane.f32.xlu0 %v9974_v44  ;;  %v14879_v11 = vadd.f32 %v9825_v2, %v14609_v28  ;;  %v9968_v45 = vsel %vm426_vm0, %v14874_v61, 0.0 }
0x1397   : > { %v9977_v52 = vsel %vm426_vm0, %v14871_v0, 0.0 }
0x1398   : > { %v11871_v3 = vpop.f32.mrb[40].mxu1  ;;  %9978 = vadd.xlane.f32.xlu1 %v9977_v52  ;;  %v9971_v33 = vsel %vm426_vm0, %v14879_v11, 0.0 }
0x1399   : > { %v9846_v29 = vadd.f32 %v11871_v3, %v14787_v51  ;;  %v9837_v40 = vpop.f32.mrb[41].mxu1 }
0x139a   : > { %v9838_v39 = vadd.f32 %v14787_v51, %v9837_v40  ;;  %v11872_v20 = vpop.f32.mrb[42].mxu1  ;;  %9969 = vadd.xlane.f32.xlu0 %v9968_v45 }
0x139b   : > { %v9849_v27 = vadd.f32 %v11872_v20, %v14787_v51  ;;  %v9840_v23 = vpop.f32.mrb[43].mxu1  ;;  %v14889_v28 = vadd.f32 %v9846_v29, %v14646_v32 }
0x139c   : > { %v9841_v7 = vadd.f32 %v14787_v51, %v9840_v23  ;;  %9972 = vadd.xlane.f32.xlu1 %v9971_v33  ;;  %v14898_v16 = vadd.f32 %v9838_v39, %v14633_v36 }
0x139d   : > { %v9986_v53 = vsel %vm426_vm0, %v14889_v28, 0.0  ;;  %v14895_v37 = vadd.f32 %v9849_v27, %v14649_v6 }
0x139e   : > { %9987 = vadd.xlane.f32.xlu0 %v9986_v53  ;;  %v14903_v47 = vadd.f32 %v9841_v7, %v14636_v60  ;;  %v9980_v21 = vsel %vm426_vm0, %v14898_v16, 0.0 }
0x139f   : > { %v9989_v59 = vsel %vm426_vm0, %v14895_v37, 0.0 }
0x13a0   : > { %v11875_v32 = vpop.f32.mrb[44].mxu1  ;;  %9990 = vadd.xlane.f32.xlu1 %v9989_v59  ;;  %v9983_v63 = vsel %vm426_vm0, %v14903_v47, 0.0 }
0x13a1   : > { %v9862_v22 = vadd.f32 %v11875_v32, %v14787_v51  ;;  %v9853_v50 = vpop.f32.mrb[45].mxu1 }
0x13a2   : > { %v9854_v6 = vadd.f32 %v14787_v51, %v9853_v50  ;;  %v11876_v34 = vpop.f32.mrb[46].mxu1  ;;  %9981 = vadd.xlane.f32.xlu0 %v9980_v21 }
0x13a3   : > { %v9865_v36 = vadd.f32 %v11876_v34, %v14787_v51  ;;  %v9856_v58 = vpop.f32.mrb[47].mxu1  ;;  %v14913_v60 = vadd.f32 %v9862_v22, %v14672_v62 }
0x13a4   : > { %v9857_v12 = vadd.f32 %v14787_v51, %v9856_v58  ;;  %9984 = vadd.xlane.f32.xlu1 %v9983_v63  ;;  %v14922_v14 = vadd.f32 %v9854_v6, %v14659_v13 }
0x13a5   : > { %v9998_v43 = vsel %vm426_vm0, %v14913_v60, 0.0  ;;  %v14919_v5 = vadd.f32 %v9865_v36, %v14675_v55 }
0x13a6   : > { %9999 = vadd.xlane.f32.xlu0 %v9998_v43  ;;  %v14927_v24 = vadd.f32 %v9857_v12, %v14662_v57  ;;  %v9992_v52 = vsel %vm426_vm0, %v14922_v14, 0.0 }
0x13a7   : > { %v10001_v56 = vsel %vm426_vm0, %v14919_v5, 0.0 }
0x13a8   : > { %v11879_v62 = vpop.f32.mrb[48].mxu1  ;;  %10002 = vadd.xlane.f32.xlu1 %v10001_v56  ;;  %v9995_v40 = vsel %vm426_vm0, %v14927_v24, 0.0 }
0x13a9   : > { %v9878_v2 = vadd.f32 %v11879_v62, %v14787_v51  ;;  %v9869_v44 = vpop.f32.mrb[49].mxu1 }
0x13aa   : > { %v9870_v55 = vadd.f32 %v14787_v51, %v9869_v44  ;;  %v11880_v3 = vpop.f32.mrb[50].mxu1  ;;  %9993 = vadd.xlane.f32.xlu0 %v9992_v52 }
0x13ab   : > { %v9881_v13 = vadd.f32 %v11880_v3, %v14787_v51  ;;  %v9872_v29 = vpop.f32.mrb[51].mxu1  ;;  %v14937_v57 = vadd.f32 %v9878_v2, %v14698_v54 }
0x13ac   : > { %v9873_v45 = vadd.f32 %v14787_v51, %v9872_v29  ;;  %9996 = vadd.xlane.f32.xlu1 %v9995_v40  ;;  %v14946_v27 = vadd.f32 %v9870_v55, %v14685_v42 }
0x13ad   : > { %v10010_v39 = vsel %vm426_vm0, %v14937_v57, 0.0  ;;  %v14943_v20 = vadd.f32 %v9881_v13, %v14701_v35 }
0x13ae   : > { %10011 = vadd.xlane.f32.xlu0 %v10010_v39  ;;  %v14951_v33 = vadd.f32 %v9873_v45, %v14688_v10  ;;  %v10004_v53 = vsel %vm426_vm0, %v14946_v27, 0.0 }
0x13af   : > { %v10013_v23 = vsel %vm426_vm0, %v14943_v20, 0.0 }
0x13b0   : > { %10014 = vadd.xlane.f32.xlu1 %v10013_v23  ;;  %v11883_v54 = vpop.f32.mrb[52].mxu1  ;;  %v10007_v22 = vsel %vm426_vm0, %v14951_v33, 0.0 }
0x13b1   : > { %v9885_v7 = vpop.f32.mrb[53].mxu1  ;;  %v9894_v59 = vadd.f32 %v11883_v54, %v14787_v51 }
0x13b2   : > { %v9886_v35 = vadd.f32 %v14787_v51, %v9885_v7  ;;  %10005 = vadd.xlane.f32.xlu0 %v10004_v53  ;;  %v11884_v42 = vpop.f32.mrb[54].mxu1 }
0x13b3   : > { %v9888_v32 = vpop.f32.mrb[55].mxu1  ;;  %v9897_v50 = vadd.f32 %v11884_v42, %v14787_v51  ;;  %v14970_v36 = vadd.f32 %v9894_v59, %v14723_v48 }
0x13b4   : > { %v9889_v10 = vadd.f32 %v14787_v51, %v9888_v32  ;;  %10008 = vadd.xlane.f32.xlu1 %v10007_v22  ;;  %v14962_v21 = vadd.f32 %v9886_v35, %v14711_v4 }
0x13b5   : > { %v14975_v63 = vadd.f32 %v9897_v50, %v14726_v8  ;;  %v10022_v4 = vsel %vm426_vm0, %v14970_v36, 0.0 }
0x13b6   : > { %v10016_v6 = vsel %vm426_vm0, %v14962_v21, 0.0  ;;  %v14967_v34 = vadd.f32 %v9889_v10, %v14714_v30 }
0x13b7   : > { %10017 = vadd.xlane.f32.xlu0 %v10016_v6  ;;  %v10025_v51 = vsel %vm426_vm0, %v14975_v63, 0.0 }
0x13b8   : > { %v10019_v58 = vsel %vm426_vm0, %v14967_v34, 0.0 }
0x13b9   : > { %10020 = vadd.xlane.f32.xlu1 %v10019_v58 }
0x13bb   : > { %10023 = vadd.xlane.f32.xlu0 %v10022_v4 }
0x13bd   : > { %10026 = vadd.xlane.f32.xlu1 %v10025_v51 }
0x140b   : > { %v9940_v30 = vpop.xlane.xlu0 %9939 }
0x140c   : > { %v10030_v12 = vmul.f32 0.03125, %v9940_v30 }
0x140d   : > { %v9943_v48 = vpop.xlane.xlu1 %9942 }
0x140e   : > { %v14982_v43 = vsub.f32 %v14793_v31, %v10030_v12  ;;  %v10031_v56 = vmul.f32 0.03125, %v9943_v48 }
0x140f   : > { %v9934_v62 = vpop.xlane.xlu0 %9933 }
0x1410   : > { %v14985_v8 = vsub.f32 %v14799_v41, %v10031_v56  ;;  %v10028_v2 = vmul.f32 0.03125, %v9934_v62  ;;  %v10094_v44 = vmul.f32 %v14982_v43, %v14982_v43 }
0x1411   : > { %v9937_v52 = vpop.xlane.xlu1 %9936 }
0x1412   : > { %v14990_v55 = vsub.f32 %v14802_v25, %v10028_v2  ;;  %v10029_v3 = vmul.f32 0.03125, %v9937_v52  ;;  %v10130_v13 = vsel %vm426_vm0, %v10094_v44, 0.0  ;;  %v10095_v31 = vmul.f32 %v14985_v8, %v14985_v8 }
0x1413   : > { %v9952_v29 = vpop.xlane.xlu0 %9951  ;;  %10131 = vadd.xlane.f32.xlu0 %v10130_v13 }
0x1414   : > { %v14996_v40 = vsub.f32 %v14807_v19, %v10029_v3  ;;  %v10034_v41 = vmul.f32 0.03125, %v9952_v29  ;;  %v10133_v45 = vsel %vm426_vm0, %v10095_v31, 0.0  ;;  %v10092_v39 = vmul.f32 %v14990_v55, %v14990_v55 }
0x1415   : > { %v9955_v23 = vpop.xlane.xlu1 %9954  ;;  %10134 = vadd.xlane.f32.xlu1 %v10133_v45 }
0x1416   : > { %v15002_v25 = vsub.f32 %v14817_v18, %v10034_v41  ;;  %v10035_v54 = vmul.f32 0.03125, %v9955_v23  ;;  %v10124_v7 = vsel %vm426_vm0, %v10092_v39, 0.0  ;;  %v10093_v53 = vmul.f32 %v14996_v40, %v14996_v40 }
0x1417   : > { %v9946_v59 = vpop.xlane.xlu0 %9945  ;;  %10125 = vadd.xlane.f32.xlu0 %v10124_v7 }
0x1418   : > { %v15008_v19 = vsub.f32 %v14823_v38, %v10035_v54  ;;  %v10032_v35 = vmul.f32 0.03125, %v9946_v59  ;;  %v10127_v42 = vsel %vm426_vm0, %v10093_v53, 0.0  ;;  %v10098_v32 = vmul.f32 %v15002_v25, %v15002_v25 }
0x1419   : > { %v9949_v22 = vpop.xlane.xlu1 %9948  ;;  %10128 = vadd.xlane.f32.xlu1 %v10127_v42 }
0x141a   : > { %v15014_v18 = vsub.f32 %v14826_v15, %v10032_v35  ;;  %v10033_v50 = vmul.f32 0.03125, %v9949_v22  ;;  %v10142_v10 = vsel %vm426_vm0, %v10098_v32, 0.0  ;;  %v10099_v6 = vmul.f32 %v15008_v19, %v15008_v19 }
0x141b   : > { %v9964_v58 = vpop.xlane.xlu0 %9963  ;;  %10143 = vadd.xlane.f32.xlu0 %v10142_v10 }
0x141c   : > { %v15020_v38 = vsub.f32 %v14831_v46, %v10033_v50  ;;  %v10038_v4 = vmul.f32 0.03125, %v9964_v58  ;;  %v10145_v51 = vsel %vm426_vm0, %v10099_v6, 0.0  ;;  %v10096_v30 = vmul.f32 %v15014_v18, %v15014_v18 }
0x141d   : > { %v9967_v12 = vpop.xlane.xlu1 %9966  ;;  %10146 = vadd.xlane.f32.xlu1 %v10145_v51 }
0x141e   : > { %v15026_v15 = vsub.f32 %v14841_v1, %v10038_v4  ;;  %v10039_v48 = vmul.f32 0.03125, %v9967_v12  ;;  %v10136_v56 = vsel %vm426_vm0, %v10096_v30, 0.0  ;;  %v10097_v62 = vmul.f32 %v15020_v38, %v15020_v38 }
0x141f   : > { %v9958_v2 = vpop.xlane.xlu0 %9957  ;;  %10137 = vadd.xlane.f32.xlu0 %v10136_v56 }
0x1420   : > { %v15032_v46 = vsub.f32 %v14847_v49, %v10039_v48  ;;  %v10036_v44 = vmul.f32 0.03125, %v9958_v2  ;;  %v10139_v52 = vsel %vm426_vm0, %v10097_v62, 0.0  ;;  %v10102_v3 = vmul.f32 %v15026_v15, %v15026_v15 }
0x1421   : > { %v9961_v13 = vpop.xlane.xlu1 %9960  ;;  %10140 = vadd.xlane.f32.xlu1 %v10139_v52 }
0x1422   : > { %v15038_v1 = vsub.f32 %v14850_v9, %v10036_v44  ;;  %v10037_v31 = vmul.f32 0.03125, %v9961_v13  ;;  %v10154_v29 = vsel %vm426_vm0, %v10102_v3, 0.0  ;;  %v10103_v41 = vmul.f32 %v15032_v46, %v15032_v46 }
0x1423   : > { %v9976_v45 = vpop.xlane.xlu0 %9975  ;;  %10155 = vadd.xlane.f32.xlu0 %v10154_v29 }
0x1424   : > { %v15044_v49 = vsub.f32 %v14855_v26, %v10037_v31  ;;  %v10042_v39 = vmul.f32 0.03125, %v9976_v45  ;;  %v10157_v23 = vsel %vm426_vm0, %v10103_v41, 0.0  ;;  %v10100_v54 = vmul.f32 %v15038_v1, %v15038_v1 }
0x1425   : > { %v9979_v7 = vpop.xlane.xlu1 %9978  ;;  %10158 = vadd.xlane.f32.xlu1 %v10157_v23 }
0x1426   : > { %v15050_v9 = vsub.f32 %v14865_v17, %v10042_v39  ;;  %v10043_v53 = vmul.f32 0.03125, %v9979_v7  ;;  %v10148_v59 = vsel %vm426_vm0, %v10100_v54, 0.0  ;;  %v10101_v35 = vmul.f32 %v15044_v49, %v15044_v49 }
0x1427   : > { %v9970_v42 = vpop.xlane.xlu0 %9969  ;;  %10149 = vadd.xlane.f32.xlu0 %v10148_v59 }
0x1428   : > { %v15056_v26 = vsub.f32 %v14871_v0, %v10043_v53  ;;  %v10040_v32 = vmul.f32 0.03125, %v9970_v42  ;;  %v10151_v22 = vsel %vm426_vm0, %v10101_v35, 0.0  ;;  %v10106_v50 = vmul.f32 %v15050_v9, %v15050_v9 }
0x1429   : > { %v9973_v10 = vpop.xlane.xlu1 %9972  ;;  %10152 = vadd.xlane.f32.xlu1 %v10151_v22 }
0x142a   : > { %v15062_v17 = vsub.f32 %v14874_v61, %v10040_v32  ;;  %v10041_v6 = vmul.f32 0.03125, %v9973_v10  ;;  %v10166_v58 = vsel %vm426_vm0, %v10106_v50, 0.0  ;;  %v10107_v4 = vmul.f32 %v15056_v26, %v15056_v26 }
0x142b   : > { %v9988_v51 = vpop.xlane.xlu0 %9987  ;;  %10167 = vadd.xlane.f32.xlu0 %v10166_v58 }
0x142c   : > { %v15068_v0 = vsub.f32 %v14879_v11, %v10041_v6  ;;  %v10046_v30 = vmul.f32 0.03125, %v9988_v51  ;;  %v10169_v12 = vsel %vm426_vm0, %v10107_v4, 0.0  ;;  %v10104_v48 = vmul.f32 %v15062_v17, %v15062_v17 }
0x142d   : > { %v9991_v56 = vpop.xlane.xlu1 %9990  ;;  %10170 = vadd.xlane.f32.xlu1 %v10169_v12 }
0x142e   : > { %v15074_v61 = vsub.f32 %v14889_v28, %v10046_v30  ;;  %v10047_v62 = vmul.f32 0.03125, %v9991_v56  ;;  %v10160_v2 = vsel %vm426_vm0, %v10104_v48, 0.0  ;;  %v10105_v44 = vmul.f32 %v15068_v0, %v15068_v0 }
0x142f   : > { %v9982_v52 = vpop.xlane.xlu0 %9981  ;;  %10161 = vadd.xlane.f32.xlu0 %v10160_v2 }
0x1430   : > { %v15080_v11 = vsub.f32 %v14895_v37, %v10047_v62  ;;  %v10044_v3 = vmul.f32 0.03125, %v9982_v52  ;;  %v10163_v13 = vsel %vm426_vm0, %v10105_v44, 0.0  ;;  %v10110_v31 = vmul.f32 %v15074_v61, %v15074_v61 }
0x1431   : > { %v9985_v29 = vpop.xlane.xlu1 %9984  ;;  %10164 = vadd.xlane.f32.xlu1 %v10163_v13 }
0x1432   : > { %v15086_v28 = vsub.f32 %v14898_v16, %v10044_v3  ;;  %v10045_v41 = vmul.f32 0.03125, %v9985_v29  ;;  %v10178_v45 = vsel %vm426_vm0, %v10110_v31, 0.0  ;;  %v10111_v39 = vmul.f32 %v15080_v11, %v15080_v11 }
0x1433   : > { %v10000_v23 = vpop.xlane.xlu0 %9999  ;;  %10179 = vadd.xlane.f32.xlu0 %v10178_v45 }
0x1434   : > { %v15092_v37 = vsub.f32 %v14903_v47, %v10045_v41  ;;  %v10050_v54 = vmul.f32 0.03125, %v10000_v23  ;;  %v10181_v7 = vsel %vm426_vm0, %v10111_v39, 0.0  ;;  %v10108_v53 = vmul.f32 %v15086_v28, %v15086_v28 }
0x1435   : > { %v10003_v59 = vpop.xlane.xlu1 %10002  ;;  %10182 = vadd.xlane.f32.xlu1 %v10181_v7 }
0x1436   : > { %v15098_v16 = vsub.f32 %v14913_v60, %v10050_v54  ;;  %v10051_v35 = vmul.f32 0.03125, %v10003_v59  ;;  %v10172_v42 = vsel %vm426_vm0, %v10108_v53, 0.0  ;;  %v10109_v32 = vmul.f32 %v15092_v37, %v15092_v37 }
0x1437   : > { %v9994_v22 = vpop.xlane.xlu0 %9993  ;;  %10173 = vadd.xlane.f32.xlu0 %v10172_v42 }
0x1438   : > { %v15104_v47 = vsub.f32 %v14919_v5, %v10051_v35  ;;  %v10048_v50 = vmul.f32 0.03125, %v9994_v22  ;;  %v10175_v10 = vsel %vm426_vm0, %v10109_v32, 0.0  ;;  %v10114_v6 = vmul.f32 %v15098_v16, %v15098_v16 }
0x1439   : > { %v9997_v58 = vpop.xlane.xlu1 %9996  ;;  %10176 = vadd.xlane.f32.xlu1 %v10175_v10 }
0x143a   : > { %v15110_v60 = vsub.f32 %v14922_v14, %v10048_v50  ;;  %v10049_v4 = vmul.f32 0.03125, %v9997_v58  ;;  %v10190_v51 = vsel %vm426_vm0, %v10114_v6, 0.0  ;;  %v10115_v30 = vmul.f32 %v15104_v47, %v15104_v47 }
0x143b   : > { %v10012_v12 = vpop.xlane.xlu0 %10011  ;;  %10191 = vadd.xlane.f32.xlu0 %v10190_v51 }
0x143c   : > { %v15116_v5 = vsub.f32 %v14927_v24, %v10049_v4  ;;  %v10054_v48 = vmul.f32 0.03125, %v10012_v12  ;;  %v10193_v56 = vsel %vm426_vm0, %v10115_v30, 0.0  ;;  %v10112_v62 = vmul.f32 %v15110_v60, %v15110_v60 }
0x143d   : > { %v10015_v2 = vpop.xlane.xlu1 %10014  ;;  %10194 = vadd.xlane.f32.xlu1 %v10193_v56 }
0x143e   : > { %v15122_v14 = vsub.f32 %v14937_v57, %v10054_v48  ;;  %v10055_v44 = vmul.f32 0.03125, %v10015_v2  ;;  %v10184_v52 = vsel %vm426_vm0, %v10112_v62, 0.0  ;;  %v10113_v3 = vmul.f32 %v15116_v5, %v15116_v5 }
0x143f   : > { %v10006_v13 = vpop.xlane.xlu0 %10005  ;;  %10185 = vadd.xlane.f32.xlu0 %v10184_v52 }
0x1440   : > { %v15128_v24 = vsub.f32 %v14943_v20, %v10055_v44  ;;  %v10052_v31 = vmul.f32 0.03125, %v10006_v13  ;;  %v10187_v29 = vsel %vm426_vm0, %v10113_v3, 0.0  ;;  %v10118_v41 = vmul.f32 %v15122_v14, %v15122_v14 }
0x1441   : > { %v10009_v45 = vpop.xlane.xlu1 %10008  ;;  %10188 = vadd.xlane.f32.xlu1 %v10187_v29 }
0x1442   : > { %v15134_v57 = vsub.f32 %v14946_v27, %v10052_v31  ;;  %v10053_v39 = vmul.f32 0.03125, %v10009_v45  ;;  %v10202_v23 = vsel %vm426_vm0, %v10118_v41, 0.0  ;;  %v10119_v54 = vmul.f32 %v15128_v24, %v15128_v24 }
0x1443   : > { %10203 = vadd.xlane.f32.xlu0 %v10202_v23 }
0x1444   : > { %v15140_v20 = vsub.f32 %v14951_v33, %v10053_v39  ;;  %v10018_v7 = vpop.xlane.xlu0 %10017  ;;  %v10205_v53 = vsel %vm426_vm0, %v10119_v54, 0.0  ;;  %v10116_v59 = vmul.f32 %v15134_v57, %v15134_v57 }
0x1445   : > { %v10056_v35 = vmul.f32 0.03125, %v10018_v7  ;;  %10206 = vadd.xlane.f32.xlu1 %v10205_v53 }
0x1446   : > { %v10021_v27 = vpop.xlane.xlu1 %10020  ;;  %v10196_v42 = vsel %vm426_vm0, %v10116_v59, 0.0  ;;  %v10117_v32 = vmul.f32 %v15140_v20, %v15140_v20 }
0x1447   : > { %v15149_v22 = vsub.f32 %v14962_v21, %v10056_v35  ;;  %v10057_v50 = vmul.f32 0.03125, %v10021_v27  ;;  %10197 = vadd.xlane.f32.xlu0 %v10196_v42 }
0x1448   : > { %v10024_v33 = vpop.xlane.xlu0 %10023  ;;  %v10199_v10 = vsel %vm426_vm0, %v10117_v32, 0.0 }
0x1449   : > { %v15153_v6 = vsub.f32 %v14967_v34, %v10057_v50  ;;  %v10058_v58 = vmul.f32 0.03125, %v10024_v33  ;;  %10200 = vadd.xlane.f32.xlu1 %v10199_v10  ;;  %v10120_v4 = vmul.f32 %v15149_v22, %v15149_v22 }
0x144a   : > { %v10027_v51 = vpop.xlane.xlu1 %10026 }
0x144b   : > { %v15158_v30 = vsub.f32 %v14970_v36, %v10058_v58  ;;  %v10059_v12 = vmul.f32 0.03125, %v10027_v51  ;;  %v10208_v21 = vsel %vm426_vm0, %v10120_v4, 0.0  ;;  %v10121_v48 = vmul.f32 %v15153_v6, %v15153_v6  ;;  %v15176_v4 = vld [vmem:[%s15352_s6 + $0x5] ss:$0 sm:$0xff] }
0x144c   : > { %10209 = vadd.xlane.f32.xlu0 %v10208_v21 }
0x144d   : > { %v15164_v56 = vsub.f32 %v14975_v63, %v10059_v12  ;;  %v10211_v34 = vsel %vm426_vm0, %v10121_v48, 0.0  ;;  %v10122_v62 = vmul.f32 %v15158_v30, %v15158_v30 }
0x144e   : > { %10212 = vadd.xlane.f32.xlu1 %v10211_v34 }
0x144f   : > { %v10214_v2 = vsel %vm426_vm0, %v10122_v62, 0.0  ;;  %v10123_v36 = vmul.f32 %v15164_v56, %v15164_v56  ;;  %v15182_v62 = vld [vmem:[%s15352_s6 + $0x6] ss:$0 sm:$0xff] }
0x1450   : > { %10215 = vadd.xlane.f32.xlu0 %v10214_v2 }
0x1451   : > { %v10217_v44 = vsel %vm426_vm0, %v10123_v36, 0.0 }
0x1452   : > { %10218 = vadd.xlane.f32.xlu1 %v10217_v44 }
0x14a0   : > { %v10132_v52 = vpop.xlane.xlu0 %10131 }
0x14a1   : > { %v10222_v3 = vmul.f32 0.03125, %v10132_v52 }
0x14a2   : > { %v10135_v13 = vpop.xlane.xlu1 %10134 }
0x14a3   : > { %v10254_v63 = vadd.f32 1e-05, %v10222_v3  ;;  %v10223_v31 = vmul.f32 0.03125, %v10135_v13 }
0x14a4   : > { %v10126_v29 = vpop.xlane.xlu0 %10125 }
0x14a5   : > { %12423 = vrsqrt.f32 %v10254_v63  ;;  %v10255_v41 = vadd.f32 1e-05, %v10223_v31  ;;  %v10220_v45 = vmul.f32 0.03125, %v10126_v29 }
0x14a6   : > { %v10129_v39 = vpop.xlane.xlu1 %10128 }
0x14a7   : > { %12425 = vrsqrt.f32 %v10255_v41  ;;  %v10252_v23 = vadd.f32 1e-05, %v10220_v45  ;;  %v10221_v54 = vmul.f32 0.03125, %v10129_v39 }
0x14a8   : > { %v10144_v7 = vpop.xlane.xlu0 %10143 }
0x14a9   : > { %12427 = vrsqrt.f32 %v10252_v23  ;;  %v10253_v53 = vadd.f32 1e-05, %v10221_v54  ;;  %v10226_v59 = vmul.f32 0.03125, %v10144_v7 }
0x14aa   : > { %v10147_v35 = vpop.xlane.xlu1 %10146 }
0x14ab   : > { %12429 = vrsqrt.f32 %v10253_v53  ;;  %v10258_v27 = vadd.f32 1e-05, %v10226_v59  ;;  %v10227_v42 = vmul.f32 0.03125, %v10147_v35 }
0x14ac   : > { %v10138_v32 = vpop.xlane.xlu0 %10137 }
0x14ad   : > { %12431 = vrsqrt.f32 %v10258_v27  ;;  %v10259_v50 = vadd.f32 1e-05, %v10227_v42  ;;  %v10224_v33 = vmul.f32 0.03125, %v10138_v32 }
0x14ae   : > { %v10141_v10 = vpop.xlane.xlu1 %10140 }
0x14af   : > { %v12424_v58 = vpop.eup %12423  ;;  %12433 = vrsqrt.f32 %v10259_v50  ;;  %v10256_v51 = vadd.f32 1e-05, %v10224_v33  ;;  %v10225_v12 = vmul.f32 0.03125, %v10141_v10 }
0x14b0   : > { %v10318_v21 = vmul.f32 %v12424_v58, %v14982_v43  ;;  %v10156_v48 = vpop.xlane.xlu0 %10155 }
0x14b1   : > { %v12426_v34 = vpop.eup %12425  ;;  %12435 = vrsqrt.f32 %v10256_v51  ;;  %v10257_v2 = vadd.f32 1e-05, %v10225_v12  ;;  %v10230_v36 = vmul.f32 0.03125, %v10156_v48 }
0x14b2   : > { %v10355_v44 = vmul.f32 %v15176_v4, %v10318_v21  ;;  %v10319_v52 = vmul.f32 %v12426_v34, %v14985_v8  ;;  %v10159_v3 = vpop.xlane.xlu1 %10158 }
0x14b3   : > { %v12428_v13 = vpop.eup %12427  ;;  %12437 = vrsqrt.f32 %v10257_v2  ;;  %v10262_v63 = vadd.f32 1e-05, %v10230_v36  ;;  %v10231_v43 = vmul.f32 0.03125, %v10159_v3 }
0x14b4   : > { %v10392_v31 = vadd.f32 %v15182_v62, %v10355_v44  ;;  %v10356_v29 = vmul.f32 %v15176_v4, %v10319_v52  ;;  %v10316_v41 = vmul.f32 %v12428_v13, %v14990_v55  ;;  %v10150_v45 = vpop.xlane.xlu0 %10149 }
0x14b5   : > { %v12430_v39 = vpop.eup %12429  ;;  %12439 = vrsqrt.f32 %v10262_v63  ;;  %v10263_v23 = vadd.f32 1e-05, %v10231_v43  ;;  %v10228_v54 = vmul.f32 0.03125, %v10150_v45 }
0x14b6   : > { %10424 = vst.msk [vmem:[%s12589_s22 + $0x10] sm:$0xff] %vm426_vm0, %v10392_v31  ;;  %v10393_v8 = vadd.f32 %v15182_v62, %v10356_v29  ;;  %v10353_v7 = vmul.f32 %v15176_v4, %v10316_v41  ;;  %v10317_v53 = vmul.f32 %v12430_v39, %v14996_v40  ;;  %v10153_v59 = vpop.xlane.xlu1 %10152 }
0x14b7   : > { %v12432_v35 = vpop.eup %12431  ;;  %12441 = vrsqrt.f32 %v10263_v23  ;;  %v10260_v27 = vadd.f32 1e-05, %v10228_v54  ;;  %v10229_v42 = vmul.f32 0.03125, %v10153_v59 }
0x14b8   : > { %10425 = vst.msk [vmem:[%s12589_s22 + $0x18] sm:$0xff] %vm426_vm0, %v10393_v8  ;;  %v10390_v55 = vadd.f32 %v15182_v62, %v10353_v7  ;;  %v10354_v32 = vmul.f32 %v15176_v4, %v10317_v53  ;;  %v10322_v50 = vmul.f32 %v12432_v35, %v15002_v25  ;;  %v10168_v33 = vpop.xlane.xlu0 %10167 }
0x14b9   : > { %v12434_v10 = vpop.eup %12433  ;;  %12443 = vrsqrt.f32 %v10260_v27  ;;  %v10261_v58 = vadd.f32 1e-05, %v10229_v42  ;;  %v10234_v51 = vmul.f32 0.03125, %v10168_v33 }
0x14ba   : > { %10422 = vst.msk [vmem:[%s12589_s22] sm:$0xff] %vm426_vm0, %v10390_v55  ;;  %v10391_v40 = vadd.f32 %v15182_v62, %v10354_v32  ;;  %v10359_v12 = vmul.f32 %v15176_v4, %v10322_v50  ;;  %v10323_v21 = vmul.f32 %v12434_v10, %v15008_v19  ;;  %v10171_v48 = vpop.xlane.xlu1 %10170 }
0x14bb   : > { %v12436_v34 = vpop.eup %12435  ;;  %12445 = vrsqrt.f32 %v10261_v58  ;;  %v10266_v2 = vadd.f32 1e-05, %v10234_v51  ;;  %v10235_v36 = vmul.f32 0.03125, %v10171_v48 }
0x14bc   : > { %10423 = vst.msk [vmem:[%s12589_s22 + $0x8] sm:$0xff] %vm426_vm0, %v10391_v40  ;;  %v10396_v25 = vadd.f32 %v15182_v62, %v10359_v12  ;;  %v10360_v44 = vmul.f32 %v15176_v4, %v10323_v21  ;;  %v10320_v52 = vmul.f32 %v12436_v34, %v15014_v18  ;;  %v10162_v3 = vpop.xlane.xlu0 %10161 }
0x14bd   : > { %v12438_v13 = vpop.eup %12437  ;;  %12447 = vrsqrt.f32 %v10266_v2  ;;  %v10267_v63 = vadd.f32 1e-05, %v10235_v36  ;;  %v10232_v43 = vmul.f32 0.03125, %v10162_v3 }
0x14be   : > { %10428 = vst.msk [vmem:[%s12589_s22 + $0x30] sm:$0xff] %vm426_vm0, %v10396_v25  ;;  %v10397_v19 = vadd.f32 %v15182_v62, %v10360_v44  ;;  %v10357_v31 = vmul.f32 %v15176_v4, %v10320_v52  ;;  %v10321_v29 = vmul.f32 %v12438_v13, %v15020_v38  ;;  %v10165_v41 = vpop.xlane.xlu1 %10164 }
0x14bf   : > { %v12440_v45 = vpop.eup %12439  ;;  %12449 = vrsqrt.f32 %v10267_v63  ;;  %v10264_v39 = vadd.f32 1e-05, %v10232_v43  ;;  %v10233_v23 = vmul.f32 0.03125, %v10165_v41 }
0x14c0   : > { %10429 = vst.msk [vmem:[%s12589_s22 + $0x38] sm:$0xff] %vm426_vm0, %v10397_v19  ;;  %v10394_v18 = vadd.f32 %v15182_v62, %v10357_v31  ;;  %v10358_v54 = vmul.f32 %v15176_v4, %v10321_v29  ;;  %v10326_v8 = vmul.f32 %v12440_v45, %v15026_v15  ;;  %v10180_v7 = vpop.xlane.xlu0 %10179 }
0x14c1   : > { %v12442_v53 = vpop.eup %12441  ;;  %12451 = vrsqrt.f32 %v10264_v39  ;;  %v10265_v59 = vadd.f32 1e-05, %v10233_v23  ;;  %v10238_v35 = vmul.f32 0.03125, %v10180_v7 }
0x14c2   : > { %10426 = vst.msk [vmem:[%s12589_s22 + $0x20] sm:$0xff] %vm426_vm0, %v10394_v18  ;;  %v10395_v38 = vadd.f32 %v15182_v62, %v10358_v54  ;;  %v10363_v27 = vmul.f32 %v15176_v4, %v10326_v8  ;;  %v10327_v42 = vmul.f32 %v12442_v53, %v15032_v46  ;;  %v10183_v55 = vpop.xlane.xlu1 %10182 }
0x14c3   : > { %v12444_v32 = vpop.eup %12443  ;;  %12453 = vrsqrt.f32 %v10265_v59  ;;  %v10270_v50 = vadd.f32 1e-05, %v10238_v35  ;;  %v10239_v33 = vmul.f32 0.03125, %v10183_v55 }
0x14c4   : > { %10427 = vst.msk [vmem:[%s12589_s22 + $0x28] sm:$0xff] %vm426_vm0, %v10395_v38  ;;  %v10400_v15 = vadd.f32 %v15182_v62, %v10363_v27  ;;  %v10364_v10 = vmul.f32 %v15176_v4, %v10327_v42  ;;  %v10324_v58 = vmul.f32 %v12444_v32, %v15038_v1  ;;  %v10174_v51 = vpop.xlane.xlu0 %10173 }
0x14c5   : > { %v12446_v40 = vpop.eup %12445  ;;  %12455 = vrsqrt.f32 %v10270_v50  ;;  %v10271_v12 = vadd.f32 1e-05, %v10239_v33  ;;  %v10236_v21 = vmul.f32 0.03125, %v10174_v51 }
0x14c6   : > { %10432 = vst.msk [vmem:[%s12589_s22 + $0x50] sm:$0xff] %vm426_vm0, %v10400_v15  ;;  %v10401_v46 = vadd.f32 %v15182_v62, %v10364_v10  ;;  %v10361_v48 = vmul.f32 %v15176_v4, %v10324_v58  ;;  %v10325_v34 = vmul.f32 %v12446_v40, %v15044_v49  ;;  %v10177_v2 = vpop.xlane.xlu1 %10176 }
0x14c7   : > { %v12448_v36 = vpop.eup %12447  ;;  %12457 = vrsqrt.f32 %v10271_v12  ;;  %v10268_v25 = vadd.f32 1e-05, %v10236_v21  ;;  %v10237_v44 = vmul.f32 0.03125, %v10177_v2 }
0x14c8   : > { %10433 = vst.msk [vmem:[%s12589_s22 + $0x58] sm:$0xff] %vm426_vm0, %v10401_v46  ;;  %v10398_v1 = vadd.f32 %v15182_v62, %v10361_v48  ;;  %v10362_v52 = vmul.f32 %v15176_v4, %v10325_v34  ;;  %v10330_v3 = vmul.f32 %v12448_v36, %v15050_v9  ;;  %v10192_v13 = vpop.xlane.xlu0 %10191 }
0x14c9   : > { %v12450_v63 = vpop.eup %12449  ;;  %12459 = vrsqrt.f32 %v10268_v25  ;;  %v10269_v43 = vadd.f32 1e-05, %v10237_v44  ;;  %v10242_v19 = vmul.f32 0.03125, %v10192_v13 }
0x14ca   : > { %10430 = vst.msk [vmem:[%s12589_s22 + $0x40] sm:$0xff] %vm426_vm0, %v10398_v1  ;;  %v10399_v49 = vadd.f32 %v15182_v62, %v10362_v52  ;;  %v10367_v31 = vmul.f32 %v15176_v4, %v10330_v3  ;;  %v10331_v29 = vmul.f32 %v12450_v63, %v15056_v26  ;;  %v10195_v41 = vpop.xlane.xlu1 %10194 }
0x14cb   : > { %v12452_v45 = vpop.eup %12451  ;;  %12461 = vrsqrt.f32 %v10269_v43  ;;  %v10274_v39 = vadd.f32 1e-05, %v10242_v19  ;;  %v10243_v23 = vmul.f32 0.03125, %v10195_v41 }
0x14cc   : > { %10431 = vst.msk [vmem:[%s12589_s22 + $0x48] sm:$0xff] %vm426_vm0, %v10399_v49  ;;  %v10404_v9 = vadd.f32 %v15182_v62, %v10367_v31  ;;  %v10368_v18 = vmul.f32 %v15176_v4, %v10331_v29  ;;  %v10328_v54 = vmul.f32 %v12452_v45, %v15062_v17  ;;  %v10186_v8 = vpop.xlane.xlu0 %10185 }
0x14cd   : > { %v12454_v7 = vpop.eup %12453  ;;  %12463 = vrsqrt.f32 %v10274_v39  ;;  %v10275_v53 = vadd.f32 1e-05, %v10243_v23  ;;  %v10240_v59 = vmul.f32 0.03125, %v10186_v8 }
0x14ce   : > { %10436 = vst.msk [vmem:[%s12589_s22 + $0x70] sm:$0xff] %vm426_vm0, %v10404_v9  ;;  %v10405_v26 = vadd.f32 %v15182_v62, %v10368_v18  ;;  %v10365_v35 = vmul.f32 %v15176_v4, %v10328_v54  ;;  %v10329_v38 = vmul.f32 %v12454_v7, %v15068_v0  ;;  %v10189_v27 = vpop.xlane.xlu1 %10188 }
0x14cf   : > { %v12456_v42 = vpop.eup %12455  ;;  %12465 = vrsqrt.f32 %v10275_v53  ;;  %v10272_v55 = vadd.f32 1e-05, %v10240_v59  ;;  %v10241_v32 = vmul.f32 0.03125, %v10189_v27 }
0x14d0   : > { %10437 = vst.msk [vmem:[%s12589_s22 + $0x78] sm:$0xff] %vm426_vm0, %v10405_v26  ;;  %v10402_v17 = vadd.f32 %v15182_v62, %v10365_v35  ;;  %v10366_v50 = vmul.f32 %v15176_v4, %v10329_v38  ;;  %v10334_v33 = vmul.f32 %v12456_v42, %v15074_v61  ;;  %v10204_v15 = vpop.xlane.xlu0 %10203 }
0x14d1   : > { %v12458_v10 = vpop.eup %12457  ;;  %12467 = vrsqrt.f32 %v10272_v55  ;;  %v10273_v58 = vadd.f32 1e-05, %v10241_v32  ;;  %v10246_v51 = vmul.f32 0.03125, %v10204_v15 }
0x14d2   : > { %10434 = vst.msk [vmem:[%s12589_s22 + $0x60] sm:$0xff] %vm426_vm0, %v10402_v17  ;;  %v10403_v0 = vadd.f32 %v15182_v62, %v10366_v50  ;;  %v10371_v40 = vmul.f32 %v15176_v4, %v10334_v33  ;;  %v10335_v12 = vmul.f32 %v12458_v10, %v15080_v11  ;;  %v10207_v21 = vpop.xlane.xlu1 %10206 }
0x14d3   : > { %v12460_v46 = vpop.eup %12459  ;;  %12469 = vrsqrt.f32 %v10273_v58  ;;  %v10278_v48 = vadd.f32 1e-05, %v10246_v51  ;;  %v10247_v34 = vmul.f32 0.03125, %v10207_v21 }
0x14d4   : > { %10435 = vst.msk [vmem:[%s12589_s22 + $0x68] sm:$0xff] %vm426_vm0, %v10403_v0  ;;  %v10408_v61 = vadd.f32 %v15182_v62, %v10371_v40  ;;  %v10372_v2 = vmul.f32 %v15176_v4, %v10335_v12  ;;  %v10332_v36 = vmul.f32 %v12460_v46, %v15086_v28  ;;  %v10198_v25 = vpop.xlane.xlu0 %10197 }
0x14d5   : > { %v12462_v44 = vpop.eup %12461  ;;  %12471 = vrsqrt.f32 %v10278_v48  ;;  %v10279_v1 = vadd.f32 1e-05, %v10247_v34  ;;  %v10244_v52 = vmul.f32 0.03125, %v10198_v25 }
0x14d6   : > { %10440 = vst.msk [vmem:[%s12589_s22 + $0x90] sm:$0xff] %vm426_vm0, %v10408_v61  ;;  %v10409_v11 = vadd.f32 %v15182_v62, %v10372_v2  ;;  %v10369_v3 = vmul.f32 %v15176_v4, %v10332_v36  ;;  %v10333_v13 = vmul.f32 %v12462_v44, %v15092_v37  ;;  %v10201_v63 = vpop.xlane.xlu1 %10200 }
0x14d7   : > { %v12464_v43 = vpop.eup %12463  ;;  %12473 = vrsqrt.f32 %v10279_v1  ;;  %v10276_v19 = vadd.f32 1e-05, %v10244_v52  ;;  %v10245_v49 = vmul.f32 0.03125, %v10201_v63 }
0x14d8   : > { %10441 = vst.msk [vmem:[%s12589_s22 + $0x98] sm:$0xff] %vm426_vm0, %v10409_v11  ;;  %v10406_v28 = vadd.f32 %v15182_v62, %v10369_v3  ;;  %v10370_v31 = vmul.f32 %v15176_v4, %v10333_v13  ;;  %v10338_v29 = vmul.f32 %v12464_v43, %v15098_v16 }
0x14d9   : > { %v12466_v41 = vpop.eup %12465  ;;  %12475 = vrsqrt.f32 %v10276_v19  ;;  %v10277_v45 = vadd.f32 1e-05, %v10245_v49  ;;  %v10210_v39 = vpop.xlane.xlu0 %10209 }
0x14da   : > { %10438 = vst.msk [vmem:[%s12589_s22 + $0x80] sm:$0xff] %vm426_vm0, %v10406_v28  ;;  %v10407_v37 = vadd.f32 %v15182_v62, %v10370_v31  ;;  %v10375_v23 = vmul.f32 %v15176_v4, %v10338_v29  ;;  %v10339_v9 = vmul.f32 %v12466_v41, %v15104_v47  ;;  %v10248_v18 = vmul.f32 0.03125, %v10210_v39 }
0x14db   : > { %v12468_v54 = vpop.eup %12467  ;;  %12477 = vrsqrt.f32 %v10277_v45  ;;  %v10213_v8 = vpop.xlane.xlu1 %10212 }
0x14dc   : > { %10439 = vst.msk [vmem:[%s12589_s22 + $0x88] sm:$0xff] %vm426_vm0, %v10407_v37  ;;  %v10412_v16 = vadd.f32 %v15182_v62, %v10375_v23  ;;  %v10376_v7 = vmul.f32 %v15176_v4, %v10339_v9  ;;  %v10336_v53 = vmul.f32 %v12468_v54, %v15110_v60  ;;  %v10280_v59 = vadd.f32 1e-05, %v10248_v18 }
0x14dd   : > { %v12470_v26 = vpop.eup %12469  ;;  %v10249_v35 = vmul.f32 0.03125, %v10213_v8  ;;  %v10216_v38 = vpop.xlane.xlu0 %10215 }
0x14de   : > { %10444 = vst.msk [vmem:[%s12589_s22 + $0xb0] sm:$0xff] %vm426_vm0, %v10412_v16  ;;  %v10413_v47 = vadd.f32 %v15182_v62, %v10376_v7  ;;  %v10373_v27 = vmul.f32 %v15176_v4, %v10336_v53  ;;  %v10337_v42 = vmul.f32 %v12470_v26, %v15116_v5  ;;  %12479 = vrsqrt.f32 %v10280_v59 }
0x14df   : > { %v12472_v55 = vpop.eup %12471  ;;  %v10281_v32 = vadd.f32 1e-05, %v10249_v35  ;;  %v10250_v17 = vmul.f32 0.03125, %v10216_v38  ;;  %v10219_v50 = vpop.xlane.xlu1 %10218 }
0x14e0   : > { %10445 = vst.msk [vmem:[%s12589_s22 + $0xb8] sm:$0xff] %vm426_vm0, %v10413_v47  ;;  %v10410_v60 = vadd.f32 %v15182_v62, %v10373_v27  ;;  %v10374_v33 = vmul.f32 %v15176_v4, %v10337_v42  ;;  %v10342_v15 = vmul.f32 %v12472_v55, %v15122_v14  ;;  %v10251_v10 = vmul.f32 0.03125, %v10219_v50 }
0x14e1   : > { %v12474_v58 = vpop.eup %12473  ;;  %12481 = vrsqrt.f32 %v10281_v32  ;;  %v10282_v51 = vadd.f32 1e-05, %v10250_v17 }
0x14e2   : > { %10442 = vst.msk [vmem:[%s12589_s22 + $0xa0] sm:$0xff] %vm426_vm0, %v10410_v60  ;;  %v10411_v5 = vadd.f32 %v15182_v62, %v10374_v33  ;;  %v10379_v0 = vmul.f32 %v15176_v4, %v10342_v15  ;;  %v10343_v40 = vmul.f32 %v12474_v58, %v15128_v24  ;;  %v10283_v12 = vadd.f32 1e-05, %v10251_v10 }
0x14e3   : > { %v12476_v21 = vpop.eup %12475  ;;  %12483 = vrsqrt.f32 %v10282_v51 }
0x14e4   : > { %10443 = vst.msk [vmem:[%s12589_s22 + $0xa8] sm:$0xff] %vm426_vm0, %v10411_v5  ;;  %v10416_v14 = vadd.f32 %v15182_v62, %v10379_v0  ;;  %v10380_v46 = vmul.f32 %v15176_v4, %v10343_v40  ;;  %v10340_v48 = vmul.f32 %v12476_v21, %v15134_v57  ;;  %12485 = vrsqrt.f32 %v10283_v12 }
0x14e5   : > { %v12478_v34 = vpop.eup %12477 }
0x14e6   : > { %10448 = vst.msk [vmem:[%s12589_s22 + $0xd0] sm:$0xff] %vm426_vm0, %v10416_v14  ;;  %v10417_v61 = vadd.f32 %v15182_v62, %v10380_v46  ;;  %v10377_v24 = vmul.f32 %v15176_v4, %v10340_v48  ;;  %v10341_v2 = vmul.f32 %v12478_v34, %v15140_v20 }
0x14e8   : > { %v12480_v36 = vpop.eup %12479  ;;  %10449 = vst.msk [vmem:[%s12589_s22 + $0xd8] sm:$0xff] %vm426_vm0, %v10417_v61  ;;  %v10414_v25 = vadd.f32 %v15182_v62, %v10377_v24  ;;  %v10378_v44 = vmul.f32 %v15176_v4, %v10341_v2 }
0x14e9   : > { %v10344_v57 = vmul.f32 %v12480_v36, %v15149_v22 }
0x14ea   : > { %10446 = vst.msk [vmem:[%s12589_s22 + $0xc0] sm:$0xff] %vm426_vm0, %v10414_v25  ;;  %v10415_v1 = vadd.f32 %v15182_v62, %v10378_v44 }
0x14eb   : > { %v12482_v52 = vpop.eup %12481  ;;  %v10381_v11 = vmul.f32 %v15176_v4, %v10344_v57 }
0x14ec   : > { %10447 = vst.msk [vmem:[%s12589_s22 + $0xc8] sm:$0xff] %vm426_vm0, %v10415_v1  ;;  %v10345_v20 = vmul.f32 %v12482_v52, %v15153_v6 }
0x14ed   : > { %v12484_v3 = vpop.eup %12483  ;;  %v10418_v13 = vadd.f32 %v15182_v62, %v10381_v11 }
0x14ee   : > { %v12486_v63 = vpop.eup %12485  ;;  %v10382_v22 = vmul.f32 %v15176_v4, %v10345_v20  ;;  %v10346_v43 = vmul.f32 %v12484_v3, %v15158_v30 }
0x14ef   : > { %10450 = vst.msk [vmem:[%s12589_s22 + $0xe0] sm:$0xff] %vm426_vm0, %v10418_v13  ;;  %v10347_v19 = vmul.f32 %v12486_v63, %v15164_v56 }
0x14f0   : > { %v10419_v49 = vadd.f32 %v15182_v62, %v10382_v22  ;;  %v10383_v28 = vmul.f32 %v15176_v4, %v10346_v43 }
0x14f1   : > { %v10384_v31 = vmul.f32 %v15176_v4, %v10347_v19 }
0x14f2   : > { %10451 = vst.msk [vmem:[%s12589_s22 + $0xe8] sm:$0xff] %vm426_vm0, %v10419_v49  ;;  %v10420_v6 = vadd.f32 %v15182_v62, %v10383_v28 }
0x14f3   : > { %v10421_v29 = vadd.f32 %v15182_v62, %v10384_v31 }
0x14f4   : > { %10452 = vst.msk [vmem:[%s12589_s22 + $0xf0] sm:$0xff] %vm426_vm0, %v10420_v6 }
0x14f5   : > { %10453 = vst.msk [vmem:[%s12589_s22 + $0xf8] sm:$0xff] %vm426_vm0, %v10421_v29 }
0x14f6 PF: > { %s18_s27 = sadd.s32 1, %s12501_s27  }
0x14f7   : > { %p15_p6 = scmp.ge.s32.totalorder %s18_s27, 4  }
0x14f9   :  { %17 = sbr.rel (!%p15_p6) target bundleno = 1 (0x1), region = 125 }

</bundles_post_ra>
